<compile_context>
chip_gen: v7x
topology: tpu7x:2x2x1
jax: 0.10.0
libtpu: 0.0.40
codegen_flags: <defaults>
</compile_context>

<pallas_src>
import functools

import numpy as np

import jax
import jax.numpy as jnp
from jax.experimental import pallas as pl
from jax.experimental.pallas import tpu as pltpu


def _round_up(x, m):
    return ((x + m - 1) // m) * m


# --------------------------------------------------------------------------- #
# Kernels
# --------------------------------------------------------------------------- #
def _moe_kernel_blockdiag(x_ref, wf_ref, bg_ref, b1_ref, w2_ref, b2_ref, o_ref,
                          *, views, vh_pad, out_pad, precision, approx_recip):
    """Fused path: experts as block-diagonal weights, gate fused into dot #1."""
    x = x_ref[...]                                            # (tb, views*D)

    # One MXU pass over [ W1_blockdiag | Wg ] -> (tb, vh_pad + gate_pad)
    xw = jnp.dot(x, wf_ref[...], preferred_element_type=jnp.float32,
                 precision=precision)

    # ---- gate softmax (f32 epilogue) ----------------------------------------
    logits = xw[:, vh_pad:vh_pad + views] + bg_ref[...]       # (tb, views)
    m = jnp.max(logits, axis=-1, keepdims=True)
    e = jnp.exp(logits - m)
    gate = e * pl.reciprocal(jnp.sum(e, axis=-1, keepdims=True),
                             approx=approx_recip)

    # ---- hidden activation: bias + ReLU in the dot dtype --------------------
    h = jnp.maximum(xw[:, :vh_pad].astype(b1_ref.dtype) + b1_ref[...], 0.0)

    # ---- second expert matmul (block-diagonal, per-view 128-lane blocks) ----
    eo = jnp.dot(h.astype(w2_ref.dtype), w2_ref[...],
                 preferred_element_type=jnp.float32, precision=precision)
    eo = eo + b2_ref[...]                                     # (tb, views*out_pad)

    # ---- gated mixture: per-view slices are 128-lane aligned ----------------
    # TODO(synk): for views >> 8 recast the mixture as a matmul to avoid the
    # per-view 1-lane gate broadcast (XLU work) scaling with views.
    out = gate[:, 0:1] * eo[:, 0:out_pad]
    for v in range(1, views):
        out = out + gate[:, v:v + 1] * eo[:, v * out_pad:(v + 1) * out_pad]
    o_ref[...] = out.astype(o_ref.dtype)                      # lane-dense store


def _moe_kernel_perview(x_ref, wg_ref, bg_ref, w1_ref, b1_ref, w2_ref, b2_ref,
                        o_ref, *, views, out_pad, precision, approx_recip):
    """Fallback path for large shapes: loop views with per-view dots."""
    tb = x_ref.shape[1]

    # Gate logits: sum over views of x_v @ Wg_v  (== concat(x) @ Wg).
    logits = bg_ref[...] + jnp.zeros((tb, views), jnp.float32)
    for v in range(views):
        logits = logits + jnp.dot(x_ref[v], wg_ref[v],
                                  preferred_element_type=jnp.float32,
                                  precision=precision)
    m = jnp.max(logits, axis=-1, keepdims=True)
    e = jnp.exp(logits - m)
    gate = e * pl.reciprocal(jnp.sum(e, axis=-1, keepdims=True),
                             approx=approx_recip)

    out = jnp.zeros((tb, out_pad), jnp.float32)
    for v in range(views):
        h = jnp.dot(x_ref[v], w1_ref[v], preferred_element_type=jnp.float32,
                    precision=precision)
        h = jnp.maximum(h.astype(b1_ref.dtype) + b1_ref[v], 0.0)
        eo = jnp.dot(h.astype(w2_ref.dtype), w2_ref[v],
                     preferred_element_type=jnp.float32, precision=precision)
        eo = eo + b2_ref[v]                                   # (tb, out_pad)
        out = out + gate[:, v:v + 1] * eo
    o_ref[...] = out.astype(o_ref.dtype)


# --------------------------------------------------------------------------- #
# Wrapper helpers
# --------------------------------------------------------------------------- #
def _hw_vmem_capacity_bytes():
    """Hardware-derived VMEM capacity (64 MiB/TC on v7x, 128 MiB on v5e/v6e)."""
    try:
        cap = int(pltpu.get_tpu_info().vmem_capacity_bytes)
        if cap > 0:
            return cap
    except Exception:
        pass
    return 64 * 2 ** 20  # conservative default (v7x per-TensorCore)


def _pick_batch_tile(B, max_tb):
    """Largest divisor-of-B tile (multiple of 8) under the VMEM-derived cap,
    preferring an even grid so both v7x TensorCores get work."""
    max_tb = max(8, min(int(max_tb), 2048))
    cands = [t for t in range(8, min(B, max_tb) + 1, 8) if B % t == 0]
    if not cands:
        return B                      # full-batch block (grid of 1)
    even = [t for t in cands if (B // t) % 2 == 0]
    return max(even) if even else max(cands)


# --------------------------------------------------------------------------- #
# Forward
# --------------------------------------------------------------------------- #
def moe_forward(xs, w1, b1, w2, b2, wg, bg, *, batch_tile=None,
                dot_dtype=jnp.bfloat16, blockdiag_max_dim=256,
                approx_softmax_recip=None):
    """MoE forward.

    xs : (views, B, input_dim)      w1 : (views, input_dim, hidden)   b1 : (views, hidden)
    w2 : (views, hidden, output)    b2 : (views, output)
    wg : (views*input_dim, views)   bg : (views,)
    """
    views, B, input_dim = xs.shape
    hidden_dim = w1.shape[-1]
    output_dim = w2.shape[-1]
    VD, VH = views * input_dim, views * hidden_dim
    vh_pad = _round_up(VH, 128)
    out_pad = _round_up(output_dim, 128)
    vo_pad = views * out_pad

    dd = np.dtype(dot_dtype)
    f32 = np.dtype(jnp.float32)
    epi_dtype = f32 if dd == f32 else dd            # bias + ReLU dtype
    precision = jax.lax.Precision.HIGHEST if dd == f32 else None
    approx = (dd != f32) if approx_softmax_recip is None else approx_softmax_recip

    dot_sz = dd.itemsize
    epi_sz = np.dtype(epi_dtype).itemsize
    out_sz = np.dtype(xs.dtype).itemsize

    # Block-diag fusion only pays off while views*D / views*H fit one MXU tile.
    use_blockdiag = (VD <= blockdiag_max_dim) and (vh_pad <= blockdiag_max_dim)

    # ---- generation-aware VMEM budget -> batch tile --------------------------
    vmem_cap = _hw_vmem_capacity_bytes()
    budget = int(0.70 * vmem_cap)

    if use_blockdiag:
        g_pad = _round_up(max(views, 1), 128)
        nf = vh_pad + g_pad
        fixed = 2 * (VD * nf * dot_sz + vh_pad * epi_sz
                     + vh_pad * vo_pad * dot_sz + vo_pad * 4 + views * 4)
        per_row = (2 * VD * dot_sz + 2 * out_pad * out_sz          # pipelined x / out
                   + nf * 4 + vh_pad * epi_sz + vo_pad * 4         # xw, h, eo
                   + out_pad * 4 + 8 * views)                      # mixture, gate
    else:
        fixed = 2 * (VD * views * dot_sz
                     + VD * hidden_dim * dot_sz + VH * epi_sz
                     + VH * out_pad * dot_sz + views * out_pad * 4 + views * 4)
        per_row = (2 * VD * dot_sz + 2 * out_pad * out_sz
                   + hidden_dim * max(4, epi_sz) + 2 * out_pad * 4 + 8 * views)

    max_tb = max(8, (budget - fixed) // max(per_row, 1))
    tb = _pick_batch_tile(B, max_tb) if batch_tile is None else batch_tile
    assert B % tb == 0, "batch must be divisible by the batch tile"

    est = fixed + per_row * tb
    vmem_limit = int(min(0.9 * vmem_cap, max(32 * 2 ** 20, 2 * est)))

    # ---- wrapper-side packing (one-time XLA cost) -----------------------------
    if use_blockdiag:
        x_cat = jnp.transpose(xs, (1, 0, 2)).reshape(B, VD).astype(dd)

        wf = jnp.zeros((VD, nf), dd)                       # [ W1_blockdiag | Wg ]
        for v in range(views):
            wf = wf.at[v * input_dim:(v + 1) * input_dim,
                       v * hidden_dim:(v + 1) * hidden_dim].set(w1[v].astype(dd))
        wf = wf.at[:, vh_pad:vh_pad + views].set(wg.astype(dd))

        b1p = jnp.zeros((1, vh_pad), epi_dtype).at[0, :VH].set(
            b1.reshape(VH).astype(epi_dtype))

        w2p = jnp.zeros((vh_pad, vo_pad), dd)              # per-view 128-lane blocks
        b2p = jnp.zeros((1, vo_pad), jnp.float32)
        for v in range(views):
            w2p = w2p.at[v * hidden_dim:(v + 1) * hidden_dim,
                         v * out_pad:v * out_pad + output_dim].set(w2[v].astype(dd))
            b2p = b2p.at[0, v * out_pad:v * out_pad + output_dim].set(
                b2[v].astype(jnp.float32))
        bgp = bg.reshape(1, views).astype(jnp.float32)

        kernel = functools.partial(_moe_kernel_blockdiag, views=views,
                                   vh_pad=vh_pad, out_pad=out_pad,
                                   precision=precision, approx_recip=approx)
        operands = (x_cat, wf, bgp, b1p, w2p, b2p)
        data_specs = [pl.BlockSpec((tb, VD), lambda i: (i, 0))]
        weight_shapes = [(VD, nf), (1, views), (1, vh_pad),
                         (vh_pad, vo_pad), (1, vo_pad)]
    else:
        x3 = xs.astype(dd)                                  # (views, B, D)
        wg3 = wg.reshape(views, input_dim, views).astype(dd)
        bgp = bg.reshape(1, views).astype(jnp.float32)
        w13 = w1.astype(dd)
        b13 = b1.reshape(views, 1, hidden_dim).astype(epi_dtype)
        w2p = jnp.zeros((views, hidden_dim, out_pad), dd).at[
            :, :, :output_dim].set(w2.astype(dd))
        b2p = jnp.zeros((views, 1, out_pad), jnp.float32).at[
            :, :, :output_dim].set(b2.reshape(views, 1, output_dim).astype(jnp.float32))

        kernel = functools.partial(_moe_kernel_perview, views=views,
                                   out_pad=out_pad, precision=precision,
                                   approx_recip=approx)
        operands = (x3, wg3, bgp, w13, b13, w2p, b2p)
        data_specs = [pl.BlockSpec((views, tb, input_dim), lambda i: (0, i, 0))]
        weight_shapes = [(views, input_dim, views), (1, views),
                         (views, input_dim, hidden_dim), (views, 1, hidden_dim),
                         (views, hidden_dim, out_pad), (views, 1, out_pad)]

    def _call(single_buffer_weights):
        def wspec(shape):
            zmap = (lambda i: (0, 0)) if len(shape) == 2 else (lambda i: (0, 0, 0))
            if single_buffer_weights:
                # Grid-constant blocks: single-buffer to halve their VMEM footprint.
                return pl.BlockSpec(shape, zmap, pipeline_mode=pl.Buffered(1))
            return pl.BlockSpec(shape, zmap)

        in_specs = data_specs + [wspec(s) for s in weight_shapes]
        return pl.pallas_call(
            kernel,
            out_shape=jax.ShapeDtypeStruct((B, out_pad), xs.dtype),
            grid_spec=pltpu.PrefetchScalarGridSpec(
                num_scalar_prefetch=0,
                grid=(B // tb,),
                in_specs=in_specs,
                out_specs=pl.BlockSpec((tb, out_pad), lambda i: (i, 0)),
            ),
            compiler_params=pltpu.CompilerParams(
                dimension_semantics=("parallel",),
                vmem_limit_bytes=vmem_limit),
        )(*operands)

    try:
        out_padded = _call(True)     # single-buffer the grid-constant weights
    except Exception:
        out_padded = _call(False)    # fall back to default double buffering

    return out_padded[:, :output_dim]


# --------------------------------------------------------------------------- #
# Pure-JAX reference (mirrors the PyTorch forward)
# --------------------------------------------------------------------------- #
def moe_reference(xs, w1, b1, w2, b2, wg, bg):
    views = xs.shape[0]
    gate_in = jnp.concatenate([xs[v] for v in range(views)], axis=-1)
    gate = jax.nn.softmax(gate_in @ wg + bg, axis=-1)
    eo = jnp.stack(
        [jax.nn.relu(xs[v] @ w1[v] + b1[v]) @ w2[v] + b2[v] for v in range(views)],
        axis=1)                                               # (B, views, O)
    return jnp.einsum("bv,bvo->bo", gate, eo)


def _uniform(key, shape, bound):
    return jax.random.uniform(key, shape, jnp.float32, -bound, bound)


if __name__ == "__main__":
    # Highest f32 matmul precision so the pure-JAX reference matches the
    # kernel's HIGHEST-precision f32 path tightly.
    jax.config.update("jax_default_matmul_precision", "highest")

    views, input_dim, output_dim = 4, 32, 16
    hidden_dim = (input_dim + output_dim) * 2 // 3   # 32
    B = 256

    key = jax.random.PRNGKey(0)
    ks = jax.random.split(key, 7)

    xs = jax.random.normal(ks[0], (views, B, input_dim), jnp.float32)
    w1 = _uniform(ks[1], (views, input_dim, hidden_dim), 1.0 / input_dim ** 0.5)
    b1 = _uniform(ks[2], (views, hidden_dim), 1.0 / input_dim ** 0.5)
    w2 = _uniform(ks[3], (views, hidden_dim, output_dim), 1.0 / hidden_dim ** 0.5)
    b2 = _uniform(ks[4], (views, output_dim), 1.0 / hidden_dim ** 0.5)
    wg = _uniform(ks[5], (views * input_dim, views), 1.0 / (views * input_dim) ** 0.5)
    bg = _uniform(ks[6], (views,), 1.0 / (views * input_dim) ** 0.5)

    ref = moe_reference(xs, w1, b1, w2, b2, wg, bg)

    # Fused block-diagonal path, f32 MXU operands (tight parity).
    out_f32 = jax.block_until_ready(
        moe_forward(xs, w1, b1, w2, b2, wg, bg, dot_dtype=jnp.float32))
    assert out_f32.shape == (B, output_dim)
    assert jnp.allclose(out_f32, ref, atol=1e-3, rtol=1e-3), \
        float(jnp.max(jnp.abs(out_f32 - ref)))

    # Fused path, bf16 MXU operands (recommended v6e/v7x production path).
    out_bf16 = jax.block_until_ready(
        moe_forward(xs, w1, b1, w2, b2, wg, bg, dot_dtype=jnp.bfloat16))
    assert out_bf16.shape == (B, output_dim)
    assert jnp.allclose(out_bf16, ref, atol=5e-2, rtol=5e-2), \
        float(jnp.max(jnp.abs(out_bf16 - ref)))

    # Per-view fallback path (used when views*D exceeds one MXU tile); force it
    # here to exercise the second kernel at small shapes.
    out_loop = jax.block_until_ready(
        moe_forward(xs, w1, b1, w2, b2, wg, bg, dot_dtype=jnp.float32,
                    blockdiag_max_dim=64))
    assert jnp.allclose(out_loop, ref, atol=1e-3, rtol=1e-3), \
        float(jnp.max(jnp.abs(out_loop - ref)))

    print("KERNEL_OK")
</pallas_src>

<mosaic_0001>
module attributes {stable_mosaic.version = 11 : i64} {
  func.func @_moe_kernel_blockdiag(%arg0: i32, %arg1: memref<128x128xf32, #tpu.memory_space<vmem>>, %arg2: memref<128x256xf32, #tpu.memory_space<vmem>>, %arg3: memref<1x4xf32, #tpu.memory_space<vmem>>, %arg4: memref<1x128xf32, #tpu.memory_space<vmem>>, %arg5: memref<128x512xf32, #tpu.memory_space<vmem>>, %arg6: memref<1x512xf32, #tpu.memory_space<vmem>>, %arg7: memref<128x128xf32, #tpu.memory_space<vmem>>) attributes {dimension_semantics = [#tpu.dimension_semantics<parallel>], iteration_bounds = array<i64: 2>, scalar_prefetch = 0 : i64, scratch_operands = 0 : i64, tpu.core_type = #tpu.core_type<tc>, window_params = [{transform_indices = @transform_0, window_bounds = array<i64: 128, 128>}, {pipeline_mode = #tpu.pipeline_mode<synchronous>, transform_indices = @transform_1, window_bounds = array<i64: 128, 256>}, {pipeline_mode = #tpu.pipeline_mode<synchronous>, transform_indices = @transform_2, window_bounds = array<i64: 1, 4>}, {pipeline_mode = #tpu.pipeline_mode<synchronous>, transform_indices = @transform_3, window_bounds = array<i64: 1, 128>}, {pipeline_mode = #tpu.pipeline_mode<synchronous>, transform_indices = @transform_4, window_bounds = array<i64: 128, 512>}, {pipeline_mode = #tpu.pipeline_mode<synchronous>, transform_indices = @transform_5, window_bounds = array<i64: 1, 512>}, {transform_indices = @transform_6, window_bounds = array<i64: 128, 128>}]} {
    %c0 = arith.constant 0 : index
    %c0_0 = arith.constant 0 : index
    %0 = vector.load %arg1[%c0, %c0_0] : memref<128x128xf32, #tpu.memory_space<vmem>>, vector<128x128xf32>
    %c0_1 = arith.constant 0 : index
    %c0_2 = arith.constant 0 : index
    %1 = vector.load %arg2[%c0_1, %c0_2] : memref<128x256xf32, #tpu.memory_space<vmem>>, vector<128x256xf32>
    %cst = arith.constant dense<0.000000e+00> : vector<128x256xf32>
    %2 = tpu.matmul %0, %1, %cst {dimension_numbers = #tpu.dot_dimension_numbers<[1], [0], [0], [1], [0, 0, 1, 1], [], []>, precision = #tpu.contract_precision<fp32>} : vector<128x128xf32>, vector<128x256xf32>, vector<128x256xf32> -> vector<128x256xf32>
    %3 = vector.extract_strided_slice %2 {offsets = [0, 128], sizes = [128, 4], strides = [1, 1]} : vector<128x256xf32> to vector<128x4xf32>
    %c0_3 = arith.constant 0 : index
    %c0_4 = arith.constant 0 : index
    %4 = vector.load %arg3[%c0_3, %c0_4] : memref<1x4xf32, #tpu.memory_space<vmem>>, vector<1x4xf32>
    %5 = vector.broadcast %4 : vector<1x4xf32> to vector<128x4xf32>
    %6 = arith.addf %3, %5 : vector<128x4xf32>
    %cst_5 = arith.constant dense<0xFF800000> : vector<128xf32>
    %7 = vector.multi_reduction <maximumf>, %6, %cst_5 [1] : vector<128x4xf32> to vector<128xf32>
    %8 = vector.shape_cast %7 : vector<128xf32> to vector<128x1xf32>
    %9 = vector.broadcast %8 : vector<128x1xf32> to vector<128x4xf32>
    %10 = arith.subf %6, %9 : vector<128x4xf32>
    %11 = math.exp %10 : vector<128x4xf32>
    %cst_6 = arith.constant dense<0.000000e+00> : vector<128xf32>
    %12 = vector.multi_reduction <add>, %11, %cst_6 [1] : vector<128x4xf32> to vector<128xf32>
    %13 = vector.shape_cast %12 : vector<128xf32> to vector<128x1xf32>
    %14 = tpu.reciprocal %13 : vector<128x1xf32> -> vector<128x1xf32>
    %15 = vector.broadcast %14 : vector<128x1xf32> to vector<128x4xf32>
    %16 = arith.mulf %11, %15 : vector<128x4xf32>
    %17 = vector.extract_strided_slice %2 {offsets = [0, 0], sizes = [128, 128], strides = [1, 1]} : vector<128x256xf32> to vector<128x128xf32>
    %c0_7 = arith.constant 0 : index
    %c0_8 = arith.constant 0 : index
    %18 = vector.load %arg4[%c0_7, %c0_8] : memref<1x128xf32, #tpu.memory_space<vmem>>, vector<1x128xf32>
    %19 = vector.broadcast %18 : vector<1x128xf32> to vector<128x128xf32>
    %20 = arith.addf %17, %19 : vector<128x128xf32>
    %cst_9 = arith.constant 0.000000e+00 : f32
    %21 = vector.broadcast %cst_9 : f32 to vector<128x128xf32>
    %22 = arith.maximumf %20, %21 : vector<128x128xf32>
    %c0_10 = arith.constant 0 : index
    %c0_11 = arith.constant 0 : index
    %23 = vector.load %arg5[%c0_10, %c0_11] : memref<128x512xf32, #tpu.memory_space<vmem>>, vector<128x512xf32>
    %cst_12 = arith.constant dense<0.000000e+00> : vector<128x512xf32>
    %24 = tpu.matmul %22, %23, %cst_12 {dimension_numbers = #tpu.dot_dimension_numbers<[1], [0], [0], [1], [0, 0, 1, 1], [], []>, precision = #tpu.contract_precision<fp32>} : vector<128x128xf32>, vector<128x512xf32>, vector<128x512xf32> -> vector<128x512xf32>
    %c0_13 = arith.constant 0 : index
    %c0_14 = arith.constant 0 : index
    %25 = vector.load %arg6[%c0_13, %c0_14] : memref<1x512xf32, #tpu.memory_space<vmem>>, vector<1x512xf32>
    %26 = vector.broadcast %25 : vector<1x512xf32> to vector<128x512xf32>
    %27 = arith.addf %24, %26 : vector<128x512xf32>
    %28 = vector.extract_strided_slice %16 {offsets = [0, 0], sizes = [128, 1], strides = [1, 1]} : vector<128x4xf32> to vector<128x1xf32>
    %29 = vector.extract_strided_slice %27 {offsets = [0, 0], sizes = [128, 128], strides = [1, 1]} : vector<128x512xf32> to vector<128x128xf32>
    %30 = vector.broadcast %28 : vector<128x1xf32> to vector<128x128xf32>
    %31 = arith.mulf %30, %29 : vector<128x128xf32>
    %32 = vector.extract_strided_slice %16 {offsets = [0, 1], sizes = [128, 1], strides = [1, 1]} : vector<128x4xf32> to vector<128x1xf32>
    %33 = vector.extract_strided_slice %27 {offsets = [0, 128], sizes = [128, 128], strides = [1, 1]} : vector<128x512xf32> to vector<128x128xf32>
    %34 = vector.broadcast %32 : vector<128x1xf32> to vector<128x128xf32>
    %35 = arith.mulf %34, %33 : vector<128x128xf32>
    %36 = arith.addf %31, %35 : vector<128x128xf32>
    %37 = vector.extract_strided_slice %16 {offsets = [0, 2], sizes = [128, 1], strides = [1, 1]} : vector<128x4xf32> to vector<128x1xf32>
    %38 = vector.extract_strided_slice %27 {offsets = [0, 256], sizes = [128, 128], strides = [1, 1]} : vector<128x512xf32> to vector<128x128xf32>
    %39 = vector.broadcast %37 : vector<128x1xf32> to vector<128x128xf32>
    %40 = arith.mulf %39, %38 : vector<128x128xf32>
    %41 = arith.addf %36, %40 : vector<128x128xf32>
    %42 = vector.extract_strided_slice %16 {offsets = [0, 3], sizes = [128, 1], strides = [1, 1]} : vector<128x4xf32> to vector<128x1xf32>
    %43 = vector.extract_strided_slice %27 {offsets = [0, 384], sizes = [128, 128], strides = [1, 1]} : vector<128x512xf32> to vector<128x128xf32>
    %44 = vector.broadcast %42 : vector<128x1xf32> to vector<128x128xf32>
    %45 = arith.mulf %44, %43 : vector<128x128xf32>
    %46 = arith.addf %41, %45 : vector<128x128xf32>
    %c0_15 = arith.constant 0 : index
    %c0_16 = arith.constant 0 : index
    %47 = vector.load %arg7[%c0_15, %c0_16] : memref<128x128xf32, #tpu.memory_space<vmem>>, vector<128x128xf32>
    tpu.vector_store %arg7[%c0_15, %c0_16], %46 {strides = array<i32>} : memref<128x128xf32, #tpu.memory_space<vmem>>, vector<128x128xf32>,
    return
  }
  func.func @transform_0(%arg0: i32) -> (i32, i32) {
    %c0_i32 = arith.constant 0 : i32
    %c0_i32_0 = arith.constant 0 : i32
    return %arg0, %c0_i32 : i32, i32
  }
  func.func @transform_1(%arg0: i32) -> (i32, i32) {
    %c0_i32 = arith.constant 0 : i32
    %c0_i32_0 = arith.constant 0 : i32
    %c0_i32_1 = arith.constant 0 : i32
    return %c0_i32, %c0_i32_0 : i32, i32
  }
  func.func @transform_2(%arg0: i32) -> (i32, i32) {
    %c0_i32 = arith.constant 0 : i32
    %c0_i32_0 = arith.constant 0 : i32
    %c0_i32_1 = arith.constant 0 : i32
    return %c0_i32, %c0_i32_0 : i32, i32
  }
  func.func @transform_3(%arg0: i32) -> (i32, i32) {
    %c0_i32 = arith.constant 0 : i32
    %c0_i32_0 = arith.constant 0 : i32
    %c0_i32_1 = arith.constant 0 : i32
    return %c0_i32, %c0_i32_0 : i32, i32
  }
  func.func @transform_4(%arg0: i32) -> (i32, i32) {
    %c0_i32 = arith.constant 0 : i32
    %c0_i32_0 = arith.constant 0 : i32
    %c0_i32_1 = arith.constant 0 : i32
    return %c0_i32, %c0_i32_0 : i32, i32
  }
  func.func @transform_5(%arg0: i32) -> (i32, i32) {
    %c0_i32 = arith.constant 0 : i32
    %c0_i32_0 = arith.constant 0 : i32
    %c0_i32_1 = arith.constant 0 : i32
    return %c0_i32, %c0_i32_0 : i32, i32
  }
  func.func @transform_6(%arg0: i32) -> (i32, i32) {
    %c0_i32 = arith.constant 0 : i32
    %c0_i32_0 = arith.constant 0 : i32
    return %arg0, %c0_i32 : i32, i32
  }
}

module attributes {stable_mosaic.version = 11 : i64} {
  func.func @_moe_kernel_blockdiag(%arg0: i32, %arg1: memref<128x128xf32, #tpu.memory_space<vmem>>, %arg2: memref<128x256xf32, #tpu.memory_space<vmem>>, %arg3: memref<1x4xf32, #tpu.memory_space<vmem>>, %arg4: memref<1x128xf32, #tpu.memory_space<vmem>>, %arg5: memref<128x512xf32, #tpu.memory_space<vmem>>, %arg6: memref<1x512xf32, #tpu.memory_space<vmem>>, %arg7: memref<128x128xf32, #tpu.memory_space<vmem>>) attributes {dimension_semantics = [#tpu.dimension_semantics<parallel>], iteration_bounds = array<i64: 2>, scalar_prefetch = 0 : i64, scratch_operands = 0 : i64, tpu.core_type = #tpu.core_type<tc>, window_params = [{transform_indices = @transform_0, window_bounds = array<i64: 128, 128>}, {pipeline_mode = #tpu.pipeline_mode<synchronous>, transform_indices = @transform_1, window_bounds = array<i64: 128, 256>}, {pipeline_mode = #tpu.pipeline_mode<synchronous>, transform_indices = @transform_2, window_bounds = array<i64: 1, 4>}, {pipeline_mode = #tpu.pipeline_mode<synchronous>, transform_indices = @transform_3, window_bounds = array<i64: 1, 128>}, {pipeline_mode = #tpu.pipeline_mode<synchronous>, transform_indices = @transform_4, window_bounds = array<i64: 128, 512>}, {pipeline_mode = #tpu.pipeline_mode<synchronous>, transform_indices = @transform_5, window_bounds = array<i64: 1, 512>}, {transform_indices = @transform_6, window_bounds = array<i64: 128, 128>}]} {
    %c0 = arith.constant 0 : index
    %c0_0 = arith.constant 0 : index
    %0 = vector.load %arg1[%c0, %c0_0] : memref<128x128xf32, #tpu.memory_space<vmem>>, vector<128x128xf32>
    %c0_1 = arith.constant 0 : index
    %c0_2 = arith.constant 0 : index
    %1 = vector.load %arg2[%c0_1, %c0_2] : memref<128x256xf32, #tpu.memory_space<vmem>>, vector<128x256xf32>
    %cst = arith.constant dense<0.000000e+00> : vector<128x256xf32>
    %2 = tpu.matmul %0, %1, %cst {dimension_numbers = #tpu.dot_dimension_numbers<[1], [0], [0], [1], [0, 0, 1, 1], [], []>, precision = #tpu.contract_precision<fp32>} : vector<128x128xf32>, vector<128x256xf32>, vector<128x256xf32> -> vector<128x256xf32>
    %3 = vector.extract_strided_slice %2 {offsets = [0, 128], sizes = [128, 4], strides = [1, 1]} : vector<128x256xf32> to vector<128x4xf32>
    %c0_3 = arith.constant 0 : index
    %c0_4 = arith.constant 0 : index
    %4 = vector.load %arg3[%c0_3, %c0_4] : memref<1x4xf32, #tpu.memory_space<vmem>>, vector<1x4xf32>
    %5 = vector.broadcast %4 : vector<1x4xf32> to vector<128x4xf32>
    %6 = arith.addf %3, %5 : vector<128x4xf32>
    %cst_5 = arith.constant dense<0xFF800000> : vector<128xf32>
    %7 = vector.multi_reduction <maximumf>, %6, %cst_5 [1] : vector<128x4xf32> to vector<128xf32>
    %8 = vector.shape_cast %7 : vector<128xf32> to vector<128x1xf32>
    %9 = vector.broadcast %8 : vector<128x1xf32> to vector<128x4xf32>
    %10 = arith.subf %6, %9 : vector<128x4xf32>
    %11 = math.exp %10 : vector<128x4xf32>
    %cst_6 = arith.constant dense<0.000000e+00> : vector<128xf32>
    %12 = vector.multi_reduction <add>, %11, %cst_6 [1] : vector<128x4xf32> to vector<128xf32>
    %13 = vector.shape_cast %12 : vector<128xf32> to vector<128x1xf32>
    %14 = tpu.reciprocal %13 : vector<128x1xf32> -> vector<128x1xf32>
    %15 = vector.broadcast %14 : vector<128x1xf32> to vector<128x4xf32>
    %16 = arith.mulf %11, %15 : vector<128x4xf32>
    %17 = vector.extract_strided_slice %2 {offsets = [0, 0], sizes = [128, 128], strides = [1, 1]} : vector<128x256xf32> to vector<128x128xf32>
    %c0_7 = arith.constant 0 : index
    %c0_8 = arith.constant 0 : index
    %18 = vector.load %arg4[%c0_7, %c0_8] : memref<1x128xf32, #tpu.memory_space<vmem>>, vector<1x128xf32>
    %19 = vector.broadcast %18 : vector<1x128xf32> to vector<128x128xf32>
    %20 = arith.addf %17, %19 : vector<128x128xf32>
    %cst_9 = arith.constant 0.000000e+00 : f32
    %21 = vector.broadcast %cst_9 : f32 to vector<128x128xf32>
    %22 = arith.maximumf %20, %21 : vector<128x128xf32>
    %c0_10 = arith.constant 0 : index
    %c0_11 = arith.constant 0 : index
    %23 = vector.load %arg5[%c0_10, %c0_11] : memref<128x512xf32, #tpu.memory_space<vmem>>, vector<128x512xf32>
    %cst_12 = arith.constant dense<0.000000e+00> : vector<128x512xf32>
    %24 = tpu.matmul %22, %23, %cst_12 {dimension_numbers = #tpu.dot_dimension_numbers<[1], [0], [0], [1], [0, 0, 1, 1], [], []>, precision = #tpu.contract_precision<fp32>} : vector<128x128xf32>, vector<128x512xf32>, vector<128x512xf32> -> vector<128x512xf32>
    %c0_13 = arith.constant 0 : index
    %c0_14 = arith.constant 0 : index
    %25 = vector.load %arg6[%c0_13, %c0_14] : memref<1x512xf32, #tpu.memory_space<vmem>>, vector<1x512xf32>
    %26 = vector.broadcast %25 : vector<1x512xf32> to vector<128x512xf32>
    %27 = arith.addf %24, %26 : vector<128x512xf32>
    %28 = vector.extract_strided_slice %16 {offsets = [0, 0], sizes = [128, 1], strides = [1, 1]} : vector<128x4xf32> to vector<128x1xf32>
    %29 = vector.extract_strided_slice %27 {offsets = [0, 0], sizes = [128, 128], strides = [1, 1]} : vector<128x512xf32> to vector<128x128xf32>
    %30 = vector.broadcast %28 : vector<128x1xf32> to vector<128x128xf32>
    %31 = arith.mulf %30, %29 : vector<128x128xf32>
    %32 = vector.extract_strided_slice %16 {offsets = [0, 1], sizes = [128, 1], strides = [1, 1]} : vector<128x4xf32> to vector<128x1xf32>
    %33 = vector.extract_strided_slice %27 {offsets = [0, 128], sizes = [128, 128], strides = [1, 1]} : vector<128x512xf32> to vector<128x128xf32>
    %34 = vector.broadcast %32 : vector<128x1xf32> to vector<128x128xf32>
    %35 = arith.mulf %34, %33 : vector<128x128xf32>
    %36 = arith.addf %31, %35 : vector<128x128xf32>
    %37 = vector.extract_strided_slice %16 {offsets = [0, 2], sizes = [128, 1], strides = [1, 1]} : vector<128x4xf32> to vector<128x1xf32>
    %38 = vector.extract_strided_slice %27 {offsets = [0, 256], sizes = [128, 128], strides = [1, 1]} : vector<128x512xf32> to vector<128x128xf32>
    %39 = vector.broadcast %37 : vector<128x1xf32> to vector<128x128xf32>
    %40 = arith.mulf %39, %38 : vector<128x128xf32>
    %41 = arith.addf %36, %40 : vector<128x128xf32>
    %42 = vector.extract_strided_slice %16 {offsets = [0, 3], sizes = [128, 1], strides = [1, 1]} : vector<128x4xf32> to vector<128x1xf32>
    %43 = vector.extract_strided_slice %27 {offsets = [0, 384], sizes = [128, 128], strides = [1, 1]} : vector<128x512xf32> to vector<128x128xf32>
    %44 = vector.broadcast %42 : vector<128x1xf32> to vector<128x128xf32>
    %45 = arith.mulf %44, %43 : vector<128x128xf32>
    %46 = arith.addf %41, %45 : vector<128x128xf32>
    %c0_15 = arith.constant 0 : index
    %c0_16 = arith.constant 0 : index
    %47 = vector.load %arg7[%c0_15, %c0_16] : memref<128x128xf32, #tpu.memory_space<vmem>>, vector<128x128xf32>
    tpu.vector_store %arg7[%c0_15, %c0_16], %46 {strides = array<i32>} : memref<128x128xf32, #tpu.memory_space<vmem>>, vector<128x128xf32>,
    return
  }
  func.func @transform_0(%arg0: i32) -> (i32, i32) {
    %c0_i32 = arith.constant 0 : i32
    %c0_i32_0 = arith.constant 0 : i32
    return %arg0, %c0_i32 : i32, i32
  }
  func.func @transform_1(%arg0: i32) -> (i32, i32) {
    %c0_i32 = arith.constant 0 : i32
    %c0_i32_0 = arith.constant 0 : i32
    %c0_i32_1 = arith.constant 0 : i32
    return %c0_i32, %c0_i32_0 : i32, i32
  }
  func.func @transform_2(%arg0: i32) -> (i32, i32) {
    %c0_i32 = arith.constant 0 : i32
    %c0_i32_0 = arith.constant 0 : i32
    %c0_i32_1 = arith.constant 0 : i32
    return %c0_i32, %c0_i32_0 : i32, i32
  }
  func.func @transform_3(%arg0: i32) -> (i32, i32) {
    %c0_i32 = arith.constant 0 : i32
    %c0_i32_0 = arith.constant 0 : i32
    %c0_i32_1 = arith.constant 0 : i32
    return %c0_i32, %c0_i32_0 : i32, i32
  }
  func.func @transform_4(%arg0: i32) -> (i32, i32) {
    %c0_i32 = arith.constant 0 : i32
    %c0_i32_0 = arith.constant 0 : i32
    %c0_i32_1 = arith.constant 0 : i32
    return %c0_i32, %c0_i32_0 : i32, i32
  }
  func.func @transform_5(%arg0: i32) -> (i32, i32) {
    %c0_i32 = arith.constant 0 : i32
    %c0_i32_0 = arith.constant 0 : i32
    %c0_i32_1 = arith.constant 0 : i32
    return %c0_i32, %c0_i32_0 : i32, i32
  }
  func.func @transform_6(%arg0: i32) -> (i32, i32) {
    %c0_i32 = arith.constant 0 : i32
    %c0_i32_0 = arith.constant 0 : i32
    return %arg0, %c0_i32 : i32, i32
  }
}

</mosaic_0001>

<bundles_post_ra>
// kernel: tpu_custom_call.1
= control target key start
LH: loop header
LB: loop body
LE: loop exit
PB: predicated region body
PF: predicated region fallthrough
CT: control target
= control target key end

     0   :  { %11 = vsyncpa [#allocation3], 0  ;;  %s10766_s0 = inlined_call_operand.hbm [shape: f32[256,128], index: 0, kind: input, shape index: {}]   ;;  %s10767_s1 = inlined_call_operand.hbm [shape: f32[128,256], index: 1, kind: input, shape index: {}]   ;;  %s10768_s2 = inlined_call_operand.vmem [shape: f32[1,4], index: 2, kind: input, shape index: {}]   ;;  %s10769_s3 = inlined_call_operand.vmem [shape: f32[1,128], index: 3, kind: input, shape index: {}]   ;;  %s10770_s4 = inlined_call_operand.hbm [shape: f32[128,512], index: 4, kind: input, shape index: {}]   ;;  %s10771_s5 = inlined_call_operand.vmem [shape: f32[1,512], index: 5, kind: input, shape index: {}]   ;;  %s10772_s6 = inlined_call_operand.hbm [shape: f32[256,128], index: 6, kind: output, shape index: {}]  }
   0x1   :  { %13 = vsyncpa [#allocation3 + $0x1], 0 }
   0x2   :  { %14 = vsyncpa [#allocation6], 0 }
   0x3   :  { %15 = vsyncpa [#allocation4], 0 }
   0x4   :  { %17 = vsyncpa [#allocation4 + $0x1], 0  ;;  %s7510_s21 = smov 0   ;;  %s7512_s22 = smov 0  }
   0x5   :  { %s7514_s23 = smov 0   ;;  %s7516_s24 = smov 0  }
   0x6 LB: > { %s7531_s25 = sadd.s32 4294967295, %s7456_s24   ;;  %s5950_s26 = sadd.s32 4294967294, %s7456_s24   ;;  %s7456_s24 = sphi %s7516_s24, %s11969_s24   ;;  %s7452_s23 = sphi %s7514_s23, %s11968_s23   ;;  %s7448_s22 = sphi %s7512_s22, %s11967_s22   ;;  %s7444_s21 = sphi %s7510_s21, %s11966_s21  }
   0x7   : > { %p43_p0 = scmp.ne.s32.totalorder %s7448_s22, %s7444_s21  ;;  %p10773_p1 = scmp.eq.s32.totalorder %s7531_s25, 0 }
   0x8   : > { %p178_p3 = scmp.eq.s32.totalorder %s5950_s26, 1  ;;  %p5951_p5 = scmp.ge.s32.totalorder %s7456_s24, 1 }
   0x9   : > { %p7540_p4 = por %p10773_p1, %p43_p0  ;;  %p185_p7 = scmp.lt.s32.totalorder %s7456_s24, 3 }
   0xa   : > { %p7545_p6 = por %p178_p3, %p43_p0  ;;  %s7458_s30 = smov [#allocation5]  }
   0xb   : > { %s11208_s27 = scalar_select %p7540_p4, 1, 0 }
   0xc   : > { %s11209_s28 = scalar_select %p7545_p6, 1, 0 }
   0xd   : > { %p7550_p8 = pnand %p5951_p5, %p185_p7  ;;  %s197_s7 = sshll.u32 %s7458_s30, 4  ;;  %s7554_s7 = int_to_ptr.vmem [resolvable:$true] %s197_s7 }
   0xe   : > { %s7459_s9 = smov [#allocation7]   ;;  %s7300_s13 = scalar_lea.hbm %s10767_s1, 4096 }
   0xf   : > { %p7104_p9 = pneg %p7550_p8  ;;  %s216_s10 = sshll.u32 %s7459_s9, 4  ;;  %s7565_s10 = int_to_ptr.vmem [resolvable:$true] %s216_s10 }
  0x10   : > { %p7301_p12 = scmp.ne.s32.totalorder %s10767_s1, %s7300_s13  ;;  %p7307_p5 = scmp.lt.u32.totalorder %s7300_s13, %s10767_s1 }
  0x11   : > { %p7561_p11 = pnand %p7104_p9, %p10773_p1 }
  0x13   : > { %p7302_p13 = pneg %p7561_p11 }
  0x15   : > { %p7303_p0 = pnand %p7302_p13, %p7301_p12 }
  0x17   : > { %p7304_p3 = pneg %p7303_p0 }
  0x19   : > { %p7309_p7 = pnand %p7307_p5, %p7304_p3 }
  0x1b   : > { %7312 = shalt.err (!%p7309_p7)
}
  0x1c   : > { %s7313_s18 = scalar_lea.vmem %s7554_s7, 4096  ;;  %p7321_p2 = scmp.lt.s32.totalorder %s7554_s7, %s7554_s7 }
  0x1d   : > { %p7314_p9 = scmp.ne.s32.totalorder %s7554_s7, %s7313_s18  ;;  %p7322_p12 = scmp.lt.s32.totalorder %s7313_s18, %s7313_s18 }
  0x1f   : > { %p7316_p10 = pnand %p7314_p9, %p7302_p13  ;;  %p7323_p0 = por %p7322_p12, %p7321_p2 }
  0x21   : > { %p7317_p1 = pneg %p7316_p10 }
  0x23   : > { %p7324_p6 = pnand %p7323_p0, %p7317_p1 }
  0x25   : > { %7327 = shalt.err (!%p7324_p6)
}
  0x26   : > { %s7460_s19 = smov 256   ;;  %s7461_s20 = smov 16  }
  0x27   : > { %7107 = dma.hbm_to_vmem [thread:$0]  (!%p7561_p11), %s10767_s1, 4096, %s7554_s7, [#allocation6], %s7460_s19, %s7460_s19, %s7461_s20  }
  0x28   : > { %s7328_s12 = scalar_lea.hbm %s10770_s4, 8192 }
  0x29   : > { %p7329_p2 = scmp.ne.s32.totalorder %s10770_s4, %s7328_s12  ;;  %p7335_p10 = scmp.lt.u32.totalorder %s7328_s12, %s10770_s4 }
  0x2b   : > { %p7331_p1 = pnand %p7329_p2, %p7302_p13 }
  0x2d   : > { %p7332_p6 = pneg %p7331_p1 }
  0x2f   : > { %p7337_p3 = pnand %p7335_p10, %p7332_p6 }
  0x31   : > { %7340 = shalt.err (!%p7337_p3)
}
  0x32   : > { %s7341_s7 = scalar_lea.vmem %s7565_s10, 8192  ;;  %p7349_p12 = scmp.lt.s32.totalorder %s7565_s10, %s7565_s10 }
  0x33   : > { %p7342_p5 = scmp.ne.s32.totalorder %s7565_s10, %s7341_s7  ;;  %p7350_p0 = scmp.lt.s32.totalorder %s7341_s7, %s7341_s7 }
  0x35   : > { %p7344_p7 = pnand %p7342_p5, %p7302_p13  ;;  %p7351_p2 = por %p7350_p0, %p7349_p12 }
  0x37   : > { %p7345_p9 = pneg %p7344_p7 }
  0x39   : > { %p7352_p1 = pnand %p7351_p2, %p7345_p9 }
  0x3b   : > { %7355 = shalt.err (!%p7352_p1)
}
  0x3c   : > { %s7462_s17 = smov 512   ;;  %s7463_s18 = smov 32  }
  0x3d   : > { %7110 = dma.hbm_to_vmem [thread:$0]  (!%p7561_p11), %s10770_s4, 8192, %s7565_s10, [#allocation6], %s7462_s17, %s7462_s17, %s7463_s18  }
  0x3e   : > { %s7620_s26 = sadd.s32 1, %s7456_s24   ;;  %s30_s9 = sadd.s32 1, %s7452_s23 }
  0x3f   : > { %s27_s30 = ssub.s32 %s7456_s24, %s7620_s26  ;;  %p37_p6 = scmp.ne.s32.totalorder %s7452_s23, %s7448_s22 }
  0x40   : > { %p28_p13 = scmp.eq.s32.totalorder %s27_s30, 0  ;;  %p38_p10 = scmp.eq.s32.totalorder %s7456_s24, 0 }
  0x41   : > { %p11212_p5 = scmp.eq.s32.totalorder %s7531_s25, 1  ;;  %p7121_p9 = scmp.lt.s32.totalorder %s7456_s24, 2 }
  0x42   : > { %s7629_s11 = scalar_select %p28_p13, %s7452_s23, %s30_s9  }
  0x43   : > { %p39_p3 = por %p38_p10, %p37_p6  ;;  %p7633_p7 = por %p11212_p5, %p37_p6 }
  0x44   : > { %s233_s8 = sand.u32 1, %s7452_s23   ;;  %s5970_s10 = sshll.u32 %s7456_s24, 11 }
  0x45   : > { %s11213_s12 = scalar_select %p7633_p7, 1, 0 }
  0x46   : > { %s5955_s13 = sshll.u32 %s233_s8, 7  ;;  %s7643_s16 = scalar_lea.hbm %s10766_s0, %s5970_s10 }
  0x47   : > { %s237_s7 = scalar_lea.vmem [#allocation2], %s5955_s13  ;;  %p7647_p11 = pnand %p7121_p9, %p39_p3 }
  0x48   : > { %s244_s17 = sshll.u32 %s237_s7, 4  ;;  %s7651_s19 = scalar_lea.sflag [#allocation3], %s233_s8  ;;  %s7645_s17 = int_to_ptr.vmem [resolvable:$true] %s244_s17 }
  0x49   : > { %s7356_s20 = scalar_lea.hbm %s7643_s16, 2048  ;;  %p7358_p0 = pneg %p7647_p11 }
  0x4a   : > { %p7357_p12 = scmp.ne.s32.totalorder %s7643_s16, %s7356_s20  ;;  %s7361_s13 = scalar_lea.hbm %s10766_s0, 4096 }
  0x4b   : > { %p7362_p13 = scmp.lt.u32.totalorder %s7643_s16, %s10766_s0  ;;  %p7363_p6 = scmp.lt.u32.totalorder %s7361_s13, %s7356_s20 }
  0x4c   : > { %p7359_p2 = pnand %p7358_p0, %p7357_p12  ;;  %p7365_p3 = scmp.lt.u32.totalorder %s7356_s20, %s7643_s16 }
  0x4d   : > { %p7364_p10 = por %p7363_p6, %p7362_p13 }
  0x4e   : > { %p7360_p1 = pneg %p7359_p2 }
  0x4f   : > { %p7366_p5 = por %p7365_p3, %p7364_p10 }
  0x51   : > { %p7367_p9 = pnand %p7366_p5, %p7360_p1 }
  0x53   : > { %7370 = shalt.err (!%p7367_p9)
}
  0x54   : > { %s7371_s8 = scalar_lea.vmem %s7645_s17, 2048  ;;  %s7464_s15 = smov [#allocation2]  }
  0x55   : > { %p7372_p12 = scmp.ne.s32.totalorder %s7645_s17, %s7371_s8  ;;  %s7376_s7 = sshll.u32 %s7464_s15, 4  ;;  %s7377_s7 = int_to_ptr.vmem [resolvable:$false] %s7376_s7 }
  0x56   : > { %s7378_s30 = scalar_lea.vmem %s7377_s7, 4096  ;;  %p7379_p4 = scmp.lt.s32.totalorder %s7645_s17, %s7377_s7 }
  0x57   : > { %p7374_p2 = pnand %p7372_p12, %p7358_p0  ;;  %p7380_p13 = scmp.lt.s32.totalorder %s7378_s30, %s7371_s8 }
  0x59   : > { %p7375_p7 = pneg %p7374_p2  ;;  %p7381_p6 = por %p7380_p13, %p7379_p4 }
  0x5b   : > { %p7382_p10 = pnand %p7381_p6, %p7375_p7 }
  0x5d   : > { %7385 = shalt.err (!%p7382_p10)
}
  0x5e   : > { %s7465_s20 = smov 128   ;;  %s7466_s9 = smov 8  }
  0x5f   : > { %7114 = dma.hbm_to_vmem [thread:$0]  (!%p7647_p11), %s7643_s16, 2048, %s7645_s17, %s7651_s19, %s7465_s20, %s7465_s20, %s7466_s9  }
  0x60   : > { %256 = sbr.rel (%p7550_p8) target bundleno = 1148 (0x47c), region = 44 }
  0x67   : > { %s7682_s13 = sand.u32 1, %s7448_s22   ;;  %p11215_p4 = scmp.ne.s32.totalorder %s11208_s27, 0 }
  0x68   : > { %s5959_s10 = sshll.u32 %s7682_s13, 7  ;;  %s259_s14 = scalar_lea.sflag [#allocation3], %s7682_s13 }
  0x69   : > { %s7688_s8 = scalar_lea.vmem [#allocation2], %s5959_s10 }
  0x6a   : > { %7431 = dma.done.wait (%p11215_p4), %s259_s14, 2048  }
  0x6b   : > { %7433 = vsyncadd (%p11215_p4), %s259_s14, 4294965248  ;;  %p11216_p7 = scmp.eq.s32.totalorder %s7531_s25, 0 }
  0x6d   : > { %7435 = dma.done.wait (%p11216_p7), [#allocation6], 12288   ;;  %p11217_p8 = pmov %p11216_p7 }
  0x6e   : > { %v10776_v0 = vmov 0.0   ;;  %v318_v1 = vld [vmem:[#allocation5 + $0x8] sm:$0xff]  ;;  %v320_v2 = vld [vmem:[#allocation5 + $0x18] sm:$0xff]  ;;  %v317_v3 = vld [vmem:[#allocation5] sm:$0xff]  ;;  %vm1962_vm0 = vcmask 31744   ;;  %s10587_s15 = scalar_lea.vmem [#allocation8], %s5959_s10 }
  0x6f   : > { %7437 = vsyncadd (%p11217_p8), [#allocation6], 4294955008  ;;  %445 = vmatprep.mubr.f32.mxu1 %v10776_v0  ;;  %1312 = vmatprep.mubr.f32.mxu0 %v10776_v0  ;;  %v349_v4 = vand.u32 4294901760, %v318_v1  ;;  %v353_v5 = vand.u32 4294901760, %v320_v2  ;;  %v319_v6 = vld [vmem:[#allocation5 + $0x10] sm:$0xff]  ;;  %v351_v7 = vand.u32 4294901760, %v317_v3 }
  0x70   : > { %v322_v8 = vld [vmem:[#allocation5 + $0x28] sm:$0xff]  ;;  %v324_v9 = vld [vmem:[#allocation5 + $0x38] sm:$0xff]  ;;  %v355_v10 = vand.u32 4294901760, %v319_v6  ;;  %v321_v13 = vld [vmem:[#allocation5 + $0x20] sm:$0xff]  ;;  %s5971_s7 = sshll.u32 %s7531_s25, 11  ;;  %s5858_s30 = sshll.u32 %s10587_s15, 4  ;;  %s10721_s30 = int_to_ptr.vmem [resolvable:$true] %s5858_s30 }
  0x71   : > { %v357_v11 = vand.u32 4294901760, %v322_v8  ;;  %v361_v12 = vand.u32 4294901760, %v324_v9  ;;  %v323_v14 = vld [vmem:[#allocation5 + $0x30] sm:$0xff]  ;;  %v326_v15 = vld [vmem:[#allocation5 + $0x48] sm:$0xff]  ;;  %v7700_v16 = vpack.c.bf16 %v353_v5, %v349_v4  ;;  %v328_v17 = vld [vmem:[#allocation5 + $0x58] sm:$0xff]  ;;  %v359_v24 = vand.u32 4294901760, %v321_v13  ;;  %s10719_s10 = scalar_lea.hbm %s10772_s6, %s5971_s7 }
  0x72   : > { %v325_v18 = vld [vmem:[#allocation5 + $0x40] sm:$0xff]  ;;  %v327_v19 = vld [vmem:[#allocation5 + $0x50] sm:$0xff]  ;;  %v7702_v20 = vpack.c.bf16 %v355_v10, %v351_v7  ;;  %v330_v22 = vld [vmem:[#allocation5 + $0x68] sm:$0xff]  ;;  %v363_v25 = vand.u32 4294901760, %v323_v14  ;;  %v365_v26 = vand.u32 4294901760, %v326_v15  ;;  %v7708_v27 = vsub.f32 %v318_v1, %v349_v4  ;;  %s5845_s14 = scalar_lea.sflag [#allocation4], %s7682_s13 }
  0x73   : > { %11218 = vst [vmem:[#allocation12_spill] sm:$0xff] %v7700_v16  ;;  %v7704_v21 = vpack.c.bf16 %v361_v12, %v357_v11  ;;  %v332_v23 = vld [vmem:[#allocation5 + $0x78] sm:$0xff]  ;;  %5973 = vmatprep.subr.bf16.mxu1 %v7700_v16  ;;  %6069 = vmatprep.subr.bf16.mxu0 %v7700_v16  ;;  %v369_v28 = vand.u32 4294901760, %v328_v17  ;;  %v367_v29 = vand.u32 4294901760, %v325_v18  ;;  %v371_v30 = vand.u32 4294901760, %v327_v19  ;;  %v329_v35 = vld [vmem:[#allocation5 + $0x60] sm:$0xff] }
  0x74   : > { %11219 = vst [vmem:[#allocation13_spill] sm:$0xff] %v7702_v20  ;;  %5975 = vmatpush1.bf16.msra.mxu1 %v7702_v20  ;;  %6071 = vmatpush1.bf16.msra.mxu0 %v7702_v20  ;;  %v7712_v31 = vsub.f32 %v320_v2, %v353_v5  ;;  %v7716_v32 = vpack.c.bf16 %v363_v25, %v359_v24  ;;  %v373_v33 = vand.u32 4294901760, %v330_v22  ;;  %v377_v34 = vand.u32 4294901760, %v332_v23  ;;  %v331_v36 = vld [vmem:[#allocation5 + $0x70] sm:$0xff]  ;;  %v334_v41 = vld [vmem:[#allocation5 + $0x88] sm:$0xff]  ;;  %v336_v42 = vld [vmem:[#allocation5 + $0x98] sm:$0xff] }
  0x75   : > { %11220 = vst [vmem:[#allocation14_spill] sm:$0xff] %v7704_v21  ;;  %5977 = vmatprep.subr.bf16.mxu1 %v7704_v21  ;;  %6073 = vmatprep.subr.bf16.mxu0 %v7704_v21  ;;  %v7718_v37 = vsub.f32 %v317_v3, %v351_v7  ;;  %v7720_v38 = vsub.f32 %v319_v6, %v355_v10  ;;  %v333_v47 = vld [vmem:[#allocation5 + $0x80] sm:$0xff]  ;;  %v335_v48 = vld [vmem:[#allocation5 + $0x90] sm:$0xff]  ;;  %v375_v51 = vand.u32 4294901760, %v329_v35  ;;  %v379_v52 = vand.u32 4294901760, %v331_v36  ;;  %v338_v53 = vld [vmem:[#allocation5 + $0xa8] sm:$0xff] }
  0x76   : > { %11221 = vst [vmem:[#allocation15_spill] sm:$0xff] %v7716_v32  ;;  %v7722_v39 = vsub.f32 %v322_v8, %v357_v11  ;;  %v7724_v40 = vpack.c.bf16 %v369_v28, %v365_v26  ;;  %v7726_v43 = vsub.f32 %v324_v9, %v361_v12  ;;  %v7728_v44 = vsub.f32 %v321_v13, %v359_v24  ;;  %v340_v58 = vld [vmem:[#allocation5 + $0xb8] sm:$0xff]  ;;  %v337_v59 = vld [vmem:[#allocation5 + $0xa0] sm:$0xff]  ;;  %v339_v1 = vld [vmem:[#allocation5 + $0xb0] sm:$0xff]  ;;  %p11963_p0 = scmp.ne.s32.totalorder %s11213_s12, 0  ;;  %s7472_s25 = smov [#allocation8]  }
  0x77   : > { %v7730_v45 = vsub.f32 %v323_v14, %v363_v25  ;;  %v7732_v46 = vsub.f32 %v326_v15, %v365_v26  ;;  %v7736_v49 = vsub.f32 %v328_v17, %v369_v28  ;;  %v7738_v50 = vpack.c.bf16 %v371_v30, %v367_v29  ;;  %v342_v2 = vld [vmem:[#allocation5 + $0xc8] sm:$0xff]  ;;  %v344_v3 = vld [vmem:[#allocation5 + $0xd8] sm:$0xff]  ;;  %v341_v12 = vld [vmem:[#allocation5 + $0xc0] sm:$0xff]  ;;  %s7390_s27 = sshll.u32 %s7472_s25, 4  ;;  %s7391_s27 = int_to_ptr.vmem [resolvable:$false] %s7390_s27 }
  0x78   : > { %11222 = vst [vmem:[#allocation16_spill] sm:$0xff] %v7724_v40  ;;  %11223 = vst [vmem:[#allocation17_spill] sm:$0xff] %v7726_v43  ;;  %5979 = vmatpush1.bf16.msra.mxu1 %v7716_v32  ;;  %6075 = vmatpush1.bf16.msra.mxu0 %v7716_v32  ;;  %v7742_v54 = vsub.f32 %v325_v18, %v367_v29  ;;  %v7744_v55 = vpack.c.bf16 %v377_v34, %v373_v33  ;;  %v381_v56 = vand.u32 4294901760, %v334_v41  ;;  %v343_v13 = vld [vmem:[#allocation5 + $0xd0] sm:$0xff]  ;;  %v305_v32 = vld [vmem:[%s7688_s8 + $0x20] sm:$0xff]  ;;  %s7392_s29 = scalar_lea.vmem %s7391_s27, 4096  ;;  %p7393_p5 = scmp.lt.s32.totalorder %s10721_s30, %s7391_s27 }
  0x79   : > { %11224 = vst [vmem:[#allocation18_spill] sm:$0xff] %v7728_v44  ;;  %11225 = vst [vmem:[#allocation19_spill] sm:$0xff] %v7730_v45  ;;  %5981 = vmatprep.subr.bf16.mxu1 %v7724_v40  ;;  %6077 = vmatprep.subr.bf16.mxu0 %v7724_v40  ;;  %v385_v57 = vand.u32 4294901760, %v336_v42  ;;  %v7746_v60 = vsub.f32 %v327_v19, %v371_v30  ;;  %v7748_v61 = vsub.f32 %v330_v22, %v373_v33  ;;  %v301_v30 = vld [vmem:[%s7688_s8] sm:$0xff] }
  0x7a   : > { %11226 = vst [vmem:[#allocation20_spill] sm:$0xff] %v7738_v50  ;;  %11227 = vst [vmem:[#allocation21_spill] sm:$0xff] %v7742_v54  ;;  %v383_v62 = vand.u32 4294901760, %v333_v47  ;;  %v387_v63 = vand.u32 4294901760, %v335_v48  ;;  %v7750_v4 = vsub.f32 %v332_v23, %v377_v34  ;;  %v7752_v5 = vpack.c.bf16 %v379_v52, %v375_v51 }
  0x7b   : > { %11228 = vst [vmem:[#allocation22_spill] sm:$0xff] %v7744_v55  ;;  %v7754_v6 = vsub.f32 %v329_v35, %v375_v51  ;;  %v389_v7 = vand.u32 4294901760, %v338_v53  ;;  %v7758_v8 = vsub.f32 %v331_v36, %v379_v52  ;;  %v7760_v9 = vsub.f32 %v334_v41, %v381_v56  ;;  %v346_v36 = vld [vmem:[#allocation5 + $0xe8] sm:$0xff]  ;;  %v7787_v41 = vld [vmem:[#allocation5 + $0xf8] sm:$0xff]  ;;  %v7799_v52 = vld [vmem:[#allocation5 + $0xe0] sm:$0xff] }
  0x7c   : > { %11229 = vst [vmem:[#allocation23_spill] sm:$0xff] %v7752_v5  ;;  %5983 = vmatpush1.bf16.msra.mxu1 %v7738_v50  ;;  %6079 = vmatpush1.bf16.msra.mxu0 %v7738_v50  ;;  %v393_v10 = vand.u32 4294901760, %v340_v58  ;;  %v391_v11 = vand.u32 4294901760, %v337_v59  ;;  %v7764_v14 = vpack.c.bf16 %v385_v57, %v381_v56  ;;  %v395_v15 = vand.u32 4294901760, %v339_v1 }
  0x7d   : > { %5985 = vmatprep.subr.bf16.mxu1 %v7744_v55  ;;  %6081 = vmatprep.subr.bf16.mxu0 %v7744_v55  ;;  %v397_v17 = vand.u32 4294901760, %v342_v2  ;;  %v401_v18 = vand.u32 4294901760, %v344_v3  ;;  %v7766_v19 = vsub.f32 %v336_v42, %v385_v57  ;;  %v7768_v22 = vpack.c.bf16 %v387_v63, %v383_v62 }
  0x7e   : > { %11230 = vst [vmem:[#allocation24_spill] sm:$0xff] %v7764_v14  ;;  %v7770_v23 = vsub.f32 %v333_v47, %v383_v62  ;;  %v7772_v24 = vsub.f32 %v335_v48, %v387_v63  ;;  %v7774_v25 = vpack.c.bf16 %v393_v10, %v389_v7  ;;  %v7776_v26 = vsub.f32 %v338_v53, %v389_v7 }
  0x7f   : > { %11231 = vst [vmem:[#allocation25_spill] sm:$0xff] %v7768_v22  ;;  %v399_v28 = vand.u32 4294901760, %v341_v12  ;;  %v403_v29 = vand.u32 4294901760, %v343_v13  ;;  %v7781_v33 = vsub.f32 %v340_v58, %v393_v10  ;;  %v7783_v34 = vpack.c.bf16 %v395_v15, %v391_v11  ;;  %v302_v58 = vld [vmem:[%s7688_s8 + $0x8] sm:$0xff] }
  0x80   : > { %11232 = vst [vmem:[#allocation26_spill] sm:$0xff] %v7774_v25  ;;  %5987 = vmatpush1.bf16.msra.mxu1 %v7752_v5  ;;  %6083 = vmatpush1.bf16.msra.mxu0 %v7752_v5  ;;  %v7785_v35 = vsub.f32 %v337_v59, %v391_v11  ;;  %v7791_v42 = vsub.f32 %v339_v1, %v395_v15  ;;  %v7801_v53 = vand.u32 4294901760, %v301_v30  ;;  %v624_v56 = vand.u32 4294901760, %v7708_v27 }
  0x81   : > { %11233 = vst [vmem:[#allocation27_spill] sm:$0xff] %v7783_v34  ;;  %5989 = vmatprep.subr.bf16.mxu1 %v7764_v14  ;;  %6085 = vmatprep.subr.bf16.mxu0 %v7764_v14  ;;  %v7793_v47 = vpack.c.bf16 %v401_v18, %v397_v17  ;;  %v7795_v48 = vsub.f32 %v342_v2, %v397_v17  ;;  %v636_v57 = vand.u32 4294901760, %v7712_v31  ;;  %v405_v63 = vand.u32 4294901760, %v346_v36  ;;  %v7811_v2 = vld [vmem:[#allocation5 + $0xf0] sm:$0xff] }
  0x82   : > { %v7797_v51 = vsub.f32 %v344_v3, %v401_v18  ;;  %11235 = vst [vmem:[#allocation29_spill] sm:$0xff] %v7801_v53  ;;  %v7806_v59 = vpack.c.bf16 %v403_v29, %v399_v28  ;;  %v7808_v62 = vsub.f32 %v341_v12, %v399_v28  ;;  %v10782_v1 = vand.u32 4294901760, %v7787_v41  ;;  %v303_v3 = vld [vmem:[%s7688_s8 + $0x10] sm:$0xff] }
  0x83   : > { %11234 = vst [vmem:[#allocation28_spill] sm:$0xff] %v7793_v47  ;;  %v7816_v7 = vsub.f32 %v343_v13, %v403_v29  ;;  %v7819_v10 = vsub.f32 %v301_v30, %v7801_v53  ;;  %v625_v11 = vsub.f32 %v7708_v27, %v624_v56  ;;  %v630_v12 = vand.u32 4294901760, %v7718_v37 }
  0x84   : > { %11236 = vst [vmem:[#allocation30_spill] sm:$0xff] %v7806_v59  ;;  %5991 = vmatpush1.bf16.msra.mxu1 %v7768_v22  ;;  %6087 = vmatpush1.bf16.msra.mxu0 %v7768_v22  ;;  %v637_v17 = vsub.f32 %v7712_v31, %v636_v57  ;;  %v642_v18 = vand.u32 4294901760, %v7720_v38  ;;  %v7828_v28 = vand.u32 4294901760, %v302_v58  ;;  %v7833_v0 = vand.u32 4294901760, %v303_v3 }
  0x85   : > { %11237 = vst [vmem:[#allocation31_spill] sm:$0xff] %v7819_v10  ;;  %5993 = vmatprep.subr.bf16.mxu1 %v7774_v25  ;;  %6089 = vmatprep.subr.bf16.mxu0 %v7774_v25  ;;  %v10787_v29 = vand.u32 4294901760, %v7819_v10  ;;  %v631_v30 = vsub.f32 %v7718_v37, %v630_v12  ;;  %v7837_v22 = vpack.c.bf16 %v10782_v1, %v405_v63  ;;  %v626_v25 = vand.u32 4294901760, %v625_v11 }
  0x86   : > { %11238 = vst [vmem:[#allocation32_spill] sm:$0xff] %v7828_v28  ;;  %11239 = vst [vmem:[#allocation33_spill] sm:$0xff] %v7833_v0  ;;  %v643_v15 = vsub.f32 %v7720_v38, %v642_v18  ;;  %v7841_v14 = vsub.f32 %v302_v58, %v7828_v28  ;;  %v638_v5 = vand.u32 4294901760, %v637_v17  ;;  %v7849_v1 = vsub.f32 %v303_v3, %v7833_v0  ;;  %v304_v0 = vld [vmem:[%s7688_s8 + $0x18] sm:$0xff] }
  0x87   : > { %11240 = vst [vmem:[#allocation34_spill] sm:$0xff] %v7837_v22  ;;  %v449_v13 = vsub.f32 %v7819_v10, %v10787_v29  ;;  %v648_v11 = vand.u32 4294901760, %v7722_v39  ;;  %v632_v58 = vand.u32 4294901760, %v631_v30  ;;  %v7856_v40 = vsub.f32 %v346_v36, %v405_v63 }
  0x88   : > { %11241 = vst [vmem:[#allocation35_spill] sm:$0xff] %v7841_v14  ;;  %5995 = vmatpush1.bf16.msra.mxu1 %v7783_v34  ;;  %6091 = vmatpush1.bf16.msra.mxu0 %v7783_v34  ;;  %11242 = vst [vmem:[#allocation36_spill] sm:$0xff] %v7849_v1  ;;  %v644_v55 = vand.u32 4294901760, %v643_v15  ;;  %v660_v34 = vand.u32 4294901760, %v7726_v43  ;;  %v654_v3 = vand.u32 4294901760, %v7728_v44  ;;  %v11243_v28 = vand.u32 4294901760, %v7799_v52 }
  0x89   : > { %5997 = vmatprep.subr.bf16.mxu1 %v7793_v47  ;;  %6093 = vmatprep.subr.bf16.mxu0 %v7793_v47  ;;  %v649_v17 = vsub.f32 %v7722_v39, %v648_v11  ;;  %v11244_v47 = vand.u32 4294901760, %v7811_v2  ;;  %v6100_v15 = vpack.c.bf16 %v636_v57, %v624_v56  ;;  %v6102_v50 = vpack.c.bf16 %v642_v18, %v630_v12 }
  0x8a   : > { %v661_v21 = vsub.f32 %v7726_v43, %v660_v34  ;;  %v450_v36 = vand.u32 4294901760, %v449_v13  ;;  %v6004_v63 = vpack.c.bf16 %v638_v5, %v626_v25  ;;  %v655_v29 = vsub.f32 %v7728_v44, %v654_v3  ;;  %v307_v44 = vld [vmem:[%s7688_s8 + $0x30] sm:$0xff] }
  0x8b   : > { %v7867_v30 = vpack.c.bf16 %v11244_v47, %v11243_v28  ;;  %v666_v20 = vand.u32 4294901760, %v7730_v45  ;;  %v6006_v47 = vpack.c.bf16 %v644_v55, %v632_v58  ;;  %v11246_v56 = vand.u32 4294901760, %v7841_v14 }
  0x8c   : > { %5999 = vmatpush1.bf16.msra.mxu1 %v7806_v59  ;;  %6095 = vmatpush1.bf16.msra.mxu0 %v7806_v59  ;;  %v7879_v12 = vand.u32 4294901760, %v304_v0  ;;  %v7881_v18 = vand.u32 4294901760, %v305_v32  ;;  %v11249_v5 = vand.u32 4294901760, %v7849_v1  ;;  %v650_v28 = vand.u32 4294901760, %v649_v17 }
  0x8d   : > { %11245 = vst [vmem:[#allocation37_spill] sm:$0xff] %v7867_v30  ;;  %6001 = vmatprep.subr.bf16.mxu1 %v7837_v22  ;;  %6097 = vmatprep.subr.bf16.mxu0 %v7837_v22  ;;  %v460_v57 = vsub.f32 %v7841_v14, %v11246_v56  ;;  %v662_v13 = vand.u32 4294901760, %v661_v21  ;;  %v667_v59 = vsub.f32 %v7730_v45, %v666_v20  ;;  %v656_v53 = vand.u32 4294901760, %v655_v29  ;;  %v306_v22 = vld [vmem:[%s7688_s8 + $0x28] sm:$0xff] }
  0x8e   : > { %11247 = vst [vmem:[#allocation38_spill] sm:$0xff] %v7879_v12  ;;  %11248 = vst [vmem:[#allocation39_spill] sm:$0xff] %v7881_v18  ;;  %v7886_v25 = vsub.f32 %v7849_v1, %v11249_v5  ;;  %v7890_v55 = vsub.f32 %v304_v0, %v7879_v12  ;;  %v7893_v58 = vsub.f32 %v305_v32, %v7881_v18  ;;  %v672_v56 = vand.u32 4294901760, %v7732_v46 }
  0x8f   : > { %v668_v5 = vand.u32 4294901760, %v667_v59  ;;  %v684_v21 = vand.u32 4294901760, %v7736_v49  ;;  %v678_v17 = vand.u32 4294901760, %v7742_v54  ;;  %v690_v29 = vand.u32 4294901760, %v7746_v60 }
  0x90   : > { %11250 = vst [vmem:[#allocation40_spill] sm:$0xff] %v7890_v55  ;;  %11251 = vst [vmem:[#allocation41_spill] sm:$0xff] %v7893_v58  ;;  %6003 = vmatpush1.bf16.msra.mxu1 %v7867_v30  ;;  %6099 = vmatpush1.bf16.msra.mxu0 %v7867_v30  ;;  %v461_v0 = vand.u32 4294901760, %v460_v57  ;;  %v6104_v32 = vpack.c.bf16 %v660_v34, %v648_v11  ;;  %v673_v12 = vsub.f32 %v7732_v46, %v672_v56 }
  0x91   : > { %6005 = vmatprep.subr.bf16.mxu1 %v6004_v63  ;;  %6101 = vmatprep.subr.bf16.mxu0 %v6100_v15  ;;  %v6008_v16 = vpack.c.bf16 %v662_v13, %v650_v28  ;;  %v685_v45 = vsub.f32 %v7736_v49, %v684_v21  ;;  %v679_v30 = vsub.f32 %v7742_v54, %v678_v17  ;;  %v7906_v59 = vand.u32 4294901760, %v306_v22 }
  0x92   : > { %v11252_v43 = vand.u32 4294901760, %v7819_v10  ;;  %v472_v15 = vand.u32 4294901760, %v7886_v25  ;;  %v674_v11 = vand.u32 4294901760, %v673_v12  ;;  %v691_v63 = vsub.f32 %v7746_v60, %v690_v29  ;;  %v8234_v10 = vld [vmem:[#allocation7 + $0x78] sm:$0xff] }
  0x93   : > { %451 = vmatmul.mubr.f32.vlgmr.msra.gmra.mrb[0].mxu1 %v450_v36  ;;  %v6010_v57 = vpack.c.bf16 %v668_v5, %v656_v53  ;;  %v6106_v28 = vpack.c.bf16 %v666_v20, %v654_v3  ;;  %v686_v13 = vand.u32 4294901760, %v685_v45  ;;  %v6108_v18 = vpack.c.bf16 %v684_v21, %v672_v56  ;;  %v308_v3 = vld [vmem:[%s7688_s8 + $0x38] sm:$0xff] }
  0x94   : > { %1316 = vmatmul.mubr.f32.vlgmr.msra.gmra.mrb[0].mxu0 %v11252_v43  ;;  %6007 = vmatpush1.bf16.msra.mxu1 %v6006_v47  ;;  %v11253_v54 = vmov 0.0   ;;  %v11254_v43 = vand.u32 4294901760, %v7890_v55  ;;  %v680_v25 = vand.u32 4294901760, %v679_v30  ;;  %v692_v34 = vand.u32 4294901760, %v691_v63 }
  0x95   : > { %6103 = vmatpush1.bf16.msra.mxu0 %v6102_v50  ;;  %456 = vmatprep.mubr.f32.mxu1 %v11253_v54  ;;  %v7919_v12 = vand.u32 4294901760, %v307_v44  ;;  %v6012_v50 = vpack.c.bf16 %v686_v13, %v674_v11  ;;  %v7922_v53 = vsub.f32 %v306_v22, %v7906_v59  ;;  %v696_v20 = vand.u32 4294901760, %v7748_v61 }
  0x96   : > { %1321 = vmatprep.mubr.f32.mxu0 %v11253_v54  ;;  %v482_v36 = vsub.f32 %v7890_v55, %v11254_v43  ;;  %6009 = vmatprep.subr.bf16.mxu1 %v6008_v16  ;;  %v708_v45 = vand.u32 4294901760, %v7750_v4  ;;  %v11256_v47 = vand.u32 4294901760, %v7841_v14  ;;  %v11257_v30 = vand.u32 4294901760, %v7893_v58 }
  0x97   : > { %6105 = vmatprep.subr.bf16.mxu0 %v6104_v32  ;;  %11255 = vst [vmem:[#allocation42_spill] sm:$0xff] %v7922_v53  ;;  %462 = vmatmul.mubr.f32.gmra.mrb[2].mxu1 %v461_v0  ;;  %v7935_v16 = vsub.f32 %v307_v44, %v7919_v12  ;;  %v702_v22 = vand.u32 4294901760, %v7754_v6  ;;  %v714_v5 = vand.u32 4294901760, %v7758_v8  ;;  %v6110_v21 = vpack.c.bf16 %v690_v29, %v678_v17  ;;  %v309_v29 = vld [vmem:[%s7688_s8 + $0x40] sm:$0xff] }
  0x98   : > { %1325 = vmatmul.mubr.f32.gmra.mrb[2].mxu0 %v11256_v47  ;;  %v7932_v56 = vsub.f32 %v7893_v58, %v11257_v30  ;;  %467 = vmatprep.mubr.f32.mxu1 %v11253_v54  ;;  %v697_v0 = vsub.f32 %v7748_v61, %v696_v20  ;;  %v709_v32 = vsub.f32 %v7750_v4, %v708_v45  ;;  %v7945_v13 = vand.u32 4294901760, %v308_v3 }
  0x99   : > { %11258 = vst [vmem:[#allocation43_spill] sm:$0xff] %v7935_v16  ;;  %1330 = vmatprep.mubr.f32.mxu0 %v11253_v54  ;;  %6011 = vmatpush1.bf16.msra.mxu1 %v6010_v57  ;;  %v6014_v11 = vpack.c.bf16 %v692_v34, %v680_v25  ;;  %v703_v44 = vsub.f32 %v7754_v6, %v702_v22  ;;  %v10815_v43 = vand.u32 4294901760, %v7922_v53  ;;  %v11259_v14 = vand.u32 4294901760, %v7849_v1  ;;  %v314_v1 = vld [vmem:[%s7688_s8 + $0x68] sm:$0xff] }
  0x9a   : > { %6107 = vmatpush1.bf16.msra.mxu0 %v6106_v28  ;;  %v715_v63 = vsub.f32 %v7758_v8, %v714_v5  ;;  %6013 = vmatprep.subr.bf16.mxu1 %v6012_v50  ;;  %v698_v47 = vand.u32 4294901760, %v697_v0  ;;  %v710_v30 = vand.u32 4294901760, %v709_v32  ;;  %v6112_v17 = vpack.c.bf16 %v708_v45, %v696_v20 }
  0x9b   : > { %6109 = vmatprep.subr.bf16.mxu0 %v6108_v18  ;;  %473 = vmatmul.mubr.f32.gmra.mrb[4].mxu1 %v472_v15  ;;  %v483_v57 = vand.u32 4294901760, %v482_v36  ;;  %v10817_v34 = vand.u32 4294901760, %v7935_v16  ;;  %v704_v28 = vand.u32 4294901760, %v703_v44  ;;  %v6114_v50 = vpack.c.bf16 %v714_v5, %v702_v22 }
  0x9c   : > { %1334 = vmatmul.mubr.f32.gmra.mrb[4].mxu0 %v11259_v14  ;;  %v716_v25 = vand.u32 4294901760, %v715_v63  ;;  %478 = vmatprep.mubr.f32.mxu1 %v11253_v54  ;;  %v6016_v18 = vpack.c.bf16 %v710_v30, %v698_v47  ;;  %v720_v0 = vand.u32 4294901760, %v7760_v9  ;;  %v732_v20 = vand.u32 4294901760, %v7766_v19 }
  0x9d   : > { %1339 = vmatprep.mubr.f32.mxu0 %v11253_v54  ;;  %6015 = vmatpush1.bf16.msra.mxu1 %v6014_v11  ;;  %v7957_v14 = vsub.f32 %v308_v3, %v7945_v13  ;;  %v7959_v36 = vand.u32 4294901760, %v309_v29  ;;  %v726_v45 = vand.u32 4294901760, %v7770_v23  ;;  %v504_v32 = vsub.f32 %v7922_v53, %v10815_v43 }
  0x9e   : > { %6111 = vmatpush1.bf16.msra.mxu0 %v6110_v21  ;;  %v6018_v15 = vpack.c.bf16 %v716_v25, %v704_v28  ;;  %6017 = vmatprep.subr.bf16.mxu1 %v6016_v18  ;;  %v721_v22 = vsub.f32 %v7760_v9, %v720_v0  ;;  %v733_v5 = vsub.f32 %v7766_v19, %v732_v20  ;;  %v738_v21 = vand.u32 4294901760, %v7772_v24  ;;  %v311_v18 = vld [vmem:[%s7688_s8 + $0x50] sm:$0xff] }
  0x9f   : > { %11260 = vst [vmem:[#allocation44_spill] sm:$0xff] %v7957_v14  ;;  %6113 = vmatprep.subr.bf16.mxu0 %v6112_v17  ;;  %v11261_v3 = vand.u32 4294901760, %v7787_v41  ;;  %484 = vmatmul.mubr.f32.gmra.mrb[6].mxu1 %v483_v57  ;;  %v11262_v44 = vand.u32 4294901760, %v7890_v55  ;;  %v494_v63 = vand.u32 4294901760, %v7932_v56  ;;  %v6116_v47 = vpack.c.bf16 %v732_v20, %v720_v0  ;;  %v310_v17 = vld [vmem:[%s7688_s8 + $0x48] sm:$0xff] }
  0xa0   : > { %v727_v30 = vsub.f32 %v7770_v23, %v726_v45  ;;  %489 = vmatprep.mubr.f32.mxu1 %v11253_v54  ;;  %v7983_v28 = vsub.f32 %v7935_v16, %v10817_v34  ;;  %v734_v57 = vand.u32 4294901760, %v733_v5  ;;  %v739_v25 = vsub.f32 %v7772_v24, %v738_v21 }
  0xa1   : > { %v7971_v11 = vsub.f32 %v7787_v41, %v11261_v3  ;;  %1343 = vmatmul.mubr.f32.gmra.mrb[6].mxu0 %v11262_v44  ;;  %v722_v41 = vand.u32 4294901760, %v721_v22  ;;  %6019 = vmatpush1.bf16.msra.mxu1 %v6018_v15  ;;  %v10818_v56 = vand.u32 4294901760, %v7957_v14  ;;  %v7989_v0 = vsub.f32 %v309_v29, %v7959_v36 }
  0xa2   : > { %1348 = vmatprep.mubr.f32.mxu0 %v11253_v54  ;;  %6115 = vmatpush1.bf16.msra.mxu0 %v6114_v50  ;;  %v728_v20 = vand.u32 4294901760, %v727_v30  ;;  %v6118_v3 = vpack.c.bf16 %v738_v21, %v726_v45  ;;  %v505_v44 = vand.u32 4294901760, %v504_v32  ;;  %v740_v55 = vand.u32 4294901760, %v739_v25  ;;  %v312_v25 = vld [vmem:[%s7688_s8 + $0x58] sm:$0xff] }
  0xa3   : > { %11263 = vst [vmem:[#allocation45_spill] sm:$0xff] %v7989_v0  ;;  %v6020_v43 = vpack.c.bf16 %v734_v57, %v722_v41  ;;  %6117 = vmatprep.subr.bf16.mxu0 %v6116_v47  ;;  %v7991_v34 = vand.u32 4294901760, %v310_v17  ;;  %495 = vmatmul.mubr.f32.gmra.mrb[8].mxu1 %v494_v63  ;;  %v11264_v22 = vand.u32 4294901760, %v7893_v58  ;;  %v7995_v5 = vand.u32 4294901760, %v311_v18 }
  0xa4   : > { %v744_v50 = vand.u32 4294901760, %v7776_v26  ;;  %v756_v29 = vand.u32 4294901760, %v7781_v33  ;;  %v750_v15 = vand.u32 4294901760, %v7785_v35  ;;  %v11265_v45 = vand.u32 4294901760, %v7799_v52  ;;  %500 = vmatprep.mubr.f32.mxu1 %v11253_v54 }
  0xa5   : > { %1352 = vmatmul.mubr.f32.gmra.mrb[8].mxu0 %v11264_v22  ;;  %v516_v21 = vand.u32 4294901760, %v7983_v28  ;;  %v6022_v63 = vpack.c.bf16 %v740_v55, %v728_v20  ;;  %v762_v47 = vand.u32 4294901760, %v7791_v42  ;;  %v526_v30 = vsub.f32 %v7957_v14, %v10818_v56  ;;  %6021 = vmatprep.subr.bf16.mxu1 %v6020_v43 }
  0xa6   : > { %v8003_v32 = vsub.f32 %v7799_v52, %v11265_v45  ;;  %1357 = vmatprep.mubr.f32.mxu0 %v11253_v54  ;;  %6119 = vmatpush1.bf16.msra.mxu0 %v6118_v3  ;;  %v745_v52 = vsub.f32 %v7776_v26, %v744_v50  ;;  %v757_v57 = vsub.f32 %v7781_v33, %v756_v29  ;;  %v11267_v45 = vand.u32 4294901760, %v7922_v53  ;;  %v313_v53 = vld [vmem:[%s7688_s8 + $0x60] sm:$0xff] }
  0xa7   : > { %6023 = vmatpush1.bf16.msra.mxu1 %v6022_v63  ;;  %v8017_v22 = vsub.f32 %v310_v17, %v7991_v34  ;;  %v6120_v55 = vpack.c.bf16 %v756_v29, %v744_v50  ;;  %v751_v28 = vsub.f32 %v7785_v35, %v750_v15  ;;  %v763_v20 = vsub.f32 %v7791_v42, %v762_v47 }
  0xa8   : > { %506 = vmatmul.mubr.f32.gmra.mrb[10].mxu1 %v505_v44  ;;  %v8024_v43 = vsub.f32 %v311_v18, %v7995_v5  ;;  %v746_v3 = vand.u32 4294901760, %v745_v52  ;;  %v758_v56 = vand.u32 4294901760, %v757_v57  ;;  %v6122_v41 = vpack.c.bf16 %v762_v47, %v750_v15 }
  0xa9   : > { %11266 = vst [vmem:[#allocation46_spill] sm:$0xff] %v8017_v22  ;;  %1361 = vmatmul.mubr.f32.gmra.mrb[10].mxu0 %v11267_v45  ;;  %v11269_v63 = vand.u32 4294901760, %v7811_v2  ;;  %511 = vmatprep.mubr.f32.mxu1 %v11253_v54  ;;  %v752_v44 = vand.u32 4294901760, %v751_v28  ;;  %v764_v50 = vand.u32 4294901760, %v763_v20  ;;  %v8033_v29 = vand.u32 4294901760, %v312_v25 }
  0xaa   : > { %11268 = vst [vmem:[#allocation47_spill] sm:$0xff] %v8024_v43  ;;  %1366 = vmatprep.mubr.f32.mxu0 %v11253_v54  ;;  %v527_v45 = vand.u32 4294901760, %v526_v30  ;;  %v6024_v18 = vpack.c.bf16 %v758_v56, %v746_v3  ;;  %6121 = vmatprep.subr.bf16.mxu0 %v6120_v55  ;;  %v768_v52 = vand.u32 4294901760, %v7795_v48  ;;  %v780_v15 = vand.u32 4294901760, %v7797_v51 }
  0xab   : > { %v8029_v17 = vsub.f32 %v7811_v2, %v11269_v63  ;;  %v11270_v47 = vand.u32 4294901760, %v7989_v0  ;;  %v6026_v63 = vpack.c.bf16 %v764_v50, %v752_v44  ;;  %6123 = vmatpush1.bf16.msra.mxu0 %v6122_v41  ;;  %v774_v28 = vand.u32 4294901760, %v7808_v62 }
  0xac   : > { %517 = vmatmul.mubr.f32.gmra.mrb[12].mxu1 %v516_v21  ;;  %v11271_v30 = vand.u32 4294901760, %v7935_v16  ;;  %v769_v55 = vsub.f32 %v7795_v48, %v768_v52  ;;  %v781_v20 = vsub.f32 %v7797_v51, %v780_v15  ;;  %v786_v3 = vand.u32 4294901760, %v7816_v7  ;;  %6025 = vmatprep.subr.bf16.mxu1 %v6024_v18 }
  0xad   : > { %v537_v2 = vsub.f32 %v7989_v0, %v11270_v47  ;;  %522 = vmatprep.mubr.f32.mxu1 %v11253_v54  ;;  %v8052_v41 = vsub.f32 %v312_v25, %v8033_v29  ;;  %v6124_v21 = vpack.c.bf16 %v780_v15, %v768_v52  ;;  %v775_v44 = vsub.f32 %v7808_v62, %v774_v28 }
  0xae   : > { %1370 = vmatmul.mubr.f32.gmra.mrb[12].mxu0 %v11271_v30  ;;  %v8055_v50 = vand.u32 4294901760, %v313_v53  ;;  %v770_v47 = vand.u32 4294901760, %v769_v55  ;;  %v782_v30 = vand.u32 4294901760, %v781_v20  ;;  %v787_v56 = vsub.f32 %v7816_v7, %v786_v3  ;;  %6027 = vmatpush1.bf16.msra.mxu1 %v6026_v63 }
  0xaf   : > { %1375 = vmatprep.mubr.f32.mxu0 %v11253_v54  ;;  %11272 = vst [vmem:[#allocation48_spill] sm:$0xff] %v8052_v41  ;;  %v538_v57 = vand.u32 4294901760, %v537_v2  ;;  %6125 = vmatprep.subr.bf16.mxu0 %v6124_v21  ;;  %v776_v16 = vand.u32 4294901760, %v775_v44  ;;  %v6126_v58 = vpack.c.bf16 %v786_v3, %v774_v28  ;;  %v11273_v25 = vand.u32 4294901760, %v7957_v14 }
  0xb0   : > { %528 = vmatmul.mubr.f32.gmra.mrb[14].mxu1 %v527_v45  ;;  %v11274_v52 = vand.u32 4294901760, %v8017_v22  ;;  %v11275_v15 = vand.u32 4294901760, %v8024_v43  ;;  %v6028_v20 = vpack.c.bf16 %v782_v30, %v770_v47  ;;  %v788_v2 = vand.u32 4294901760, %v787_v56 }
  0xb1   : > { %533 = vmatprep.mubr.f32.mxu1 %v11253_v54  ;;  %v792_v63 = vand.u32 4294901760, %v7856_v40  ;;  %v804_v28 = vand.u32 4294901760, %v7971_v11  ;;  %v798_v3 = vand.u32 4294901760, %v8003_v32  ;;  %v8076_v21 = vsub.f32 %v313_v53, %v8055_v50  ;;  %6127 = vmatpush1.bf16.msra.mxu0 %v6126_v58 }
  0xb2   : > { %1379 = vmatmul.mubr.f32.gmra.mrb[14].mxu0 %v11273_v25  ;;  %v548_v18 = vsub.f32 %v8017_v22, %v11274_v52  ;;  %v8067_v55 = vsub.f32 %v8024_v43, %v11275_v15  ;;  %6029 = vmatprep.subr.bf16.mxu1 %v6028_v20  ;;  %v6030_v44 = vpack.c.bf16 %v788_v2, %v776_v16  ;;  %v8078_v56 = vand.u32 4294901760, %v314_v1 }
  0xb3   : > { %1384 = vmatprep.mubr.f32.mxu0 %v11253_v54  ;;  %11276 = vst [vmem:[#allocation49_spill] sm:$0xff] %v8076_v21  ;;  %v810_v47 = vand.u32 4294901760, %v8029_v17  ;;  %v793_v30 = vsub.f32 %v7856_v40, %v792_v63  ;;  %v805_v25 = vsub.f32 %v7971_v11, %v804_v28  ;;  %v6128_v52 = vpack.c.bf16 %v804_v28, %v792_v63 }
  0xb4   : > { %539 = vmatmul.mubr.f32.gmra.mrb[16].mxu1 %v538_v57  ;;  %v11277_v15 = vand.u32 4294901760, %v7989_v0  ;;  %v549_v45 = vand.u32 4294901760, %v548_v18  ;;  %v799_v53 = vsub.f32 %v8003_v32, %v798_v3  ;;  %v560_v20 = vand.u32 4294901760, %v8067_v55  ;;  %v315_v57 = vld [vmem:[%s7688_s8 + $0x70] sm:$0xff] }
  0xb5   : > { %v811_v16 = vsub.f32 %v8029_v17, %v810_v47  ;;  %v6130_v58 = vpack.c.bf16 %v810_v47, %v798_v3  ;;  %544 = vmatprep.mubr.f32.mxu1 %v11253_v54  ;;  %v11278_v2 = vand.u32 4294901760, %v8052_v41  ;;  %v794_v28 = vand.u32 4294901760, %v793_v30  ;;  %6031 = vmatpush1.bf16.msra.mxu1 %v6030_v44  ;;  %v11280_v30 = vld [vmem:[#allocation17_spill] sm:$0xff] }
  0xb6   : > { %1388 = vmatmul.mubr.f32.gmra.mrb[16].mxu0 %v11277_v15  ;;  %v806_v0 = vand.u32 4294901760, %v805_v25  ;;  %v580_v18 = vand.u32 4294901760, %v8076_v21  ;;  %v8096_v15 = vsub.f32 %v314_v1, %v8078_v56  ;;  %6129 = vmatprep.subr.bf16.mxu0 %v6128_v52  ;;  %v800_v3 = vand.u32 4294901760, %v799_v53  ;;  %v11282_v53 = vld [vmem:[#allocation18_spill] sm:$0xff] }
  0xb7   : > { %1393 = vmatprep.mubr.f32.mxu0 %v11253_v54  ;;  %v570_v63 = vsub.f32 %v8052_v41, %v11278_v2  ;;  %v812_v47 = vand.u32 4294901760, %v811_v16  ;;  %6131 = vmatpush1.bf16.msra.mxu0 %v6130_v58  ;;  %v6036_v55 = vpack.c.bf16 %v7712_v31, %v7708_v27  ;;  %v11281_v44 = vand.u32 4294901760, %v8017_v22  ;;  %v11283_v16 = vld [vmem:[#allocation19_spill] sm:$0xff]  ;;  %v11284_v31 = vld [vmem:[#allocation21_spill] sm:$0xff] }
  0xb8   : > { %11279 = vst [vmem:[#allocation50_spill] sm:$0xff] %v8096_v15  ;;  %v6032_v14 = vpack.c.bf16 %v806_v0, %v794_v28  ;;  %550 = vmatmul.mubr.f32.gmra.mrb[18].mxu1 %v549_v45  ;;  %v8106_v1 = vand.u32 4294901760, %v315_v57  ;;  %v316_v27 = vld [vmem:[%s7688_s8 + $0x78] sm:$0xff]  ;;  %v8180_v28 = vld [vmem:[#allocation7 + $0x10] sm:$0xff]  ;;  %v11298_v41 = vld [vmem:[#allocation29_spill] sm:$0xff]  ;;  %s7386_s8 = scalar_lea.vmem %s10721_s30, 2048 }
  0xb9   : > { %v6034_v52 = vpack.c.bf16 %v812_v47, %v800_v3  ;;  %555 = vmatprep.mubr.f32.mxu1 %v11253_v54  ;;  %v11285_v47 = vld [vmem:[#allocation12_spill] sm:$0xff]  ;;  %v571_v25 = vand.u32 4294901760, %v570_v63  ;;  %v8139_v0 = vand.u32 4294901760, %v316_v27  ;;  %v8182_v45 = vld [vmem:[#allocation7 + $0x30] sm:$0xff]  ;;  %p7387_p11 = scmp.ne.s32.totalorder %s10721_s30, %s7386_s8  ;;  %p7394_p9 = scmp.lt.s32.totalorder %s7392_s29, %s7386_s8 }
  0xba   : > { %1397 = vmatmul.mubr.f32.gmra.mrb[18].mxu0 %v11281_v44  ;;  %6033 = vmatprep.subr.bf16.mxu1 %v6032_v14  ;;  %v11286_v14 = vand.u32 4294901760, %v8024_v43  ;;  %v591_v44 = vand.u32 4294901760, %v8096_v15  ;;  %v8137_v58 = vsub.f32 %v315_v57, %v8106_v1 }
  0xbb   : > { %1402 = vmatprep.mubr.f32.mxu0 %v11253_v54  ;;  %6133 = vmatprep.subr.bf16.mxu0 %v11285_v47  ;;  %v581_v47 = vsub.f32 %v8076_v21, %v580_v18  ;;  %v8148_v3 = vsub.f32 %v316_v27, %v8139_v0  ;;  %v8204_v21 = vld [vmem:[#allocation7 + $0x40] sm:$0xff]  ;;  %p7388_p1 = pnand %p7387_p11, %p11963_p0  ;;  %p7395_p12 = por %p7394_p9, %p7393_p5 }
  0xbc   : > { %6035 = vmatpush1.bf16.msra.mxu1 %v6034_v52  ;;  %11287 = vst [vmem:[#allocation17_spill] sm:$0xff] %v8137_v58  ;;  %v592_v52 = vsub.f32 %v8096_v15, %v591_v44  ;;  %v8202_v15 = vld [vmem:[#allocation7 + $0x68] sm:$0xff]  ;;  %11297 = vst [vmem:[#allocation53_spill] sm:$0xff] %v8204_v21 }
  0xbd   : > { %561 = vmatmul.mubr.f32.gmra.mrb[20].mxu1 %v560_v20  ;;  %6037 = vmatprep.subr.bf16.mxu1 %v6036_v55  ;;  %v11288_v20 = vmov %v11278_v2  ;;  %v582_v63 = vand.u32 4294901760, %v581_v47  ;;  %11289 = vst [vmem:[#allocation18_spill] sm:$0xff] %v8148_v3  ;;  %v8184_v2 = vld [vmem:[#allocation7 + $0x48] sm:$0xff]  ;;  %11296 = vst [vmem:[#allocation52_spill] sm:$0xff] %v8202_v15  ;;  %p7389_p3 = pneg %p7388_p1 }
  0xbe   : > { %1406 = vmatmul.mubr.f32.gmra.mrb[20].mxu0 %v11286_v14  ;;  %566 = vmatprep.mubr.f32.mxu1 %v11253_v54  ;;  %v602_v14 = vand.u32 4294901760, %v8137_v58  ;;  %v593_v57 = vand.u32 4294901760, %v592_v52  ;;  %11290 = vst [vmem:[#allocation19_spill] sm:$0xff] %v8184_v2 }
  0xbf   : > { %1411 = vmatprep.mubr.f32.mxu0 %v11253_v54  ;;  %p7396_p2 = pnand %p7395_p12, %p7389_p3 }
  0xc0   : > { %v603_v55 = vsub.f32 %v8137_v58, %v602_v14  ;;  %v11302_v58 = vpack.c.bf16 %v7720_v38, %v7718_v37  ;;  %v11308_v37 = vand.u32 4294901760, %v8180_v28 }
  0xc1   : > { %572 = vmatmul.mubr.f32.gmra.mrb[22].mxu1 %v571_v25  ;;  %v613_v25 = vand.u32 4294901760, %v8148_v3 }
  0xc2   : > { %1415 = vmatmul.mubr.f32.gmra.mrb[22].mxu0 %v11288_v20  ;;  %577 = vmatprep.mubr.f32.mxu1 %v11253_v54  ;;  %v604_v47 = vand.u32 4294901760, %v603_v55  ;;  %v8161_v20 = vld [vmem:[#allocation7 + $0x8] sm:$0xff]  ;;  %v8241_v38 = vsub.f32 %v8180_v28, %v11308_v37  ;;  %v11313_v37 = vand.u32 4294901760, %v8184_v2 }
  0xc3   : > { %1420 = vmatprep.mubr.f32.mxu0 %v11253_v54  ;;  %v614_v27 = vsub.f32 %v8148_v3, %v613_v25  ;;  %v10830_v52 = vand.u32 4294901760, %v8161_v20 }
  0xc4   : > { %11309 = vst [vmem:[#allocation57_spill] sm:$0xff] %v8241_v38  ;;  %v8259_v38 = vsub.f32 %v8184_v2, %v11313_v37  ;;  %v8299_v2 = vld [vmem:[#allocation7 + $0x98] sm:$0xff] }
  0xc5   : > { %583 = vmatmul.mubr.f32.gmra.mrb[24].mxu1 %v582_v63  ;;  %v8163_v63 = vld [vmem:[#allocation7 + $0x28] sm:$0xff] }
  0xc6   : > { %1424 = vmatmul.mubr.f32.gmra.mrb[24].mxu0 %v580_v18  ;;  %588 = vmatprep.mubr.f32.mxu1 %v11253_v54  ;;  %v615_v18 = vand.u32 4294901760, %v614_v27  ;;  %v11292_v55 = vand.u32 4294901760, %v8163_v63  ;;  %11314 = vst [vmem:[#allocation58_spill] sm:$0xff] %v8259_v38 }
  0xc7   : > { %1429 = vmatprep.mubr.f32.mxu0 %v11253_v54 }
  0xc8   : > { %v8194_v3 = vsub.f32 %v8163_v63, %v11292_v55 }
  0xc9   : > { %594 = vmatmul.mubr.f32.gmra.mrb[26].mxu1 %v593_v57  ;;  %v8171_v57 = vld [vmem:[#allocation7 + $0x20] sm:$0xff] }
  0xca   : > { %1433 = vmatmul.mubr.f32.gmra.mrb[26].mxu0 %v591_v44  ;;  %599 = vmatprep.mubr.f32.mxu1 %v11253_v54  ;;  %v8165_v44 = vld [vmem:[#allocation7] sm:$0xff]  ;;  %11293 = vst [vmem:[#allocation12_spill] sm:$0xff] %v8194_v3  ;;  %v10842_v3 = vand.u32 4294901760, %v8182_v45 }
  0xcb   : > { %1438 = vmatprep.mubr.f32.mxu0 %v11253_v54  ;;  %v11294_v27 = vand.u32 4294901760, %v8165_v44 }
  0xcd   : > { %605 = vmatmul.mubr.f32.gmra.mrb[28].mxu1 %v604_v47  ;;  %v8174_v47 = vld [vmem:[#allocation7 + $0x18] sm:$0xff] }
  0xce   : > { %1442 = vmatmul.mubr.f32.gmra.mrb[28].mxu0 %v602_v14  ;;  %610 = vmatprep.mubr.f32.mxu1 %v11253_v54  ;;  %v8189_v14 = vsub.f32 %v8161_v20, %v10830_v52  ;;  %v11299_v52 = vand.u32 4294901760, %v8171_v57  ;;  %v11304_v43 = vand.u32 4294901760, %v8174_v47 }
  0xcf   : > { %1447 = vmatprep.mubr.f32.mxu0 %v11253_v54 }
  0xd0   : > { %11291 = vst [vmem:[#allocation21_spill] sm:$0xff] %v8189_v14  ;;  %v8211_v55 = vsub.f32 %v8171_v57, %v11299_v52  ;;  %v8214_v14 = vld [vmem:[#allocation7 + $0x60] sm:$0xff]  ;;  %v8225_v22 = vsub.f32 %v8174_v47, %v11304_v43  ;;  %v11319_v43 = vand.u32 4294901760, %v8204_v21 }
  0xd1   : > { %616 = vmatmul.mubr.f32.gmra.mrb[30].mxu1 %v615_v18  ;;  %v8199_v18 = vsub.f32 %v8165_v44, %v11294_v27  ;;  %11301 = vst [vmem:[#allocation55_spill] sm:$0xff] %v8214_v14  ;;  %v8216_v27 = vld [vmem:[#allocation7 + $0x58] sm:$0xff] }
  0xd2   : > { %1451 = vmatmul.mubr.f32.gmra.mrb[30].mxu0 %v613_v25  ;;  %846 = vmatprep.mubr.f32.mxu1 %v11253_v54  ;;  %v8176_v25 = vld [vmem:[#allocation7 + $0x38] sm:$0xff]  ;;  %11300 = vst [vmem:[#allocation54_spill] sm:$0xff] %v8211_v55  ;;  %v8284_v38 = vsub.f32 %v8204_v21, %v11319_v43  ;;  %v11323_v37 = vand.u32 4294901760, %v8216_v27  ;;  %v11326_v43 = vpack.c.bf16 %v11283_v16, %v11282_v53  ;;  %v11331_v21 = vld [vmem:[#allocation16_spill] sm:$0xff] }
  0xd3   : > { %1617 = vmatprep.mubr.f32.mxu0 %v11253_v54  ;;  %11295 = vst [vmem:[#allocation51_spill] sm:$0xff] %v8199_v18  ;;  %v11303_v18 = vld [vmem:[#allocation13_spill] sm:$0xff]  ;;  %v11306_v52 = vand.u32 4294901760, %v8176_v25 }
  0xd4   : > { %11305 = vst [vmem:[#allocation13_spill] sm:$0xff] %v8225_v22  ;;  %v8263_v22 = vld [vmem:[#allocation7 + $0x70] sm:$0xff]  ;;  %11320 = vst [vmem:[#allocation61_spill] sm:$0xff] %v8284_v38  ;;  %v11327_v38 = vld [vmem:[#allocation15_spill] sm:$0xff] }
  0xd5   : > { %848 = vmatmul.mubr.f32.vlgmr.msra.gmra.mrb[0].mxu1 %v11298_v41  ;;  %v8230_v55 = vsub.f32 %v8176_v25, %v11306_v52  ;;  %v11310_v52 = vpack.c.bf16 %v11280_v30, %v7722_v39  ;;  %v8265_v39 = vld [vmem:[#allocation7 + $0x88] sm:$0xff]  ;;  %v11315_v30 = vld [vmem:[#allocation32_spill] sm:$0xff] }
  0xd6   : > { %1619 = vmatmul.mubr.f32.vlgmr.msra.gmra.mrb[0].mxu0 %v11298_v41  ;;  %6039 = vmatpush1.bf16.msra.mxu1 %v11302_v58  ;;  %v11311_v41 = vld [vmem:[#allocation14_spill] sm:$0xff]  ;;  %v8277_v58 = vld [vmem:[#allocation7 + $0x80] sm:$0xff] }
  0xd7   : > { %6135 = vmatpush1.bf16.msra.mxu0 %v11303_v18  ;;  %11307 = vst [vmem:[#allocation56_spill] sm:$0xff] %v8230_v55  ;;  %853 = vmatprep.mubr.f32.mxu1 %v11253_v54  ;;  %v8245_v18 = vld [vmem:[#allocation7 + $0x50] sm:$0xff]  ;;  %v8254_v55 = vsub.f32 %v8182_v45, %v10842_v3  ;;  %v8275_v3 = vld [vmem:[#allocation7 + $0xa8] sm:$0xff] }
  0xd8   : > { %1624 = vmatprep.mubr.f32.mxu0 %v11253_v54  ;;  %6041 = vmatprep.subr.bf16.mxu1 %v11310_v52  ;;  %11318 = vst [vmem:[#allocation60_spill] sm:$0xff] %v8275_v3  ;;  %v11332_v53 = vand.u32 4294901760, %v8245_v18 }
  0xd9   : > { %6137 = vmatprep.subr.bf16.mxu0 %v11311_v41  ;;  %11312 = vst [vmem:[#allocation14_spill] sm:$0xff] %v8254_v55  ;;  %855 = vmatmul.mubr.f32.gmra.mrb[2].mxu1 %v11315_v30  ;;  %v11316_v41 = vand.u32 4294901760, %v8202_v15  ;;  %v11321_v55 = vand.u32 4294901760, %v8214_v14 }
  0xda   : > { %1626 = vmatmul.mubr.f32.gmra.mrb[2].mxu0 %v11315_v30  ;;  %860 = vmatprep.mubr.f32.mxu1 %v11253_v54  ;;  %v8312_v30 = vld [vmem:[#allocation7 + $0xb8] sm:$0xff]  ;;  %v8321_v16 = vsub.f32 %v8245_v18, %v11332_v53  ;;  %v11341_v53 = vpack.c.bf16 %v7746_v60, %v11284_v31  ;;  %v8377_v31 = vld [vmem:[#allocation7 + $0xe0] sm:$0xff] }
  0xdb   : > { %v8272_v52 = vsub.f32 %v8202_v15, %v11316_v41  ;;  %1631 = vmatprep.mubr.f32.mxu0 %v11253_v54  ;;  %v8289_v41 = vsub.f32 %v8214_v14, %v11321_v55  ;;  %v8297_v15 = vld [vmem:[#allocation7 + $0xa0] sm:$0xff]  ;;  %6043 = vmatpush1.bf16.msra.mxu1 %v11326_v43  ;;  %v11328_v55 = vand.u32 4294901760, %v8234_v10  ;;  %v11330_v14 = vpack.c.bf16 %v7736_v49, %v7732_v46  ;;  %v8341_v43 = vld [vmem:[#allocation7 + $0xb0] sm:$0xff]  ;;  %v8392_v60 = vld [vmem:[#allocation7 + $0xf8] sm:$0xff] }
  0xdc   : > { %11325 = vst [vmem:[#allocation64_spill] sm:$0xff] %v8297_v15  ;;  %6139 = vmatpush1.bf16.msra.mxu0 %v11327_v38  ;;  %11333 = vst [vmem:[#allocation16_spill] sm:$0xff] %v8321_v16  ;;  %v11337_v49 = vand.u32 4294901760, %v8265_v39  ;;  %v8343_v38 = vld [vmem:[#allocation7 + $0xc8] sm:$0xff]  ;;  %v11342_v16 = vld [vmem:[#allocation20_spill] sm:$0xff] }
  0xdd   : > { %11317 = vst [vmem:[#allocation59_spill] sm:$0xff] %v8272_v52  ;;  %11322 = vst [vmem:[#allocation62_spill] sm:$0xff] %v8289_v41  ;;  %v8294_v52 = vsub.f32 %v8216_v27, %v11323_v37  ;;  %v8308_v41 = vsub.f32 %v8234_v10, %v11328_v55  ;;  %v10854_v37 = vand.u32 4294901760, %v8263_v22  ;;  %6045 = vmatprep.subr.bf16.mxu1 %v11330_v14  ;;  %6141 = vmatprep.subr.bf16.mxu0 %v11331_v21  ;;  %v8325_v55 = vld [vmem:[#allocation7 + $0x90] sm:$0xff]  ;;  %v8355_v14 = vld [vmem:[#allocation7 + $0xc0] sm:$0xff] }
  0xde   : > { %11334 = vst [vmem:[#allocation65_spill] sm:$0xff] %v8325_v55  ;;  %v8337_v21 = vsub.f32 %v8265_v39, %v11337_v49  ;;  %v11347_v49 = vand.u32 4294901760, %v8299_v2 }
  0xdf   : > { %11324 = vst [vmem:[#allocation63_spill] sm:$0xff] %v8294_v52  ;;  %11329 = vst [vmem:[#allocation15_spill] sm:$0xff] %v8308_v41  ;;  %v11335_v52 = vld [vmem:[#allocation33_spill] sm:$0xff]  ;;  %v8332_v46 = vsub.f32 %v8263_v22, %v10854_v37  ;;  %v11339_v37 = vand.u32 4294901760, %v8275_v3  ;;  %6047 = vmatpush1.bf16.msra.mxu1 %v11341_v53  ;;  %v11343_v41 = vand.u32 4294901760, %v8277_v58  ;;  %v11350_v53 = vld [vmem:[#allocation22_spill] sm:$0xff] }
  0xe0   : > { %862 = vmatmul.mubr.f32.gmra.mrb[4].mxu1 %v11335_v52  ;;  %1633 = vmatmul.mubr.f32.gmra.mrb[4].mxu0 %v11335_v52  ;;  %11338 = vst [vmem:[#allocation67_spill] sm:$0xff] %v8337_v21  ;;  %v8353_v21 = vld [vmem:[#allocation7 + $0xe8] sm:$0xff] }
  0xe1   : > { %11336 = vst [vmem:[#allocation66_spill] sm:$0xff] %v8332_v46  ;;  %867 = vmatprep.mubr.f32.mxu1 %v11253_v54  ;;  %1638 = vmatprep.mubr.f32.mxu0 %v11253_v54  ;;  %v8350_v46 = vsub.f32 %v8275_v3, %v11339_v37  ;;  %v8364_v52 = vsub.f32 %v8277_v58, %v11343_v41  ;;  %v11345_v37 = vand.u32 4294901760, %v8297_v15 }
  0xe2   : > { %6143 = vmatpush1.bf16.msra.mxu0 %v11342_v16  ;;  %v8374_v3 = vsub.f32 %v8299_v2, %v11347_v49  ;;  %v8379_v16 = vld [vmem:[#allocation7 + $0xd8] sm:$0xff]  ;;  %v11349_v41 = vpack.c.bf16 %v7750_v4, %v7748_v61  ;;  %v10870_v49 = vand.u32 4294901760, %v8341_v43  ;;  %v11354_v61 = vand.u32 4294901760, %v8325_v55 }
  0xe3   : > { %11340 = vst [vmem:[#allocation68_spill] sm:$0xff] %v8350_v46  ;;  %11344 = vst [vmem:[#allocation20_spill] sm:$0xff] %v8364_v52  ;;  %v8369_v46 = vsub.f32 %v8297_v15, %v11345_v37  ;;  %6145 = vmatprep.subr.bf16.mxu0 %v11350_v53  ;;  %v11351_v37 = vand.u32 4294901760, %v8312_v30  ;;  %v11353_v52 = vld [vmem:[#allocation38_spill] sm:$0xff]  ;;  %v11360_v15 = vld [vmem:[#allocation23_spill] sm:$0xff]  ;;  %v11363_v53 = vpack.c.bf16 %v7766_v19, %v7760_v9 }
  0xe4   : > { %11348 = vst [vmem:[#allocation70_spill] sm:$0xff] %v8374_v3  ;;  %6049 = vmatprep.subr.bf16.mxu1 %v11349_v41  ;;  %869 = vmatmul.mubr.f32.gmra.mrb[6].mxu1 %v11353_v52  ;;  %v8399_v4 = vsub.f32 %v8325_v55, %v11354_v61  ;;  %v8410_v3 = vsub.f32 %v8341_v43, %v10870_v49  ;;  %v11361_v49 = vand.u32 4294901760, %v8353_v21  ;;  %v8433_v41 = vld [vmem:[#allocation7 + $0x128] sm:$0xff]  ;;  %v8455_v19 = vld [vmem:[#allocation7 + $0x100] sm:$0xff] }
  0xe5   : > { %11346 = vst [vmem:[#allocation69_spill] sm:$0xff] %v8369_v46  ;;  %v8388_v46 = vsub.f32 %v8312_v30, %v11351_v37  ;;  %1640 = vmatmul.mubr.f32.gmra.mrb[6].mxu0 %v11353_v52  ;;  %v8403_v37 = vld [vmem:[#allocation7 + $0xd0] sm:$0xff]  ;;  %874 = vmatprep.mubr.f32.mxu1 %v11253_v54  ;;  %v8421_v52 = vld [vmem:[#allocation7 + $0x108] sm:$0xff]  ;;  %v11359_v55 = vpack.c.bf16 %v7758_v8, %v7754_v6  ;;  %v11365_v6 = vand.u32 4294901760, %v8355_v14 }
  0xe6   : > { %11355 = vst [vmem:[#allocation71_spill] sm:$0xff] %v8399_v4  ;;  %1645 = vmatprep.mubr.f32.mxu0 %v11253_v54  ;;  %11356 = vst [vmem:[#allocation72_spill] sm:$0xff] %v8410_v3  ;;  %v8419_v4 = vld [vmem:[#allocation7 + $0xf0] sm:$0xff]  ;;  %6147 = vmatpush1.bf16.msra.mxu0 %v11360_v15  ;;  %v8430_v3 = vsub.f32 %v8353_v21, %v11361_v49  ;;  %v11367_v15 = vand.u32 4294901760, %v8377_v31  ;;  %v11369_v49 = vand.u32 4294901760, %v8379_v16  ;;  %v10879_v9 = vand.u32 4294901760, %v8403_v37 }
  0xe7   : > { %11352 = vst [vmem:[#allocation22_spill] sm:$0xff] %v8388_v46  ;;  %v11357_v46 = vand.u32 4294901760, %v8343_v38  ;;  %6051 = vmatpush1.bf16.msra.mxu1 %v11359_v55  ;;  %v8442_v8 = vsub.f32 %v8355_v14, %v11365_v6  ;;  %v11372_v6 = vand.u32 4294901760, %v8392_v60 }
  0xe8   : > { %11362 = vst [vmem:[#allocation23_spill] sm:$0xff] %v8430_v3  ;;  %6053 = vmatprep.subr.bf16.mxu1 %v11363_v53  ;;  %v8447_v55 = vsub.f32 %v8377_v31, %v11367_v15  ;;  %v8457_v53 = vld [vmem:[#allocation7 + $0x120] sm:$0xff]  ;;  %v11375_v3 = vpack.c.bf16 %v7772_v24, %v7770_v23  ;;  %v11379_v23 = vpack.c.bf16 %v7781_v33, %v7776_v26  ;;  %v11380_v24 = vld [vmem:[#allocation26_spill] sm:$0xff] }
  0xe9   : > { %v8415_v61 = vsub.f32 %v8343_v38, %v11357_v46  ;;  %v8452_v46 = vsub.f32 %v8379_v16, %v11369_v49  ;;  %v8464_v15 = vsub.f32 %v8392_v60, %v11372_v6  ;;  %v11376_v6 = vld [vmem:[#allocation25_spill] sm:$0xff]  ;;  %v11385_v33 = vpack.c.bf16 %v7791_v42, %v7785_v35  ;;  %v11389_v35 = vld [vmem:[#allocation30_spill] sm:$0xff] }
  0xea   : > { %11368 = vst [vmem:[#allocation74_spill] sm:$0xff] %v8447_v55  ;;  %v3884_v55 = vand.u32 4294901760, %v8419_v4  ;;  %v6066_v42 = vpack.c.bf16 %v8029_v17, %v8003_v32  ;;  %v11397_v32 = vld [vmem:[#allocation37_spill] sm:$0xff]  ;;  %v11398_v17 = vand.u32 4294901760, %v8165_v44  ;;  %v11410_v44 = vand.u32 4294901760, %v8234_v10 }
  0xeb   : > { %11358 = vst [vmem:[#allocation73_spill] sm:$0xff] %v8415_v61  ;;  %v11364_v61 = vld [vmem:[#allocation24_spill] sm:$0xff]  ;;  %11370 = vst [vmem:[#allocation75_spill] sm:$0xff] %v8452_v46  ;;  %v8473_v46 = vsub.f32 %v8403_v37, %v10879_v9  ;;  %6055 = vmatpush1.bf16.msra.mxu1 %v11375_v3  ;;  %v10880_v9 = vand.u32 4294901760, %v8455_v19  ;;  %v11381_v3 = vand.u32 4294901760, %v8433_v41  ;;  %v11419_v10 = vand.u32 4294901760, %v8245_v18 }
  0xec   : > { %6149 = vmatprep.subr.bf16.mxu0 %v11364_v61  ;;  %11366 = vst [vmem:[#allocation24_spill] sm:$0xff] %v8442_v8  ;;  %v11371_v61 = vld [vmem:[#allocation39_spill] sm:$0xff]  ;;  %11373 = vst [vmem:[#allocation76_spill] sm:$0xff] %v8464_v15  ;;  %v8483_v49 = vsub.f32 %v8419_v4, %v3884_v55  ;;  %v11378_v15 = vand.u32 4294901760, %v8421_v52  ;;  %v10881_v8 = vand.u32 4294901760, %v8457_v53  ;;  %6057 = vmatprep.subr.bf16.mxu1 %v11379_v23  ;;  %v11457_v4 = vand.u32 4294901760, %v8455_v19 }
  0xed   : > { %876 = vmatmul.mubr.f32.gmra.mrb[8].mxu1 %v11371_v61  ;;  %1647 = vmatmul.mubr.f32.gmra.mrb[8].mxu0 %v11371_v61  ;;  %11374 = vst [vmem:[#allocation77_spill] sm:$0xff] %v8473_v46  ;;  %v11386_v23 = vld [vmem:[#allocation27_spill] sm:$0xff] }
  0xee   : > { %881 = vmatprep.mubr.f32.mxu1 %v11253_v54  ;;  %1652 = vmatprep.mubr.f32.mxu0 %v11253_v54  ;;  %11377 = vst [vmem:[#allocation25_spill] sm:$0xff] %v8483_v49  ;;  %v8488_v61 = vsub.f32 %v8421_v52, %v11378_v15  ;;  %v8506_v15 = vsub.f32 %v8455_v19, %v10880_v9  ;;  %v11388_v9 = vld [vmem:[#allocation28_spill] sm:$0xff]  ;;  %v11429_v18 = vld [vmem:[#allocation35_spill] sm:$0xff] }
  0xef   : > { %6151 = vmatpush1.bf16.msra.mxu0 %v11376_v6  ;;  %v8499_v6 = vsub.f32 %v8433_v41, %v11381_v3  ;;  %v8511_v26 = vsub.f32 %v8457_v53, %v10881_v8  ;;  %6059 = vmatpush1.bf16.msra.mxu1 %v11385_v33  ;;  %v11387_v3 = vpack.c.bf16 %v7797_v51, %v7795_v48  ;;  %v11390_v48 = vld [vmem:[#allocation34_spill] sm:$0xff]  ;;  %v11391_v51 = vand.u32 4294901760, %v8161_v20  ;;  %v11404_v33 = vld [vmem:[#allocation19_spill] sm:$0xff] }
  0xf0   : > { %6153 = vmatprep.subr.bf16.mxu0 %v11380_v24  ;;  %11383 = vst [vmem:[#allocation78_spill] sm:$0xff] %v8506_v15  ;;  %v6062_v24 = vpack.c.bf16 %v7816_v7, %v7808_v62  ;;  %v6064_v8 = vpack.c.bf16 %v7971_v11, %v7856_v40  ;;  %v11392_v40 = vand.u32 4294901760, %v8163_v63  ;;  %v11394_v7 = vand.u32 4294901760, %v8174_v47  ;;  %v11463_v19 = vld [vmem:[#allocation43_spill] sm:$0xff] }
  0xf1   : > { %11382 = vst [vmem:[#allocation26_spill] sm:$0xff] %v8499_v6  ;;  %883 = vmatmul.mubr.f32.gmra.mrb[10].mxu1 %v7906_v59  ;;  %1654 = vmatmul.mubr.f32.gmra.mrb[10].mxu0 %v7906_v59  ;;  %11384 = vst [vmem:[#allocation79_spill] sm:$0xff] %v8511_v26  ;;  %v11395_v11 = vand.u32 4294901760, %v8176_v25  ;;  %v11399_v20 = vand.u32 4294901760, %v8171_v57  ;;  %v11401_v47 = vand.u32 4294901760, %v8180_v28  ;;  %v11402_v25 = vand.u32 4294901760, %v8182_v45 }
  0xf2   : > { %888 = vmatprep.mubr.f32.mxu1 %v11253_v54  ;;  %1659 = vmatprep.mubr.f32.mxu0 %v11253_v54  ;;  %v8539_v62 = vpack.c.bf16 %v11392_v40, %v11391_v51  ;;  %v11412_v57 = vld [vmem:[#allocation31_spill] sm:$0xff]  ;;  %v11413_v51 = vld [vmem:[#allocation29_spill] sm:$0xff] }
  0xf3   : > { %6155 = vmatpush1.bf16.msra.mxu0 %v11386_v23  ;;  %6061 = vmatprep.subr.bf16.mxu1 %v11387_v3  ;;  %v8590_v63 = vpack.c.bf16 %v11399_v20, %v11398_v17  ;;  %v11405_v23 = vand.u32 4294901760, %v11404_v33  ;;  %v11414_v45 = vld [vmem:[#allocation53_spill] sm:$0xff]  ;;  %v11416_v40 = vld [vmem:[#allocation55_spill] sm:$0xff]  ;;  %v11422_v17 = vand.u32 4294901760, %v8265_v39  ;;  %v11423_v20 = vld [vmem:[#allocation60_spill] sm:$0xff]  ;;  %v11426_v33 = vand.u32 4294901760, %v8299_v2 }
  0xf4   : > { %6157 = vmatprep.subr.bf16.mxu0 %v11388_v9  ;;  %6063 = vmatpush1.bf16.msra.mxu1 %v6062_v24  ;;  %11393 = vst [vmem:[#allocation27_spill] sm:$0xff] %v8539_v62  ;;  %v8545_v9 = vpack.c.bf16 %v11395_v11, %v11394_v7  ;;  %v11406_v24 = vld [vmem:[#allocation52_spill] sm:$0xff]  ;;  %v11415_v28 = vand.u32 4294901760, %v11414_v45  ;;  %v11420_v11 = vand.u32 4294901760, %v8263_v22  ;;  %v11431_v39 = vand.u32 4294901760, %v8277_v58 }
  0xf5   : > { %890 = vmatmul.mubr.f32.gmra.mrb[12].mxu1 %v7919_v12  ;;  %1661 = vmatmul.mubr.f32.gmra.mrb[12].mxu0 %v7919_v12  ;;  %11400 = vst [vmem:[#allocation30_spill] sm:$0xff] %v8590_v63  ;;  %v11407_v3 = vand.u32 4294901760, %v11406_v24  ;;  %v11430_v22 = vld [vmem:[#allocation32_spill] sm:$0xff]  ;;  %v11439_v45 = vand.u32 4294901760, %v8343_v38  ;;  %v11442_v58 = vand.u32 4294901760, %v8379_v16  ;;  %v11447_v38 = vand.u32 4294901760, %v8355_v14 }
  0xf6   : > { %895 = vmatprep.mubr.f32.mxu1 %v11253_v54  ;;  %1666 = vmatprep.mubr.f32.mxu0 %v11253_v54  ;;  %11396 = vst [vmem:[#allocation28_spill] sm:$0xff] %v8545_v9  ;;  %v11455_v14 = vld [vmem:[#allocation40_spill] sm:$0xff] }
  0xf7   : > { %6159 = vmatpush1.bf16.msra.mxu0 %v11389_v35  ;;  %6065 = vmatprep.subr.bf16.mxu1 %v6064_v8  ;;  %v8596_v8 = vpack.c.bf16 %v11402_v25, %v11401_v47  ;;  %v8602_v35 = vpack.c.bf16 %v11407_v3, %v11405_v23  ;;  %v11424_v47 = vand.u32 4294901760, %v11423_v20  ;;  %v11427_v23 = vand.u32 4294901760, %v8312_v30  ;;  %v11432_v3 = vld [vmem:[#allocation64_spill] sm:$0xff]  ;;  %v11435_v30 = vld [vmem:[#allocation65_spill] sm:$0xff] }
  0xf8   : > { %6161 = vmatprep.subr.bf16.mxu0 %v11390_v48  ;;  %6067 = vmatpush1.bf16.msra.mxu1 %v6066_v42  ;;  %v11409_v42 = vand.u32 4294901760, %v8216_v27  ;;  %v11417_v27 = vand.u32 4294901760, %v11416_v40  ;;  %v11433_v2 = vand.u32 4294901760, %v11432_v3  ;;  %v11452_v20 = vand.u32 4294901760, %v8421_v52  ;;  %v8770_v3 = vld [vmem:[#allocation7 + $0x130] sm:$0xff] }
  0xf9   : > { %897 = vmatmul.mubr.f32.gmra.mrb[14].mxu1 %v7945_v13  ;;  %1668 = vmatmul.mubr.f32.gmra.mrb[14].mxu0 %v7945_v13  ;;  %11403 = vst [vmem:[#allocation34_spill] sm:$0xff] %v8596_v8  ;;  %11408 = vst [vmem:[#allocation37_spill] sm:$0xff] %v8602_v35  ;;  %v8634_v25 = vpack.c.bf16 %v11424_v47, %v11422_v17  ;;  %v8640_v24 = vpack.c.bf16 %v11427_v23, %v11426_v33  ;;  %v11453_v47 = vand.u32 4294901760, %v8433_v41  ;;  %v11460_v41 = vld [vmem:[#allocation41_spill] sm:$0xff]  ;;  %v11462_v23 = vld [vmem:[#allocation42_spill] sm:$0xff] }
  0xfa   : > { %902 = vmatprep.mubr.f32.mxu1 %v11253_v54  ;;  %1673 = vmatprep.mubr.f32.mxu0 %v11253_v54  ;;  %v8608_v48 = vpack.c.bf16 %v11410_v44, %v11409_v42  ;;  %v8620_v7 = vpack.c.bf16 %v11417_v27, %v11415_v28  ;;  %v8652_v42 = vpack.c.bf16 %v11433_v2, %v11431_v39  ;;  %v11436_v44 = vand.u32 4294901760, %v11435_v30  ;;  %v8768_v39 = vld [vmem:[#allocation7 + $0x110] sm:$0xff] }
  0xfb   : > { %6163 = vmatpush1.bf16.msra.mxu0 %v11397_v32  ;;  %6165 = vmatprep.subr.bf16.mxu1 %v8539_v62  ;;  %v8626_v32 = vpack.c.bf16 %v11420_v11, %v11419_v10  ;;  %11425 = vst [vmem:[#allocation29_spill] sm:$0xff] %v8634_v25  ;;  %11428 = vst [vmem:[#allocation53_spill] sm:$0xff] %v8640_v24  ;;  %v11440_v28 = vand.u32 4294901760, %v8353_v21  ;;  %v11443_v27 = vand.u32 4294901760, %v8392_v60  ;;  %v11445_v11 = vld [vmem:[#allocation36_spill] sm:$0xff]  ;;  %v11448_v21 = vand.u32 4294901760, %v8377_v31 }
  0xfc   : > { %6357 = vmatprep.subr.bf16.mxu0 %v8545_v9  ;;  %11411 = vst [vmem:[#allocation19_spill] sm:$0xff] %v8608_v48  ;;  %11418 = vst [vmem:[#allocation52_spill] sm:$0xff] %v8620_v7  ;;  %v11450_v60 = vand.u32 4294901760, %v8403_v37  ;;  %v8698_v33 = vpack.c.bf16 %v11453_v47, %v11452_v20  ;;  %v11456_v31 = vld [vmem:[#allocation38_spill] sm:$0xff]  ;;  %v11458_v52 = vand.u32 4294901760, %v8457_v53  ;;  %v11464_v53 = vld [vmem:[#allocation44_spill] sm:$0xff] }
  0xfd   : > { %904 = vmatmul.mubr.f32.gmra.mrb[16].mxu1 %v7959_v36  ;;  %1675 = vmatmul.mubr.f32.gmra.mrb[16].mxu0 %v7959_v36  ;;  %11421 = vst [vmem:[#allocation31_spill] sm:$0xff] %v8626_v32  ;;  %11434 = vst [vmem:[#allocation55_spill] sm:$0xff] %v8652_v42  ;;  %v8666_v40 = vpack.c.bf16 %v11440_v28, %v11439_v45  ;;  %v8672_v10 = vpack.c.bf16 %v11443_v27, %v11442_v58  ;;  %v10887_v2 = vand.u32 4294901760, %v8768_v39  ;;  %v8788_v45 = vld [vmem:[#allocation7 + $0x168] sm:$0xff]  ;;  %v8790_v28 = vld [vmem:[#allocation7 + $0x158] sm:$0xff] }
  0xfe   : > { %909 = vmatprep.mubr.f32.mxu1 %v11253_v54  ;;  %1680 = vmatprep.mubr.f32.mxu0 %v11253_v54  ;;  %v8684_v16 = vpack.c.bf16 %v11448_v21, %v11447_v38  ;;  %v8690_v17 = vpack.c.bf16 %v3884_v55, %v11450_v60  ;;  %11454 = vst [vmem:[#allocation36_spill] sm:$0xff] %v8698_v33  ;;  %v11461_v55 = vld [vmem:[#allocation39_spill] sm:$0xff]  ;;  %v10884_v27 = vand.u32 4294901760, %v8788_v45  ;;  %v8800_v21 = vld [vmem:[#allocation7 + $0x140] sm:$0xff]  ;;  %v8804_v20 = vld [vmem:[#allocation7 + $0x150] sm:$0xff] }
  0xff   : > { %11441 = vst [vmem:[#allocation35_spill] sm:$0xff] %v8666_v40  ;;  %11444 = vst [vmem:[#allocation32_spill] sm:$0xff] %v8672_v10  ;;  %v8710_v37 = vpack.c.bf16 %v11458_v52, %v11457_v4  ;;  %v8802_v60 = vld [vmem:[#allocation7 + $0x160] sm:$0xff]  ;;  %v2224_v4 = vld [vmem:[#allocation7 + $0x170] sm:$0xff]  ;;  %v3896_v52 = vand.u32 4294901760, %v8804_v20 }
 0x100   : > { %11449 = vst [vmem:[#allocation64_spill] sm:$0xff] %v8684_v16  ;;  %11451 = vst [vmem:[#allocation65_spill] sm:$0xff] %v8690_v17 }
 0x101   : > { %911 = vmatmul.mubr.f32.gmra.mrb[18].mxu1 %v7991_v34  ;;  %1682 = vmatmul.mubr.f32.gmra.mrb[18].mxu0 %v7991_v34 }
 0x102   : > { %916 = vmatprep.mubr.f32.mxu1 %v11253_v54  ;;  %1687 = vmatprep.mubr.f32.mxu0 %v11253_v54 }
 0x105   : > { %918 = vmatmul.mubr.f32.gmra.mrb[20].mxu1 %v7995_v5  ;;  %1689 = vmatmul.mubr.f32.gmra.mrb[20].mxu0 %v7995_v5 }
 0x106   : > { %923 = vmatprep.mubr.f32.mxu1 %v11253_v54  ;;  %1694 = vmatprep.mubr.f32.mxu0 %v11253_v54 }
 0x109   : > { %925 = vmatmul.mubr.f32.gmra.mrb[22].mxu1 %v8033_v29  ;;  %1696 = vmatmul.mubr.f32.gmra.mrb[22].mxu0 %v8033_v29 }
 0x10a   : > { %930 = vmatprep.mubr.f32.mxu1 %v11253_v54  ;;  %1701 = vmatprep.mubr.f32.mxu0 %v11253_v54 }
 0x10d   : > { %932 = vmatmul.mubr.f32.gmra.mrb[24].mxu1 %v8055_v50  ;;  %1703 = vmatmul.mubr.f32.gmra.mrb[24].mxu0 %v8055_v50 }
 0x10e   : > { %937 = vmatprep.mubr.f32.mxu1 %v11253_v54  ;;  %1708 = vmatprep.mubr.f32.mxu0 %v11253_v54 }
 0x111   : > { %939 = vmatmul.mubr.f32.gmra.mrb[26].mxu1 %v8078_v56  ;;  %1710 = vmatmul.mubr.f32.gmra.mrb[26].mxu0 %v8078_v56 }
 0x112   : > { %944 = vmatprep.mubr.f32.mxu1 %v11253_v54  ;;  %1715 = vmatprep.mubr.f32.mxu0 %v11253_v54 }
 0x115   : > { %946 = vmatmul.mubr.f32.gmra.mrb[28].mxu1 %v8106_v1  ;;  %1717 = vmatmul.mubr.f32.gmra.mrb[28].mxu0 %v8106_v1 }
 0x116   : > { %951 = vmatprep.mubr.f32.mxu1 %v11253_v54  ;;  %1722 = vmatprep.mubr.f32.mxu0 %v11253_v54 }
 0x119   : > { %953 = vmatmul.mubr.f32.gmra.mrb[30].mxu1 %v8139_v0  ;;  %1724 = vmatmul.mubr.f32.gmra.mrb[30].mxu0 %v8139_v0 }
 0x11a   : > { %1087 = vmatprep.mubr.f32.mxu1 %v11253_v54  ;;  %1826 = vmatprep.mubr.f32.mxu0 %v11253_v54 }
 0x11d   : > { %1090 = vmatmul.mubr.f32.vlgmr.msra.gmra.mrb[0].mxu1 %v11412_v57  ;;  %1828 = vmatmul.mubr.f32.vlgmr.msra.gmra.mrb[0].mxu0 %v11413_v51  ;;  %v11437_v57 = vand.u32 4294901760, %v8341_v43  ;;  %v11446_v43 = vld [vmem:[#allocation33_spill] sm:$0xff] }
 0x11e   : > { %1095 = vmatprep.mubr.f32.mxu1 %v11253_v54  ;;  %1833 = vmatprep.mubr.f32.mxu0 %v11253_v54  ;;  %11459 = vst [vmem:[#allocation33_spill] sm:$0xff] %v8710_v37 }
 0x11f   : > { %6167 = vmatpush1.bf16.msra.mxu1 %v8590_v63  ;;  %6359 = vmatpush1.bf16.msra.mxu0 %v8596_v8  ;;  %v8658_v51 = vpack.c.bf16 %v11437_v57, %v11436_v44  ;;  %v8786_v57 = vld [vmem:[#allocation7 + $0x148] sm:$0xff]  ;;  %v2240_v63 = vld [vmem:[#allocation7 + $0x1f0] sm:$0xff] }
 0x120   : > { %6169 = vmatprep.subr.bf16.mxu1 %v8602_v35  ;;  %6361 = vmatprep.subr.bf16.mxu0 %v8608_v48  ;;  %v10885_v58 = vand.u32 4294901760, %v8786_v57  ;;  %v11487_v48 = vand.u32 4294901760, %v8768_v39 }
 0x121   : > { %1098 = vmatmul.mubr.f32.gmra.mrb[2].mxu1 %v11429_v18  ;;  %1835 = vmatmul.mubr.f32.gmra.mrb[2].mxu0 %v11430_v22  ;;  %11438 = vst [vmem:[#allocation60_spill] sm:$0xff] %v8658_v51  ;;  %v8764_v18 = vld [vmem:[#allocation7 + $0x138] sm:$0xff] }
 0x122   : > { %1103 = vmatprep.mubr.f32.mxu1 %v11253_v54  ;;  %1840 = vmatprep.mubr.f32.mxu0 %v11253_v54  ;;  %v8810_v47 = vpack.c.bf16 %v10884_v27, %v10885_v58  ;;  %v2228_v27 = vld [vmem:[#allocation7 + $0x190] sm:$0xff]  ;;  %v8861_v35 = vsub.f32 %v8768_v39, %v11487_v48  ;;  %v11494_v48 = vand.u32 4294901760, %v8786_v57 }
 0x123   : > { %6171 = vmatpush1.bf16.msra.mxu1 %v8620_v7  ;;  %6363 = vmatpush1.bf16.msra.mxu0 %v8626_v32  ;;  %v2232_v58 = vld [vmem:[#allocation7 + $0x1b0] sm:$0xff] }
 0x124   : > { %6173 = vmatprep.subr.bf16.mxu1 %v8634_v25  ;;  %6365 = vmatprep.subr.bf16.mxu0 %v8640_v24  ;;  %11475 = vst [vmem:[#allocation41_spill] sm:$0xff] %v8810_v47  ;;  %v8879_v39 = vsub.f32 %v8786_v57, %v11494_v48  ;;  %v8903_v48 = vsub.f32 %v8804_v20, %v3896_v52 }
 0x125   : > { %1106 = vmatmul.mubr.f32.gmra.mrb[4].mxu1 %v11445_v11  ;;  %1842 = vmatmul.mubr.f32.gmra.mrb[4].mxu0 %v11446_v43  ;;  %v8795_v11 = vld [vmem:[#allocation7 + $0x178] sm:$0xff]  ;;  %v10883_v43 = vand.u32 4294901760, %v8790_v28 }
 0x126   : > { %1111 = vmatprep.mubr.f32.mxu1 %v11253_v54  ;;  %1847 = vmatprep.mubr.f32.mxu0 %v11253_v54  ;;  %v10882_v38 = vand.u32 4294901760, %v8795_v11  ;;  %v11498_v9 = vand.u32 4294901760, %v8795_v11 }
 0x127   : > { %6175 = vmatpush1.bf16.msra.mxu1 %v8652_v42  ;;  %6367 = vmatpush1.bf16.msra.mxu0 %v8658_v51 }
 0x128   : > { %6177 = vmatprep.subr.bf16.mxu1 %v8666_v40  ;;  %6369 = vmatprep.subr.bf16.mxu0 %v8672_v10  ;;  %v2234_v10 = vld [vmem:[#allocation7 + $0x1c0] sm:$0xff]  ;;  %v8894_v62 = vsub.f32 %v8795_v11, %v11498_v9  ;;  %v3916_v9 = vand.u32 4294901760, %v2240_v63 }
 0x129   : > { %1114 = vmatmul.mubr.f32.gmra.mrb[6].mxu1 %v11455_v14  ;;  %1849 = vmatmul.mubr.f32.gmra.mrb[6].mxu0 %v11456_v31  ;;  %v2306_v14 = vand.u32 4294901760, %v8800_v21  ;;  %v2310_v31 = vand.u32 4294901760, %v8802_v60  ;;  %v2238_v40 = vld [vmem:[#allocation7 + $0x1e0] sm:$0xff]  ;;  %v2322_v42 = vand.u32 4294901760, %v2234_v10 }
 0x12a   : > { %1119 = vmatprep.mubr.f32.mxu1 %v11253_v54  ;;  %1854 = vmatprep.mubr.f32.mxu0 %v11253_v54  ;;  %v2326_v24 = vand.u32 4294901760, %v2238_v40  ;;  %11499 = vst [vmem:[#allocation83_spill] sm:$0xff] %v8894_v62 }
 0x12b   : > { %6179 = vmatpush1.bf16.msra.mxu1 %v8684_v16  ;;  %6371 = vmatpush1.bf16.msra.mxu0 %v8690_v17  ;;  %v2241_v16 = vld [vmem:[#allocation7 + $0x1f8] sm:$0xff]  ;;  %v8900_v57 = vsub.f32 %v8802_v60, %v2310_v31 }
 0x12c   : > { %6181 = vmatprep.subr.bf16.mxu1 %v8698_v33 }
 0x12d   : > { %1122 = vmatmul.mubr.f32.gmra.mrb[8].mxu1 %v11460_v41  ;;  %1856 = vmatmul.mubr.f32.gmra.mrb[8].mxu0 %v11461_v55  ;;  %v8819_v41 = vpack.c.bf16 %v10882_v38, %v10883_v43  ;;  %v3900_v55 = vand.u32 4294901760, %v2224_v4 }
 0x12e   : > { %1127 = vmatprep.mubr.f32.mxu1 %v11253_v54  ;;  %1861 = vmatprep.mubr.f32.mxu0 %v11253_v54 }
 0x12f   : > { %6183 = vmatpush1.bf16.msra.mxu1 %v8710_v37  ;;  %11476 = vst [vmem:[#allocation39_spill] sm:$0xff] %v8819_v41  ;;  %v2237_v37 = vld [vmem:[#allocation7 + $0x1d8] sm:$0xff] }
 0x130   : > { %6185 = vmatprep.subr.bf16.mxu1 %v8810_v47  ;;  %v3910_v51 = vand.u32 4294901760, %v2237_v37 }
 0x131   : > { %1130 = vmatmul.mubr.f32.gmra.mrb[10].mxu1 %v11462_v23  ;;  %1863 = vmatmul.mubr.f32.gmra.mrb[10].mxu0 %v7906_v59  ;;  %v11465_v59 = vld [vmem:[#allocation45_spill] sm:$0xff] }
 0x132   : > { %1135 = vmatprep.mubr.f32.mxu1 %v11253_v54  ;;  %1868 = vmatprep.mubr.f32.mxu0 %v11253_v54  ;;  %v8821_v23 = vld [vmem:[#allocation7 + $0x188] sm:$0xff] }
 0x135   : > { %1138 = vmatmul.mubr.f32.gmra.mrb[12].mxu1 %v11463_v19  ;;  %1870 = vmatmul.mubr.f32.gmra.mrb[12].mxu0 %v7919_v12  ;;  %v11466_v12 = vld [vmem:[#allocation46_spill] sm:$0xff]  ;;  %v8823_v19 = vld [vmem:[#allocation7 + $0x1a8] sm:$0xff] }
 0x136   : > { %1143 = vmatprep.mubr.f32.mxu1 %v11253_v54  ;;  %1875 = vmatprep.mubr.f32.mxu0 %v11253_v54 }
 0x139   : > { %1146 = vmatmul.mubr.f32.gmra.mrb[14].mxu1 %v11464_v53  ;;  %1877 = vmatmul.mubr.f32.gmra.mrb[14].mxu0 %v7945_v13  ;;  %v11467_v13 = vld [vmem:[#allocation47_spill] sm:$0xff] }
 0x13a   : > { %1151 = vmatprep.mubr.f32.mxu1 %v11253_v54  ;;  %1882 = vmatprep.mubr.f32.mxu0 %v11253_v54  ;;  %v8825_v53 = vld [vmem:[#allocation7 + $0x198] sm:$0xff] }
 0x13d   : > { %1154 = vmatmul.mubr.f32.gmra.mrb[16].mxu1 %v11465_v59  ;;  %1884 = vmatmul.mubr.f32.gmra.mrb[16].mxu0 %v7959_v36  ;;  %v11468_v36 = vld [vmem:[#allocation48_spill] sm:$0xff]  ;;  %v8828_v59 = vpack.c.bf16 %v2310_v31, %v2306_v14 }
 0x13e   : > { %1159 = vmatprep.mubr.f32.mxu1 %v11253_v54  ;;  %1889 = vmatprep.mubr.f32.mxu0 %v11253_v54 }
 0x13f   : > { %11477 = vst [vmem:[#allocation42_spill] sm:$0xff] %v8828_v59  ;;  %6187 = vmatpush1.bf16.msra.mxu1 %v8828_v59 }
 0x141   : > { %1162 = vmatmul.mubr.f32.gmra.mrb[18].mxu1 %v11466_v12  ;;  %1891 = vmatmul.mubr.f32.gmra.mrb[18].mxu0 %v7991_v34  ;;  %v11469_v34 = vld [vmem:[#allocation49_spill] sm:$0xff]  ;;  %v2312_v12 = vand.u32 4294901760, %v8821_v23 }
 0x142   : > { %1167 = vmatprep.mubr.f32.mxu1 %v11253_v54  ;;  %1896 = vmatprep.mubr.f32.mxu0 %v11253_v54 }
 0x145   : > { %1170 = vmatmul.mubr.f32.gmra.mrb[20].mxu1 %v11467_v13  ;;  %1898 = vmatmul.mubr.f32.gmra.mrb[20].mxu0 %v7995_v5  ;;  %v11470_v5 = vld [vmem:[#allocation50_spill] sm:$0xff]  ;;  %v2316_v13 = vand.u32 4294901760, %v8823_v19 }
 0x146   : > { %1175 = vmatprep.mubr.f32.mxu1 %v11253_v54  ;;  %1903 = vmatprep.mubr.f32.mxu0 %v11253_v54  ;;  %11488 = vst [vmem:[#allocation50_spill] sm:$0xff] %v8861_v35 }
 0x147   : > { %v8914_v11 = vsub.f32 %v8823_v19, %v2316_v13  ;;  %v8935_v19 = vsub.f32 %v2237_v37, %v3910_v51 }
 0x149   : > { %1178 = vmatmul.mubr.f32.gmra.mrb[22].mxu1 %v11468_v36  ;;  %1905 = vmatmul.mubr.f32.gmra.mrb[22].mxu0 %v8033_v29  ;;  %v11471_v29 = vld [vmem:[#allocation17_spill] sm:$0xff]  ;;  %v2233_v36 = vld [vmem:[#allocation7 + $0x1b8] sm:$0xff]  ;;  %11502 = vst [vmem:[#allocation86_spill] sm:$0xff] %v8914_v11  ;;  %11511 = vst [vmem:[#allocation95_spill] sm:$0xff] %v8935_v19 }
 0x14a   : > { %1183 = vmatprep.mubr.f32.mxu1 %v11253_v54  ;;  %1910 = vmatprep.mubr.f32.mxu0 %v11253_v54  ;;  %v3906_v38 = vand.u32 4294901760, %v2233_v36 }
 0x14c   : > { %v8919_v60 = vsub.f32 %v2233_v36, %v3906_v38 }
 0x14d   : > { %1186 = vmatmul.mubr.f32.gmra.mrb[24].mxu1 %v11469_v34  ;;  %1912 = vmatmul.mubr.f32.gmra.mrb[24].mxu0 %v8055_v50  ;;  %v11472_v50 = vld [vmem:[#allocation18_spill] sm:$0xff]  ;;  %v2226_v34 = vld [vmem:[#allocation7 + $0x180] sm:$0xff] }
 0x14e   : > { %1191 = vmatprep.mubr.f32.mxu1 %v11253_v54  ;;  %1917 = vmatprep.mubr.f32.mxu0 %v11253_v54  ;;  %v2314_v43 = vand.u32 4294901760, %v2226_v34  ;;  %11504 = vst [vmem:[#allocation88_spill] sm:$0xff] %v8919_v60 }
 0x150   : > { %v8921_v20 = vsub.f32 %v2226_v34, %v2314_v43  ;;  %v11522_v34 = vld [vmem:[#allocation56_spill] sm:$0xff] }
 0x151   : > { %1194 = vmatmul.mubr.f32.gmra.mrb[26].mxu1 %v11470_v5  ;;  %1919 = vmatmul.mubr.f32.gmra.mrb[26].mxu0 %v8078_v56  ;;  %v8762_v56 = vld [vmem:[#allocation7 + $0x118] sm:$0xff]  ;;  %v2230_v5 = vld [vmem:[#allocation7 + $0x1a0] sm:$0xff] }
 0x152   : > { %1199 = vmatprep.mubr.f32.mxu1 %v11253_v54  ;;  %1924 = vmatprep.mubr.f32.mxu0 %v11253_v54  ;;  %v10889_v22 = vand.u32 4294901760, %v8762_v56  ;;  %v11483_v25 = vand.u32 4294901760, %v8762_v56 }
 0x154   : > { %v8851_v32 = vsub.f32 %v8762_v56, %v11483_v25 }
 0x155   : > { %1202 = vmatmul.mubr.f32.gmra.mrb[28].mxu1 %v11471_v29  ;;  %1926 = vmatmul.mubr.f32.gmra.mrb[28].mxu0 %v8106_v1  ;;  %v10888_v1 = vand.u32 4294901760, %v8764_v18  ;;  %v8833_v29 = vpack.c.bf16 %v3900_v55, %v3896_v52 }
 0x156   : > { %1207 = vmatprep.mubr.f32.mxu1 %v11253_v54  ;;  %1931 = vmatprep.mubr.f32.mxu0 %v11253_v54  ;;  %11484 = vst [vmem:[#allocation48_spill] sm:$0xff] %v8851_v32 }
 0x157   : > { %v8778_v30 = vpack.c.bf16 %v10888_v1, %v10889_v22  ;;  %11478 = vst [vmem:[#allocation43_spill] sm:$0xff] %v8833_v29  ;;  %v3904_v1 = vand.u32 4294901760, %v2228_v27  ;;  %v3908_v22 = vand.u32 4294901760, %v2232_v58 }
 0x159   : > { %1210 = vmatmul.mubr.f32.gmra.mrb[30].mxu1 %v11472_v50  ;;  %1933 = vmatmul.mubr.f32.gmra.mrb[30].mxu0 %v8139_v0  ;;  %v10886_v0 = vand.u32 4294901760, %v8770_v3  ;;  %11473 = vst [vmem:[#allocation40_spill] sm:$0xff] %v8778_v30  ;;  %v3902_v50 = vand.u32 4294901760, %v8825_v53  ;;  %v8845_v33 = vpack.c.bf16 %v3908_v22, %v3904_v1  ;;  %v8925_v31 = vsub.f32 %v2228_v27, %v3904_v1 }
 0x15a   : > { %2360 = vmatprep.mubr.f32.mxu1 %v11253_v54  ;;  %3950 = vmatprep.mubr.f32.mxu0 %v11253_v54  ;;  %v8897_v54 = vsub.f32 %v8800_v21, %v2306_v14 }
 0x15b   : > { %v8784_v44 = vpack.c.bf16 %v10886_v0, %v10887_v2  ;;  %6373 = vmatprep.subr.bf16.mxu0 %v8778_v30  ;;  %v8837_v0 = vpack.c.bf16 %v2316_v13, %v2312_v12  ;;  %v2318_v2 = vand.u32 4294901760, %v2230_v5  ;;  %v8840_v47 = vpack.c.bf16 %v3906_v38, %v3902_v50  ;;  %11482 = vst [vmem:[#allocation47_spill] sm:$0xff] %v8845_v33  ;;  %v11521_v13 = vld [vmem:[#allocation13_spill] sm:$0xff] }
 0x15c   : > { %v8917_v21 = vsub.f32 %v8825_v53, %v3902_v50  ;;  %11506 = vst [vmem:[#allocation90_spill] sm:$0xff] %v8925_v31  ;;  %v10949_v36 = vand.u32 4294901760, %v11521_v13 }
 0x15d   : > { %11474 = vst [vmem:[#allocation38_spill] sm:$0xff] %v8784_v44  ;;  %6375 = vmatpush1.bf16.msra.mxu0 %v8784_v44  ;;  %11479 = vst [vmem:[#allocation44_spill] sm:$0xff] %v8837_v0  ;;  %v2239_v44 = vld [vmem:[#allocation7 + $0x1e8] sm:$0xff]  ;;  %6189 = vmatprep.subr.bf16.mxu1 %v8837_v0  ;;  %v8843_v30 = vpack.c.bf16 %v2318_v2, %v2314_v43  ;;  %v11485_v0 = vand.u32 4294901760, %v8764_v18  ;;  %v8923_v14 = vsub.f32 %v2230_v5, %v2318_v2 }
 0x15e   : > { %6377 = vmatprep.subr.bf16.mxu0 %v8819_v41  ;;  %11480 = vst [vmem:[#allocation45_spill] sm:$0xff] %v8840_v47  ;;  %v2235_v41 = vld [vmem:[#allocation7 + $0x1c8] sm:$0xff]  ;;  %v2324_v59 = vand.u32 4294901760, %v2239_v44  ;;  %11503 = vst [vmem:[#allocation87_spill] sm:$0xff] %v8917_v21  ;;  %v8940_v43 = vsub.f32 %v2234_v10, %v2322_v42  ;;  %v8942_v2 = vsub.f32 %v2238_v40, %v2326_v24  ;;  %v10954_v5 = vand.u32 4294901760, %v11522_v34 }
 0x15f   : > { %11481 = vst [vmem:[#allocation46_spill] sm:$0xff] %v8843_v30  ;;  %v2320_v17 = vand.u32 4294901760, %v2235_v41  ;;  %v8856_v7 = vsub.f32 %v8764_v18, %v11485_v0  ;;  %6191 = vmatpush1.bf16.msra.mxu1 %v8843_v30  ;;  %v8874_v18 = vpack.c.bf16 %v2326_v24, %v2322_v42  ;;  %v2236_v0 = vld [vmem:[#allocation7 + $0x1d0] sm:$0xff]  ;;  %11505 = vst [vmem:[#allocation89_spill] sm:$0xff] %v8923_v14 }
 0x160   : > { %11513 = vst [vmem:[#allocation97_spill] sm:$0xff] %v8940_v43  ;;  %11514 = vst [vmem:[#allocation98_spill] sm:$0xff] %v8942_v2 }
 0x161   : > { %6379 = vmatpush1.bf16.msra.mxu0 %v8833_v29  ;;  %v3914_v29 = vand.u32 4294901760, %v2241_v16  ;;  %11486 = vst [vmem:[#allocation49_spill] sm:$0xff] %v8856_v7  ;;  %v8870_v25 = vpack.c.bf16 %v2324_v59, %v2320_v17  ;;  %11493 = vst [vmem:[#allocation81_spill] sm:$0xff] %v8874_v18 }
 0x162   : > { %6381 = vmatprep.subr.bf16.mxu0 %v8840_v47  ;;  %v11489_v47 = vand.u32 4294901760, %v8770_v3 }
 0x163   : > { %11491 = vst [vmem:[#allocation18_spill] sm:$0xff] %v8870_v25  ;;  %v8872_v56 = vpack.c.bf16 %v3914_v29, %v3910_v51  ;;  %6193 = vmatprep.subr.bf16.mxu1 %v8870_v25  ;;  %v8937_v53 = vsub.f32 %v2241_v16, %v3914_v29  ;;  %v11520_v51 = vld [vmem:[#allocation54_spill] sm:$0xff]  ;;  %v11523_v29 = vld [vmem:[#allocation57_spill] sm:$0xff]  ;;  %v11532_v25 = vld [vmem:[#allocation15_spill] sm:$0xff] }
 0x164   : > { %v8866_v8 = vsub.f32 %v8770_v3, %v11489_v47  ;;  %v11495_v3 = vand.u32 4294901760, %v8788_v45  ;;  %6195 = vmatpush1.bf16.msra.mxu1 %v8874_v18  ;;  %v10948_v37 = vand.u32 4294901760, %v11520_v51  ;;  %v10957_v50 = vand.u32 4294901760, %v11523_v29 }
 0x165   : > { %6383 = vmatpush1.bf16.msra.mxu0 %v8845_v33  ;;  %11492 = vst [vmem:[#allocation80_spill] sm:$0xff] %v8872_v56  ;;  %v11496_v33 = vand.u32 4294901760, %v8790_v28  ;;  %11512 = vst [vmem:[#allocation96_spill] sm:$0xff] %v8937_v53 }
 0x166   : > { %11490 = vst [vmem:[#allocation17_spill] sm:$0xff] %v8866_v8  ;;  %v8884_v47 = vsub.f32 %v8788_v45, %v11495_v3  ;;  %v8905_v45 = vsub.f32 %v2224_v4, %v3900_v55  ;;  %6385 = vmatprep.subr.bf16.mxu0 %v8872_v56  ;;  %v8927_v4 = vsub.f32 %v2232_v58, %v3908_v22  ;;  %v11517_v58 = vld [vmem:[#allocation21_spill] sm:$0xff] }
 0x167   : > { %v8889_v30 = vsub.f32 %v8790_v28, %v11496_v33  ;;  %v3912_v33 = vand.u32 4294901760, %v2236_v0  ;;  %v8911_v28 = vsub.f32 %v8821_v23, %v2312_v12  ;;  %v8931_v55 = vsub.f32 %v2235_v41, %v2320_v17  ;;  %v11518_v17 = vld [vmem:[#allocation12_spill] sm:$0xff] }
 0x168   : > { %11500 = vst [vmem:[#allocation84_spill] sm:$0xff] %v8905_v45  ;;  %11507 = vst [vmem:[#allocation91_spill] sm:$0xff] %v8927_v4  ;;  %v8933_v23 = vsub.f32 %v2239_v44, %v2324_v59  ;;  %v8946_v22 = vsub.f32 %v2240_v63, %v3916_v9  ;;  %v10951_v27 = vand.u32 4294901760, %v11517_v58  ;;  %v10950_v38 = vand.u32 4294901760, %v11518_v17  ;;  %v11519_v44 = vld [vmem:[#allocation51_spill] sm:$0xff] }
 0x169   : > { %11497 = vst [vmem:[#allocation82_spill] sm:$0xff] %v8889_v30  ;;  %11501 = vst [vmem:[#allocation85_spill] sm:$0xff] %v8911_v28  ;;  %v8929_v52 = vpack.c.bf16 %v3916_v9, %v3912_v33  ;;  %v8944_v1 = vsub.f32 %v2236_v0, %v3912_v33  ;;  %v10947_v41 = vand.u32 4294901760, %v11519_v44  ;;  %v2558_v42 = vsub.f32 %v11520_v51, %v10948_v37  ;;  %v11524_v0 = vld [vmem:[#allocation14_spill] sm:$0xff] }
 0x16a   : > { %11509 = vst [vmem:[#allocation93_spill] sm:$0xff] %v8931_v55  ;;  %11510 = vst [vmem:[#allocation94_spill] sm:$0xff] %v8933_v23  ;;  %v2540_v16 = vsub.f32 %v11517_v58, %v10951_v27  ;;  %v2552_v24 = vsub.f32 %v11518_v17, %v10950_v38  ;;  %v10958_v3 = vand.u32 4294901760, %v11524_v0  ;;  %v11578_v51 = vld [vmem:[#allocation62_spill] sm:$0xff]  ;;  %v11579_v17 = vld [vmem:[#allocation63_spill] sm:$0xff] }
 0x16b   : > { %11508 = vst [vmem:[#allocation92_spill] sm:$0xff] %v8929_v52  ;;  %6387 = vmatpush1.bf16.msra.mxu0 %v8929_v52  ;;  %11515 = vst [vmem:[#allocation99_spill] sm:$0xff] %v8944_v1  ;;  %v2546_v63 = vsub.f32 %v11519_v44, %v10947_v41  ;;  %v2559_v12 = vand.u32 4294901760, %v2558_v42  ;;  %v4130_v41 = vsub.f32 %v11521_v13, %v10949_v36  ;;  %v11526_v42 = vld [vmem:[#allocation58_spill] sm:$0xff]  ;;  %v11585_v13 = vld [vmem:[#allocation20_spill] sm:$0xff] }
 0x16c   : > { %11516 = vst [vmem:[#allocation100_spill] sm:$0xff] %v8946_v22  ;;  %v2541_v40 = vand.u32 4294901760, %v2540_v16  ;;  %v2553_v10 = vand.u32 4294901760, %v2552_v24  ;;  %v4142_v16 = vsub.f32 %v11522_v34, %v10954_v5  ;;  %v4136_v24 = vsub.f32 %v11523_v29, %v10957_v50  ;;  %v11529_v36 = vld [vmem:[#allocation62_spill] sm:$0xff]  ;;  %v11586_v34 = vld [vmem:[#allocation69_spill] sm:$0xff]  ;;  %v11590_v44 = vld [vmem:[#allocation72_spill] sm:$0xff] }
 0x16d   : > { %v2547_v59 = vand.u32 4294901760, %v2546_v63  ;;  %v4148_v63 = vsub.f32 %v11524_v0, %v10958_v3  ;;  %v10968_v38 = vand.u32 4294901760, %v11529_v36  ;;  %v4131_v27 = vand.u32 4294901760, %v4130_v41 }
 0x16e   : > { %v6196_v33 = vpack.c.bf16 %v2553_v10, %v2541_v40  ;;  %v10963_v40 = vand.u32 4294901760, %v11526_v42  ;;  %v11527_v10 = vld [vmem:[#allocation59_spill] sm:$0xff]  ;;  %v4143_v52 = vand.u32 4294901760, %v4142_v16  ;;  %v4137_v5 = vand.u32 4294901760, %v4136_v24 }
 0x16f   : > { %v8968_v9 = vpack.c.bf16 %v2559_v12, %v2547_v59  ;;  %v10969_v59 = vand.u32 4294901760, %v11527_v10  ;;  %v11528_v12 = vld [vmem:[#allocation61_spill] sm:$0xff]  ;;  %v4149_v18 = vand.u32 4294901760, %v4148_v63  ;;  %v2582_v56 = vsub.f32 %v11529_v36, %v10968_v38  ;;  %v11531_v24 = vld [vmem:[#allocation63_spill] sm:$0xff] }
 0x170   : > { %6197 = vmatprep.subr.bf16.mxu1 %v6196_v33  ;;  %v10967_v37 = vand.u32 4294901760, %v11528_v12  ;;  %v2564_v50 = vsub.f32 %v11526_v42, %v10963_v40  ;;  %v6388_v41 = vpack.c.bf16 %v4143_v52, %v4131_v27  ;;  %v10971_v63 = vand.u32 4294901760, %v11531_v24  ;;  %v11533_v52 = vld [vmem:[#allocation16_spill] sm:$0xff]  ;;  %v11534_v27 = vld [vmem:[#allocation66_spill] sm:$0xff] }
 0x171   : > { %11525 = vst [vmem:[#allocation101_spill] sm:$0xff] %v8968_v9  ;;  %v2576_v33 = vsub.f32 %v11527_v10, %v10969_v59  ;;  %v8998_v16 = vpack.c.bf16 %v4149_v18, %v4137_v5  ;;  %v10972_v9 = vand.u32 4294901760, %v11532_v25  ;;  %v2583_v29 = vand.u32 4294901760, %v2582_v56  ;;  %v11538_v56 = vld [vmem:[#allocation68_spill] sm:$0xff]  ;;  %v11591_v10 = vld [vmem:[#allocation73_spill] sm:$0xff] }
 0x172   : > { %v2570_v3 = vsub.f32 %v11528_v12, %v10967_v37  ;;  %v2565_v40 = vand.u32 4294901760, %v2564_v50  ;;  %6389 = vmatprep.subr.bf16.mxu0 %v6388_v41  ;;  %v4154_v37 = vsub.f32 %v11531_v24, %v10971_v63  ;;  %v10973_v18 = vand.u32 4294901760, %v11533_v52  ;;  %v11537_v50 = vld [vmem:[#allocation67_spill] sm:$0xff] }
 0x173   : > { %11530 = vst [vmem:[#allocation102_spill] sm:$0xff] %v8998_v16  ;;  %v2577_v42 = vand.u32 4294901760, %v2576_v33  ;;  %v4166_v38 = vsub.f32 %v11532_v25, %v10972_v9  ;;  %v10977_v5 = vand.u32 4294901760, %v11534_v27  ;;  %v10979_v33 = vand.u32 4294901760, %v11538_v56 }
 0x174   : > { %v2571_v0 = vand.u32 4294901760, %v2570_v3  ;;  %v10978_v3 = vand.u32 4294901760, %v11537_v50  ;;  %v4155_v41 = vand.u32 4294901760, %v4154_v37  ;;  %v4160_v63 = vsub.f32 %v11533_v52, %v10973_v18  ;;  %v11540_v37 = vld [vmem:[#allocation69_spill] sm:$0xff]  ;;  %v11542_v52 = vld [vmem:[#allocation70_spill] sm:$0xff] }
 0x175   : > { %v9010_v59 = vpack.c.bf16 %v2577_v42, %v2565_v40  ;;  %v4167_v36 = vand.u32 4294901760, %v4166_v38  ;;  %v4172_v9 = vsub.f32 %v11534_v27, %v10977_v5  ;;  %v10986_v38 = vand.u32 4294901760, %v11540_v37  ;;  %v11547_v27 = vld [vmem:[#allocation72_spill] sm:$0xff] }
 0x176   : > { %v9012_v16 = vpack.c.bf16 %v2583_v29, %v2571_v0  ;;  %v2588_v42 = vsub.f32 %v11537_v50, %v10978_v3  ;;  %v2600_v29 = vsub.f32 %v11538_v56, %v10979_v33  ;;  %v11539_v0 = vld [vmem:[#allocation20_spill] sm:$0xff]  ;;  %v10985_v25 = vand.u32 4294901760, %v11542_v52 }
 0x177   : > { %11535 = vst [vmem:[#allocation103_spill] sm:$0xff] %v9010_v59  ;;  %v10983_v40 = vand.u32 4294901760, %v11539_v0  ;;  %v4161_v59 = vand.u32 4294901760, %v4160_v63  ;;  %v4173_v18 = vand.u32 4294901760, %v4172_v9  ;;  %v2606_v33 = vsub.f32 %v11540_v37, %v10986_v38  ;;  %v11544_v63 = vld [vmem:[#allocation22_spill] sm:$0xff] }
 0x178   : > { %11536 = vst [vmem:[#allocation104_spill] sm:$0xff] %v9012_v16  ;;  %v9030_v16 = vpack.c.bf16 %v4167_v36, %v4155_v41  ;;  %v2589_v24 = vand.u32 4294901760, %v2588_v42  ;;  %v2601_v5 = vand.u32 4294901760, %v2600_v29  ;;  %v4178_v36 = vsub.f32 %v11542_v52, %v10985_v25  ;;  %v11545_v41 = vld [vmem:[#allocation71_spill] sm:$0xff]  ;;  %v11548_v25 = vld [vmem:[#allocation73_spill] sm:$0xff] }
 0x179   : > { %v2594_v3 = vsub.f32 %v11539_v0, %v10983_v40  ;;  %v9039_v56 = vpack.c.bf16 %v4173_v18, %v4161_v59  ;;  %v10988_v9 = vand.u32 4294901760, %v11544_v63  ;;  %v2607_v50 = vand.u32 4294901760, %v2606_v33  ;;  %v11551_v33 = vld [vmem:[#allocation24_spill] sm:$0xff] }
 0x17a   : > { %11541 = vst [vmem:[#allocation105_spill] sm:$0xff] %v9030_v16  ;;  %v10990_v16 = vand.u32 4294901760, %v11545_v41  ;;  %v9046_v42 = vpack.c.bf16 %v2601_v5, %v2589_v24  ;;  %v10992_v40 = vand.u32 4294901760, %v11547_v27  ;;  %v4179_v0 = vand.u32 4294901760, %v4178_v36  ;;  %v11550_v5 = vld [vmem:[#allocation23_spill] sm:$0xff] }
 0x17b   : > { %11543 = vst [vmem:[#allocation106_spill] sm:$0xff] %v9039_v56  ;;  %v2595_v29 = vand.u32 4294901760, %v2594_v3  ;;  %v4190_v59 = vsub.f32 %v11544_v63, %v10988_v9  ;;  %v10994_v38 = vand.u32 4294901760, %v11548_v25  ;;  %v10998_v3 = vand.u32 4294901760, %v11550_v5  ;;  %v11552_v63 = vld [vmem:[#allocation74_spill] sm:$0xff] }
 0x17c   : > { %11546 = vst [vmem:[#allocation107_spill] sm:$0xff] %v9046_v42  ;;  %v4184_v18 = vsub.f32 %v11545_v41, %v10990_v16  ;;  %v4196_v24 = vsub.f32 %v11547_v27, %v10992_v40  ;;  %v10999_v36 = vand.u32 4294901760, %v11551_v33  ;;  %v11000_v16 = vand.u32 4294901760, %v11552_v63  ;;  %v11553_v40 = vld [vmem:[#allocation75_spill] sm:$0xff] }
 0x17d   : > { %v9056_v56 = vpack.c.bf16 %v2607_v50, %v2595_v29  ;;  %v4191_v42 = vand.u32 4294901760, %v4190_v59  ;;  %v2612_v9 = vsub.f32 %v11548_v25, %v10994_v38  ;;  %v2624_v50 = vsub.f32 %v11550_v5, %v10998_v3  ;;  %v11555_v38 = vld [vmem:[#allocation76_spill] sm:$0xff] }
 0x17e   : > { %v4185_v52 = vand.u32 4294901760, %v4184_v18  ;;  %v4197_v41 = vand.u32 4294901760, %v4196_v24  ;;  %v2618_v29 = vsub.f32 %v11551_v33, %v10999_v36  ;;  %v2630_v18 = vsub.f32 %v11552_v63, %v11000_v16 }
 0x17f   : > { %11549 = vst [vmem:[#allocation108_spill] sm:$0xff] %v9056_v56  ;;  %v11003_v56 = vand.u32 4294901760, %v11553_v40  ;;  %v9074_v27 = vpack.c.bf16 %v4191_v42, %v4179_v0  ;;  %v2613_v59 = vand.u32 4294901760, %v2612_v9  ;;  %v11001_v25 = vand.u32 4294901760, %v11555_v38 }
 0x180   : > { %v9080_v24 = vpack.c.bf16 %v4197_v41, %v4185_v52  ;;  %v2625_v37 = vand.u32 4294901760, %v2624_v50  ;;  %v2619_v12 = vand.u32 4294901760, %v2618_v29  ;;  %v2631_v36 = vand.u32 4294901760, %v2630_v18 }
 0x181   : > { %11554 = vst [vmem:[#allocation23_spill] sm:$0xff] %v9074_v27  ;;  %v4202_v3 = vsub.f32 %v11553_v40, %v11003_v56  ;;  %v4214_v0 = vsub.f32 %v11555_v38, %v11001_v25  ;;  %v11002_v9 = vand.u32 4294901760, %v8473_v46  ;;  %v11004_v42 = vand.u32 4294901760, %v8483_v49 }
 0x182   : > { %11556 = vst [vmem:[#allocation24_spill] sm:$0xff] %v9080_v24  ;;  %v9090_v16 = vpack.c.bf16 %v2625_v37, %v2613_v59  ;;  %v11005_v52 = vand.u32 4294901760, %v8488_v61  ;;  %v11006_v41 = vand.u32 4294901760, %v8499_v6  ;;  %v9094_v50 = vpack.c.bf16 %v2631_v36, %v2619_v12 }
 0x183   : > { %v4203_v27 = vand.u32 4294901760, %v4202_v3  ;;  %v4215_v29 = vand.u32 4294901760, %v4214_v0  ;;  %v4208_v18 = vsub.f32 %v8473_v46, %v11002_v9  ;;  %v4220_v25 = vsub.f32 %v8483_v49, %v11004_v42 }
 0x184   : > { %11557 = vst [vmem:[#allocation74_spill] sm:$0xff] %v9090_v16  ;;  %11558 = vst [vmem:[#allocation75_spill] sm:$0xff] %v9094_v50  ;;  %v2636_v37 = vsub.f32 %v8488_v61, %v11005_v52  ;;  %v2648_v3 = vsub.f32 %v8499_v6, %v11006_v41  ;;  %v11007_v12 = vand.u32 4294901760, %v8506_v15  ;;  %v11008_v36 = vand.u32 4294901760, %v8511_v26 }
 0x185   : > { %v9110_v59 = vpack.c.bf16 %v4215_v29, %v4203_v27  ;;  %v4209_v0 = vand.u32 4294901760, %v4208_v18  ;;  %v4221_v9 = vand.u32 4294901760, %v4220_v25  ;;  %v11009_v56 = vand.u32 4294901760, %v8851_v32 }
 0x186   : > { %v2637_v50 = vand.u32 4294901760, %v2636_v37  ;;  %v2649_v42 = vand.u32 4294901760, %v2648_v3  ;;  %v2642_v52 = vsub.f32 %v8506_v15, %v11007_v12  ;;  %v2654_v41 = vsub.f32 %v8511_v26, %v11008_v36 }
 0x187   : > { %11559 = vst [vmem:[#allocation109_spill] sm:$0xff] %v9110_v59  ;;  %v9119_v16 = vpack.c.bf16 %v4221_v9, %v4209_v0  ;;  %v4226_v27 = vsub.f32 %v8851_v32, %v11009_v56  ;;  %v11010_v25 = vand.u32 4294901760, %v8856_v7  ;;  %v11011_v29 = vand.u32 4294901760, %v8861_v35 }
 0x188   : > { %v9126_v18 = vpack.c.bf16 %v2649_v42, %v2637_v50  ;;  %v2643_v37 = vand.u32 4294901760, %v2642_v52  ;;  %v2655_v3 = vand.u32 4294901760, %v2654_v41  ;;  %v11012_v12 = vand.u32 4294901760, %v8866_v8 }
 0x189   : > { %11560 = vst [vmem:[#allocation110_spill] sm:$0xff] %v9119_v16  ;;  %v4227_v59 = vand.u32 4294901760, %v4226_v27  ;;  %v4238_v9 = vsub.f32 %v8856_v7, %v11010_v25  ;;  %v4232_v0 = vsub.f32 %v8861_v35, %v11011_v29  ;;  %v11013_v36 = vand.u32 4294901760, %v8879_v39 }
 0x18a   : > { %11561 = vst [vmem:[#allocation111_spill] sm:$0xff] %v9126_v18  ;;  %v9136_v56 = vpack.c.bf16 %v2655_v3, %v2643_v37  ;;  %v4244_v42 = vsub.f32 %v8866_v8, %v11012_v12  ;;  %v11014_v52 = vand.u32 4294901760, %v8884_v47  ;;  %v11015_v41 = vand.u32 4294901760, %v8889_v30 }
 0x18b   : > { %v4239_v50 = vand.u32 4294901760, %v4238_v9  ;;  %v4233_v27 = vand.u32 4294901760, %v4232_v0  ;;  %v2660_v25 = vsub.f32 %v8879_v39, %v11013_v36  ;;  %v11016_v29 = vand.u32 4294901760, %v8894_v62 }
 0x18c   : > { %11562 = vst [vmem:[#allocation112_spill] sm:$0xff] %v9136_v56  ;;  %v4245_v18 = vand.u32 4294901760, %v4244_v42  ;;  %v2672_v37 = vsub.f32 %v8884_v47, %v11014_v52  ;;  %v4250_v3 = vsub.f32 %v8889_v30, %v11015_v41  ;;  %v11019_v12 = vand.u32 4294901760, %v8897_v54 }
 0x18d   : > { %v9154_v56 = vpack.c.bf16 %v4239_v50, %v4227_v59  ;;  %v2661_v9 = vand.u32 4294901760, %v2660_v25  ;;  %v4262_v0 = vsub.f32 %v8894_v62, %v11016_v29  ;;  %v11017_v36 = vand.u32 4294901760, %v8900_v57 }
 0x18e   : > { %v9160_v42 = vpack.c.bf16 %v4245_v18, %v4233_v27  ;;  %v2673_v16 = vand.u32 4294901760, %v2672_v37  ;;  %v4251_v24 = vand.u32 4294901760, %v4250_v3  ;;  %v2666_v52 = vsub.f32 %v8897_v54, %v11019_v12 }
 0x18f   : > { %11563 = vst [vmem:[#allocation113_spill] sm:$0xff] %v9154_v56  ;;  %v4263_v41 = vand.u32 4294901760, %v4262_v0  ;;  %v2678_v59 = vsub.f32 %v8900_v57, %v11017_v36  ;;  %v11018_v25 = vand.u32 4294901760, %v8903_v48  ;;  %v11020_v50 = vand.u32 4294901760, %v8905_v45 }
 0x190   : > { %11564 = vst [vmem:[#allocation114_spill] sm:$0xff] %v9160_v42  ;;  %v9170_v29 = vpack.c.bf16 %v2673_v16, %v2661_v9  ;;  %v2667_v56 = vand.u32 4294901760, %v2666_v52  ;;  %v11021_v18 = vand.u32 4294901760, %v8911_v28  ;;  %v11022_v27 = vand.u32 4294901760, %v8914_v11 }
 0x191   : > { %v9174_v37 = vpack.c.bf16 %v4263_v41, %v4251_v24  ;;  %v2679_v3 = vand.u32 4294901760, %v2678_v59  ;;  %v4256_v0 = vsub.f32 %v8903_v48, %v11018_v25  ;;  %v4268_v36 = vsub.f32 %v8905_v45, %v11020_v50 }
 0x192   : > { %11565 = vst [vmem:[#allocation115_spill] sm:$0xff] %v9170_v29  ;;  %v2684_v16 = vsub.f32 %v8911_v28, %v11021_v18  ;;  %v2696_v52 = vsub.f32 %v8914_v11, %v11022_v27  ;;  %v11023_v24 = vand.u32 4294901760, %v8917_v21  ;;  %v11025_v41 = vand.u32 4294901760, %v8919_v60 }
 0x193   : > { %11566 = vst [vmem:[#allocation116_spill] sm:$0xff] %v9174_v37  ;;  %v9190_v9 = vpack.c.bf16 %v2679_v3, %v2667_v56  ;;  %v4257_v59 = vand.u32 4294901760, %v4256_v0  ;;  %v4269_v25 = vand.u32 4294901760, %v4268_v36  ;;  %v11024_v12 = vand.u32 4294901760, %v8921_v20 }
 0x194   : > { %v2685_v37 = vand.u32 4294901760, %v2684_v16  ;;  %v2697_v50 = vand.u32 4294901760, %v2696_v52  ;;  %v4274_v18 = vsub.f32 %v8917_v21, %v11023_v24  ;;  %v4286_v27 = vsub.f32 %v8919_v60, %v11025_v41 }
 0x195   : > { %11567 = vst [vmem:[#allocation117_spill] sm:$0xff] %v9190_v9  ;;  %v9199_v42 = vpack.c.bf16 %v4269_v25, %v4257_v59  ;;  %v2690_v56 = vsub.f32 %v8921_v20, %v11024_v12  ;;  %v11026_v36 = vand.u32 4294901760, %v8923_v14  ;;  %v11027_v3 = vand.u32 4294901760, %v8925_v31 }
 0x196   : > { %v9206_v0 = vpack.c.bf16 %v2697_v50, %v2685_v37  ;;  %v4275_v16 = vand.u32 4294901760, %v4274_v18  ;;  %v4287_v52 = vand.u32 4294901760, %v4286_v27  ;;  %v11028_v24 = vand.u32 4294901760, %v8927_v4 }
 0x197   : > { %11568 = vst [vmem:[#allocation118_spill] sm:$0xff] %v9199_v42  ;;  %v2691_v9 = vand.u32 4294901760, %v2690_v56  ;;  %v2702_v25 = vsub.f32 %v8923_v14, %v11026_v36  ;;  %v4280_v59 = vsub.f32 %v8925_v31, %v11027_v3  ;;  %v11029_v12 = vand.u32 4294901760, %v8931_v55 }
 0x198   : > { %11569 = vst [vmem:[#allocation119_spill] sm:$0xff] %v9206_v0  ;;  %v9216_v41 = vpack.c.bf16 %v4287_v52, %v4275_v16  ;;  %v4292_v50 = vsub.f32 %v8927_v4, %v11028_v24  ;;  %v11030_v18 = vand.u32 4294901760, %v8933_v23  ;;  %v11031_v27 = vand.u32 4294901760, %v8935_v19 }
 0x199   : > { %v2703_v37 = vand.u32 4294901760, %v2702_v25  ;;  %v4281_v56 = vand.u32 4294901760, %v4280_v59  ;;  %v2708_v36 = vsub.f32 %v8931_v55, %v11029_v12  ;;  %v11032_v3 = vand.u32 4294901760, %v8937_v53 }
 0x19a   : > { %11570 = vst [vmem:[#allocation120_spill] sm:$0xff] %v9216_v41  ;;  %v4293_v0 = vand.u32 4294901760, %v4292_v50  ;;  %v2720_v16 = vsub.f32 %v8933_v23, %v11030_v18  ;;  %v4298_v52 = vsub.f32 %v8935_v19, %v11031_v27  ;;  %v11034_v24 = vand.u32 4294901760, %v8940_v43 }
 0x19b   : > { %v9234_v41 = vpack.c.bf16 %v2703_v37, %v2691_v9  ;;  %v2709_v25 = vand.u32 4294901760, %v2708_v36  ;;  %v4310_v59 = vsub.f32 %v8937_v53, %v11032_v3  ;;  %v11033_v12 = vand.u32 4294901760, %v8942_v2 }
 0x19c   : > { %v9240_v50 = vpack.c.bf16 %v4293_v0, %v4281_v56  ;;  %v2721_v42 = vand.u32 4294901760, %v2720_v16  ;;  %v4299_v29 = vand.u32 4294901760, %v4298_v52  ;;  %v2714_v18 = vsub.f32 %v8940_v43, %v11034_v24  ;;  %v9312_v0 = vld [vmem:[%s10768_s2] ss:$0 sm:$0xff] }
 0x19d   : > { %11571 = vst [vmem:[#allocation121_spill] sm:$0xff] %v9234_v41  ;;  %v4311_v27 = vand.u32 4294901760, %v4310_v59  ;;  %v2726_v9 = vsub.f32 %v8942_v2, %v11033_v12  ;;  %v11036_v36 = vand.u32 4294901760, %v8944_v1  ;;  %v11040_v37 = vand.u32 4294901760, %v8946_v22 }
 0x19e   : > { %v9250_v3 = vpack.c.bf16 %v2721_v42, %v2709_v25  ;;  %v2715_v41 = vand.u32 4294901760, %v2714_v18  ;;  %v11582_v42 = vld [vmem:[#allocation66_spill] sm:$0xff] }
 0x19f   : > { %v9256_v16 = vpack.c.bf16 %v4311_v27, %v4299_v29  ;;  %v2727_v52 = vand.u32 4294901760, %v2726_v9  ;;  %v4304_v59 = vsub.f32 %v8944_v1, %v11036_v36  ;;  %v4316_v12 = vsub.f32 %v8946_v22, %v11040_v37  ;;  %v11577_v36 = vld [vmem:[#allocation61_spill] sm:$0xff]  ;;  %v11580_v37 = vld [vmem:[#allocation15_spill] sm:$0xff] }
 0x1a0   : > { %11572 = vst [vmem:[#allocation122_spill] sm:$0xff] %v9250_v3  ;;  %v11581_v3 = vld [vmem:[#allocation16_spill] sm:$0xff]  ;;  %v11604_v1 = vmov 0.0  }
 0x1a1   : > { %11573 = vst [vmem:[#allocation123_spill] sm:$0xff] %v9256_v16  ;;  %v9266_v18 = vpack.c.bf16 %v2727_v52, %v2715_v41  ;;  %v4305_v25 = vand.u32 4294901760, %v4304_v59  ;;  %v4317_v24 = vand.u32 4294901760, %v4316_v12  ;;  %v11583_v52 = vld [vmem:[#allocation67_spill] sm:$0xff]  ;;  %v11584_v59 = vld [vmem:[#allocation68_spill] sm:$0xff] }
 0x1a2   : > { %v9305_v16 = vld [vmem:[%s10769_s3] ss:$0 sm:$0xff] }
 0x1a3   : > { %v9270_v27 = vpack.c.bf16 %v4317_v24, %v4305_v25  ;;  %v11587_v24 = vld [vmem:[#allocation70_spill] sm:$0xff] }
 0x1a4   : > { %v11588_v25 = vld [vmem:[#allocation22_spill] sm:$0xff] }
 0x1f0   : > { %v1091_v56 = vpop.f32.mrb[0].mxu1  ;;  %v1829_v58 = vpop.f32.mrb[0].mxu0 }
 0x1f1   : > { %v6548_v12 = vadd.f32 %v1829_v58, %v1091_v56  ;;  %v1093_v46 = vpop.f32.mrb[1].mxu1  ;;  %v1831_v49 = vpop.f32.mrb[1].mxu0 }
 0x1f2   : > { %v6549_v29 = vadd.f32 %v1831_v49, %v1093_v46 }
 0x1f3   : > { %v2146_v9 = vadd.f32 %v6548_v12, %v9305_v16 }
 0x1f4   : > { %v1099_v32 = vpop.f32.mrb[2].mxu1  ;;  %v1836_v41 = vpop.f32.mrb[2].mxu0  ;;  %v9320_v58 = vadd.f32 %v6549_v29, %v9312_v0 }
 0x1f5   : > { %v2162_v49 = vmax.f32 %v2146_v9, 0.0  ;;  %v6550_v12 = vadd.f32 %v1836_v41, %v1099_v32  ;;  %v1101_v35 = vpop.f32.mrb[3].mxu1  ;;  %v1838_v8 = vpop.f32.mrb[3].mxu0 }
 0x1f6   : > { %11592 = vst [vmem:[#allocation61_spill] sm:$0xff] %v9320_v58  ;;  %v6551_v7 = vadd.f32 %v1838_v8, %v1101_v35  ;;  %v1963_v15 = vsel %vm1962_vm0, %v9320_v58, -inf }
 0x1f7   : > { %v9328_v26 = vand.u32 4294901760, %v2162_v49  ;;  %v2147_v30 = vadd.f32 %v6550_v12, %v9305_v16  ;;  %1964 = vmax.xlane.f32.xlu0 %v1963_v15 }
 0x1f8   : > { %v1107_v46 = vpop.f32.mrb[4].mxu1  ;;  %v1843_v9 = vpop.f32.mrb[4].mxu0  ;;  %v9336_v32 = vadd.f32 %v6551_v7, %v9312_v0 }
 0x1f9   : > { %11593 = vst [vmem:[#allocation62_spill] sm:$0xff] %v9328_v26  ;;  %v9343_v41 = vsub.f32 %v2162_v49, %v9328_v26  ;;  %v2163_v15 = vmax.f32 %v2147_v30, 0.0  ;;  %v6552_v12 = vadd.f32 %v1843_v9, %v1107_v46  ;;  %v1109_v29 = vpop.f32.mrb[5].mxu1  ;;  %v1845_v58 = vpop.f32.mrb[5].mxu0 }
 0x1fa   : > { %11594 = vst [vmem:[#allocation63_spill] sm:$0xff] %v9336_v32  ;;  %v6553_v28 = vadd.f32 %v1845_v58, %v1109_v29  ;;  %v1966_v56 = vsel %vm1962_vm0, %v9336_v32, -inf }
 0x1fb   : > { %11595 = vst [vmem:[#allocation15_spill] sm:$0xff] %v9343_v41  ;;  %v9348_v7 = vand.u32 4294901760, %v9343_v41  ;;  %v9350_v21 = vand.u32 4294901760, %v2163_v15  ;;  %v2148_v8 = vadd.f32 %v6552_v12, %v9305_v16  ;;  %1967 = vmax.xlane.f32.xlu0 %v1966_v56 }
 0x1fc   : > { %v1115_v35 = vpop.f32.mrb[6].mxu1  ;;  %v1850_v30 = vpop.f32.mrb[6].mxu0  ;;  %v9356_v46 = vadd.f32 %v6553_v28, %v9312_v0 }
 0x1fd   : > { %11596 = vst [vmem:[#allocation16_spill] sm:$0xff] %v9348_v7  ;;  %11597 = vst [vmem:[#allocation66_spill] sm:$0xff] %v9350_v21  ;;  %v9365_v12 = vsub.f32 %v2163_v15, %v9350_v21  ;;  %v2164_v56 = vmax.f32 %v2148_v8, 0.0  ;;  %v6554_v32 = vadd.f32 %v1850_v30, %v1115_v35  ;;  %v1117_v49 = vpop.f32.mrb[7].mxu1  ;;  %v1852_v55 = vpop.f32.mrb[7].mxu0  ;;  %v2364_v28 = vsub.f32 %v9343_v41, %v9348_v7 }
 0x1fe   : > { %11598 = vst [vmem:[#allocation67_spill] sm:$0xff] %v9356_v46  ;;  %v6555_v23 = vadd.f32 %v1852_v55, %v1117_v49  ;;  %v1969_v58 = vsel %vm1962_vm0, %v9356_v46, -inf }
 0x1ff   : > { %11599 = vst [vmem:[#allocation68_spill] sm:$0xff] %v9365_v12  ;;  %v9371_v19 = vand.u32 4294901760, %v2164_v56  ;;  %v2149_v29 = vadd.f32 %v6554_v32, %v9305_v16  ;;  %1970 = vmax.xlane.f32.xlu1 %v1969_v58  ;;  %v2365_v9 = vand.u32 4294901760, %v2364_v28  ;;  %v9375_v15 = vand.u32 4294901760, %v9365_v12 }
 0x200   : > { %v1123_v8 = vpop.f32.mrb[8].mxu1  ;;  %v1857_v35 = vpop.f32.mrb[8].mxu0  ;;  %v9378_v30 = vadd.f32 %v6555_v23, %v9312_v0 }
 0x201   : > { %11600 = vst [vmem:[#allocation20_spill] sm:$0xff] %v9371_v19  ;;  %11601 = vst [vmem:[#allocation69_spill] sm:$0xff] %v9375_v15  ;;  %v9381_v7 = vsub.f32 %v2164_v56, %v9371_v19  ;;  %v2165_v55 = vmax.f32 %v2149_v29, 0.0  ;;  %v6556_v49 = vadd.f32 %v1857_v35, %v1123_v8  ;;  %v1125_v46 = vpop.f32.mrb[9].mxu1  ;;  %v1859_v41 = vpop.f32.mrb[9].mxu0  ;;  %2366 = vmatmul.mubr.f32.vlgmr.msra.gmra.mrb[32].mxu1 %v2365_v9  ;;  %3956 = vmatmul.mubr.f32.vlgmr.msra.gmra.mrb[32].mxu0 %v2365_v9  ;;  %v11607_v9 = vld [vmem:[#allocation101_spill] sm:$0xff] }
 0x202   : > { %11602 = vst [vmem:[#allocation70_spill] sm:$0xff] %v9378_v30  ;;  %v2375_v32 = vsub.f32 %v9365_v12, %v9375_v15  ;;  %v6557_v58 = vadd.f32 %v1859_v41, %v1125_v46  ;;  %v1972_v28 = vsel %vm1962_vm0, %v9378_v30, -inf  ;;  %2371 = vmatprep.mubr.f32.mxu1 %v11604_v1  ;;  %3961 = vmatprep.mubr.f32.mxu0 %v11604_v1  ;;  %v11609_v15 = vld [vmem:[#allocation102_spill] sm:$0xff]  ;;  %v11610_v30 = vld [vmem:[#allocation103_spill] sm:$0xff] }
 0x203   : > { %11603 = vst [vmem:[#allocation22_spill] sm:$0xff] %v9381_v7  ;;  %v9389_v23 = vand.u32 4294901760, %v2165_v55  ;;  %v2150_v29 = vadd.f32 %v6556_v49, %v9305_v16  ;;  %1973 = vmax.xlane.f32.xlu1 %v1972_v28  ;;  %v9393_v8 = vand.u32 4294901760, %v9381_v7  ;;  %6199 = vmatpush1.bf16.msra.mxu1 %v11607_v9 }
 0x204   : > { %v2376_v56 = vand.u32 4294901760, %v2375_v32  ;;  %v1131_v35 = vpop.f32.mrb[10].mxu1  ;;  %v1864_v41 = vpop.f32.mrb[10].mxu0  ;;  %v9397_v46 = vadd.f32 %v6557_v58, %v9312_v0  ;;  %6391 = vmatpush1.bf16.msra.mxu0 %v11609_v15  ;;  %6201 = vmatprep.subr.bf16.mxu1 %v11610_v30 }
 0x205   : > { %11605 = vst [vmem:[#allocation72_spill] sm:$0xff] %v9389_v23  ;;  %11606 = vst [vmem:[#allocation73_spill] sm:$0xff] %v9393_v8  ;;  %v9402_v12 = vsub.f32 %v2165_v55, %v9389_v23  ;;  %v2166_v49 = vmax.f32 %v2150_v29, 0.0  ;;  %v6558_v28 = vadd.f32 %v1864_v41, %v1131_v35  ;;  %v1133_v32 = vpop.f32.mrb[11].mxu1  ;;  %v1866_v22 = vpop.f32.mrb[11].mxu0  ;;  %v2386_v9 = vsub.f32 %v9381_v7, %v9393_v8  ;;  %v11617_v8 = vld [vmem:[#allocation107_spill] sm:$0xff] }
 0x206   : > { %11608 = vst [vmem:[#allocation101_spill] sm:$0xff] %v9397_v46  ;;  %2377 = vmatmul.mubr.f32.gmra.mrb[34].mxu1 %v2376_v56  ;;  %3967 = vmatmul.mubr.f32.gmra.mrb[34].mxu0 %v2376_v56  ;;  %v6559_v43 = vadd.f32 %v1866_v22, %v1133_v32  ;;  %v1975_v58 = vsel %vm1962_vm0, %v9397_v46, -inf  ;;  %v11614_v56 = vld [vmem:[#allocation104_spill] sm:$0xff]  ;;  %v11616_v32 = vld [vmem:[#allocation105_spill] sm:$0xff] }
 0x207   : > { %11611 = vst [vmem:[#allocation102_spill] sm:$0xff] %v9402_v12  ;;  %2382 = vmatprep.mubr.f32.mxu1 %v11604_v1  ;;  %3972 = vmatprep.mubr.f32.mxu0 %v11604_v1  ;;  %v9410_v15 = vand.u32 4294901760, %v2166_v49  ;;  %v2151_v30 = vadd.f32 %v6558_v28, %v9305_v16  ;;  %v2387_v55 = vand.u32 4294901760, %v2386_v9  ;;  %v9414_v29 = vand.u32 4294901760, %v9402_v12 }
 0x208   : > { %1976 = vmax.xlane.f32.xlu0 %v1975_v58  ;;  %6203 = vmatpush1.bf16.msra.mxu1 %v11614_v56  ;;  %v1139_v35 = vpop.f32.mrb[12].mxu1  ;;  %v1871_v22 = vpop.f32.mrb[12].mxu0  ;;  %v9418_v41 = vadd.f32 %v6559_v43, %v9312_v0 }
 0x209   : > { %11612 = vst [vmem:[#allocation103_spill] sm:$0xff] %v9410_v15  ;;  %11613 = vst [vmem:[#allocation124_spill] sm:$0xff] %v9414_v29  ;;  %6393 = vmatprep.subr.bf16.mxu0 %v11616_v32  ;;  %6205 = vmatprep.subr.bf16.mxu1 %v11617_v8  ;;  %v9423_v46 = vsub.f32 %v2166_v49, %v9410_v15  ;;  %v2167_v28 = vmax.f32 %v2151_v30, 0.0  ;;  %v6560_v58 = vadd.f32 %v1871_v22, %v1139_v35  ;;  %v1141_v9 = vpop.f32.mrb[13].mxu1  ;;  %v1873_v7 = vpop.f32.mrb[13].mxu0 }
 0x20a   : > { %11615 = vst [vmem:[#allocation104_spill] sm:$0xff] %v9418_v41  ;;  %2388 = vmatmul.mubr.f32.gmra.mrb[36].mxu1 %v2387_v55  ;;  %3978 = vmatmul.mubr.f32.gmra.mrb[36].mxu0 %v2387_v55  ;;  %v2397_v56 = vsub.f32 %v9402_v12, %v9414_v29  ;;  %v6561_v2 = vadd.f32 %v1873_v7, %v1141_v9  ;;  %v1978_v43 = vsel %vm1962_vm0, %v9418_v41, -inf  ;;  %v11621_v55 = vld [vmem:[#allocation106_spill] sm:$0xff]  ;;  %v11623_v9 = vld [vmem:[#allocation108_spill] sm:$0xff]  ;;  %v11624_v29 = vld [vmem:[#allocation23_spill] sm:$0xff] }
 0x20b   : > { %11618 = vst [vmem:[#allocation105_spill] sm:$0xff] %v9423_v46  ;;  %2393 = vmatprep.mubr.f32.mxu1 %v11604_v1  ;;  %3983 = vmatprep.mubr.f32.mxu0 %v11604_v1  ;;  %v9431_v8 = vand.u32 4294901760, %v2167_v28  ;;  %v2152_v49 = vadd.f32 %v6560_v58, %v9305_v16  ;;  %v9435_v35 = vand.u32 4294901760, %v9423_v46 }
 0x20c   : > { %1979 = vmax.xlane.f32.xlu1 %v1978_v43  ;;  %v2398_v30 = vand.u32 4294901760, %v2397_v56  ;;  %6395 = vmatpush1.bf16.msra.mxu0 %v11621_v55  ;;  %v1147_v22 = vpop.f32.mrb[14].mxu1  ;;  %v1878_v7 = vpop.f32.mrb[14].mxu0  ;;  %v9439_v32 = vadd.f32 %v6561_v2, %v9312_v0 }
 0x20d   : > { %11619 = vst [vmem:[#allocation107_spill] sm:$0xff] %v9431_v8  ;;  %11620 = vst [vmem:[#allocation125_spill] sm:$0xff] %v9435_v35  ;;  %6207 = vmatpush1.bf16.msra.mxu1 %v11623_v9  ;;  %6397 = vmatprep.subr.bf16.mxu0 %v11624_v29  ;;  %v9444_v41 = vsub.f32 %v2167_v28, %v9431_v8  ;;  %v2168_v58 = vmax.f32 %v2152_v49, 0.0  ;;  %v6562_v43 = vadd.f32 %v1878_v7, %v1147_v22  ;;  %v1149_v56 = vpop.f32.mrb[15].mxu1  ;;  %v1880_v12 = vpop.f32.mrb[15].mxu0 }
 0x20e   : > { %11622 = vst [vmem:[#allocation106_spill] sm:$0xff] %v9439_v32  ;;  %2399 = vmatmul.mubr.f32.gmra.mrb[38].mxu1 %v2398_v30  ;;  %3989 = vmatmul.mubr.f32.gmra.mrb[38].mxu0 %v2398_v30  ;;  %v2408_v55 = vsub.f32 %v9423_v46, %v9435_v35  ;;  %v6563_v53 = vadd.f32 %v1880_v12, %v1149_v56  ;;  %v1981_v2 = vsel %vm1962_vm0, %v9439_v32, -inf  ;;  %v11628_v30 = vld [vmem:[#allocation24_spill] sm:$0xff]  ;;  %v11630_v56 = vld [vmem:[#allocation74_spill] sm:$0xff]  ;;  %v11631_v35 = vld [vmem:[#allocation109_spill] sm:$0xff] }
 0x20f   : > { %11625 = vst [vmem:[#allocation108_spill] sm:$0xff] %v9444_v41  ;;  %2404 = vmatprep.mubr.f32.mxu1 %v11604_v1  ;;  %3994 = vmatprep.mubr.f32.mxu0 %v11604_v1  ;;  %v9452_v29 = vand.u32 4294901760, %v2168_v58  ;;  %v2153_v28 = vadd.f32 %v6562_v43, %v9305_v16  ;;  %v9456_v22 = vand.u32 4294901760, %v9444_v41 }
 0x210   : > { %1982 = vmax.xlane.f32.xlu0 %v1981_v2  ;;  %v2409_v49 = vand.u32 4294901760, %v2408_v55  ;;  %6399 = vmatpush1.bf16.msra.mxu0 %v11628_v30  ;;  %v1155_v7 = vpop.f32.mrb[16].mxu1  ;;  %v1885_v12 = vpop.f32.mrb[16].mxu0  ;;  %v9460_v9 = vadd.f32 %v6563_v53, %v9312_v0 }
 0x211   : > { %11626 = vst [vmem:[#allocation23_spill] sm:$0xff] %v9452_v29  ;;  %11627 = vst [vmem:[#allocation126_spill] sm:$0xff] %v9456_v22  ;;  %6209 = vmatprep.subr.bf16.mxu1 %v11630_v56  ;;  %6401 = vmatprep.subr.bf16.mxu0 %v11631_v35  ;;  %v9465_v32 = vsub.f32 %v2168_v58, %v9452_v29  ;;  %v2169_v43 = vmax.f32 %v2153_v28, 0.0  ;;  %v6564_v2 = vadd.f32 %v1885_v12, %v1155_v7  ;;  %v1157_v55 = vpop.f32.mrb[17].mxu1  ;;  %v1887_v46 = vpop.f32.mrb[17].mxu0 }
 0x212   : > { %11629 = vst [vmem:[#allocation24_spill] sm:$0xff] %v9460_v9  ;;  %2410 = vmatmul.mubr.f32.gmra.mrb[40].mxu1 %v2409_v49  ;;  %4000 = vmatmul.mubr.f32.gmra.mrb[40].mxu0 %v2409_v49  ;;  %v2419_v30 = vsub.f32 %v9444_v41, %v9456_v22  ;;  %v6565_v31 = vadd.f32 %v1887_v46, %v1157_v55  ;;  %v1984_v53 = vsel %vm1962_vm0, %v9460_v9, -inf  ;;  %v11635_v49 = vld [vmem:[#allocation75_spill] sm:$0xff]  ;;  %v11637_v55 = vld [vmem:[#allocation110_spill] sm:$0xff] }
 0x213   : > { %11632 = vst [vmem:[#allocation74_spill] sm:$0xff] %v9465_v32  ;;  %2415 = vmatprep.mubr.f32.mxu1 %v11604_v1  ;;  %4005 = vmatprep.mubr.f32.mxu0 %v11604_v1  ;;  %v9473_v35 = vand.u32 4294901760, %v2169_v43  ;;  %v2154_v58 = vadd.f32 %v6564_v2, %v9305_v16  ;;  %v9477_v7 = vand.u32 4294901760, %v9465_v32  ;;  %v11638_v22 = vld [vmem:[#allocation111_spill] sm:$0xff] }
 0x214   : > { %1985 = vmax.xlane.f32.xlu1 %v1984_v53  ;;  %v2420_v28 = vand.u32 4294901760, %v2419_v30  ;;  %6211 = vmatpush1.bf16.msra.mxu1 %v11635_v49  ;;  %v1163_v12 = vpop.f32.mrb[18].mxu1  ;;  %v1892_v46 = vpop.f32.mrb[18].mxu0  ;;  %v9481_v56 = vadd.f32 %v6565_v31, %v9312_v0 }
 0x215   : > { %11633 = vst [vmem:[#allocation109_spill] sm:$0xff] %v9473_v35  ;;  %11634 = vst [vmem:[#allocation127_spill] sm:$0xff] %v9477_v7  ;;  %6403 = vmatpush1.bf16.msra.mxu0 %v11637_v55  ;;  %6213 = vmatprep.subr.bf16.mxu1 %v11638_v22  ;;  %v9486_v9 = vsub.f32 %v2169_v43, %v9473_v35  ;;  %v2170_v2 = vmax.f32 %v2154_v58, 0.0  ;;  %v6566_v53 = vadd.f32 %v1892_v46, %v1163_v12  ;;  %v1165_v30 = vpop.f32.mrb[19].mxu1  ;;  %v1894_v41 = vpop.f32.mrb[19].mxu0 }
 0x216   : > { %11636 = vst [vmem:[#allocation75_spill] sm:$0xff] %v9481_v56  ;;  %2421 = vmatmul.mubr.f32.gmra.mrb[42].mxu1 %v2420_v28  ;;  %4011 = vmatmul.mubr.f32.gmra.mrb[42].mxu0 %v2420_v28  ;;  %v2430_v49 = vsub.f32 %v9465_v32, %v9477_v7  ;;  %v6567_v4 = vadd.f32 %v1894_v41, %v1165_v30  ;;  %v1987_v31 = vsel %vm1962_vm0, %v9481_v56, -inf  ;;  %v11642_v28 = vld [vmem:[#allocation112_spill] sm:$0xff]  ;;  %v11644_v30 = vld [vmem:[#allocation113_spill] sm:$0xff]  ;;  %v11645_v7 = vld [vmem:[#allocation115_spill] sm:$0xff] }
 0x217   : > { %11639 = vst [vmem:[#allocation110_spill] sm:$0xff] %v9486_v9  ;;  %2426 = vmatprep.mubr.f32.mxu1 %v11604_v1  ;;  %4016 = vmatprep.mubr.f32.mxu0 %v11604_v1  ;;  %v9494_v22 = vand.u32 4294901760, %v2170_v2  ;;  %v2155_v43 = vadd.f32 %v6566_v53, %v9305_v16  ;;  %v9498_v12 = vand.u32 4294901760, %v9486_v9 }
 0x218   : > { %1988 = vmax.xlane.f32.xlu0 %v1987_v31  ;;  %v2431_v58 = vand.u32 4294901760, %v2430_v49  ;;  %6215 = vmatpush1.bf16.msra.mxu1 %v11642_v28  ;;  %v1171_v46 = vpop.f32.mrb[20].mxu1  ;;  %v1899_v41 = vpop.f32.mrb[20].mxu0  ;;  %v9502_v55 = vadd.f32 %v6567_v4, %v9312_v0 }
 0x219   : > { %11640 = vst [vmem:[#allocation111_spill] sm:$0xff] %v9494_v22  ;;  %11641 = vst [vmem:[#allocation128_spill] sm:$0xff] %v9498_v12  ;;  %6405 = vmatprep.subr.bf16.mxu0 %v11644_v30  ;;  %6217 = vmatprep.subr.bf16.mxu1 %v11645_v7  ;;  %v9507_v56 = vsub.f32 %v2170_v2, %v9494_v22  ;;  %v2171_v53 = vmax.f32 %v2155_v43, 0.0  ;;  %v6568_v31 = vadd.f32 %v1899_v41, %v1171_v46  ;;  %v1173_v49 = vpop.f32.mrb[21].mxu1  ;;  %v1901_v32 = vpop.f32.mrb[21].mxu0 }
 0x21a   : > { %11643 = vst [vmem:[#allocation112_spill] sm:$0xff] %v9502_v55  ;;  %2432 = vmatmul.mubr.f32.gmra.mrb[44].mxu1 %v2431_v58  ;;  %4022 = vmatmul.mubr.f32.gmra.mrb[44].mxu0 %v2431_v58  ;;  %v2441_v28 = vsub.f32 %v9486_v9, %v9498_v12  ;;  %v6569_v35 = vadd.f32 %v1901_v32, %v1173_v49  ;;  %v1990_v4 = vsel %vm1962_vm0, %v9502_v55, -inf  ;;  %v11649_v58 = vld [vmem:[#allocation114_spill] sm:$0xff]  ;;  %v11651_v49 = vld [vmem:[#allocation116_spill] sm:$0xff]  ;;  %v11652_v12 = vld [vmem:[#allocation117_spill] sm:$0xff] }
 0x21b   : > { %11646 = vst [vmem:[#allocation113_spill] sm:$0xff] %v9507_v56  ;;  %2437 = vmatprep.mubr.f32.mxu1 %v11604_v1  ;;  %4027 = vmatprep.mubr.f32.mxu0 %v11604_v1  ;;  %v9515_v7 = vand.u32 4294901760, %v2171_v53  ;;  %v2156_v2 = vadd.f32 %v6568_v31, %v9305_v16  ;;  %v9519_v46 = vand.u32 4294901760, %v9507_v56 }
 0x21c   : > { %1991 = vmax.xlane.f32.xlu1 %v1990_v4  ;;  %v2442_v43 = vand.u32 4294901760, %v2441_v28  ;;  %6407 = vmatpush1.bf16.msra.mxu0 %v11649_v58  ;;  %v1179_v41 = vpop.f32.mrb[22].mxu1  ;;  %v1906_v32 = vpop.f32.mrb[22].mxu0  ;;  %v9523_v30 = vadd.f32 %v6569_v35, %v9312_v0 }
 0x21d   : > { %11647 = vst [vmem:[#allocation115_spill] sm:$0xff] %v9515_v7  ;;  %11648 = vst [vmem:[#allocation129_spill] sm:$0xff] %v9519_v46  ;;  %6409 = vmatprep.subr.bf16.mxu0 %v11651_v49  ;;  %6219 = vmatpush1.bf16.msra.mxu1 %v11652_v12  ;;  %v9528_v55 = vsub.f32 %v2171_v53, %v9515_v7  ;;  %v2172_v31 = vmax.f32 %v2156_v2, 0.0  ;;  %v6570_v4 = vadd.f32 %v1906_v32, %v1179_v41  ;;  %v1181_v28 = vpop.f32.mrb[23].mxu1  ;;  %v1908_v9 = vpop.f32.mrb[23].mxu0 }
 0x21e   : > { %11650 = vst [vmem:[#allocation114_spill] sm:$0xff] %v9523_v30  ;;  %2443 = vmatmul.mubr.f32.gmra.mrb[46].mxu1 %v2442_v43  ;;  %4033 = vmatmul.mubr.f32.gmra.mrb[46].mxu0 %v2442_v43  ;;  %v2452_v58 = vsub.f32 %v9507_v56, %v9519_v46  ;;  %v6571_v22 = vadd.f32 %v1908_v9, %v1181_v28  ;;  %v1993_v35 = vsel %vm1962_vm0, %v9523_v30, -inf  ;;  %v11656_v43 = vld [vmem:[#allocation118_spill] sm:$0xff]  ;;  %v11658_v28 = vld [vmem:[#allocation119_spill] sm:$0xff]  ;;  %v11659_v46 = vld [vmem:[#allocation120_spill] sm:$0xff] }
 0x21f   : > { %11653 = vst [vmem:[#allocation116_spill] sm:$0xff] %v9528_v55  ;;  %2448 = vmatprep.mubr.f32.mxu1 %v11604_v1  ;;  %4038 = vmatprep.mubr.f32.mxu0 %v11604_v1  ;;  %v9536_v12 = vand.u32 4294901760, %v2172_v31  ;;  %v2157_v53 = vadd.f32 %v6570_v4, %v9305_v16  ;;  %v9540_v41 = vand.u32 4294901760, %v9528_v55 }
 0x220   : > { %1994 = vmax.xlane.f32.xlu0 %v1993_v35  ;;  %v2453_v2 = vand.u32 4294901760, %v2452_v58  ;;  %6411 = vmatpush1.bf16.msra.mxu0 %v11656_v43  ;;  %v1187_v32 = vpop.f32.mrb[24].mxu1  ;;  %v1913_v9 = vpop.f32.mrb[24].mxu0  ;;  %v9544_v49 = vadd.f32 %v6571_v22, %v9312_v0 }
 0x221   : > { %11654 = vst [vmem:[#allocation117_spill] sm:$0xff] %v9536_v12  ;;  %11655 = vst [vmem:[#allocation130_spill] sm:$0xff] %v9540_v41  ;;  %6221 = vmatprep.subr.bf16.mxu1 %v11658_v28  ;;  %6413 = vmatprep.subr.bf16.mxu0 %v11659_v46  ;;  %v9549_v30 = vsub.f32 %v2172_v31, %v9536_v12  ;;  %v2173_v4 = vmax.f32 %v2157_v53, 0.0  ;;  %v6572_v35 = vadd.f32 %v1913_v9, %v1187_v32  ;;  %v1189_v58 = vpop.f32.mrb[25].mxu1  ;;  %v1915_v56 = vpop.f32.mrb[25].mxu0 }
 0x222   : > { %11657 = vst [vmem:[#allocation118_spill] sm:$0xff] %v9544_v49  ;;  %2454 = vmatmul.mubr.f32.gmra.mrb[48].mxu1 %v2453_v2  ;;  %4044 = vmatmul.mubr.f32.gmra.mrb[48].mxu0 %v2453_v2  ;;  %v2463_v43 = vsub.f32 %v9528_v55, %v9540_v41  ;;  %v6573_v7 = vadd.f32 %v1915_v56, %v1189_v58  ;;  %v1996_v22 = vsel %vm1962_vm0, %v9544_v49, -inf  ;;  %v11663_v2 = vld [vmem:[#allocation121_spill] sm:$0xff]  ;;  %v11665_v58 = vld [vmem:[#allocation122_spill] sm:$0xff] }
 0x223   : > { %11660 = vst [vmem:[#allocation119_spill] sm:$0xff] %v9549_v30  ;;  %2459 = vmatprep.mubr.f32.mxu1 %v11604_v1  ;;  %4049 = vmatprep.mubr.f32.mxu0 %v11604_v1  ;;  %v9557_v46 = vand.u32 4294901760, %v2173_v4  ;;  %v2158_v31 = vadd.f32 %v6572_v35, %v9305_v16  ;;  %v9561_v32 = vand.u32 4294901760, %v9549_v30 }
 0x224   : > { %1997 = vmax.xlane.f32.xlu1 %v1996_v22  ;;  %v2464_v53 = vand.u32 4294901760, %v2463_v43  ;;  %6223 = vmatpush1.bf16.msra.mxu1 %v11663_v2  ;;  %v1195_v9 = vpop.f32.mrb[26].mxu1  ;;  %v1920_v56 = vpop.f32.mrb[26].mxu0  ;;  %v9565_v28 = vadd.f32 %v6573_v7, %v9312_v0 }
 0x225   : > { %11661 = vst [vmem:[#allocation120_spill] sm:$0xff] %v9557_v46  ;;  %11662 = vst [vmem:[#allocation131_spill] sm:$0xff] %v9561_v32  ;;  %6415 = vmatpush1.bf16.msra.mxu0 %v9240_v50  ;;  %6225 = vmatprep.subr.bf16.mxu1 %v11665_v58  ;;  %v9570_v41 = vsub.f32 %v2173_v4, %v9557_v46  ;;  %v2174_v35 = vmax.f32 %v2158_v31, 0.0  ;;  %v6574_v22 = vadd.f32 %v1920_v56, %v1195_v9  ;;  %v1197_v43 = vpop.f32.mrb[27].mxu1  ;;  %v1922_v49 = vpop.f32.mrb[27].mxu0 }
 0x226   : > { %11664 = vst [vmem:[#allocation121_spill] sm:$0xff] %v9565_v28  ;;  %2465 = vmatmul.mubr.f32.gmra.mrb[50].mxu1 %v2464_v53  ;;  %4055 = vmatmul.mubr.f32.gmra.mrb[50].mxu0 %v2464_v53  ;;  %v2474_v2 = vsub.f32 %v9549_v30, %v9561_v32  ;;  %v6575_v55 = vadd.f32 %v1922_v49, %v1197_v43  ;;  %v1999_v7 = vsel %vm1962_vm0, %v9565_v28, -inf  ;;  %v11669_v53 = vld [vmem:[#allocation123_spill] sm:$0xff] }
 0x227   : > { %11666 = vst [vmem:[#allocation122_spill] sm:$0xff] %v9570_v41  ;;  %2470 = vmatprep.mubr.f32.mxu1 %v11604_v1  ;;  %4060 = vmatprep.mubr.f32.mxu0 %v11604_v1  ;;  %v9578_v50 = vand.u32 4294901760, %v2174_v35  ;;  %v2159_v4 = vadd.f32 %v6574_v22, %v9305_v16  ;;  %v9582_v9 = vand.u32 4294901760, %v9570_v41 }
 0x228   : > { %2000 = vmax.xlane.f32.xlu0 %v1999_v7  ;;  %v2475_v31 = vand.u32 4294901760, %v2474_v2  ;;  %6417 = vmatprep.subr.bf16.mxu0 %v11669_v53  ;;  %v1203_v56 = vpop.f32.mrb[28].mxu1  ;;  %v1927_v49 = vpop.f32.mrb[28].mxu0  ;;  %v9586_v58 = vadd.f32 %v6575_v55, %v9312_v0 }
 0x229   : > { %11667 = vst [vmem:[#allocation132_spill] sm:$0xff] %v9578_v50  ;;  %11668 = vst [vmem:[#allocation133_spill] sm:$0xff] %v9582_v9  ;;  %6227 = vmatpush1.bf16.msra.mxu1 %v9266_v18  ;;  %6419 = vmatpush1.bf16.msra.mxu0 %v9270_v27  ;;  %v9591_v43 = vsub.f32 %v2174_v35, %v9578_v50  ;;  %v2175_v22 = vmax.f32 %v2159_v4, 0.0  ;;  %v6576_v7 = vadd.f32 %v1927_v49, %v1203_v56  ;;  %v1205_v2 = vpop.f32.mrb[29].mxu1  ;;  %v1929_v32 = vpop.f32.mrb[29].mxu0  ;;  %v11674_v56 = vld [vmem:[#allocation21_spill] sm:$0xff] }
 0x22a   : > { %11670 = vst [vmem:[#allocation123_spill] sm:$0xff] %v9586_v58  ;;  %2476 = vmatmul.mubr.f32.gmra.mrb[52].mxu1 %v2475_v31  ;;  %4066 = vmatmul.mubr.f32.gmra.mrb[52].mxu0 %v2475_v31  ;;  %v2485_v53 = vsub.f32 %v9570_v41, %v9582_v9  ;;  %v6577_v28 = vadd.f32 %v1929_v32, %v1205_v2  ;;  %v2002_v55 = vsel %vm1962_vm0, %v9586_v58, -inf  ;;  %v11673_v31 = vld [vmem:[#allocation12_spill] sm:$0xff]  ;;  %v11677_v41 = vld [vmem:[#allocation13_spill] sm:$0xff] }
 0x22b   : > { %2481 = vmatprep.mubr.f32.mxu1 %v11604_v1  ;;  %4071 = vmatprep.mubr.f32.mxu0 %v11604_v1  ;;  %v9599_v18 = vand.u32 4294901760, %v2175_v22  ;;  %v2160_v27 = vadd.f32 %v6576_v7, %v9305_v16  ;;  %v9603_v4 = vand.u32 4294901760, %v9591_v43  ;;  %v11675_v49 = vpack.c.bf16 %v11673_v31, %v11674_v56  ;;  %v11676_v58 = vld [vmem:[#allocation56_spill] sm:$0xff] }
 0x22c   : > { %2003 = vmax.xlane.f32.xlu1 %v2002_v55  ;;  %v2486_v35 = vand.u32 4294901760, %v2485_v53  ;;  %v1211_v32 = vpop.f32.mrb[30].mxu1  ;;  %v1934_v2 = vpop.f32.mrb[30].mxu0  ;;  %v9609_v9 = vadd.f32 %v6577_v28, %v9312_v0  ;;  %v11678_v30 = vpack.c.bf16 %v11676_v58, %v11677_v41 }
 0x22d   : > { %11671 = vst [vmem:[#allocation134_spill] sm:$0xff] %v9599_v18  ;;  %11672 = vst [vmem:[#allocation135_spill] sm:$0xff] %v9603_v4  ;;  %6229 = vmatprep.subr.bf16.mxu1 %v11675_v49  ;;  %v9615_v7 = vsub.f32 %v2175_v22, %v9599_v18  ;;  %v2176_v53 = vmax.f32 %v2160_v27, 0.0  ;;  %v6578_v55 = vadd.f32 %v1934_v2, %v1211_v32  ;;  %v1213_v50 = vpop.f32.mrb[31].mxu1  ;;  %v1936_v46 = vpop.f32.mrb[31].mxu0 }
 0x22e   : > { %6421 = vmatprep.subr.bf16.mxu0 %v11678_v30  ;;  %2487 = vmatmul.mubr.f32.gmra.mrb[54].mxu1 %v2486_v35  ;;  %v2496_v49 = vsub.f32 %v9591_v43, %v9603_v4  ;;  %v6579_v31 = vadd.f32 %v1936_v46, %v1213_v50  ;;  %v2005_v28 = vsel %vm1962_vm0, %v9609_v9, -inf  ;;  %v11709_v4 = vld [vmem:[#allocation48_spill] sm:$0xff] }
 0x22f   : > { %4077 = vmatmul.mubr.f32.gmra.mrb[54].mxu0 %v2486_v35  ;;  %2492 = vmatprep.mubr.f32.mxu1 %v11604_v1  ;;  %v9623_v30 = vand.u32 4294901760, %v2176_v53  ;;  %v2161_v22 = vadd.f32 %v6578_v55, %v9305_v16  ;;  %v9627_v32 = vand.u32 4294901760, %v9615_v7 }
 0x230   : > { %4082 = vmatprep.mubr.f32.mxu0 %v11604_v1  ;;  %2006 = vmax.xlane.f32.xlu0 %v2005_v28  ;;  %v2497_v27 = vand.u32 4294901760, %v2496_v49  ;;  %v9630_v35 = vadd.f32 %v6579_v31, %v9312_v0 }
 0x231   : > { %11679 = vst [vmem:[#allocation21_spill] sm:$0xff] %v9623_v30  ;;  %11680 = vst [vmem:[#allocation56_spill] sm:$0xff] %v9627_v32  ;;  %v9633_v46 = vsub.f32 %v2176_v53, %v9623_v30  ;;  %v2177_v50 = vmax.f32 %v2161_v22, 0.0  ;;  %v2507_v2 = vsub.f32 %v9615_v7, %v9627_v32  ;;  %v11693_v32 = vpack.c.bf16 %v11580_v37, %v11579_v17 }
 0x232   : > { %2498 = vmatmul.mubr.f32.gmra.mrb[56].mxu1 %v2497_v27  ;;  %v2008_v16 = vsel %vm1962_vm0, %v9630_v35, -inf }
 0x233   : > { %4088 = vmatmul.mubr.f32.gmra.mrb[56].mxu0 %v2497_v27  ;;  %2503 = vmatprep.mubr.f32.mxu1 %v11604_v1  ;;  %v9641_v55 = vand.u32 4294901760, %v2177_v50  ;;  %v2508_v0 = vand.u32 4294901760, %v2507_v2  ;;  %v9644_v31 = vand.u32 4294901760, %v9633_v46  ;;  %v11684_v2 = vld [vmem:[#allocation54_spill] sm:$0xff] }
 0x234   : > { %4093 = vmatprep.mubr.f32.mxu0 %v11604_v1  ;;  %2009 = vmax.xlane.f32.xlu1 %v2008_v16  ;;  %v11685_v16 = vld [vmem:[#allocation51_spill] sm:$0xff] }
 0x235   : > { %11681 = vst [vmem:[#allocation13_spill] sm:$0xff] %v9641_v55  ;;  %11682 = vst [vmem:[#allocation136_spill] sm:$0xff] %v9644_v31  ;;  %v9647_v53 = vsub.f32 %v2177_v50, %v9641_v55  ;;  %v2518_v49 = vsub.f32 %v9633_v46, %v9644_v31 }
 0x236   : > { %2509 = vmatmul.mubr.f32.gmra.mrb[58].mxu1 %v2508_v0 }
 0x237   : > { %4099 = vmatmul.mubr.f32.gmra.mrb[58].mxu0 %v2508_v0  ;;  %2514 = vmatprep.mubr.f32.mxu1 %v11604_v1  ;;  %v2519_v28 = vand.u32 4294901760, %v2518_v49  ;;  %v9654_v22 = vand.u32 4294901760, %v9647_v53  ;;  %v11686_v0 = vpack.c.bf16 %v11684_v2, %v11685_v16  ;;  %v11687_v49 = vld [vmem:[#allocation14_spill] sm:$0xff] }
 0x238   : > { %4104 = vmatprep.mubr.f32.mxu0 %v11604_v1 }
 0x239   : > { %11683 = vst [vmem:[#allocation137_spill] sm:$0xff] %v9654_v22  ;;  %v2529_v27 = vsub.f32 %v9647_v53, %v9654_v22  ;;  %v11691_v22 = vld [vmem:[#allocation58_spill] sm:$0xff] }
 0x23a   : > { %2520 = vmatmul.mubr.f32.gmra.mrb[60].mxu1 %v2519_v28 }
 0x23b   : > { %4110 = vmatmul.mubr.f32.gmra.mrb[60].mxu0 %v2519_v28  ;;  %2525 = vmatprep.mubr.f32.mxu1 %v11604_v1  ;;  %v2530_v50 = vand.u32 4294901760, %v2529_v27  ;;  %v11688_v28 = vld [vmem:[#allocation57_spill] sm:$0xff] }
 0x23c   : > { %4115 = vmatprep.mubr.f32.mxu0 %v11604_v1  ;;  %v11689_v27 = vpack.c.bf16 %v11687_v49, %v11688_v28 }
 0x23e   : > { %2531 = vmatmul.mubr.f32.gmra.mrb[62].mxu1 %v2530_v50 }
 0x23f   : > { %4121 = vmatmul.mubr.f32.gmra.mrb[62].mxu0 %v2530_v50  ;;  %2761 = vmatprep.mubr.f32.mxu1 %v11604_v1  ;;  %v11690_v50 = vld [vmem:[#allocation59_spill] sm:$0xff] }
 0x240   : > { %4351 = vmatprep.mubr.f32.mxu0 %v11604_v1  ;;  %v11692_v31 = vpack.c.bf16 %v11690_v50, %v11691_v22 }
 0x242   : > { %2763 = vmatmul.mubr.f32.vlgmr.msra.gmra.mrb[32].mxu1 %v9328_v26 }
 0x243   : > { %4353 = vmatmul.mubr.f32.vlgmr.msra.gmra.mrb[32].mxu0 %v9328_v26  ;;  %2768 = vmatprep.mubr.f32.mxu1 %v11604_v1 }
 0x244   : > { %4358 = vmatprep.mubr.f32.mxu0 %v11604_v1  ;;  %6231 = vmatpush1.bf16.msra.mxu1 %v11686_v0  ;;  %v11694_v0 = vpack.c.bf16 %v11578_v51, %v11577_v36 }
 0x245   : > { %6423 = vmatpush1.bf16.msra.mxu0 %v11689_v27  ;;  %6233 = vmatprep.subr.bf16.mxu1 %v11692_v31  ;;  %v11695_v27 = vpack.c.bf16 %v11582_v42, %v11581_v3  ;;  %v11696_v31 = vpack.c.bf16 %v11584_v59, %v11583_v52 }
 0x246   : > { %6425 = vmatprep.subr.bf16.mxu0 %v11693_v32  ;;  %2770 = vmatmul.mubr.f32.gmra.mrb[34].mxu1 %v9350_v21  ;;  %v11697_v32 = vpack.c.bf16 %v11588_v25, %v11587_v24 }
 0x247   : > { %4360 = vmatmul.mubr.f32.gmra.mrb[34].mxu0 %v9350_v21  ;;  %2775 = vmatprep.mubr.f32.mxu1 %v11604_v1 }
 0x248   : > { %4365 = vmatprep.mubr.f32.mxu0 %v11604_v1  ;;  %6235 = vmatpush1.bf16.msra.mxu1 %v11694_v0  ;;  %v11698_v0 = vpack.c.bf16 %v11586_v34, %v11585_v13 }
 0x249   : > { %6427 = vmatpush1.bf16.msra.mxu0 %v11695_v27  ;;  %6237 = vmatprep.subr.bf16.mxu1 %v11696_v31  ;;  %v11699_v27 = vld [vmem:[#allocation71_spill] sm:$0xff]  ;;  %v11701_v31 = vpack.c.bf16 %v11550_v5, %v11591_v10 }
 0x24a   : > { %6429 = vmatprep.subr.bf16.mxu0 %v11697_v32  ;;  %2777 = vmatmul.mubr.f32.gmra.mrb[36].mxu1 %v9371_v19  ;;  %v11700_v21 = vpack.c.bf16 %v11590_v44, %v11699_v27  ;;  %v11702_v32 = vpack.c.bf16 %v11555_v38, %v11553_v40 }
 0x24b   : > { %4367 = vmatmul.mubr.f32.gmra.mrb[36].mxu0 %v9371_v19  ;;  %2782 = vmatprep.mubr.f32.mxu1 %v11604_v1  ;;  %v11705_v19 = vld [vmem:[#allocation77_spill] sm:$0xff] }
 0x24c   : > { %4372 = vmatprep.mubr.f32.mxu0 %v11604_v1  ;;  %6239 = vmatpush1.bf16.msra.mxu1 %v11698_v0  ;;  %v11703_v0 = vpack.c.bf16 %v11552_v63, %v11551_v33 }
 0x24d   : > { %6431 = vmatpush1.bf16.msra.mxu0 %v11700_v21  ;;  %6241 = vmatprep.subr.bf16.mxu1 %v11701_v31  ;;  %v11704_v21 = vld [vmem:[#allocation25_spill] sm:$0xff]  ;;  %v11707_v31 = vpack.c.bf16 %v8499_v6, %v8488_v61 }
 0x24e   : > { %6433 = vmatprep.subr.bf16.mxu0 %v11702_v32  ;;  %2784 = vmatmul.mubr.f32.gmra.mrb[38].mxu1 %v9389_v23  ;;  %v11706_v26 = vpack.c.bf16 %v11704_v21, %v11705_v19  ;;  %v11708_v32 = vld [vmem:[#allocation49_spill] sm:$0xff]  ;;  %v11715_v19 = vld [vmem:[#allocation50_spill] sm:$0xff] }
 0x24f   : > { %4374 = vmatmul.mubr.f32.gmra.mrb[38].mxu0 %v9389_v23  ;;  %2789 = vmatprep.mubr.f32.mxu1 %v11604_v1  ;;  %v11710_v38 = vpack.c.bf16 %v11708_v32, %v11709_v4  ;;  %v11712_v23 = vld [vmem:[#allocation78_spill] sm:$0xff] }
 0x250   : > { %4379 = vmatprep.mubr.f32.mxu0 %v11604_v1  ;;  %6243 = vmatpush1.bf16.msra.mxu1 %v11703_v0  ;;  %v11711_v0 = vld [vmem:[#allocation79_spill] sm:$0xff] }
 0x251   : > { %6435 = vmatpush1.bf16.msra.mxu0 %v11706_v26  ;;  %6245 = vmatprep.subr.bf16.mxu1 %v11707_v31  ;;  %v11713_v21 = vpack.c.bf16 %v11711_v0, %v11712_v23  ;;  %v11714_v26 = vld [vmem:[#allocation17_spill] sm:$0xff]  ;;  %v11717_v31 = vpack.c.bf16 %v8884_v47, %v8879_v39 }
 0x252   : > { %6437 = vmatprep.subr.bf16.mxu0 %v11710_v38  ;;  %2791 = vmatmul.mubr.f32.gmra.mrb[40].mxu1 %v9410_v15  ;;  %v11716_v6 = vpack.c.bf16 %v11714_v26, %v11715_v19  ;;  %v11718_v38 = vld [vmem:[#allocation82_spill] sm:$0xff] }
 0x253   : > { %4381 = vmatmul.mubr.f32.gmra.mrb[40].mxu0 %v9410_v15  ;;  %2796 = vmatprep.mubr.f32.mxu1 %v11604_v1  ;;  %v11719_v32 = vpack.c.bf16 %v8894_v62, %v11718_v38 }
 0x254   : > { %4386 = vmatprep.mubr.f32.mxu0 %v11604_v1  ;;  %6247 = vmatpush1.bf16.msra.mxu1 %v11713_v21  ;;  %v11720_v21 = vpack.c.bf16 %v8900_v57, %v8897_v54 }
 0x255   : > { %6439 = vmatpush1.bf16.msra.mxu0 %v11716_v6  ;;  %6249 = vmatprep.subr.bf16.mxu1 %v11717_v31  ;;  %v11721_v6 = vpack.c.bf16 %v8905_v45, %v8903_v48  ;;  %v11722_v31 = vld [vmem:[#allocation85_spill] sm:$0xff] }
 0x256   : > { %6441 = vmatprep.subr.bf16.mxu0 %v11719_v32  ;;  %2798 = vmatmul.mubr.f32.gmra.mrb[42].mxu1 %v9431_v8  ;;  %v11723_v15 = vpack.c.bf16 %v8914_v11, %v11722_v31  ;;  %v11724_v32 = vld [vmem:[#allocation87_spill] sm:$0xff]  ;;  %v11731_v31 = vld [vmem:[#allocation93_spill] sm:$0xff] }
 0x257   : > { %4388 = vmatmul.mubr.f32.gmra.mrb[42].mxu0 %v9431_v8  ;;  %2803 = vmatprep.mubr.f32.mxu1 %v11604_v1  ;;  %v11725_v62 = vpack.c.bf16 %v8919_v60, %v11724_v32  ;;  %v11728_v8 = vld [vmem:[#allocation90_spill] sm:$0xff]  ;;  %v11734_v32 = vld [vmem:[#allocation95_spill] sm:$0xff] }
 0x258   : > { %4393 = vmatprep.mubr.f32.mxu0 %v11604_v1  ;;  %6251 = vmatpush1.bf16.msra.mxu1 %v11720_v21  ;;  %v11726_v21 = vpack.c.bf16 %v8923_v14, %v8921_v20  ;;  %v11738_v14 = vld [vmem:[#allocation97_spill] sm:$0xff] }
 0x259   : > { %6443 = vmatpush1.bf16.msra.mxu0 %v11721_v6  ;;  %6253 = vmatprep.subr.bf16.mxu1 %v11723_v15  ;;  %v11727_v6 = vld [vmem:[#allocation91_spill] sm:$0xff]  ;;  %v11730_v15 = vld [vmem:[#allocation94_spill] sm:$0xff] }
 0x25a   : > { %6445 = vmatprep.subr.bf16.mxu0 %v11725_v62  ;;  %2805 = vmatmul.mubr.f32.gmra.mrb[44].mxu1 %v9452_v29  ;;  %v11729_v11 = vpack.c.bf16 %v11727_v6, %v11728_v8  ;;  %v11732_v60 = vpack.c.bf16 %v11730_v15, %v11731_v31  ;;  %v11733_v62 = vld [vmem:[#allocation96_spill] sm:$0xff]  ;;  %v11741_v8 = vld [vmem:[#allocation99_spill] sm:$0xff]  ;;  %v11803_v31 = vld [vmem:[#allocation113_spill] sm:$0xff] }
 0x25b   : > { %4395 = vmatmul.mubr.f32.gmra.mrb[44].mxu0 %v9452_v29  ;;  %2810 = vmatprep.mubr.f32.mxu1 %v11604_v1  ;;  %v11735_v45 = vpack.c.bf16 %v11733_v62, %v11734_v32  ;;  %v11736_v29 = vld [vmem:[#allocation109_spill] sm:$0xff]  ;;  %v11744_v62 = vld [vmem:[#allocation28_spill] sm:$0xff] }
 0x25c   : > { %4400 = vmatprep.mubr.f32.mxu0 %v11604_v1  ;;  %6255 = vmatpush1.bf16.msra.mxu1 %v11726_v21  ;;  %v11737_v21 = vld [vmem:[#allocation98_spill] sm:$0xff] }
 0x25d   : > { %6447 = vmatpush1.bf16.msra.mxu0 %v11729_v11  ;;  %6257 = vmatprep.subr.bf16.mxu1 %v11732_v60  ;;  %v11739_v6 = vpack.c.bf16 %v11737_v21, %v11738_v14  ;;  %v11740_v11 = vld [vmem:[#allocation100_spill] sm:$0xff]  ;;  %v11743_v60 = vld [vmem:[#allocation27_spill] sm:$0xff]  ;;  %v11800_v21 = vand.u32 4294901760, %v11677_v41 }
 0x25e   : > { %6449 = vmatprep.subr.bf16.mxu0 %v11735_v45  ;;  %2812 = vmatmul.mubr.f32.gmra.mrb[46].mxu1 %v11736_v29  ;;  %v11742_v15 = vpack.c.bf16 %v11740_v11, %v11741_v8  ;;  %v11745_v45 = vld [vmem:[#allocation111_spill] sm:$0xff]  ;;  %v11758_v11 = vld [vmem:[#allocation29_spill] sm:$0xff]  ;;  %v11780_v8 = vld [vmem:[#allocation108_spill] sm:$0xff] }
 0x25f   : > { %4402 = vmatmul.mubr.f32.gmra.mrb[46].mxu0 %v11736_v29  ;;  %2817 = vmatprep.mubr.f32.mxu1 %v11604_v1  ;;  %v11746_v29 = vld [vmem:[#allocation115_spill] sm:$0xff] }
 0x260   : > { %4407 = vmatprep.mubr.f32.mxu0 %v11604_v1  ;;  %6259 = vmatpush1.bf16.msra.mxu1 %v11739_v6  ;;  %v11747_v6 = vld [vmem:[#allocation120_spill] sm:$0xff] }
 0x261   : > { %6451 = vmatpush1.bf16.msra.mxu0 %v11742_v15  ;;  %6261 = vmatprep.subr.bf16.mxu1 %v11743_v60  ;;  %v11748_v15 = vld [vmem:[#allocation132_spill] sm:$0xff] }
 0x262   : > { %6453 = vmatprep.subr.bf16.mxu0 %v11744_v62  ;;  %2819 = vmatmul.mubr.f32.gmra.mrb[48].mxu1 %v11745_v45  ;;  %v11755_v62 = vld [vmem:[#allocation68_spill] sm:$0xff] }
 0x263   : > { %4409 = vmatmul.mubr.f32.gmra.mrb[48].mxu0 %v11745_v45  ;;  %2824 = vmatprep.mubr.f32.mxu1 %v11604_v1  ;;  %v11756_v60 = vld [vmem:[#allocation52_spill] sm:$0xff] }
 0x264   : > { %4414 = vmatprep.mubr.f32.mxu0 %v11604_v1 }
 0x266   : > { %2826 = vmatmul.mubr.f32.gmra.mrb[50].mxu1 %v11746_v29 }
 0x267   : > { %4416 = vmatmul.mubr.f32.gmra.mrb[50].mxu0 %v11746_v29  ;;  %2831 = vmatprep.mubr.f32.mxu1 %v11604_v1  ;;  %v11754_v29 = vld [vmem:[#allocation61_spill] sm:$0xff] }
 0x268   : > { %4421 = vmatprep.mubr.f32.mxu0 %v11604_v1 }
 0x26a   : > { %2833 = vmatmul.mubr.f32.gmra.mrb[52].mxu1 %v9536_v12 }
 0x26b   : > { %4423 = vmatmul.mubr.f32.gmra.mrb[52].mxu0 %v9536_v12  ;;  %2838 = vmatprep.mubr.f32.mxu1 %v11604_v1  ;;  %v11752_v12 = vld [vmem:[#allocation37_spill] sm:$0xff] }
 0x26c   : > { %4428 = vmatprep.mubr.f32.mxu0 %v11604_v1 }
 0x26e   : > { %2840 = vmatmul.mubr.f32.gmra.mrb[54].mxu1 %v11747_v6 }
 0x26f   : > { %4430 = vmatmul.mubr.f32.gmra.mrb[54].mxu0 %v11747_v6  ;;  %2845 = vmatprep.mubr.f32.mxu1 %v11604_v1 }
 0x270   : > { %4435 = vmatprep.mubr.f32.mxu0 %v11604_v1 }
 0x272   : > { %2847 = vmatmul.mubr.f32.gmra.mrb[56].mxu1 %v11748_v15 }
 0x273   : > { %4437 = vmatmul.mubr.f32.gmra.mrb[56].mxu0 %v11748_v15  ;;  %2852 = vmatprep.mubr.f32.mxu1 %v11604_v1  ;;  %v11751_v15 = vld [vmem:[#allocation34_spill] sm:$0xff] }
 0x274   : > { %4442 = vmatprep.mubr.f32.mxu0 %v11604_v1 }
 0x276   : > { %2854 = vmatmul.mubr.f32.gmra.mrb[58].mxu1 %v9599_v18 }
 0x277   : > { %4444 = vmatmul.mubr.f32.gmra.mrb[58].mxu0 %v9599_v18  ;;  %2859 = vmatprep.mubr.f32.mxu1 %v11604_v1  ;;  %v11749_v18 = vld [vmem:[#allocation15_spill] sm:$0xff] }
 0x278   : > { %4449 = vmatprep.mubr.f32.mxu0 %v11604_v1 }
 0x27a   : > { %2861 = vmatmul.mubr.f32.gmra.mrb[60].mxu1 %v9623_v30 }
 0x27b   : > { %4451 = vmatmul.mubr.f32.gmra.mrb[60].mxu0 %v9623_v30  ;;  %2866 = vmatprep.mubr.f32.mxu1 %v11604_v1  ;;  %v11750_v30 = vld [vmem:[#allocation30_spill] sm:$0xff] }
 0x27c   : > { %4456 = vmatprep.mubr.f32.mxu0 %v11604_v1 }
 0x27e   : > { %2868 = vmatmul.mubr.f32.gmra.mrb[62].mxu1 %v9641_v55 }
 0x27f   : > { %4458 = vmatmul.mubr.f32.gmra.mrb[62].mxu0 %v9641_v55  ;;  %3002 = vmatprep.mubr.f32.mxu1 %v11604_v1  ;;  %v11753_v55 = vld [vmem:[#allocation19_spill] sm:$0xff] }
 0x280   : > { %4592 = vmatprep.mubr.f32.mxu0 %v11604_v1 }
 0x282   : > { %3005 = vmatmul.mubr.f32.vlgmr.msra.gmra.mrb[32].mxu1 %v11749_v18 }
 0x283   : > { %4595 = vmatmul.mubr.f32.vlgmr.msra.gmra.mrb[32].mxu0 %v11749_v18  ;;  %3010 = vmatprep.mubr.f32.mxu1 %v11604_v1 }
 0x284   : > { %4600 = vmatprep.mubr.f32.mxu0 %v11604_v1  ;;  %6263 = vmatpush1.bf16.msra.mxu1 %v11750_v30  ;;  %v1965_v6 = vpop.xlane.xlu0 %1964  ;;  %v11757_v30 = vld [vmem:[#allocation31_spill] sm:$0xff] }
 0x285   : > { %6455 = vmatpush1.bf16.msra.mxu0 %v11751_v15  ;;  %6265 = vmatprep.subr.bf16.mxu1 %v11752_v12  ;;  %v2011_v45 = vsub.f32 %v11754_v29, %v1965_v6  ;;  %v11759_v12 = vld [vmem:[#allocation53_spill] sm:$0xff]  ;;  %v11760_v29 = vld [vmem:[#allocation63_spill] sm:$0xff] }
 0x286   : > { %6457 = vmatprep.subr.bf16.mxu0 %v11753_v55  ;;  %3013 = vmatmul.mubr.f32.gmra.mrb[34].mxu1 %v11755_v62  ;;  %v11761_v55 = vld [vmem:[#allocation22_spill] sm:$0xff] }
 0x287   : > { %4603 = vmatmul.mubr.f32.gmra.mrb[34].mxu0 %v11755_v62  ;;  %3018 = vmatprep.mubr.f32.mxu1 %v11604_v1  ;;  %v2027_v18 = vmul.f32 1.442695, %v2011_v45  ;;  %v11762_v45 = vld [vmem:[#allocation55_spill] sm:$0xff] }
 0x288   : > { %4608 = vmatprep.mubr.f32.mxu0 %v11604_v1  ;;  %6267 = vmatpush1.bf16.msra.mxu1 %v11756_v60  ;;  %v1968_v15 = vpop.xlane.xlu0 %1967 }
 0x289   : > { %6459 = vmatpush1.bf16.msra.mxu0 %v11757_v30  ;;  %6269 = vmatprep.subr.bf16.mxu1 %v11758_v11  ;;  %7236 = vpow2.f32 %v2027_v18  ;;  %v2012_v6 = vsub.f32 %v11760_v29, %v1968_v15  ;;  %v11763_v30 = vld [vmem:[#allocation60_spill] sm:$0xff]  ;;  %v11764_v11 = vld [vmem:[#allocation35_spill] sm:$0xff]  ;;  %v11767_v29 = vld [vmem:[#allocation102_spill] sm:$0xff] }
 0x28a   : > { %6461 = vmatprep.subr.bf16.mxu0 %v11759_v12  ;;  %3021 = vmatmul.mubr.f32.gmra.mrb[36].mxu1 %v11761_v55  ;;  %v11765_v12 = vld [vmem:[#allocation32_spill] sm:$0xff]  ;;  %v11766_v15 = vld [vmem:[#allocation67_spill] sm:$0xff] }
 0x28b   : > { %4611 = vmatmul.mubr.f32.gmra.mrb[36].mxu0 %v11761_v55  ;;  %3026 = vmatprep.mubr.f32.mxu1 %v11604_v1  ;;  %v2029_v62 = vmul.f32 1.442695, %v2012_v6  ;;  %v11768_v6 = vld [vmem:[#allocation64_spill] sm:$0xff] }
 0x28c   : > { %4616 = vmatprep.mubr.f32.mxu0 %v11604_v1  ;;  %6271 = vmatpush1.bf16.msra.mxu1 %v11762_v45  ;;  %v1971_v60 = vpop.xlane.xlu1 %1970 }
 0x28d   : > { %6463 = vmatpush1.bf16.msra.mxu0 %v11763_v30  ;;  %6273 = vmatprep.subr.bf16.mxu1 %v11764_v11  ;;  %7238 = vpow2.f32 %v2029_v62  ;;  %v2013_v18 = vsub.f32 %v11766_v15, %v1971_v60  ;;  %v11769_v30 = vld [vmem:[#allocation65_spill] sm:$0xff]  ;;  %v11770_v11 = vld [vmem:[#allocation36_spill] sm:$0xff]  ;;  %v11772_v60 = vld [vmem:[#allocation70_spill] sm:$0xff] }
 0x28e   : > { %6465 = vmatprep.subr.bf16.mxu0 %v11765_v12  ;;  %3029 = vmatmul.mubr.f32.gmra.mrb[38].mxu1 %v11767_v29  ;;  %v11771_v12 = vld [vmem:[#allocation40_spill] sm:$0xff]  ;;  %v11773_v15 = vld [vmem:[#allocation105_spill] sm:$0xff] }
 0x28f   : > { %4619 = vmatmul.mubr.f32.gmra.mrb[38].mxu0 %v11767_v29  ;;  %3034 = vmatprep.mubr.f32.mxu1 %v11604_v1  ;;  %v2031_v55 = vmul.f32 1.442695, %v2013_v18 }
 0x290   : > { %4624 = vmatprep.mubr.f32.mxu0 %v11604_v1  ;;  %6275 = vmatpush1.bf16.msra.mxu1 %v11768_v6  ;;  %v1974_v45 = vpop.xlane.xlu1 %1973  ;;  %v11776_v6 = vld [vmem:[#allocation38_spill] sm:$0xff] }
 0x291   : > { %6467 = vmatpush1.bf16.msra.mxu0 %v11769_v30  ;;  %6277 = vmatprep.subr.bf16.mxu1 %v11770_v11  ;;  %7240 = vpow2.f32 %v2031_v55  ;;  %v2014_v62 = vsub.f32 %v11772_v60, %v1974_v45  ;;  %v11775_v30 = vld [vmem:[#allocation33_spill] sm:$0xff]  ;;  %v11778_v60 = vld [vmem:[#allocation39_spill] sm:$0xff] }
 0x292   : > { %6469 = vmatprep.subr.bf16.mxu0 %v11771_v12  ;;  %3037 = vmatmul.mubr.f32.gmra.mrb[40].mxu1 %v11773_v15  ;;  %v11777_v45 = vld [vmem:[#allocation41_spill] sm:$0xff] }
 0x293   : > { %4627 = vmatmul.mubr.f32.gmra.mrb[40].mxu0 %v11773_v15  ;;  %3042 = vmatprep.mubr.f32.mxu1 %v11604_v1  ;;  %v9858_v18 = vpop.eup %7236  ;;  %v2033_v29 = vmul.f32 1.442695, %v2014_v62  ;;  %v11779_v15 = vld [vmem:[#allocation101_spill] sm:$0xff] }
 0x294   : > { %4632 = vmatprep.mubr.f32.mxu0 %v11604_v1  ;;  %11774 = vst [vmem:[#allocation54_spill] sm:$0xff] %v9858_v18  ;;  %6279 = vmatpush1.bf16.msra.mxu1 %v11775_v30  ;;  %v2059_v55 = vsel %vm1962_vm0, %v9858_v18, 0.0  ;;  %v11782_v18 = vld [vmem:[#allocation42_spill] sm:$0xff] }
 0x295   : > { %6471 = vmatpush1.bf16.msra.mxu0 %v11776_v6  ;;  %v1977_v11 = vpop.xlane.xlu0 %1976  ;;  %6281 = vmatprep.subr.bf16.mxu1 %v11777_v45  ;;  %7242 = vpow2.f32 %v2033_v29 }
 0x296   : > { %6473 = vmatprep.subr.bf16.mxu0 %v11778_v60  ;;  %v2015_v12 = vsub.f32 %v11779_v15, %v1977_v11  ;;  %2060 = vadd.xlane.f32.xlu0 %v2059_v55  ;;  %v11783_v60 = vld [vmem:[#allocation43_spill] sm:$0xff]  ;;  %v11784_v11 = vld [vmem:[#allocation44_spill] sm:$0xff]  ;;  %v11786_v15 = vld [vmem:[#allocation74_spill] sm:$0xff] }
 0x297   : > { %3045 = vmatmul.mubr.f32.gmra.mrb[42].mxu1 %v11780_v8  ;;  %4635 = vmatmul.mubr.f32.gmra.mrb[42].mxu0 %v11780_v8  ;;  %v9870_v62 = vpop.eup %7238  ;;  %v11785_v55 = vld [vmem:[#allocation104_spill] sm:$0xff] }
 0x298   : > { %3050 = vmatprep.mubr.f32.mxu1 %v11604_v1  ;;  %11781 = vst [vmem:[#allocation51_spill] sm:$0xff] %v9870_v62  ;;  %v2035_v6 = vmul.f32 1.442695, %v2015_v12  ;;  %4640 = vmatprep.mubr.f32.mxu0 %v11604_v1  ;;  %v2062_v29 = vsel %vm1962_vm0, %v9870_v62, 0.0  ;;  %v11788_v62 = vld [vmem:[#allocation45_spill] sm:$0xff] }
 0x299   : > { %6283 = vmatpush1.bf16.msra.mxu1 %v11782_v18  ;;  %v1980_v45 = vpop.xlane.xlu1 %1979  ;;  %6475 = vmatpush1.bf16.msra.mxu0 %v11783_v60 }
 0x29a   : > { %6285 = vmatprep.subr.bf16.mxu1 %v11784_v11  ;;  %7244 = vpow2.f32 %v2035_v6  ;;  %v2016_v8 = vsub.f32 %v11785_v55, %v1980_v45  ;;  %2063 = vadd.xlane.f32.xlu1 %v2062_v29  ;;  %v11789_v11 = vld [vmem:[#allocation46_spill] sm:$0xff]  ;;  %v11790_v45 = vld [vmem:[#allocation47_spill] sm:$0xff] }
 0x29b   : > { %3053 = vmatmul.mubr.f32.gmra.mrb[44].mxu1 %v11786_v15  ;;  %4643 = vmatmul.mubr.f32.gmra.mrb[44].mxu0 %v11786_v15  ;;  %v9882_v12 = vpop.eup %7240  ;;  %v11791_v29 = vld [vmem:[#allocation106_spill] sm:$0xff] }
 0x29c   : > { %3058 = vmatprep.mubr.f32.mxu1 %v11604_v1  ;;  %11787 = vst [vmem:[#allocation14_spill] sm:$0xff] %v9882_v12  ;;  %v2037_v18 = vmul.f32 1.442695, %v2016_v8  ;;  %4648 = vmatprep.mubr.f32.mxu0 %v11604_v1  ;;  %v2065_v6 = vsel %vm1962_vm0, %v9882_v12, 0.0  ;;  %v11792_v15 = vld [vmem:[#allocation110_spill] sm:$0xff] }
 0x29d   : > { %6477 = vmatprep.subr.bf16.mxu0 %v11788_v62  ;;  %v1983_v60 = vpop.xlane.xlu0 %1982  ;;  %6287 = vmatpush1.bf16.msra.mxu1 %v11789_v11  ;;  %v11794_v12 = vld [vmem:[#allocation18_spill] sm:$0xff] }
 0x29e   : > { %6479 = vmatpush1.bf16.msra.mxu0 %v11790_v45  ;;  %7246 = vpow2.f32 %v2037_v18  ;;  %v2017_v55 = vsub.f32 %v11791_v29, %v1983_v60  ;;  %2066 = vadd.xlane.f32.xlu0 %v2065_v6  ;;  %v11795_v45 = vld [vmem:[#allocation80_spill] sm:$0xff]  ;;  %v11796_v60 = vld [vmem:[#allocation81_spill] sm:$0xff]  ;;  %v11797_v6 = vand.u32 4294901760, %v11674_v56 }
 0x29f   : > { %3061 = vmatmul.mubr.f32.gmra.mrb[46].mxu1 %v11792_v15  ;;  %4651 = vmatmul.mubr.f32.gmra.mrb[46].mxu0 %v11792_v15  ;;  %v9894_v8 = vpop.eup %7242  ;;  %v11798_v29 = vld [vmem:[#allocation12_spill] sm:$0xff] }
 0x2a0   : > { %3066 = vmatprep.mubr.f32.mxu1 %v11604_v1  ;;  %11793 = vst [vmem:[#allocation57_spill] sm:$0xff] %v9894_v8  ;;  %v2039_v62 = vmul.f32 1.442695, %v2017_v55  ;;  %4656 = vmatprep.mubr.f32.mxu0 %v11604_v1  ;;  %v2068_v18 = vsel %vm1962_vm0, %v9894_v8, 0.0  ;;  %v11799_v15 = vand.u32 4294901760, %v11798_v29  ;;  %v11801_v55 = vand.u32 4294901760, %v11676_v58 }
 0x2a1   : > { %6289 = vmatprep.subr.bf16.mxu1 %v11794_v12  ;;  %v1986_v11 = vpop.xlane.xlu1 %1985  ;;  %6481 = vmatprep.subr.bf16.mxu0 %v11795_v45  ;;  %v11802_v12 = vld [vmem:[#allocation24_spill] sm:$0xff]  ;;  %v11808_v29 = vld [vmem:[#allocation119_spill] sm:$0xff] }
 0x2a2   : > { %6291 = vmatpush1.bf16.msra.mxu1 %v11796_v60  ;;  %v6292_v30 = vpack.c.bf16 %v11799_v15, %v11797_v6  ;;  %v6484_v14 = vpack.c.bf16 %v11801_v55, %v11800_v21  ;;  %7248 = vpow2.f32 %v2039_v62  ;;  %v2018_v32 = vsub.f32 %v11802_v12, %v1986_v11  ;;  %2069 = vadd.xlane.f32.xlu1 %v2068_v18  ;;  %v11804_v6 = vld [vmem:[#allocation92_spill] sm:$0xff]  ;;  %v11805_v21 = vld [vmem:[#allocation75_spill] sm:$0xff] }
 0x2a3   : > { %3069 = vmatmul.mubr.f32.gmra.mrb[48].mxu1 %v11803_v31  ;;  %4659 = vmatmul.mubr.f32.gmra.mrb[48].mxu0 %v11803_v31  ;;  %v11806_v31 = vld [vmem:[#allocation116_spill] sm:$0xff] }
 0x2a4   : > { %3074 = vmatprep.mubr.f32.mxu1 %v11604_v1  ;;  %v9914_v8 = vpop.eup %7244  ;;  %v2041_v56 = vmul.f32 1.442695, %v2018_v32  ;;  %4664 = vmatprep.mubr.f32.mxu0 %v11604_v1 }
 0x2a5   : > { %6483 = vmatpush1.bf16.msra.mxu0 %v11804_v6  ;;  %v1989_v41 = vpop.xlane.xlu0 %1988  ;;  %v2071_v58 = vsel %vm1962_vm0, %v9914_v8, 0.0  ;;  %6293 = vmatprep.subr.bf16.mxu1 %v6292_v30 }
 0x2a6   : > { %6485 = vmatprep.subr.bf16.mxu0 %v6484_v14  ;;  %7250 = vpow2.f32 %v2041_v56  ;;  %v2019_v62 = vsub.f32 %v11805_v21, %v1989_v41  ;;  %2072 = vadd.xlane.f32.xlu0 %v2071_v58  ;;  %v11807_v14 = vld [vmem:[#allocation112_spill] sm:$0xff]  ;;  %v11809_v58 = vld [vmem:[#allocation114_spill] sm:$0xff] }
 0x2a7   : > { %3077 = vmatmul.mubr.f32.gmra.mrb[50].mxu1 %v11806_v31  ;;  %4667 = vmatmul.mubr.f32.gmra.mrb[50].mxu0 %v11806_v31 }
 0x2a8   : > { %3082 = vmatprep.mubr.f32.mxu1 %v11604_v1  ;;  %v9924_v32 = vpop.eup %7246  ;;  %v2043_v11 = vmul.f32 1.442695, %v2019_v62  ;;  %4672 = vmatprep.mubr.f32.mxu0 %v11604_v1  ;;  %v11810_v62 = vld [vmem:[#allocation122_spill] sm:$0xff] }
 0x2a9   : > { %v1992_v12 = vpop.xlane.xlu1 %1991  ;;  %v2074_v30 = vsel %vm1962_vm0, %v9924_v32, 0.0 }
 0x2aa   : > { %7252 = vpow2.f32 %v2043_v11  ;;  %v2020_v18 = vsub.f32 %v11807_v14, %v1992_v12  ;;  %2075 = vadd.xlane.f32.xlu1 %v2074_v30  ;;  %v11206_v14 = vmov 1  }
 0x2ab   : > { %3085 = vmatmul.mubr.f32.gmra.mrb[52].mxu1 %v11808_v29  ;;  %4675 = vmatmul.mubr.f32.gmra.mrb[52].mxu0 %v11808_v29  ;;  %v11811_v29 = vld [vmem:[#allocation118_spill] sm:$0xff] }
 0x2ac   : > { %3090 = vmatprep.mubr.f32.mxu1 %v11604_v1  ;;  %v9933_v15 = vpop.eup %7248  ;;  %v2045_v55 = vmul.f32 1.442695, %v2020_v18  ;;  %4680 = vmatprep.mubr.f32.mxu0 %v11604_v1  ;;  %v11204_v18 = vmov 0  }
 0x2ad   : > { %v1995_v56 = vpop.xlane.xlu0 %1994  ;;  %v2077_v41 = vsel %vm1962_vm0, %v9933_v15, 0.0  ;;  %7173 = vset.pattern.permute.xlu1 %v11206_v14  ;;  %7172 = vset.pattern.permute.xlu0 %v11204_v18  ;;  %v11820_v14 = vld [vmem:[#allocation16_spill] sm:$0xff] }
 0x2ae   : > { %7254 = vpow2.f32 %v2045_v55  ;;  %v2021_v21 = vsub.f32 %v11809_v58, %v1995_v56  ;;  %2078 = vadd.xlane.f32.xlu0 %v2077_v41 }
 0x2af   : > { %3093 = vmatmul.mubr.f32.gmra.mrb[54].mxu1 %v11810_v62  ;;  %4683 = vmatmul.mubr.f32.gmra.mrb[54].mxu0 %v11810_v62  ;;  %v11812_v62 = vld [vmem:[#allocation121_spill] sm:$0xff] }
 0x2b0   : > { %3098 = vmatprep.mubr.f32.mxu1 %v11604_v1  ;;  %v9942_v31 = vpop.eup %7250  ;;  %v2047_v11 = vmul.f32 1.442695, %v2021_v21  ;;  %4688 = vmatprep.mubr.f32.mxu0 %v11604_v1 }
 0x2b1   : > { %v1998_v12 = vpop.xlane.xlu1 %1997  ;;  %v2080_v30 = vsel %vm1962_vm0, %v9942_v31, 0.0 }
 0x2b2   : > { %7256 = vpow2.f32 %v2047_v11  ;;  %v2022_v55 = vsub.f32 %v11811_v29, %v1998_v12  ;;  %2081 = vadd.xlane.f32.xlu1 %v2080_v30 }
 0x2b3   : > { %3101 = vmatmul.mubr.f32.gmra.mrb[56].mxu1 %v9591_v43  ;;  %4691 = vmatmul.mubr.f32.gmra.mrb[56].mxu0 %v9591_v43 }
 0x2b4   : > { %3106 = vmatprep.mubr.f32.mxu1 %v11604_v1  ;;  %v9953_v56 = vpop.eup %7252  ;;  %v2049_v41 = vmul.f32 1.442695, %v2022_v55  ;;  %4696 = vmatprep.mubr.f32.mxu0 %v11604_v1  ;;  %v11813_v55 = vld [vmem:[#allocation123_spill] sm:$0xff] }
 0x2b5   : > { %v2001_v58 = vpop.xlane.xlu0 %2000  ;;  %v2083_v21 = vsel %vm1962_vm0, %v9953_v56, 0.0 }
 0x2b6   : > { %7258 = vpow2.f32 %v2049_v41  ;;  %v2023_v11 = vsub.f32 %v11812_v62, %v2001_v58  ;;  %2084 = vadd.xlane.f32.xlu0 %v2083_v21 }
 0x2b7   : > { %3109 = vmatmul.mubr.f32.gmra.mrb[58].mxu1 %v9615_v7  ;;  %4699 = vmatmul.mubr.f32.gmra.mrb[58].mxu0 %v9615_v7 }
 0x2b8   : > { %3114 = vmatprep.mubr.f32.mxu1 %v11604_v1  ;;  %v9962_v43 = vpop.eup %7254  ;;  %v2051_v12 = vmul.f32 1.442695, %v2023_v11  ;;  %4704 = vmatprep.mubr.f32.mxu0 %v11604_v1 }
 0x2b9   : > { %v2004_v30 = vpop.xlane.xlu1 %2003  ;;  %v2086_v29 = vsel %vm1962_vm0, %v9962_v43, 0.0 }
 0x2ba   : > { %7260 = vpow2.f32 %v2051_v12  ;;  %v2024_v41 = vsub.f32 %v11813_v55, %v2004_v30  ;;  %2087 = vadd.xlane.f32.xlu1 %v2086_v29  ;;  %v11814_v30 = vand.u32 4294901760, %v11685_v16  ;;  %v11815_v29 = vand.u32 4294901760, %v11684_v2 }
 0x2bb   : > { %3117 = vmatmul.mubr.f32.gmra.mrb[60].mxu1 %v9633_v46  ;;  %4707 = vmatmul.mubr.f32.gmra.mrb[60].mxu0 %v9633_v46 }
 0x2bc   : > { %3122 = vmatprep.mubr.f32.mxu1 %v11604_v1  ;;  %v9971_v7 = vpop.eup %7256  ;;  %v2053_v58 = vmul.f32 1.442695, %v2024_v41  ;;  %4712 = vmatprep.mubr.f32.mxu0 %v11604_v1  ;;  %v6294_v55 = vpack.c.bf16 %v11815_v29, %v11814_v30  ;;  %v11825_v29 = vand.u32 4294901760, %v11583_v52 }
 0x2bd   : > { %v2007_v21 = vpop.xlane.xlu0 %2006  ;;  %v2089_v62 = vsel %vm1962_vm0, %v9971_v7, 0.0 }
 0x2be   : > { %7262 = vpow2.f32 %v2053_v58  ;;  %v2025_v11 = vsub.f32 %v9609_v9, %v2007_v21  ;;  %2090 = vadd.xlane.f32.xlu0 %v2089_v62  ;;  %v11816_v58 = vand.u32 4294901760, %v11688_v28  ;;  %v11818_v62 = vand.u32 4294901760, %v11691_v22 }
 0x2bf   : > { %3125 = vmatmul.mubr.f32.gmra.mrb[62].mxu1 %v9647_v53  ;;  %4715 = vmatmul.mubr.f32.gmra.mrb[62].mxu0 %v9647_v53  ;;  %v11817_v53 = vand.u32 4294901760, %v11687_v49  ;;  %v11821_v22 = vand.u32 4294901760, %v11577_v36  ;;  %v11822_v49 = vand.u32 4294901760, %v11578_v51  ;;  %v11827_v36 = vld [vmem:[#allocation69_spill] sm:$0xff] }
 0x2c0   : > { %3227 = vmatprep.mubr.f32.mxu1 %v11604_v1  ;;  %v9980_v46 = vpop.eup %7258  ;;  %v2055_v12 = vmul.f32 1.442695, %v2025_v11  ;;  %4817 = vmatprep.mubr.f32.mxu0 %v11604_v1  ;;  %v11819_v11 = vand.u32 4294901760, %v11690_v50 }
 0x2c1   : > { %v2010_v41 = vpop.xlane.xlu1 %2009  ;;  %v2092_v9 = vsel %vm1962_vm0, %v9980_v46, 0.0  ;;  %v6486_v21 = vpack.c.bf16 %v11817_v53, %v11816_v58  ;;  %v6298_v50 = vpack.c.bf16 %v11822_v49, %v11821_v22  ;;  %v11832_v53 = vand.u32 4294901760, %v11587_v24  ;;  %v11840_v49 = vld [vmem:[#allocation76_spill] sm:$0xff] }
 0x2c2   : > { %v6296_v18 = vpack.c.bf16 %v11819_v11, %v11818_v62  ;;  %7264 = vpow2.f32 %v2055_v12  ;;  %v2026_v16 = vsub.f32 %v9630_v35, %v2010_v41  ;;  %2093 = vadd.xlane.f32.xlu1 %v2092_v9  ;;  %v11824_v12 = vand.u32 4294901760, %v11580_v37  ;;  %v11834_v11 = vld [vmem:[#allocation73_spill] sm:$0xff] }
 0x2c3   : > { %3231 = vmatmul.mubr.f32.vlgmr.msra.gmra.mrb[32].mxu1 %v11820_v14  ;;  %4821 = vmatmul.mubr.f32.vlgmr.msra.gmra.mrb[32].mxu0 %v11820_v14  ;;  %v11823_v14 = vand.u32 4294901760, %v11579_v17  ;;  %v11826_v41 = vand.u32 4294901760, %v11584_v59  ;;  %v11828_v17 = vand.u32 4294901760, %v11581_v3  ;;  %v11829_v37 = vand.u32 4294901760, %v11582_v42 }
 0x2c4   : > { %3236 = vmatprep.mubr.f32.mxu1 %v11604_v1  ;;  %v10001_v2 = vpop.eup %7260  ;;  %v2057_v28 = vmul.f32 1.442695, %v2026_v16  ;;  %4826 = vmatprep.mubr.f32.mxu0 %v11604_v1  ;;  %v11831_v9 = vand.u32 4294901760, %v11586_v34  ;;  %v11836_v34 = vand.u32 4294901760, %v11590_v44  ;;  %v11838_v16 = vand.u32 4294901760, %v11550_v5 }
 0x2c5   : > { %6295 = vmatpush1.bf16.msra.mxu1 %v6294_v55  ;;  %v2095_v35 = vsel %vm1962_vm0, %v10001_v2, 0.0  ;;  %6487 = vmatpush1.bf16.msra.mxu0 %v6486_v21  ;;  %v6488_v30 = vpack.c.bf16 %v11824_v12, %v11823_v14  ;;  %v6300_v55 = vpack.c.bf16 %v11826_v41, %v11825_v29  ;;  %v6490_v52 = vpack.c.bf16 %v11829_v37, %v11828_v17  ;;  %v11845_v12 = vld [vmem:[#allocation77_spill] sm:$0xff]  ;;  %v11850_v17 = vld [vmem:[#allocation26_spill] sm:$0xff] }
 0x2c6   : > { %6297 = vmatprep.subr.bf16.mxu1 %v6296_v18  ;;  %7266 = vpow2.f32 %v2057_v28  ;;  %2096 = vadd.xlane.f32.xlu0 %v2095_v35  ;;  %v11830_v18 = vand.u32 4294901760, %v11585_v13  ;;  %v11833_v21 = vand.u32 4294901760, %v11588_v25  ;;  %v11835_v13 = vand.u32 4294901760, %v11699_v27  ;;  %v11842_v27 = vld [vmem:[#allocation124_spill] sm:$0xff]  ;;  %v11847_v29 = vld [vmem:[#allocation25_spill] sm:$0xff] }
 0x2c7   : > { %3240 = vmatmul.mubr.f32.gmra.mrb[34].mxu1 %v11827_v36  ;;  %4830 = vmatmul.mubr.f32.gmra.mrb[34].mxu0 %v11827_v36  ;;  %v11837_v25 = vand.u32 4294901760, %v11591_v10  ;;  %v11839_v22 = vand.u32 4294901760, %v11553_v40  ;;  %v11843_v10 = vand.u32 4294901760, %v11551_v33  ;;  %v11844_v5 = vand.u32 4294901760, %v11552_v63  ;;  %v11854_v33 = vld [vmem:[#allocation49_spill] sm:$0xff] }
 0x2c8   : > { %3245 = vmatprep.mubr.f32.mxu1 %v11604_v1  ;;  %v10021_v51 = vpop.eup %7262  ;;  %4835 = vmatprep.mubr.f32.mxu0 %v11604_v1  ;;  %v6302_v58 = vpack.c.bf16 %v11831_v9, %v11830_v18  ;;  %v6492_v62 = vpack.c.bf16 %v11833_v21, %v11832_v53  ;;  %v6494_v42 = vpack.c.bf16 %v11836_v34, %v11835_v13  ;;  %v11848_v41 = vand.u32 4294901760, %v11847_v29 }
 0x2c9   : > { %6299 = vmatpush1.bf16.msra.mxu1 %v6298_v50  ;;  %v2098_v59 = vsel %vm1962_vm0, %v10021_v51, 0.0  ;;  %6489 = vmatprep.subr.bf16.mxu0 %v6488_v30  ;;  %v6304_v28 = vpack.c.bf16 %v11838_v16, %v11837_v25  ;;  %v11841_v50 = vand.u32 4294901760, %v11840_v49  ;;  %v6306_v40 = vpack.c.bf16 %v11844_v5, %v11843_v10  ;;  %v11875_v10 = vld [vmem:[#allocation127_spill] sm:$0xff] }
 0x2ca   : > { %6301 = vmatprep.subr.bf16.mxu1 %v6300_v55  ;;  %2099 = vadd.xlane.f32.xlu1 %v2098_v59  ;;  %v11846_v30 = vand.u32 4294901760, %v11845_v12  ;;  %v11849_v36 = vand.u32 4294901760, %v8488_v61  ;;  %v11851_v37 = vand.u32 4294901760, %v11850_v17  ;;  %v11852_v59 = vld [vmem:[#allocation125_spill] sm:$0xff]  ;;  %v11853_v63 = vand.u32 4294901760, %v11709_v4  ;;  %v11876_v5 = vld [vmem:[#allocation87_spill] sm:$0xff] }
 0x2cb   : > { %3249 = vmatmul.mubr.f32.gmra.mrb[36].mxu1 %v11834_v11  ;;  %4839 = vmatmul.mubr.f32.gmra.mrb[36].mxu0 %v11834_v11  ;;  %v6496_v35 = vpack.c.bf16 %v11841_v50, %v11839_v22  ;;  %v11855_v18 = vand.u32 4294901760, %v11854_v33  ;;  %v11856_v61 = vand.u32 4294901760, %v11712_v23  ;;  %v11858_v21 = vand.u32 4294901760, %v11715_v19  ;;  %v11871_v22 = vld [vmem:[#allocation85_spill] sm:$0xff]  ;;  %v11873_v50 = vld [vmem:[#allocation86_spill] sm:$0xff] }
 0x2cc   : > { %3254 = vmatprep.mubr.f32.mxu1 %v11604_v1  ;;  %v10041_v3 = vpop.eup %7264  ;;  %4844 = vmatprep.mubr.f32.mxu0 %v11604_v1  ;;  %v6498_v55 = vpack.c.bf16 %v11848_v41, %v11846_v30  ;;  %v11859_v4 = vand.u32 4294901760, %v11714_v26  ;;  %v11860_v11 = vand.u32 4294901760, %v8879_v39  ;;  %v11861_v13 = vand.u32 4294901760, %v8884_v47  ;;  %v11881_v12 = vld [vmem:[#allocation89_spill] sm:$0xff]  ;;  %v11883_v41 = vld [vmem:[#allocation90_spill] sm:$0xff] }
 0x2cd   : > { %6491 = vmatpush1.bf16.msra.mxu0 %v6490_v52  ;;  %v2101_v24 = vsel %vm1962_vm0, %v10041_v3, 0.0  ;;  %6303 = vmatpush1.bf16.msra.mxu1 %v6302_v58  ;;  %v6308_v52 = vpack.c.bf16 %v11851_v37, %v11849_v36  ;;  %v6500_v9 = vpack.c.bf16 %v11855_v18, %v11853_v63  ;;  %v11857_v58 = vand.u32 4294901760, %v11711_v0  ;;  %v11885_v36 = vld [vmem:[#allocation91_spill] sm:$0xff]  ;;  %v11889_v63 = vld [vmem:[#allocation94_spill] sm:$0xff] }
 0x2ce   : > { %6493 = vmatprep.subr.bf16.mxu0 %v6492_v62  ;;  %2102 = vadd.xlane.f32.xlu0 %v2101_v24  ;;  %v6502_v62 = vpack.c.bf16 %v11859_v4, %v11858_v21  ;;  %v6312_v34 = vpack.c.bf16 %v11861_v13, %v11860_v11  ;;  %v11863_v23 = vand.u32 4294901760, %v11718_v38  ;;  %v11864_v24 = vld [vmem:[#allocation83_spill] sm:$0xff]  ;;  %v11866_v39 = vand.u32 4294901760, %v8897_v54  ;;  %v11869_v38 = vld [vmem:[#allocation84_spill] sm:$0xff]  ;;  %v11896_v4 = vld [vmem:[#allocation97_spill] sm:$0xff] }
 0x2cf   : > { %3258 = vmatmul.mubr.f32.gmra.mrb[38].mxu1 %v11842_v27  ;;  %4848 = vmatmul.mubr.f32.gmra.mrb[38].mxu0 %v11842_v27  ;;  %v6310_v53 = vpack.c.bf16 %v11857_v58, %v11856_v61  ;;  %v11865_v0 = vand.u32 4294901760, %v11864_v24  ;;  %v11867_v47 = vand.u32 4294901760, %v8900_v57  ;;  %v11868_v26 = vand.u32 4294901760, %v8903_v48  ;;  %v11892_v61 = vld [vmem:[#allocation95_spill] sm:$0xff]  ;;  %v11894_v58 = vld [vmem:[#allocation96_spill] sm:$0xff]  ;;  %v11898_v11 = vld [vmem:[#allocation98_spill] sm:$0xff] }
 0x2d0   : > { %3263 = vmatprep.mubr.f32.mxu1 %v11604_v1  ;;  %v10061_v44 = vpop.eup %7266  ;;  %4853 = vmatprep.mubr.f32.mxu0 %v11604_v1  ;;  %v11870_v16 = vand.u32 4294901760, %v11869_v38  ;;  %v11872_v49 = vand.u32 4294901760, %v11871_v22  ;;  %v11877_v54 = vand.u32 4294901760, %v11876_v5  ;;  %v11880_v48 = vand.u32 4294901760, %v8921_v20  ;;  %v11902_v24 = vld [vmem:[#allocation100_spill] sm:$0xff]  ;;  %v11908_v38 = vld [vmem:[#allocation131_spill] sm:$0xff] }
 0x2d1   : > { %6495 = vmatpush1.bf16.msra.mxu0 %v6494_v42  ;;  %v2104_v14 = vsel %vm1962_vm0, %v10061_v44, 0.0  ;;  %6305 = vmatprep.subr.bf16.mxu1 %v6304_v28  ;;  %v11862_v42 = vld [vmem:[#allocation126_spill] sm:$0xff]  ;;  %v6504_v25 = vpack.c.bf16 %v11865_v0, %v11863_v23  ;;  %v6314_v19 = vpack.c.bf16 %v11867_v47, %v11866_v39  ;;  %v11882_v30 = vand.u32 4294901760, %v11881_v12  ;;  %v11904_v39 = vld [vmem:[#allocation129_spill] sm:$0xff]  ;;  %v11905_v47 = vld [vmem:[#allocation27_spill] sm:$0xff] }
 0x2d2   : > { %6497 = vmatprep.subr.bf16.mxu0 %v6496_v35  ;;  %2105 = vadd.xlane.f32.xlu1 %v2104_v14  ;;  %v6506_v28 = vpack.c.bf16 %v11870_v16, %v11868_v26  ;;  %v11874_v35 = vand.u32 4294901760, %v11873_v50  ;;  %v11886_v17 = vand.u32 4294901760, %v11885_v36  ;;  %v11890_v33 = vand.u32 4294901760, %v11889_v63  ;;  %v11907_v26 = vld [vmem:[#allocation28_spill] sm:$0xff]  ;;  %v11909_v16 = vld [vmem:[#allocation133_spill] sm:$0xff]  ;;  %v11933_v63 = vld [vmem:[#allocation103_spill] sm:$0xff] }
 0x2d3   : > { %3267 = vmatmul.mubr.f32.gmra.mrb[40].mxu1 %v11852_v59  ;;  %4857 = vmatmul.mubr.f32.gmra.mrb[40].mxu0 %v11852_v59  ;;  %v6318_v29 = vpack.c.bf16 %v11882_v30, %v11880_v48  ;;  %v11893_v20 = vand.u32 4294901760, %v11892_v61  ;;  %v11899_v13 = vand.u32 4294901760, %v11898_v11  ;;  %v11903_v0 = vand.u32 4294901760, %v11902_v24  ;;  %v11911_v22 = vld [vmem:[#allocation56_spill] sm:$0xff]  ;;  %v11913_v50 = vld [vmem:[#allocation137_spill] sm:$0xff]  ;;  %v11949_v24 = vld [vmem:[#allocation111_spill] sm:$0xff] }
 0x2d4   : > { %3272 = vmatprep.mubr.f32.mxu1 %v11604_v1  ;;  %4862 = vmatprep.mubr.f32.mxu0 %v11604_v1  ;;  %v6316_v27 = vpack.c.bf16 %v11874_v35, %v11872_v49  ;;  %v11912_v49 = vld [vmem:[#allocation136_spill] sm:$0xff]  ;;  %v11914_v35 = vld [vmem:[#allocation62_spill] sm:$0xff]  ;;  %v11917_v5 = vld [vmem:[#allocation37_spill] sm:$0xff] }
 0x2d5   : > { %6307 = vmatpush1.bf16.msra.mxu1 %v6306_v40  ;;  %6499 = vmatpush1.bf16.msra.mxu0 %v6498_v55  ;;  %v11878_v40 = vld [vmem:[#allocation88_spill] sm:$0xff]  ;;  %v11884_v55 = vand.u32 4294901760, %v11883_v41  ;;  %v11922_v48 = vld [vmem:[#allocation29_spill] sm:$0xff] }
 0x2d6   : > { %6309 = vmatprep.subr.bf16.mxu1 %v6308_v52  ;;  %6501 = vmatprep.subr.bf16.mxu0 %v6500_v9  ;;  %v11879_v57 = vand.u32 4294901760, %v11878_v40  ;;  %v11887_v52 = vld [vmem:[#allocation93_spill] sm:$0xff]  ;;  %v11891_v9 = vld [vmem:[#allocation128_spill] sm:$0xff]  ;;  %v11919_v40 = vld [vmem:[#allocation19_spill] sm:$0xff] }
 0x2d7   : > { %3276 = vmatmul.mubr.f32.gmra.mrb[42].mxu1 %v11862_v42  ;;  %4866 = vmatmul.mubr.f32.gmra.mrb[42].mxu0 %v11862_v42  ;;  %v6510_v37 = vpack.c.bf16 %v11886_v17, %v11884_v55  ;;  %v11888_v59 = vand.u32 4294901760, %v11887_v52  ;;  %v11900_v42 = vld [vmem:[#allocation99_spill] sm:$0xff]  ;;  %v11923_v12 = vld [vmem:[#allocation20_spill] sm:$0xff]  ;;  %v11924_v30 = vld [vmem:[#allocation53_spill] sm:$0xff] }
 0x2d8   : > { %3281 = vmatprep.mubr.f32.mxu1 %v11604_v1  ;;  %4871 = vmatprep.mubr.f32.mxu0 %v11604_v1  ;;  %v6508_v14 = vpack.c.bf16 %v11879_v57, %v11877_v54  ;;  %v11901_v23 = vand.u32 4294901760, %v11900_v42  ;;  %v11918_v54 = vld [vmem:[#allocation66_spill] sm:$0xff]  ;;  %v11920_v57 = vld [vmem:[#allocation52_spill] sm:$0xff]  ;;  %v11927_v55 = vld [vmem:[#allocation35_spill] sm:$0xff] }
 0x2d9   : > { %6311 = vmatpush1.bf16.msra.mxu1 %v6310_v53  ;;  %6503 = vmatpush1.bf16.msra.mxu0 %v6502_v62  ;;  %v6320_v18 = vpack.c.bf16 %v11890_v33, %v11888_v59  ;;  %v11895_v53 = vand.u32 4294901760, %v11894_v58  ;;  %v11897_v62 = vand.u32 4294901760, %v11896_v4  ;;  %v11926_v41 = vld [vmem:[#allocation60_spill] sm:$0xff]  ;;  %v11931_v52 = vld [vmem:[#allocation65_spill] sm:$0xff]  ;;  %v11939_v58 = vld [vmem:[#allocation39_spill] sm:$0xff] }
 0x2da   : > { %6313 = vmatprep.subr.bf16.mxu1 %v6312_v34  ;;  %6505 = vmatprep.subr.bf16.mxu0 %v6504_v25  ;;  %v6514_v25 = vpack.c.bf16 %v11903_v0, %v11901_v23  ;;  %v11928_v36 = vld [vmem:[#allocation72_spill] sm:$0xff]  ;;  %v11937_v61 = vld [vmem:[#allocation41_spill] sm:$0xff]  ;;  %v11947_v42 = vld [vmem:[#allocation18_spill] sm:$0xff] }
 0x2db   : > { %3285 = vmatmul.mubr.f32.gmra.mrb[44].mxu1 %v11875_v10  ;;  %4875 = vmatmul.mubr.f32.gmra.mrb[44].mxu0 %v11875_v10  ;;  %v6512_v21 = vpack.c.bf16 %v11895_v53, %v11893_v20  ;;  %v6322_v34 = vpack.c.bf16 %v11899_v13, %v11897_v62  ;;  %v11916_v10 = vld [vmem:[#allocation34_spill] sm:$0xff]  ;;  %v11929_v17 = vld [vmem:[#allocation32_spill] sm:$0xff]  ;;  %v11938_v20 = vld [vmem:[#allocation107_spill] sm:$0xff] }
 0x2dc   : > { %3290 = vmatprep.mubr.f32.mxu1 %v11604_v1  ;;  %4880 = vmatprep.mubr.f32.mxu0 %v11604_v1  ;;  %v11932_v59 = vld [vmem:[#allocation36_spill] sm:$0xff]  ;;  %v11940_v53 = vld [vmem:[#allocation42_spill] sm:$0xff]  ;;  %v11943_v62 = vld [vmem:[#allocation23_spill] sm:$0xff] }
 0x2dd   : > { %6315 = vmatpush1.bf16.msra.mxu1 %v6314_v19  ;;  %6507 = vmatpush1.bf16.msra.mxu0 %v6506_v28  ;;  %v11906_v19 = vld [vmem:[#allocation130_spill] sm:$0xff]  ;;  %v11910_v28 = vld [vmem:[#allocation135_spill] sm:$0xff]  ;;  %v11934_v33 = vld [vmem:[#allocation40_spill] sm:$0xff] }
 0x2de   : > { %6317 = vmatprep.subr.bf16.mxu1 %v6316_v27  ;;  %6509 = vmatprep.subr.bf16.mxu0 %v6508_v14  ;;  %v11915_v27 = vld [vmem:[#allocation30_spill] sm:$0xff]  ;;  %v11921_v14 = vld [vmem:[#allocation31_spill] sm:$0xff]  ;;  %v11942_v4 = vld [vmem:[#allocation44_spill] sm:$0xff] }
 0x2df   : > { %3294 = vmatmul.mubr.f32.gmra.mrb[46].mxu1 %v11891_v9  ;;  %4884 = vmatmul.mubr.f32.gmra.mrb[46].mxu0 %v11891_v9  ;;  %v11936_v9 = vld [vmem:[#allocation38_spill] sm:$0xff]  ;;  %v11944_v11 = vld [vmem:[#allocation45_spill] sm:$0xff] }
 0x2e0   : > { %3299 = vmatprep.mubr.f32.mxu1 %v11604_v1  ;;  %4889 = vmatprep.mubr.f32.mxu0 %v11604_v1  ;;  %v11945_v13 = vld [vmem:[#allocation46_spill] sm:$0xff]  ;;  %v11948_v23 = vld [vmem:[#allocation109_spill] sm:$0xff] }
 0x2e1   : > { %6319 = vmatpush1.bf16.msra.mxu1 %v6318_v29  ;;  %6511 = vmatpush1.bf16.msra.mxu0 %v6510_v37  ;;  %v11925_v29 = vld [vmem:[#allocation55_spill] sm:$0xff]  ;;  %v11930_v37 = vld [vmem:[#allocation64_spill] sm:$0xff] }
 0x2e2   : > { %6321 = vmatprep.subr.bf16.mxu1 %v6320_v18  ;;  %6513 = vmatprep.subr.bf16.mxu0 %v6512_v21  ;;  %v11935_v18 = vld [vmem:[#allocation33_spill] sm:$0xff]  ;;  %v11941_v21 = vld [vmem:[#allocation43_spill] sm:$0xff] }
 0x2e3   : > { %3303 = vmatmul.mubr.f32.gmra.mrb[48].mxu1 %v11904_v39  ;;  %4893 = vmatmul.mubr.f32.gmra.mrb[48].mxu0 %v11904_v39  ;;  %v11952_v39 = vld [vmem:[#allocation120_spill] sm:$0xff] }
 0x2e4   : > { %3308 = vmatprep.mubr.f32.mxu1 %v11604_v1  ;;  %4898 = vmatprep.mubr.f32.mxu0 %v11604_v1 }
 0x2e5   : > { %6323 = vmatpush1.bf16.msra.mxu1 %v6322_v34  ;;  %6515 = vmatpush1.bf16.msra.mxu0 %v6514_v25  ;;  %v11946_v34 = vld [vmem:[#allocation47_spill] sm:$0xff] }
 0x2e6   : > { %6325 = vmatprep.subr.bf16.mxu1 %v11905_v47  ;;  %6517 = vmatprep.subr.bf16.mxu0 %v11907_v26  ;;  %v11953_v47 = vld [vmem:[#allocation54_spill] sm:$0xff]  ;;  %v11954_v26 = vld [vmem:[#allocation132_spill] sm:$0xff] }
 0x2e7   : > { %3312 = vmatmul.mubr.f32.gmra.mrb[50].mxu1 %v11906_v19  ;;  %4902 = vmatmul.mubr.f32.gmra.mrb[50].mxu0 %v11906_v19 }
 0x2e8   : > { %3317 = vmatprep.mubr.f32.mxu1 %v11604_v1  ;;  %4907 = vmatprep.mubr.f32.mxu0 %v11604_v1 }
 0x2eb   : > { %3321 = vmatmul.mubr.f32.gmra.mrb[52].mxu1 %v11908_v38  ;;  %4911 = vmatmul.mubr.f32.gmra.mrb[52].mxu0 %v11908_v38 }
 0x2ec   : > { %3326 = vmatprep.mubr.f32.mxu1 %v11604_v1  ;;  %4916 = vmatprep.mubr.f32.mxu0 %v11604_v1 }
 0x2ef   : > { %3330 = vmatmul.mubr.f32.gmra.mrb[54].mxu1 %v11909_v16  ;;  %4920 = vmatmul.mubr.f32.gmra.mrb[54].mxu0 %v11909_v16 }
 0x2f0   : > { %3335 = vmatprep.mubr.f32.mxu1 %v11604_v1  ;;  %4925 = vmatprep.mubr.f32.mxu0 %v11604_v1 }
 0x2f3   : > { %3339 = vmatmul.mubr.f32.gmra.mrb[56].mxu1 %v11910_v28  ;;  %4929 = vmatmul.mubr.f32.gmra.mrb[56].mxu0 %v11910_v28  ;;  %v7470_v28 = vmov 2  }
 0x2f4   : > { %3344 = vmatprep.mubr.f32.mxu1 %v11604_v1  ;;  %4934 = vmatprep.mubr.f32.mxu0 %v11604_v1 }
 0x2f7   : > { %3348 = vmatmul.mubr.f32.gmra.mrb[58].mxu1 %v11911_v22  ;;  %4938 = vmatmul.mubr.f32.gmra.mrb[58].mxu0 %v11911_v22  ;;  %v7471_v22 = vmov 3  }
 0x2f8   : > { %3353 = vmatprep.mubr.f32.mxu1 %v11604_v1  ;;  %4943 = vmatprep.mubr.f32.mxu0 %v11604_v1 }
 0x2fb   : > { %3357 = vmatmul.mubr.f32.gmra.mrb[60].mxu1 %v11912_v49  ;;  %4947 = vmatmul.mubr.f32.gmra.mrb[60].mxu0 %v11912_v49  ;;  %v11955_v49 = vld [vmem:[#allocation134_spill] sm:$0xff] }
 0x2fc   : > { %3362 = vmatprep.mubr.f32.mxu1 %v11604_v1  ;;  %4952 = vmatprep.mubr.f32.mxu0 %v11604_v1 }
 0x2ff   : > { %3366 = vmatmul.mubr.f32.gmra.mrb[62].mxu1 %v11913_v50  ;;  %4956 = vmatmul.mubr.f32.gmra.mrb[62].mxu0 %v11913_v50 }
 0x300   : > { %3532 = vmatprep.mubr.f32.mxu1 %v11604_v1  ;;  %5122 = vmatprep.mubr.f32.mxu0 %v11604_v1 }
 0x303   : > { %3534 = vmatmul.mubr.f32.vlgmr.msra.gmra.mrb[32].mxu1 %v11914_v35  ;;  %5124 = vmatmul.mubr.f32.vlgmr.msra.gmra.mrb[32].mxu0 %v11914_v35 }
 0x304   : > { %3539 = vmatprep.mubr.f32.mxu1 %v11604_v1  ;;  %5129 = vmatprep.mubr.f32.mxu0 %v11604_v1 }
 0x305   : > { %6327 = vmatpush1.bf16.msra.mxu1 %v11915_v27  ;;  %6519 = vmatpush1.bf16.msra.mxu0 %v11916_v10  ;;  %v11956_v10 = vmov 1  }
 0x306   : > { %6329 = vmatprep.subr.bf16.mxu1 %v11917_v5  ;;  %6521 = vmatprep.subr.bf16.mxu0 %v11919_v40  ;;  %v11957_v5 = vld [vmem:[#allocation21_spill] sm:$0xff]  ;;  %v11958_v40 = vld [vmem:[#allocation51_spill] sm:$0xff] }
 0x307   : > { %3541 = vmatmul.mubr.f32.gmra.mrb[34].mxu1 %v11918_v54  ;;  %5131 = vmatmul.mubr.f32.gmra.mrb[34].mxu0 %v11918_v54 }
 0x308   : > { %3546 = vmatprep.mubr.f32.mxu1 %v11604_v1  ;;  %5136 = vmatprep.mubr.f32.mxu0 %v11604_v1 }
 0x309   : > { %6331 = vmatpush1.bf16.msra.mxu1 %v11920_v57  ;;  %6523 = vmatpush1.bf16.msra.mxu0 %v11921_v14  ;;  %v11959_v14 = vmov 0  }
 0x30a   : > { %6333 = vmatprep.subr.bf16.mxu1 %v11922_v48  ;;  %6525 = vmatprep.subr.bf16.mxu0 %v11924_v30  ;;  %v11960_v48 = vld [vmem:[#allocation13_spill] sm:$0xff] }
 0x30b   : > { %3548 = vmatmul.mubr.f32.gmra.mrb[36].mxu1 %v11923_v12  ;;  %5138 = vmatmul.mubr.f32.gmra.mrb[36].mxu0 %v11923_v12 }
 0x30c   : > { %3553 = vmatprep.mubr.f32.mxu1 %v11604_v1  ;;  %5143 = vmatprep.mubr.f32.mxu0 %v11604_v1 }
 0x30d   : > { %6335 = vmatpush1.bf16.msra.mxu1 %v11925_v29  ;;  %6527 = vmatpush1.bf16.msra.mxu0 %v11926_v41 }
 0x30e   : > { %6337 = vmatprep.subr.bf16.mxu1 %v11927_v55  ;;  %6529 = vmatprep.subr.bf16.mxu0 %v11929_v17  ;;  %v11961_v55 = vld [vmem:[#allocation14_spill] sm:$0xff] }
 0x30f   : > { %3555 = vmatmul.mubr.f32.gmra.mrb[38].mxu1 %v11928_v36  ;;  %5145 = vmatmul.mubr.f32.gmra.mrb[38].mxu0 %v11928_v36 }
 0x310   : > { %3560 = vmatprep.mubr.f32.mxu1 %v11604_v1  ;;  %5150 = vmatprep.mubr.f32.mxu0 %v11604_v1 }
 0x311   : > { %6339 = vmatpush1.bf16.msra.mxu1 %v11930_v37  ;;  %6531 = vmatpush1.bf16.msra.mxu0 %v11931_v52  ;;  %v11962_v37 = vld [vmem:[#allocation57_spill] sm:$0xff] }
 0x312   : > { %6341 = vmatprep.subr.bf16.mxu1 %v11932_v59  ;;  %6533 = vmatprep.subr.bf16.mxu0 %v11934_v33 }
 0x313   : > { %3562 = vmatmul.mubr.f32.gmra.mrb[40].mxu1 %v11933_v63  ;;  %5152 = vmatmul.mubr.f32.gmra.mrb[40].mxu0 %v11933_v63 }
 0x314   : > { %3567 = vmatprep.mubr.f32.mxu1 %v11604_v1  ;;  %5157 = vmatprep.mubr.f32.mxu0 %v11604_v1 }
 0x315   : > { %6343 = vmatpush1.bf16.msra.mxu1 %v11935_v18  ;;  %6535 = vmatpush1.bf16.msra.mxu0 %v11936_v9 }
 0x316   : > { %6345 = vmatprep.subr.bf16.mxu1 %v11937_v61  ;;  %6537 = vmatprep.subr.bf16.mxu0 %v11939_v58 }
 0x317   : > { %3569 = vmatmul.mubr.f32.gmra.mrb[42].mxu1 %v11938_v20  ;;  %5159 = vmatmul.mubr.f32.gmra.mrb[42].mxu0 %v11938_v20 }
 0x318   : > { %3574 = vmatprep.mubr.f32.mxu1 %v11604_v1  ;;  %5164 = vmatprep.mubr.f32.mxu0 %v11604_v1 }
 0x319   : > { %6347 = vmatpush1.bf16.msra.mxu1 %v11940_v53  ;;  %6539 = vmatpush1.bf16.msra.mxu0 %v11941_v21 }
 0x31a   : > { %6349 = vmatprep.subr.bf16.mxu1 %v11942_v4  ;;  %6541 = vmatprep.subr.bf16.mxu0 %v11944_v11 }
 0x31b   : > { %3576 = vmatmul.mubr.f32.gmra.mrb[44].mxu1 %v11943_v62  ;;  %5166 = vmatmul.mubr.f32.gmra.mrb[44].mxu0 %v11943_v62 }
 0x31c   : > { %3581 = vmatprep.mubr.f32.mxu1 %v11604_v1  ;;  %5171 = vmatprep.mubr.f32.mxu0 %v11604_v1 }
 0x31d   : > { %6351 = vmatpush1.bf16.msra.mxu1 %v11945_v13  ;;  %6543 = vmatpush1.bf16.msra.mxu0 %v11946_v34 }
 0x31e   : > { %6353 = vmatprep.subr.bf16.mxu1 %v11947_v42  ;;  %6545 = vmatprep.subr.bf16.mxu0 %v11795_v45  ;;  %v11950_v45 = vld [vmem:[#allocation115_spill] sm:$0xff] }
 0x31f   : > { %3583 = vmatmul.mubr.f32.gmra.mrb[46].mxu1 %v11948_v23  ;;  %5173 = vmatmul.mubr.f32.gmra.mrb[46].mxu0 %v11948_v23 }
 0x320   : > { %3588 = vmatprep.mubr.f32.mxu1 %v11604_v1  ;;  %5178 = vmatprep.mubr.f32.mxu0 %v11604_v1 }
 0x321   : > { %6355 = vmatpush1.bf16.msra.mxu1 %v11796_v60  ;;  %6547 = vmatpush1.bf16.msra.mxu0 %v11804_v6  ;;  %v11951_v6 = vld [vmem:[#allocation117_spill] sm:$0xff] }
 0x323   : > { %3590 = vmatmul.mubr.f32.gmra.mrb[48].mxu1 %v11949_v24  ;;  %5180 = vmatmul.mubr.f32.gmra.mrb[48].mxu0 %v11949_v24  ;;  %v2061_v0 = vpop.xlane.xlu0 %2060 }
 0x324   : > { %3595 = vmatprep.mubr.f32.mxu1 %v11604_v1  ;;  %7268 = vrcp.f32 %v2061_v0  ;;  %5185 = vmatprep.mubr.f32.mxu0 %v11604_v1 }
 0x327   : > { %3597 = vmatmul.mubr.f32.gmra.mrb[50].mxu1 %v11950_v45  ;;  %5187 = vmatmul.mubr.f32.gmra.mrb[50].mxu0 %v11950_v45  ;;  %v2064_v60 = vpop.xlane.xlu1 %2063 }
 0x328   : > { %3602 = vmatprep.mubr.f32.mxu1 %v11604_v1  ;;  %5192 = vmatprep.mubr.f32.mxu0 %v11604_v1  ;;  %7270 = vrcp.f32 %v2064_v60 }
 0x32b   : > { %3604 = vmatmul.mubr.f32.gmra.mrb[52].mxu1 %v11951_v6  ;;  %5194 = vmatmul.mubr.f32.gmra.mrb[52].mxu0 %v11951_v6  ;;  %v2067_v38 = vpop.xlane.xlu0 %2066 }
 0x32c   : > { %3609 = vmatprep.mubr.f32.mxu1 %v11604_v1  ;;  %5199 = vmatprep.mubr.f32.mxu0 %v11604_v1  ;;  %7272 = vrcp.f32 %v2067_v38 }
 0x32e   : > { %v7269_v25 = vpop.eup %7268 }
 0x32f   : > { %3611 = vmatmul.mubr.f32.gmra.mrb[54].mxu1 %v11952_v39  ;;  %5201 = vmatmul.mubr.f32.gmra.mrb[54].mxu0 %v11952_v39  ;;  %v2123_v19 = vmul.f32 %v7269_v25, %v11953_v47  ;;  %v2070_v16 = vpop.xlane.xlu1 %2069 }
 0x330   : > { %3616 = vmatprep.mubr.f32.mxu1 %v11604_v1  ;;  %5206 = vmatprep.mubr.f32.mxu0 %v11604_v1  ;;  %7274 = vrcp.f32 %v2070_v16 }
 0x331   : > { %5446 = vperm.xlu0 %7172, %v2123_v19   ;;  %5541 = vperm.xlu1 %7173, %v2123_v19  }
 0x332   : > { %v7271_v50 = vpop.eup %7270 }
 0x333   : > { %3618 = vmatmul.mubr.f32.gmra.mrb[56].mxu1 %v11954_v26  ;;  %5208 = vmatmul.mubr.f32.gmra.mrb[56].mxu0 %v11954_v26  ;;  %v2073_v27 = vpop.xlane.xlu0 %2072  ;;  %v2124_v57 = vmul.f32 %v7271_v50, %v11958_v40 }
 0x334   : > { %3623 = vmatprep.mubr.f32.mxu1 %v11604_v1  ;;  %5213 = vmatprep.mubr.f32.mxu0 %v11604_v1  ;;  %7276 = vrcp.f32 %v2073_v27 }
 0x335   : > { %7174 = vset.pattern.permute.xlu0 %v7470_v28  ;;  %7175 = vset.pattern.permute.xlu1 %v7471_v22 }
 0x336   : > { %5637 = vperm.xlu0 %7174, %v2123_v19   ;;  %5733 = vperm.xlu1 %7175, %v2123_v19   ;;  %v7273_v30 = vpop.eup %7272 }
 0x337   : > { %3625 = vmatmul.mubr.f32.gmra.mrb[58].mxu1 %v11955_v49  ;;  %5215 = vmatmul.mubr.f32.gmra.mrb[58].mxu0 %v11955_v49  ;;  %v2076_v41 = vpop.xlane.xlu1 %2075  ;;  %v2125_v17 = vmul.f32 %v7273_v30, %v11961_v55 }
 0x338   : > { %3630 = vmatprep.mubr.f32.mxu1 %v11604_v1  ;;  %5220 = vmatprep.mubr.f32.mxu0 %v11604_v1  ;;  %7278 = vrcp.f32 %v2076_v41 }
 0x33a   : > { %7177 = vset.pattern.permute.xlu0 %v11956_v10  ;;  %7176 = vset.pattern.permute.xlu1 %v11959_v14  ;;  %v7275_v29 = vpop.eup %7274 }
 0x33b   : > { %3632 = vmatmul.mubr.f32.gmra.mrb[60].mxu1 %v11957_v5  ;;  %5222 = vmatmul.mubr.f32.gmra.mrb[60].mxu0 %v11957_v5  ;;  %v10296_v52 = vmul.f32 %v7275_v29, %v11962_v37 }
 0x33c   : > { %5545 = vperm.xlu0 %7177, %v2124_v57   ;;  %5451 = vperm.xlu1 %7176, %v2124_v57  }
 0x33d   : > { %3637 = vmatprep.mubr.f32.mxu1 %v11604_v1  ;;  %5227 = vmatprep.mubr.f32.mxu0 %v11604_v1 }
 0x33e   : > { %v7277_v59 = vpop.eup %7276 }
 0x33f   : > { %3639 = vmatmul.mubr.f32.gmra.mrb[62].mxu1 %v11960_v48  ;;  %5229 = vmatmul.mubr.f32.gmra.mrb[62].mxu0 %v11960_v48  ;;  %v10308_v33 = vmul.f32 %v7277_v59, %v9914_v8  ;;  %v2244_v59 = vlaneseq }
 0x340   : > { %3741 = vmatprep.mubr.f32.mxu1 %v11604_v1  ;;  %7179 = vset.pattern.permute.xlu0 %v7471_v22 }
 0x341   : > { %7178 = vset.pattern.permute.xlu1 %v7470_v28  ;;  %5737 = vperm.xlu0 %7179, %v2124_v57  }
 0x342   : > { %5641 = vperm.xlu1 %7178, %v2124_v57   ;;  %5331 = vmatprep.mubr.f32.mxu0 %v11604_v1  ;;  %v7279_v8 = vpop.eup %7278 }
 0x343   : > { %3743 = vmatmul.mubr.f32.vlgmr.msra.gmra.mrb[32].mxu1 %v11914_v35  ;;  %5333 = vmatmul.mubr.f32.vlgmr.msra.gmra.mrb[32].mxu0 %v11914_v35  ;;  %v2079_v35 = vpop.xlane.xlu0 %2078 }
 0x344   : > { %3748 = vmatprep.mubr.f32.mxu1 %v11604_v1  ;;  %5338 = vmatprep.mubr.f32.mxu0 %v11604_v1  ;;  %7280 = vrcp.f32 %v2079_v35 }
 0x345   : > { %7186 = vset.pattern.permute.xlu0 %v7470_v28 }
 0x346   : > { %7180 = vset.pattern.permute.xlu1 %v11959_v14  ;;  %5649 = vperm.xlu0 %7186, %v10296_v52  }
 0x347   : > { %5456 = vperm.xlu1 %7180, %v2125_v17   ;;  %3750 = vmatmul.mubr.f32.gmra.mrb[34].mxu1 %v11918_v54 }
 0x348   : > { %5340 = vmatmul.mubr.f32.gmra.mrb[34].mxu0 %v11918_v54  ;;  %3755 = vmatprep.mubr.f32.mxu1 %v11604_v1  ;;  %v2082_v54 = vpop.xlane.xlu1 %2081 }
 0x349   : > { %5345 = vmatprep.mubr.f32.mxu0 %v11604_v1  ;;  %7282 = vrcp.f32 %v2082_v54 }
 0x34a   : > { %7189 = vset.pattern.permute.xlu0 %v11956_v10 }
 0x34b   : > { %7181 = vset.pattern.permute.xlu1 %v11956_v10  ;;  %3757 = vmatmul.mubr.f32.gmra.mrb[36].mxu1 %v11923_v12 }
 0x34c   : > { %5347 = vmatmul.mubr.f32.gmra.mrb[36].mxu0 %v11923_v12  ;;  %5549 = vperm.xlu1 %7181, %v2125_v17   ;;  %v10325_v12 = vmul.f32 %v7279_v8, %v9924_v32  ;;  %v2085_v32 = vpop.xlane.xlu0 %2084  ;;  %v2088_v18 = vpop.xlane.xlu1 %2087  ;;  %v2245_v8 = vshrl.u32 %v2244_v59, 7 }
 0x34d   : > { %5557 = vperm.xlu0 %7189, %v10308_v33   ;;  %3762 = vmatprep.mubr.f32.mxu1 %v11604_v1  ;;  %7284 = vrcp.f32 %v2085_v32  ;;  %v2242_v32 = vld [vmem:[%s10771_s5] sm:$0xf] }
 0x34e   : > { %5352 = vmatprep.mubr.f32.mxu0 %v11604_v1  ;;  %7286 = vrcp.f32 %v2088_v18  ;;  %v2258_v18 = vsub.s32 3, %v2245_v8 }
 0x34f   : > { %3764 = vmatmul.mubr.f32.gmra.mrb[38].mxu1 %v11928_v36 }
 0x350   : > { %5354 = vmatmul.mubr.f32.gmra.mrb[38].mxu0 %v11928_v36  ;;  %7182 = vset.pattern.permute.xlu1 %v7470_v28  ;;  %v7281_v36 = vpop.eup %7280  ;;  %v2094_v53 = vpop.xlane.xlu1 %2093 }
 0x351   : > { %7191 = vset.pattern.permute.xlu0 %v7471_v22  ;;  %5645 = vperm.xlu1 %7182, %v2125_v17  }
 0x352   : > { %5749 = vperm.xlu0 %7191, %v10308_v33   ;;  %3769 = vmatprep.mubr.f32.mxu1 %v11604_v1 }
 0x353   : > { %5359 = vmatprep.mubr.f32.mxu0 %v11604_v1  ;;  %3771 = vmatmul.mubr.f32.gmra.mrb[40].mxu1 %v11933_v63 }
 0x354   : > { %5361 = vmatmul.mubr.f32.gmra.mrb[40].mxu0 %v11933_v63  ;;  %3776 = vmatprep.mubr.f32.mxu1 %v11604_v1  ;;  %v10337_v63 = vmul.f32 %v7281_v36, %v9933_v15  ;;  %v7283_v15 = vpop.eup %7282  ;;  %v2246_v36 = vsub.s32 0, %v2245_v8 }
 0x355   : > { %5366 = vmatprep.mubr.f32.mxu0 %v11604_v1  ;;  %7183 = vset.pattern.permute.xlu1 %v7471_v22  ;;  %v10358_v9 = vmul.f32 %v7283_v15, %v9942_v31  ;;  %v2250_v15 = vsub.s32 1, %v2245_v8 }
 0x356   : > { %7194 = vset.pattern.permute.xlu0 %v7470_v28  ;;  %5741 = vperm.xlu1 %7183, %v2125_v17  }
 0x357   : > { %5657 = vperm.xlu0 %7194, %v10325_v12   ;;  %3778 = vmatmul.mubr.f32.gmra.mrb[42].mxu1 %v11938_v20  ;;  %v7285_v61 = vpop.eup %7284 }
 0x358   : > { %5368 = vmatmul.mubr.f32.gmra.mrb[42].mxu0 %v11938_v20  ;;  %3783 = vmatprep.mubr.f32.mxu1 %v11604_v1  ;;  %v10369_v31 = vmul.f32 %v7285_v61, %v9953_v56  ;;  %v2091_v56 = vpop.xlane.xlu0 %2090  ;;  %v7287_v20 = vpop.eup %7286 }
 0x359   : > { %5373 = vmatprep.mubr.f32.mxu0 %v11604_v1  ;;  %7288 = vrcp.f32 %v2091_v56  ;;  %v10392_v58 = vmul.f32 %v7287_v20, %v9962_v43  ;;  %v10555_v20 = vrot.slane %v2242_v32, %v2250_v15 }
 0x35a   : > { %7184 = vset.pattern.permute.xlu1 %v11959_v14  ;;  %7290 = vrcp.f32 %v2094_v53  ;;  %v10557_v53 = vrot.slane %v2242_v32, %v2258_v18 }
 0x35b   : > { %7197 = vset.pattern.permute.xlu0 %v11956_v10  ;;  %5461 = vperm.xlu1 %7184, %v10296_v52  }
 0x35c   : > { %5565 = vperm.xlu0 %7197, %v10337_v63   ;;  %3785 = vmatmul.mubr.f32.gmra.mrb[44].mxu1 %v11943_v62  ;;  %v2097_v4 = vpop.xlane.xlu0 %2096 }
 0x35d   : > { %5375 = vmatmul.mubr.f32.gmra.mrb[44].mxu0 %v11943_v62  ;;  %3790 = vmatprep.mubr.f32.mxu1 %v11604_v1  ;;  %7292 = vrcp.f32 %v2097_v4  ;;  %v2100_v62 = vpop.xlane.xlu1 %2099 }
 0x35e   : > { %5380 = vmatprep.mubr.f32.mxu0 %v11604_v1  ;;  %7294 = vrcp.f32 %v2100_v62 }
 0x35f   : > { %7185 = vset.pattern.permute.xlu1 %v11956_v10 }
 0x360   : > { %7199 = vset.pattern.permute.xlu0 %v7471_v22  ;;  %3792 = vmatmul.mubr.f32.gmra.mrb[46].mxu1 %v11948_v23  ;;  %v2103_v13 = vpop.xlane.xlu0 %2102 }
 0x361   : > { %5382 = vmatmul.mubr.f32.gmra.mrb[46].mxu0 %v11948_v23  ;;  %5553 = vperm.xlu1 %7185, %v10296_v52   ;;  %7296 = vrcp.f32 %v2103_v13  ;;  %v2106_v42 = vpop.xlane.xlu1 %2105 }
 0x362   : > { %5757 = vperm.xlu0 %7199, %v10337_v63   ;;  %3797 = vmatprep.mubr.f32.mxu1 %v11604_v1  ;;  %7298 = vrcp.f32 %v2106_v42 }
 0x363   : > { %5387 = vmatprep.mubr.f32.mxu0 %v11604_v1  ;;  %v7289_v43 = vpop.eup %7288 }
 0x364   : > { %3799 = vmatmul.mubr.f32.gmra.mrb[48].mxu1 %v11949_v24  ;;  %v10411_v21 = vmul.f32 %v7289_v43, %v9971_v7  ;;  %v7291_v7 = vpop.eup %7290 }
 0x365   : > { %5389 = vmatmul.mubr.f32.gmra.mrb[48].mxu0 %v11949_v24  ;;  %7187 = vset.pattern.permute.xlu1 %v7471_v22 }
 0x366   : > { %7202 = vset.pattern.permute.xlu0 %v7470_v28  ;;  %5745 = vperm.xlu1 %7187, %v10296_v52  }
 0x367   : > { %5665 = vperm.xlu0 %7202, %v10358_v9   ;;  %3804 = vmatprep.mubr.f32.mxu1 %v11604_v1  ;;  %v7293_v11 = vpop.eup %7292 }
 0x368   : > { %5394 = vmatprep.mubr.f32.mxu0 %v11604_v1  ;;  %3806 = vmatmul.mubr.f32.gmra.mrb[50].mxu1 %v11950_v45  ;;  %v7295_v34 = vpop.eup %7294 }
 0x369   : > { %5396 = vmatmul.mubr.f32.gmra.mrb[50].mxu0 %v11950_v45  ;;  %3811 = vmatprep.mubr.f32.mxu1 %v11604_v1 }
 0x36a   : > { %5401 = vmatprep.mubr.f32.mxu0 %v11604_v1  ;;  %7188 = vset.pattern.permute.xlu1 %v11959_v14 }
 0x36b   : > { %7205 = vset.pattern.permute.xlu0 %v11956_v10  ;;  %5466 = vperm.xlu1 %7188, %v10308_v33   ;;  %v7297_v23 = vpop.eup %7296 }
 0x36c   : > { %5573 = vperm.xlu0 %7205, %v10369_v31   ;;  %3813 = vmatmul.mubr.f32.gmra.mrb[52].mxu1 %v11951_v6  ;;  %v2137_v24 = vmul.f32 %v7297_v23, %v10041_v3 }
 0x36d   : > { %5403 = vmatmul.mubr.f32.gmra.mrb[52].mxu0 %v11951_v6  ;;  %3818 = vmatprep.mubr.f32.mxu1 %v11604_v1 }
 0x36e   : > { %5408 = vmatprep.mubr.f32.mxu0 %v11604_v1 }
 0x36f   : > { %7190 = vset.pattern.permute.xlu1 %v7470_v28 }
 0x370   : > { %7207 = vset.pattern.permute.xlu0 %v7471_v22  ;;  %5653 = vperm.xlu1 %7190, %v10308_v33  }
 0x371   : > { %5765 = vperm.xlu0 %7207, %v10369_v31   ;;  %3820 = vmatmul.mubr.f32.gmra.mrb[54].mxu1 %v11952_v39 }
 0x372   : > { %5410 = vmatmul.mubr.f32.gmra.mrb[54].mxu0 %v11952_v39  ;;  %3825 = vmatprep.mubr.f32.mxu1 %v11604_v1 }
 0x373   : > { %5415 = vmatprep.mubr.f32.mxu0 %v11604_v1 }
 0x374   : > { %7192 = vset.pattern.permute.xlu1 %v11959_v14 }
 0x375   : > { %7208 = vset.pattern.permute.xlu0 %v11959_v14  ;;  %3827 = vmatmul.mubr.f32.gmra.mrb[56].mxu1 %v11954_v26 }
 0x376   : > { %5417 = vmatmul.mubr.f32.gmra.mrb[56].mxu0 %v11954_v26  ;;  %5471 = vperm.xlu1 %7192, %v10325_v12  }
 0x377   : > { %5491 = vperm.xlu0 %7208, %v10392_v58   ;;  %3832 = vmatprep.mubr.f32.mxu1 %v11604_v1 }
 0x378   : > { %5422 = vmatprep.mubr.f32.mxu0 %v11604_v1 }
 0x379   : > { %3834 = vmatmul.mubr.f32.gmra.mrb[58].mxu1 %v11955_v49 }
 0x37a   : > { %5424 = vmatmul.mubr.f32.gmra.mrb[58].mxu0 %v11955_v49  ;;  %7193 = vset.pattern.permute.xlu1 %v11956_v10 }
 0x37b   : > { %7210 = vset.pattern.permute.xlu0 %v7470_v28  ;;  %5561 = vperm.xlu1 %7193, %v10325_v12  }
 0x37c   : > { %5673 = vperm.xlu0 %7210, %v10392_v58   ;;  %3839 = vmatprep.mubr.f32.mxu1 %v11604_v1 }
 0x37d   : > { %5429 = vmatprep.mubr.f32.mxu0 %v11604_v1  ;;  %3841 = vmatmul.mubr.f32.gmra.mrb[60].mxu1 %v11957_v5 }
 0x37e   : > { %5431 = vmatmul.mubr.f32.gmra.mrb[60].mxu0 %v11957_v5  ;;  %3846 = vmatprep.mubr.f32.mxu1 %v11604_v1 }
 0x37f   : > { %5436 = vmatprep.mubr.f32.mxu0 %v11604_v1  ;;  %7195 = vset.pattern.permute.xlu1 %v7471_v22  ;;  %v10426_v1 = vmul.f32 %v7291_v7, %v9980_v46  ;;  %v2135_v46 = vmul.f32 %v7293_v11, %v10001_v2  ;;  %v2136_v2 = vmul.f32 %v7295_v34, %v10021_v51  ;;  %v7299_v51 = vpop.eup %7298 }
 0x380   : > { %7213 = vset.pattern.permute.xlu0 %v11956_v10  ;;  %5753 = vperm.xlu1 %7195, %v10325_v12   ;;  %v2138_v0 = vmul.f32 %v7299_v51, %v10061_v44 }
 0x381   : > { %5581 = vperm.xlu0 %7213, %v10411_v21   ;;  %3848 = vmatmul.mubr.f32.gmra.mrb[62].mxu1 %v11960_v48 }
 0x382   : > { %5438 = vmatmul.mubr.f32.gmra.mrb[62].mxu0 %v11960_v48 }
 0x384   : > { %7196 = vset.pattern.permute.xlu1 %v11959_v14 }
 0x385   : > { %7215 = vset.pattern.permute.xlu0 %v7471_v22  ;;  %5476 = vperm.xlu1 %7196, %v10337_v63  }
 0x386   : > { %5773 = vperm.xlu0 %7215, %v10411_v21  }
 0x389   : > { %7198 = vset.pattern.permute.xlu1 %v7470_v28 }
 0x38a   : > { %7216 = vset.pattern.permute.xlu0 %v11959_v14  ;;  %5661 = vperm.xlu1 %7198, %v10337_v63   ;;  %v2254_v63 = vsub.s32 2, %v2245_v8 }
 0x38b   : > { %5501 = vperm.xlu0 %7216, %v10426_v1  }
 0x38c   : > { %v10553_v56 = vrot.slane %v2242_v32, %v2254_v63 }
 0x38e   : > { %7200 = vset.pattern.permute.xlu1 %v11959_v14 }
 0x38f   : > { %7218 = vset.pattern.permute.xlu0 %v7470_v28  ;;  %5481 = vperm.xlu1 %7200, %v10358_v9  }
 0x390   : > { %5681 = vperm.xlu0 %7218, %v10426_v1  }
 0x393   : > { %7201 = vset.pattern.permute.xlu1 %v11956_v10 }
 0x394   : > { %7221 = vset.pattern.permute.xlu0 %v11956_v10  ;;  %5569 = vperm.xlu1 %7201, %v10358_v9  }
 0x395   : > { %5589 = vperm.xlu0 %7221, %v2135_v46  }
 0x398   : > { %7203 = vset.pattern.permute.xlu1 %v7471_v22 }
 0x399   : > { %7223 = vset.pattern.permute.xlu0 %v7471_v22  ;;  %5761 = vperm.xlu1 %7203, %v10358_v9   ;;  %v10547_v9 = vrot.slane %v2242_v32, %v2246_v36 }
 0x39a   : > { %5781 = vperm.xlu0 %7223, %v2135_v46  }
 0x39d   : > { %7204 = vset.pattern.permute.xlu1 %v11959_v14 }
 0x39e   : > { %7224 = vset.pattern.permute.xlu0 %v11959_v14  ;;  %5486 = vperm.xlu1 %7204, %v10369_v31  }
 0x39f   : > { %5511 = vperm.xlu0 %7224, %v2136_v2  }
 0x3a2   : > { %7206 = vset.pattern.permute.xlu1 %v7470_v28 }
 0x3a3   : > { %7226 = vset.pattern.permute.xlu0 %v7470_v28  ;;  %5669 = vperm.xlu1 %7206, %v10369_v31  }
 0x3a4   : > { %5689 = vperm.xlu0 %7226, %v2136_v2  }
 0x3a7   : > { %7209 = vset.pattern.permute.xlu1 %v11956_v10 }
 0x3a8   : > { %7229 = vset.pattern.permute.xlu0 %v11956_v10  ;;  %5577 = vperm.xlu1 %7209, %v10392_v58  }
 0x3a9   : > { %5597 = vperm.xlu0 %7229, %v2137_v24  }
 0x3ac   : > { %7211 = vset.pattern.permute.xlu1 %v7471_v22 }
 0x3ad   : > { %7231 = vset.pattern.permute.xlu0 %v11959_v14  ;;  %5769 = vperm.xlu1 %7211, %v10392_v58  }
 0x3ae   : > { %5521 = vperm.xlu0 %7231, %v2138_v0  }
 0x3b0   : > { %v10458_v45 = vpop.permute.xlu1 %5541  ;;  %v10468_v44 = vpop.permute.xlu0 %5446 }
 0x3b1   : > { %7212 = vset.pattern.permute.xlu1 %v11959_v14 }
 0x3b2   : > { %7233 = vset.pattern.permute.xlu0 %v7470_v28  ;;  %5496 = vperm.xlu1 %7212, %v10411_v21  }
 0x3b3   : > { %5697 = vperm.xlu0 %7233, %v2138_v0  }
 0x3b5   : > { %v10465_v3 = vpop.permute.xlu1 %5733  ;;  %v10474_v6 = vpop.permute.xlu0 %5637 }
 0x3b6   : > { %7214 = vset.pattern.permute.xlu1 %v7470_v28 }
 0x3b7   : > { %7234 = vset.pattern.permute.xlu0 %v7471_v22  ;;  %5677 = vperm.xlu1 %7214, %v10411_v21  }
 0x3b8   : > { %5789 = vperm.xlu0 %7234, %v2137_v24  }
 0x3bb   : > { %7217 = vset.pattern.permute.xlu1 %v11956_v10  ;;  %v10471_v60 = vpop.permute.xlu1 %5451  ;;  %v10480_v39 = vpop.permute.xlu0 %5545 }
 0x3bc   : > { %5585 = vperm.xlu1 %7217, %v10426_v1  }
 0x3c0   : > { %7219 = vset.pattern.permute.xlu1 %v7471_v22  ;;  %v10486_v19 = vpop.permute.xlu0 %5737 }
 0x3c1   : > { %v10477_v25 = vpop.permute.xlu1 %5641  ;;  %5777 = vperm.xlu1 %7219, %v10426_v1  }
 0x3c5   : > { %7220 = vset.pattern.permute.xlu1 %v11959_v14  ;;  %v10493_v16 = vpop.permute.xlu0 %5649 }
 0x3c6   : > { %v10483_v47 = vpop.permute.xlu1 %5456  ;;  %5506 = vperm.xlu1 %7220, %v2135_v46  }
 0x3ca   : > { %7222 = vset.pattern.permute.xlu1 %v7470_v28 }
 0x3cb   : > { %5685 = vperm.xlu1 %7222, %v2135_v46   ;;  %v10488_v26 = vpop.permute.xlu1 %5549 }
 0x3cc   : > { %v10498_v50 = vpop.permute.xlu0 %5557 }
 0x3cf   : > { %7225 = vset.pattern.permute.xlu1 %v11956_v10 }
 0x3d0   : > { %5593 = vperm.xlu1 %7225, %v2136_v2   ;;  %v10491_v38 = vpop.permute.xlu1 %5645 }
 0x3d1   : > { %v10503_v5 = vpop.permute.xlu0 %5749 }
 0x3d4   : > { %7227 = vset.pattern.permute.xlu1 %v7471_v22 }
 0x3d5   : > { %5785 = vperm.xlu1 %7227, %v2136_v2   ;;  %v10496_v49 = vpop.permute.xlu1 %5741 }
 0x3d6   : > { %v10508_v57 = vpop.permute.xlu0 %5657 }
 0x3d9   : > { %7228 = vset.pattern.permute.xlu1 %v11959_v14 }
 0x3da   : > { %5516 = vperm.xlu1 %7228, %v2137_v24   ;;  %v10501_v27 = vpop.permute.xlu1 %5461 }
 0x3db   : > { %v10514_v14 = vpop.permute.xlu0 %5565 }
 0x3de   : > { %7230 = vset.pattern.permute.xlu1 %v7470_v28 }
 0x3df   : > { %5693 = vperm.xlu1 %7230, %v2137_v24  }
 0x3e0   : > { %v10506_v40 = vpop.permute.xlu1 %5553 }
 0x3e1   : > { %v10518_v29 = vpop.permute.xlu0 %5757 }
 0x3e3   : > { %7232 = vset.pattern.permute.xlu1 %v11956_v10 }
 0x3e4   : > { %5601 = vperm.xlu1 %7232, %v2138_v0  }
 0x3e5   : > { %v10511_v48 = vpop.permute.xlu1 %5745 }
 0x3e6   : > { %v10522_v41 = vpop.permute.xlu0 %5665 }
 0x3e8   : > { %7235 = vset.pattern.permute.xlu1 %v7471_v22 }
 0x3e9   : > { %5793 = vperm.xlu1 %7235, %v2138_v0  }
 0x3ea   : > { %v10516_v30 = vpop.permute.xlu1 %5466 }
 0x3eb   : > { %v10528_v10 = vpop.permute.xlu0 %5573 }
 0x3ef   : > { %v10520_v28 = vpop.permute.xlu1 %5653 }
 0x3f0   : > { %v10532_v22 = vpop.permute.xlu0 %5765 }
 0x3f5   : > { %v10524_v55 = vpop.permute.xlu1 %5471 }
 0x3f6   : > { %v10536_v35 = vpop.permute.xlu0 %5491 }
 0x3fa   : > { %v10526_v17 = vpop.permute.xlu1 %5561 }
 0x3fb   : > { %v10540_v54 = vpop.permute.xlu0 %5673 }
 0x3ff   : > { %v10530_v37 = vpop.permute.xlu1 %5753 }
 0x400   : > { %v10549_v61 = vpop.permute.xlu0 %5581 }
 0x404   : > { %v10534_v52 = vpop.permute.xlu1 %5476 }
 0x405   : > { %v10565_v13 = vpop.permute.xlu0 %5773 }
 0x409   : > { %v10538_v33 = vpop.permute.xlu1 %5661 }
 0x40e   : > { %v10542_v12 = vpop.permute.xlu1 %5481 }
 0x413   : > { %v10551_v31 = vpop.permute.xlu1 %5569 }
 0x416   : > { %v3744_v58 = vpop.f32.mrb[32].mxu1  ;;  %v5334_v21 = vpop.f32.mrb[32].mxu0 }
 0x417   : > { %v6580_v43 = vadd.f32 %v3744_v58, %v10547_v9  ;;  %v3746_v4 = vpop.f32.mrb[33].mxu1  ;;  %v6612_v7 = vadd.f32 %v5334_v21, %v10553_v56  ;;  %v5336_v62 = vpop.f32.mrb[33].mxu0 }
 0x418   : > { %v6581_v1 = vadd.f32 %v3746_v4, %v10555_v20  ;;  %v10562_v11 = vpop.permute.xlu1 %5761  ;;  %v6613_v42 = vadd.f32 %v5336_v62, %v10557_v53 }
 0x419   : > { %v5524_v46 = vmul.f32 %v6580_v43, %v10468_v44  ;;  %v5700_v24 = vmul.f32 %v6612_v7, %v10474_v6 }
 0x41a   : > { %v5604_v34 = vmul.f32 %v6581_v1, %v10458_v45  ;;  %v3751_v2 = vpop.f32.mrb[34].mxu1  ;;  %v5796_v63 = vmul.f32 %v6613_v42, %v10465_v3 }
 0x41b   : > { %v5341_v23 = vpop.f32.mrb[34].mxu0  ;;  %v6582_v0 = vadd.f32 %v3751_v2, %v10547_v9  ;;  %v3753_v59 = vpop.f32.mrb[35].mxu1 }
 0x41c   : > { %v5620_v51 = vadd.f32 %v5604_v34, %v5524_v46  ;;  %v5343_v8 = vpop.f32.mrb[35].mxu0  ;;  %v6614_v36 = vadd.f32 %v5341_v23, %v10553_v56  ;;  %v6583_v32 = vadd.f32 %v3753_v59, %v10555_v20  ;;  %v10583_v34 = vpop.permute.xlu0 %5501 }
 0x41d   : > { %v5525_v45 = vmul.f32 %v6582_v0, %v10471_v60  ;;  %v10575_v15 = vpop.permute.xlu1 %5486  ;;  %v6615_v6 = vadd.f32 %v5343_v8, %v10557_v53 }
 0x41e   : > { %v5716_v44 = vadd.f32 %v5700_v24, %v5620_v51  ;;  %v5605_v18 = vmul.f32 %v6583_v32, %v10480_v39  ;;  %v3758_v58 = vpop.f32.mrb[36].mxu1  ;;  %v5701_v3 = vmul.f32 %v6614_v36, %v10477_v25 }
 0x41f   : > { %v5348_v43 = vpop.f32.mrb[36].mxu0  ;;  %v6584_v4 = vadd.f32 %v3758_v58, %v10547_v9  ;;  %v3760_v1 = vpop.f32.mrb[37].mxu1  ;;  %v5797_v2 = vmul.f32 %v6615_v6, %v10486_v19 }
 0x420   : > { %v5812_v21 = vadd.f32 %v5796_v63, %v5716_v44  ;;  %v6616_v7 = vadd.f32 %v5348_v43, %v10553_v56  ;;  %v5350_v62 = vpop.f32.mrb[37].mxu0  ;;  %v5621_v46 = vadd.f32 %v5605_v18, %v5525_v45  ;;  %v6585_v60 = vadd.f32 %v3760_v1, %v10555_v20  ;;  %v10604_v43 = vpop.permute.xlu0 %5681 }
 0x421   : > { %v5526_v39 = vmul.f32 %v6584_v4, %v10483_v47  ;;  %v6617_v25 = vadd.f32 %v5350_v62, %v10557_v53 }
 0x422   : > { %5828 = vst [vmem:[%s10587_s15] sm:$0xff] %v5812_v21  ;;  %v5717_v42 = vadd.f32 %v5701_v3, %v5621_v46  ;;  %v5606_v23 = vmul.f32 %v6585_v60, %v10488_v26  ;;  %v10594_v24 = vpop.permute.xlu1 %5669  ;;  %v5702_v51 = vmul.f32 %v6616_v7, %v10491_v38  ;;  %v3765_v0 = vpop.f32.mrb[38].mxu1 }
 0x423   : > { %v5355_v59 = vpop.f32.mrb[38].mxu0  ;;  %v6586_v32 = vadd.f32 %v3765_v0, %v10547_v9  ;;  %v3767_v44 = vpop.f32.mrb[39].mxu1  ;;  %v5798_v45 = vmul.f32 %v6617_v25, %v10496_v49 }
 0x424   : > { %v5813_v8 = vadd.f32 %v5797_v2, %v5717_v42  ;;  %v5622_v36 = vadd.f32 %v5606_v23, %v5526_v39  ;;  %v6618_v47 = vadd.f32 %v5355_v59, %v10553_v56  ;;  %v5357_v63 = vpop.f32.mrb[39].mxu0  ;;  %v6587_v19 = vadd.f32 %v3767_v44, %v10555_v20 }
 0x425   : > { %v5527_v18 = vmul.f32 %v6586_v32, %v10501_v27  ;;  %v6619_v38 = vadd.f32 %v5357_v63, %v10557_v53  ;;  %v10625_v63 = vpop.permute.xlu0 %5589 }
 0x426   : > { %5829 = vst [vmem:[%s10587_s15 + $0x8] sm:$0xff] %v5813_v8  ;;  %v5718_v26 = vadd.f32 %v5702_v51, %v5622_v36  ;;  %v3772_v6 = vpop.f32.mrb[40].mxu1  ;;  %v5607_v21 = vmul.f32 %v6587_v19, %v10506_v40  ;;  %v5703_v62 = vmul.f32 %v6618_v47, %v10493_v16 }
 0x427   : > { %v5362_v58 = vpop.f32.mrb[40].mxu0  ;;  %v10607_v4 = vpop.permute.xlu1 %5577  ;;  %v6588_v7 = vadd.f32 %v3772_v6, %v10547_v9  ;;  %v5799_v42 = vmul.f32 %v6619_v38, %v10511_v48 }
 0x428   : > { %v5814_v1 = vadd.f32 %v5798_v45, %v5718_v26  ;;  %v3774_v3 = vpop.f32.mrb[41].mxu1  ;;  %v5364_v49 = vpop.f32.mrb[41].mxu0  ;;  %v5623_v46 = vadd.f32 %v5607_v21, %v5527_v18  ;;  %v6620_v60 = vadd.f32 %v5362_v58, %v10553_v56 }
 0x429   : > { %v5528_v27 = vmul.f32 %v6588_v7, %v10516_v30  ;;  %v6589_v39 = vadd.f32 %v3774_v3, %v10555_v20  ;;  %v6621_v16 = vadd.f32 %v5364_v49, %v10557_v53 }
 0x42a   : > { %5830 = vst [vmem:[%s10587_s15 + $0x10] sm:$0xff] %v5814_v1  ;;  %v3779_v40 = vpop.f32.mrb[42].mxu1  ;;  %v5719_v23 = vadd.f32 %v5703_v62, %v5623_v46  ;;  %v5704_v48 = vmul.f32 %v6620_v60, %v10520_v28 }
 0x42b   : > { %v5369_v2 = vpop.f32.mrb[42].mxu0  ;;  %v5608_v25 = vmul.f32 %v6589_v39, %v10498_v50  ;;  %v6590_v51 = vadd.f32 %v3779_v40, %v10547_v9  ;;  %v3781_v0 = vpop.f32.mrb[43].mxu1  ;;  %v5800_v45 = vmul.f32 %v6621_v16, %v10503_v5 }
 0x42c   : > { %v5371_v59 = vpop.f32.mrb[43].mxu0  ;;  %v10619_v30 = vpop.permute.xlu1 %5769  ;;  %v6622_v8 = vadd.f32 %v5369_v2, %v10553_v56  ;;  %v6591_v36 = vadd.f32 %v3781_v0, %v10555_v20  ;;  %v5815_v32 = vadd.f32 %v5799_v42, %v5719_v23 }
 0x42d   : > { %v5624_v47 = vadd.f32 %v5608_v25, %v5528_v27  ;;  %v5529_v44 = vmul.f32 %v6590_v51, %v10524_v55  ;;  %v6623_v19 = vadd.f32 %v5371_v59, %v10557_v53 }
 0x42e   : > { %v5609_v50 = vmul.f32 %v6591_v36, %v10526_v17  ;;  %5831 = vst [vmem:[%s10587_s15 + $0x18] sm:$0xff] %v5815_v32  ;;  %v5705_v6 = vmul.f32 %v6622_v8, %v10508_v57 }
 0x42f   : > { %v5720_v26 = vadd.f32 %v5704_v48, %v5624_v47  ;;  %v3786_v18 = vpop.f32.mrb[44].mxu1  ;;  %v5801_v49 = vmul.f32 %v6623_v19, %v10530_v37 }
 0x430   : > { %v5376_v38 = vpop.f32.mrb[44].mxu0  ;;  %v5625_v58 = vadd.f32 %v5609_v50, %v5529_v44  ;;  %v6592_v28 = vadd.f32 %v3786_v18, %v10547_v9  ;;  %v3788_v21 = vpop.f32.mrb[45].mxu1 }
 0x431   : > { %v5378_v55 = vpop.f32.mrb[45].mxu0  ;;  %v5816_v7 = vadd.f32 %v5800_v45, %v5720_v26  ;;  %v6624_v1 = vadd.f32 %v5376_v38, %v10553_v56  ;;  %v10634_v17 = vpop.permute.xlu1 %5496  ;;  %v6593_v62 = vadd.f32 %v3788_v21, %v10555_v20 }
 0x432   : > { %v5721_v3 = vadd.f32 %v5705_v6, %v5625_v58  ;;  %v5530_v5 = vmul.f32 %v6592_v28, %v10534_v52  ;;  %v6625_v46 = vadd.f32 %v5378_v55, %v10557_v53  ;;  %v10646_v52 = vpop.permute.xlu0 %5781 }
 0x433   : > { %5832 = vst [vmem:[%s10587_s15 + $0x20] sm:$0xff] %v5816_v7  ;;  %v5610_v57 = vmul.f32 %v6593_v62, %v10514_v14  ;;  %v3793_v27 = vpop.f32.mrb[46].mxu1  ;;  %v5706_v23 = vmul.f32 %v6624_v1, %v10538_v33 }
 0x434   : > { %v5383_v60 = vpop.f32.mrb[46].mxu0  ;;  %v5817_v39 = vadd.f32 %v5801_v49, %v5721_v3  ;;  %v6594_v42 = vadd.f32 %v3793_v27, %v10547_v9  ;;  %v3795_v40 = vpop.f32.mrb[47].mxu1  ;;  %v5802_v59 = vmul.f32 %v6625_v46, %v10518_v29 }
 0x435   : > { %v5385_v2 = vpop.f32.mrb[47].mxu0  ;;  %v5626_v25 = vadd.f32 %v5610_v57, %v5530_v5  ;;  %v6626_v37 = vadd.f32 %v5383_v60, %v10553_v56  ;;  %v6595_v16 = vadd.f32 %v3795_v40, %v10555_v20 }
 0x436   : > { %5833 = vst [vmem:[%s10587_s15 + $0x28] sm:$0xff] %v5817_v39  ;;  %v5531_v14 = vmul.f32 %v6594_v42, %v10542_v12  ;;  %v5678_v51 = vpop.permute.xlu1 %5677  ;;  %v6627_v36 = vadd.f32 %v5385_v2, %v10557_v53  ;;  %v10664_v1 = vpop.permute.xlu0 %5511 }
 0x437   : > { %v5722_v0 = vadd.f32 %v5706_v23, %v5626_v25  ;;  %v5611_v8 = vmul.f32 %v6595_v16, %v10551_v31  ;;  %v3800_v33 = vpop.f32.mrb[48].mxu1  ;;  %v5707_v12 = vmul.f32 %v6626_v37, %v10522_v41 }
 0x438   : > { %v5390_v32 = vpop.f32.mrb[48].mxu0  ;;  %v6596_v48 = vadd.f32 %v3800_v33, %v10547_v9  ;;  %v3802_v44 = vpop.f32.mrb[49].mxu1  ;;  %v5803_v18 = vmul.f32 %v6627_v36, %v10562_v11 }
 0x439   : > { %v6628_v47 = vadd.f32 %v5390_v32, %v10553_v56  ;;  %v5392_v50 = vpop.f32.mrb[49].mxu0  ;;  %v5818_v19 = vadd.f32 %v5802_v59, %v5722_v0  ;;  %v5627_v26 = vadd.f32 %v5611_v8, %v5531_v14  ;;  %v6597_v45 = vadd.f32 %v3802_v44, %v10555_v20 }
 0x43a   : > { %v5532_v29 = vmul.f32 %v6596_v48, %v10575_v15  ;;  %v6629_v6 = vadd.f32 %v5392_v50, %v10557_v53 }
 0x43b   : > { %5834 = vst [vmem:[%s10587_s15 + $0x30] sm:$0xff] %v5818_v19  ;;  %v5723_v31 = vadd.f32 %v5707_v12, %v5627_v26  ;;  %v5612_v38 = vmul.f32 %v6597_v45, %v10528_v10  ;;  %v5586_v58 = vpop.permute.xlu1 %5585  ;;  %v3807_v28 = vpop.f32.mrb[50].mxu1  ;;  %v5708_v21 = vmul.f32 %v6628_v47, %v10594_v24 }
 0x43c   : > { %v6598_v41 = vadd.f32 %v3807_v28, %v10547_v9  ;;  %v5397_v55 = vpop.f32.mrb[50].mxu0  ;;  %v3809_v7 = vpop.f32.mrb[51].mxu1  ;;  %v5804_v57 = vmul.f32 %v6629_v6, %v10532_v22 }
 0x43d   : > { %v5819_v15 = vadd.f32 %v5803_v18, %v5723_v31  ;;  %v5628_v62 = vadd.f32 %v5612_v38, %v5532_v29  ;;  %v6630_v3 = vadd.f32 %v5397_v55, %v10553_v56  ;;  %v6599_v11 = vadd.f32 %v3809_v7, %v10555_v20  ;;  %v5399_v49 = vpop.f32.mrb[51].mxu0 }
 0x43e   : > { %v5533_v10 = vmul.f32 %v6598_v41, %v10536_v35  ;;  %v6631_v46 = vadd.f32 %v5399_v49, %v10557_v53 }
 0x43f   : > { %5835 = vst [vmem:[%s10587_s15 + $0x38] sm:$0xff] %v5819_v15  ;;  %v5724_v5 = vadd.f32 %v5708_v21, %v5628_v62  ;;  %v5613_v24 = vmul.f32 %v6599_v11, %v10607_v4  ;;  %v3814_v27 = vpop.f32.mrb[52].mxu1  ;;  %v5709_v39 = vmul.f32 %v6630_v3, %v10540_v54  ;;  %v5690_v4 = vpop.permute.xlu0 %5689 }
 0x440   : > { %v5404_v60 = vpop.f32.mrb[52].mxu0  ;;  %v5778_v42 = vpop.permute.xlu1 %5777  ;;  %v6600_v40 = vadd.f32 %v3814_v27, %v10547_v9  ;;  %v5805_v0 = vmul.f32 %v6631_v46, %v10619_v30 }
 0x441   : > { %v3816_v2 = vpop.f32.mrb[53].mxu1  ;;  %v5820_v23 = vadd.f32 %v5804_v57, %v5724_v5  ;;  %v5629_v25 = vadd.f32 %v5613_v24, %v5533_v10  ;;  %v6632_v35 = vadd.f32 %v5404_v60, %v10553_v56  ;;  %v5406_v22 = vpop.f32.mrb[53].mxu0 }
 0x442   : > { %v6601_v37 = vadd.f32 %v3816_v2, %v10555_v20  ;;  %v5534_v16 = vmul.f32 %v6600_v40, %v10634_v17  ;;  %v6633_v59 = vadd.f32 %v5406_v22, %v10557_v53 }
 0x443   : > { %5836 = vst [vmem:[%s10587_s15 + $0x40] sm:$0xff] %v5820_v23  ;;  %v5725_v14 = vadd.f32 %v5709_v39, %v5629_v25  ;;  %v5710_v32 = vmul.f32 %v6632_v35, %v5678_v51  ;;  %v5598_v15 = vpop.permute.xlu0 %5597 }
 0x444   : > { %v5614_v54 = vmul.f32 %v6601_v37, %v10549_v61  ;;  %v3821_v8 = vpop.f32.mrb[54].mxu1  ;;  %v5806_v61 = vmul.f32 %v6633_v59, %v10565_v13 }
 0x445   : > { %v5411_v36 = vpop.f32.mrb[54].mxu0  ;;  %v5821_v33 = vadd.f32 %v5805_v0, %v5725_v14  ;;  %v6602_v47 = vadd.f32 %v3821_v8, %v10547_v9  ;;  %v5507_v44 = vpop.permute.xlu1 %5506 }
 0x446   : > { %v5630_v48 = vadd.f32 %v5614_v54, %v5534_v16  ;;  %v3823_v50 = vpop.f32.mrb[55].mxu1  ;;  %v6634_v17 = vadd.f32 %v5411_v36, %v10553_v56  ;;  %v5413_v12 = vpop.f32.mrb[55].mxu0 }
 0x447   : > { %v6603_v19 = vadd.f32 %v3823_v50, %v10555_v20  ;;  %5837 = vst [vmem:[%s10587_s15 + $0x48] sm:$0xff] %v5821_v33  ;;  %v5535_v26 = vmul.f32 %v6602_v47, %v10583_v34  ;;  %v6635_v51 = vadd.f32 %v5413_v12, %v10557_v53 }
 0x448   : > { %v5726_v30 = vadd.f32 %v5710_v32, %v5630_v48  ;;  %v3828_v29 = vpop.f32.mrb[56].mxu1  ;;  %v5711_v21 = vmul.f32 %v6634_v17, %v10604_v43 }
 0x449   : > { %v5615_v45 = vmul.f32 %v6603_v19, %v5586_v58  ;;  %v5418_v31 = vpop.f32.mrb[56].mxu0  ;;  %v6604_v38 = vadd.f32 %v3828_v29, %v10547_v9  ;;  %v3830_v6 = vpop.f32.mrb[57].mxu1  ;;  %v5807_v62 = vmul.f32 %v6635_v51, %v5778_v42 }
 0x44a   : > { %v5822_v18 = vadd.f32 %v5806_v61, %v5726_v30  ;;  %v5420_v28 = vpop.f32.mrb[57].mxu0  ;;  %v6636_v55 = vadd.f32 %v5418_v31, %v10553_v56  ;;  %v6605_v13 = vadd.f32 %v3830_v6, %v10555_v20  ;;  %v5686_v7 = vpop.permute.xlu1 %5685 }
 0x44b   : > { %v5631_v41 = vadd.f32 %v5615_v45, %v5535_v26  ;;  %v5536_v34 = vmul.f32 %v6604_v38, %v5507_v44  ;;  %v6637_v11 = vadd.f32 %v5420_v28, %v10557_v53 }
 0x44c   : > { %5838 = vst [vmem:[%s10587_s15 + $0x50] sm:$0xff] %v5822_v18  ;;  %v5616_v3 = vmul.f32 %v6605_v13, %v10625_v63  ;;  %v3835_v49 = vpop.f32.mrb[58].mxu1  ;;  %v5712_v60 = vmul.f32 %v6636_v55, %v5686_v7 }
 0x44d   : > { %v5727_v58 = vadd.f32 %v5711_v21, %v5631_v41  ;;  %v5425_v10 = vpop.f32.mrb[58].mxu0  ;;  %v6606_v43 = vadd.f32 %v3835_v49, %v10547_v9  ;;  %v3837_v57 = vpop.f32.mrb[59].mxu1  ;;  %v5808_v63 = vmul.f32 %v6637_v11, %v10646_v52 }
 0x44e   : > { %v6638_v5 = vadd.f32 %v5425_v10, %v10553_v56  ;;  %v5427_v24 = vpop.f32.mrb[59].mxu0  ;;  %v5632_v27 = vadd.f32 %v5616_v3, %v5536_v34  ;;  %v6607_v39 = vadd.f32 %v3837_v57, %v10555_v20  ;;  %v5522_v52 = vpop.permute.xlu0 %5521 }
 0x44f   : > { %v5823_v46 = vadd.f32 %v5807_v62, %v5727_v58  ;;  %v5537_v40 = vmul.f32 %v6606_v43, %v10664_v1  ;;  %v5594_v42 = vpop.permute.xlu1 %5593  ;;  %v6639_v36 = vadd.f32 %v5427_v24, %v10557_v53 }
 0x450   : > { %v5728_v2 = vadd.f32 %v5712_v60, %v5632_v27  ;;  %v5617_v23 = vmul.f32 %v6607_v39, %v5594_v42  ;;  %v3842_v25 = vpop.f32.mrb[60].mxu1  ;;  %v5713_v37 = vmul.f32 %v6638_v5, %v5690_v4 }
 0x451   : > { %5839 = vst [vmem:[%s10587_s15 + $0x58] sm:$0xff] %v5823_v46  ;;  %v5432_v35 = vpop.f32.mrb[60].mxu0  ;;  %v6608_v22 = vadd.f32 %v3842_v25, %v10547_v9  ;;  %v3844_v14 = vpop.f32.mrb[61].mxu1 }
 0x452   : > { %v6640_v16 = vadd.f32 %v5432_v35, %v10553_v56  ;;  %v5434_v0 = vpop.f32.mrb[61].mxu0  ;;  %v5824_v54 = vadd.f32 %v5808_v63, %v5728_v2  ;;  %v5633_v59 = vadd.f32 %v5617_v23, %v5537_v40  ;;  %v6609_v1 = vadd.f32 %v3844_v14, %v10555_v20  ;;  %v5698_v45 = vpop.permute.xlu0 %5697 }
 0x453   : > { %v6641_v8 = vadd.f32 %v5434_v0, %v10557_v53 }
 0x454   : > { %5840 = vst [vmem:[%s10587_s15 + $0x60] sm:$0xff] %v5824_v54  ;;  %v5729_v33 = vadd.f32 %v5713_v37, %v5633_v59  ;;  %v5786_v32 = vpop.permute.xlu1 %5785  ;;  %v3849_v4 = vpop.f32.mrb[62].mxu1  ;;  %v5618_v51 = vmul.f32 %v6609_v1, %v5598_v15 }
 0x455   : > { %v5809_v48 = vmul.f32 %v6639_v36, %v5786_v32  ;;  %v6610_v47 = vadd.f32 %v3849_v4, %v10547_v9  ;;  %v5439_v44 = vpop.f32.mrb[62].mxu0  ;;  %v3851_v50 = vpop.f32.mrb[63].mxu1 }
 0x456   : > { %v6642_v17 = vadd.f32 %v5439_v44, %v10553_v56  ;;  %v6611_v19 = vadd.f32 %v3851_v50, %v10555_v20  ;;  %v5441_v12 = vpop.f32.mrb[63].mxu0  ;;  %v5790_v38 = vpop.permute.xlu0 %5789 }
 0x457   : > { %v5825_v30 = vadd.f32 %v5809_v48, %v5729_v33  ;;  %v6643_v61 = vadd.f32 %v5441_v12, %v10557_v53  ;;  %v5810_v6 = vmul.f32 %v6641_v8, %v5790_v38  ;;  %v5539_v21 = vmul.f32 %v6610_v47, %v5522_v52 }
 0x458   : > { %v5715_v41 = vmul.f32 %v6642_v17, %v5698_v45 }
 0x459   : > { %5841 = vst [vmem:[%s10587_s15 + $0x68] sm:$0xff] %v5825_v30  ;;  %v5517_v26 = vpop.permute.xlu1 %5516 }
 0x45a   : > { %v5538_v29 = vmul.f32 %v6608_v22, %v5517_v26 }
 0x45c   : > { %v5634_v31 = vadd.f32 %v5618_v51, %v5538_v29 }
 0x45e   : > { %v5694_v9 = vpop.permute.xlu1 %5693 }
 0x45f   : > { %v5714_v18 = vmul.f32 %v6640_v16, %v5694_v9 }
 0x461   : > { %v5730_v56 = vadd.f32 %v5714_v18, %v5634_v31 }
 0x463   : > { %v5826_v20 = vadd.f32 %v5810_v6, %v5730_v56  ;;  %v5602_v28 = vpop.permute.xlu1 %5601 }
 0x464   : > { %v5619_v53 = vmul.f32 %v6611_v19, %v5602_v28 }
 0x465   : > { %5842 = vst [vmem:[%s10587_s15 + $0x70] sm:$0xff] %v5826_v20 }
 0x466   : > { %v5635_v55 = vadd.f32 %v5619_v53, %v5539_v21 }
 0x468   : > { %v5731_v13 = vadd.f32 %v5715_v41, %v5635_v55  ;;  %v5794_v7 = vpop.permute.xlu1 %5793 }
 0x469   : > { %v5811_v15 = vmul.f32 %v6643_v61, %v5794_v7 }
 0x46b   : > { %v5827_v34 = vadd.f32 %v5811_v15, %v5731_v13 }
 0x46d   : > { %5843 = vst [vmem:[%s10587_s15 + $0x78] sm:$0xff] %v5827_v34 }
 0x46e   : > { %7399 = shalt.err (!%p7396_p2)
}
 0x46f   : > { %s7400_s16 = scalar_lea.hbm %s10719_s10, 2048  ;;  %s7404_s19 = scalar_lea.hbm %s10772_s6, 4096 }
 0x470   : > { %p7401_p13 = scmp.ne.s32.totalorder %s10719_s10, %s7400_s16  ;;  %p7405_p4 = scmp.lt.u32.totalorder %s10719_s10, %s10772_s6 }
 0x471   : > { %p7406_p7 = scmp.lt.u32.totalorder %s7404_s19, %s7400_s16  ;;  %p7408_p11 = scmp.lt.u32.totalorder %s7400_s16, %s10719_s10 }
 0x472   : > { %p7402_p6 = pnand %p7401_p13, %p11963_p0 }
 0x473   : > { %p7407_p8 = por %p7406_p7, %p7405_p4 }
 0x474   : > { %p7403_p10 = pneg %p7402_p6 }
 0x475   : > { %p7409_p1 = por %p7408_p11, %p7407_p8 }
 0x477   : > { %p7410_p3 = pnand %p7409_p1, %p7403_p10 }
 0x479   : > { %7413 = shalt.err (!%p7410_p3)
}
 0x47a   : > { %s7473_s20 = smov 128   ;;  %s7474_s9 = smov 8  }
 0x47b   : > { %7102 = dma.vmem_to_hbm [thread:$0]  (%p11963_p0), %s10721_s30, 2048, %s10719_s10, %s5845_s14, %s7473_s20, %s7473_s20, %s7474_s9  }
 0x47c PF: > { %s5873_s8 = sand.u32 1, %s7444_s21   ;;  %p11964_p5 = scmp.ne.s32.totalorder %s11209_s28, 0 }
 0x47d   : > { %p11965_p9 = scmp.ge.s32.totalorder %s7456_s24, 2  ;;  %s5874_s25 = scalar_lea.sflag [#allocation4], %s5873_s8 }
 0x47f   : > { %p7116_p12 = pnand %p11965_p9, %p11964_p5 }
 0x481   : > { %7439 = dma.done.wait (!%p7116_p12), %s5874_s25, 2048  }
 0x482   : > { %7441 = vsyncadd (!%p7116_p12), %s5874_s25, 4294965248  ;;  %p20_p2 = scmp.ge.s32.totalorder %s7620_s26, 4   ;;  %s11966_s21 = smov %s7448_s22 }
 0x483   : > { %s11967_s22 = smov %s7452_s23  ;;  %s11968_s23 = smov %s7629_s11 }
 0x484   : > { %s11969_s24 = smov %s7620_s26  ;;  %22 = sbr.rel (!%p20_p2) target bundleno = 6 (0x6), region = 97 }
 0x48b   :  { %5879 = vsyncpa [#allocation3], 1 }
 0x48c   :  { %5881 = vsyncpa [#allocation3 + $0x1], 1 }
 0x48d   :  { %5882 = vsyncpa [#allocation6], 1 }
 0x48e   :  { %5883 = vsyncpa [#allocation4], 1 }
 0x48f   :  { %5885 = vsyncpa [#allocation4 + $0x1], 1 }

// kernel: tpu_custom_call.1
= control target key start
LH: loop header
LB: loop body
LE: loop exit
PB: predicated region body
PF: predicated region fallthrough
CT: control target
= control target key end

     0   :  { %11 = vsyncpa [#allocation3], 0  ;;  %s10766_s0 = inlined_call_operand.hbm [shape: f32[256,128], index: 0, kind: input, shape index: {}]   ;;  %s10767_s1 = inlined_call_operand.hbm [shape: f32[128,256], index: 1, kind: input, shape index: {}]   ;;  %s10768_s2 = inlined_call_operand.vmem [shape: f32[1,4], index: 2, kind: input, shape index: {}]   ;;  %s10769_s3 = inlined_call_operand.vmem [shape: f32[1,128], index: 3, kind: input, shape index: {}]   ;;  %s10770_s4 = inlined_call_operand.hbm [shape: f32[128,512], index: 4, kind: input, shape index: {}]   ;;  %s10771_s5 = inlined_call_operand.vmem [shape: f32[1,512], index: 5, kind: input, shape index: {}]   ;;  %s10772_s6 = inlined_call_operand.hbm [shape: f32[256,128], index: 6, kind: output, shape index: {}]  }
   0x1   :  { %13 = vsyncpa [#allocation3 + $0x1], 0 }
   0x2   :  { %14 = vsyncpa [#allocation6], 0 }
   0x3   :  { %15 = vsyncpa [#allocation4], 0 }
   0x4   :  { %17 = vsyncpa [#allocation4 + $0x1], 0  ;;  %s7510_s21 = smov 0   ;;  %s7512_s22 = smov 0  }
   0x5   :  { %s7514_s23 = smov 0   ;;  %s7516_s24 = smov 0  }
   0x6 LB: > { %s7531_s25 = sadd.s32 4294967295, %s7456_s24   ;;  %s5950_s26 = sadd.s32 4294967294, %s7456_s24   ;;  %s7456_s24 = sphi %s7516_s24, %s11969_s24   ;;  %s7452_s23 = sphi %s7514_s23, %s11968_s23   ;;  %s7448_s22 = sphi %s7512_s22, %s11967_s22   ;;  %s7444_s21 = sphi %s7510_s21, %s11966_s21  }
   0x7   : > { %p43_p0 = scmp.ne.s32.totalorder %s7448_s22, %s7444_s21  ;;  %p10773_p1 = scmp.eq.s32.totalorder %s7531_s25, 0 }
   0x8   : > { %p178_p3 = scmp.eq.s32.totalorder %s5950_s26, 1  ;;  %p5951_p5 = scmp.ge.s32.totalorder %s7456_s24, 1 }
   0x9   : > { %p7540_p4 = por %p10773_p1, %p43_p0  ;;  %p185_p7 = scmp.lt.s32.totalorder %s7456_s24, 3 }
   0xa   : > { %p7545_p6 = por %p178_p3, %p43_p0  ;;  %s7458_s30 = smov [#allocation5]  }
   0xb   : > { %s11208_s27 = scalar_select %p7540_p4, 1, 0 }
   0xc   : > { %s11209_s28 = scalar_select %p7545_p6, 1, 0 }
   0xd   : > { %p7550_p8 = pnand %p5951_p5, %p185_p7  ;;  %s197_s7 = sshll.u32 %s7458_s30, 4  ;;  %s7554_s7 = int_to_ptr.vmem [resolvable:$true] %s197_s7 }
   0xe   : > { %s7459_s9 = smov [#allocation7]   ;;  %s7300_s13 = scalar_lea.hbm %s10767_s1, 4096 }
   0xf   : > { %p7104_p9 = pneg %p7550_p8  ;;  %s216_s10 = sshll.u32 %s7459_s9, 4  ;;  %s7565_s10 = int_to_ptr.vmem [resolvable:$true] %s216_s10 }
  0x10   : > { %p7301_p12 = scmp.ne.s32.totalorder %s10767_s1, %s7300_s13  ;;  %p7307_p5 = scmp.lt.u32.totalorder %s7300_s13, %s10767_s1 }
  0x11   : > { %p7561_p11 = pnand %p7104_p9, %p10773_p1 }
  0x13   : > { %p7302_p13 = pneg %p7561_p11 }
  0x15   : > { %p7303_p0 = pnand %p7302_p13, %p7301_p12 }
  0x17   : > { %p7304_p3 = pneg %p7303_p0 }
  0x19   : > { %p7309_p7 = pnand %p7307_p5, %p7304_p3 }
  0x1b   : > { %7312 = shalt.err (!%p7309_p7)
}
  0x1c   : > { %s7313_s18 = scalar_lea.vmem %s7554_s7, 4096  ;;  %p7321_p2 = scmp.lt.s32.totalorder %s7554_s7, %s7554_s7 }
  0x1d   : > { %p7314_p9 = scmp.ne.s32.totalorder %s7554_s7, %s7313_s18  ;;  %p7322_p12 = scmp.lt.s32.totalorder %s7313_s18, %s7313_s18 }
  0x1f   : > { %p7316_p10 = pnand %p7314_p9, %p7302_p13  ;;  %p7323_p0 = por %p7322_p12, %p7321_p2 }
  0x21   : > { %p7317_p1 = pneg %p7316_p10 }
  0x23   : > { %p7324_p6 = pnand %p7323_p0, %p7317_p1 }
  0x25   : > { %7327 = shalt.err (!%p7324_p6)
}
  0x26   : > { %s7460_s19 = smov 256   ;;  %s7461_s20 = smov 16  }
  0x27   : > { %7107 = dma.hbm_to_vmem [thread:$0]  (!%p7561_p11), %s10767_s1, 4096, %s7554_s7, [#allocation6], %s7460_s19, %s7460_s19, %s7461_s20  }
  0x28   : > { %s7328_s12 = scalar_lea.hbm %s10770_s4, 8192 }
  0x29   : > { %p7329_p2 = scmp.ne.s32.totalorder %s10770_s4, %s7328_s12  ;;  %p7335_p10 = scmp.lt.u32.totalorder %s7328_s12, %s10770_s4 }
  0x2b   : > { %p7331_p1 = pnand %p7329_p2, %p7302_p13 }
  0x2d   : > { %p7332_p6 = pneg %p7331_p1 }
  0x2f   : > { %p7337_p3 = pnand %p7335_p10, %p7332_p6 }
  0x31   : > { %7340 = shalt.err (!%p7337_p3)
}
  0x32   : > { %s7341_s7 = scalar_lea.vmem %s7565_s10, 8192  ;;  %p7349_p12 = scmp.lt.s32.totalorder %s7565_s10, %s7565_s10 }
  0x33   : > { %p7342_p5 = scmp.ne.s32.totalorder %s7565_s10, %s7341_s7  ;;  %p7350_p0 = scmp.lt.s32.totalorder %s7341_s7, %s7341_s7 }
  0x35   : > { %p7344_p7 = pnand %p7342_p5, %p7302_p13  ;;  %p7351_p2 = por %p7350_p0, %p7349_p12 }
  0x37   : > { %p7345_p9 = pneg %p7344_p7 }
  0x39   : > { %p7352_p1 = pnand %p7351_p2, %p7345_p9 }
  0x3b   : > { %7355 = shalt.err (!%p7352_p1)
}
  0x3c   : > { %s7462_s17 = smov 512   ;;  %s7463_s18 = smov 32  }
  0x3d   : > { %7110 = dma.hbm_to_vmem [thread:$0]  (!%p7561_p11), %s10770_s4, 8192, %s7565_s10, [#allocation6], %s7462_s17, %s7462_s17, %s7463_s18  }
  0x3e   : > { %s7620_s26 = sadd.s32 1, %s7456_s24   ;;  %s30_s9 = sadd.s32 1, %s7452_s23 }
  0x3f   : > { %s27_s30 = ssub.s32 %s7456_s24, %s7620_s26  ;;  %p37_p6 = scmp.ne.s32.totalorder %s7452_s23, %s7448_s22 }
  0x40   : > { %p28_p13 = scmp.eq.s32.totalorder %s27_s30, 0  ;;  %p38_p10 = scmp.eq.s32.totalorder %s7456_s24, 0 }
  0x41   : > { %p11212_p5 = scmp.eq.s32.totalorder %s7531_s25, 1  ;;  %p7121_p9 = scmp.lt.s32.totalorder %s7456_s24, 2 }
  0x42   : > { %s7629_s11 = scalar_select %p28_p13, %s7452_s23, %s30_s9  }
  0x43   : > { %p39_p3 = por %p38_p10, %p37_p6  ;;  %p7633_p7 = por %p11212_p5, %p37_p6 }
  0x44   : > { %s233_s8 = sand.u32 1, %s7452_s23   ;;  %s5970_s10 = sshll.u32 %s7456_s24, 11 }
  0x45   : > { %s11213_s12 = scalar_select %p7633_p7, 1, 0 }
  0x46   : > { %s5955_s13 = sshll.u32 %s233_s8, 7  ;;  %s7643_s16 = scalar_lea.hbm %s10766_s0, %s5970_s10 }
  0x47   : > { %s237_s7 = scalar_lea.vmem [#allocation2], %s5955_s13  ;;  %p7647_p11 = pnand %p7121_p9, %p39_p3 }
  0x48   : > { %s244_s17 = sshll.u32 %s237_s7, 4  ;;  %s7651_s19 = scalar_lea.sflag [#allocation3], %s233_s8  ;;  %s7645_s17 = int_to_ptr.vmem [resolvable:$true] %s244_s17 }
  0x49   : > { %s7356_s20 = scalar_lea.hbm %s7643_s16, 2048  ;;  %p7358_p0 = pneg %p7647_p11 }
  0x4a   : > { %p7357_p12 = scmp.ne.s32.totalorder %s7643_s16, %s7356_s20  ;;  %s7361_s13 = scalar_lea.hbm %s10766_s0, 4096 }
  0x4b   : > { %p7362_p13 = scmp.lt.u32.totalorder %s7643_s16, %s10766_s0  ;;  %p7363_p6 = scmp.lt.u32.totalorder %s7361_s13, %s7356_s20 }
  0x4c   : > { %p7359_p2 = pnand %p7358_p0, %p7357_p12  ;;  %p7365_p3 = scmp.lt.u32.totalorder %s7356_s20, %s7643_s16 }
  0x4d   : > { %p7364_p10 = por %p7363_p6, %p7362_p13 }
  0x4e   : > { %p7360_p1 = pneg %p7359_p2 }
  0x4f   : > { %p7366_p5 = por %p7365_p3, %p7364_p10 }
  0x51   : > { %p7367_p9 = pnand %p7366_p5, %p7360_p1 }
  0x53   : > { %7370 = shalt.err (!%p7367_p9)
}
  0x54   : > { %s7371_s8 = scalar_lea.vmem %s7645_s17, 2048  ;;  %s7464_s15 = smov [#allocation2]  }
  0x55   : > { %p7372_p12 = scmp.ne.s32.totalorder %s7645_s17, %s7371_s8  ;;  %s7376_s7 = sshll.u32 %s7464_s15, 4  ;;  %s7377_s7 = int_to_ptr.vmem [resolvable:$false] %s7376_s7 }
  0x56   : > { %s7378_s30 = scalar_lea.vmem %s7377_s7, 4096  ;;  %p7379_p4 = scmp.lt.s32.totalorder %s7645_s17, %s7377_s7 }
  0x57   : > { %p7374_p2 = pnand %p7372_p12, %p7358_p0  ;;  %p7380_p13 = scmp.lt.s32.totalorder %s7378_s30, %s7371_s8 }
  0x59   : > { %p7375_p7 = pneg %p7374_p2  ;;  %p7381_p6 = por %p7380_p13, %p7379_p4 }
  0x5b   : > { %p7382_p10 = pnand %p7381_p6, %p7375_p7 }
  0x5d   : > { %7385 = shalt.err (!%p7382_p10)
}
  0x5e   : > { %s7465_s20 = smov 128   ;;  %s7466_s9 = smov 8  }
  0x5f   : > { %7114 = dma.hbm_to_vmem [thread:$0]  (!%p7647_p11), %s7643_s16, 2048, %s7645_s17, %s7651_s19, %s7465_s20, %s7465_s20, %s7466_s9  }
  0x60   : > { %256 = sbr.rel (%p7550_p8) target bundleno = 1148 (0x47c), region = 44 }
  0x67   : > { %s7682_s13 = sand.u32 1, %s7448_s22   ;;  %p11215_p4 = scmp.ne.s32.totalorder %s11208_s27, 0 }
  0x68   : > { %s5959_s10 = sshll.u32 %s7682_s13, 7  ;;  %s259_s14 = scalar_lea.sflag [#allocation3], %s7682_s13 }
  0x69   : > { %s7688_s8 = scalar_lea.vmem [#allocation2], %s5959_s10 }
  0x6a   : > { %7431 = dma.done.wait (%p11215_p4), %s259_s14, 2048  }
  0x6b   : > { %7433 = vsyncadd (%p11215_p4), %s259_s14, 4294965248  ;;  %p11216_p7 = scmp.eq.s32.totalorder %s7531_s25, 0 }
  0x6d   : > { %7435 = dma.done.wait (%p11216_p7), [#allocation6], 12288   ;;  %p11217_p8 = pmov %p11216_p7 }
  0x6e   : > { %v10776_v0 = vmov 0.0   ;;  %v318_v1 = vld [vmem:[#allocation5 + $0x8] sm:$0xff]  ;;  %v320_v2 = vld [vmem:[#allocation5 + $0x18] sm:$0xff]  ;;  %v317_v3 = vld [vmem:[#allocation5] sm:$0xff]  ;;  %vm1962_vm0 = vcmask 31744   ;;  %s10587_s15 = scalar_lea.vmem [#allocation8], %s5959_s10 }
  0x6f   : > { %7437 = vsyncadd (%p11217_p8), [#allocation6], 4294955008  ;;  %445 = vmatprep.mubr.f32.mxu1 %v10776_v0  ;;  %1312 = vmatprep.mubr.f32.mxu0 %v10776_v0  ;;  %v349_v4 = vand.u32 4294901760, %v318_v1  ;;  %v353_v5 = vand.u32 4294901760, %v320_v2  ;;  %v319_v6 = vld [vmem:[#allocation5 + $0x10] sm:$0xff]  ;;  %v351_v7 = vand.u32 4294901760, %v317_v3 }
  0x70   : > { %v322_v8 = vld [vmem:[#allocation5 + $0x28] sm:$0xff]  ;;  %v324_v9 = vld [vmem:[#allocation5 + $0x38] sm:$0xff]  ;;  %v355_v10 = vand.u32 4294901760, %v319_v6  ;;  %v321_v13 = vld [vmem:[#allocation5 + $0x20] sm:$0xff]  ;;  %s5971_s7 = sshll.u32 %s7531_s25, 11  ;;  %s5858_s30 = sshll.u32 %s10587_s15, 4  ;;  %s10721_s30 = int_to_ptr.vmem [resolvable:$true] %s5858_s30 }
  0x71   : > { %v357_v11 = vand.u32 4294901760, %v322_v8  ;;  %v361_v12 = vand.u32 4294901760, %v324_v9  ;;  %v323_v14 = vld [vmem:[#allocation5 + $0x30] sm:$0xff]  ;;  %v326_v15 = vld [vmem:[#allocation5 + $0x48] sm:$0xff]  ;;  %v7700_v16 = vpack.c.bf16 %v353_v5, %v349_v4  ;;  %v328_v17 = vld [vmem:[#allocation5 + $0x58] sm:$0xff]  ;;  %v359_v24 = vand.u32 4294901760, %v321_v13  ;;  %s10719_s10 = scalar_lea.hbm %s10772_s6, %s5971_s7 }
  0x72   : > { %v325_v18 = vld [vmem:[#allocation5 + $0x40] sm:$0xff]  ;;  %v327_v19 = vld [vmem:[#allocation5 + $0x50] sm:$0xff]  ;;  %v7702_v20 = vpack.c.bf16 %v355_v10, %v351_v7  ;;  %v330_v22 = vld [vmem:[#allocation5 + $0x68] sm:$0xff]  ;;  %v363_v25 = vand.u32 4294901760, %v323_v14  ;;  %v365_v26 = vand.u32 4294901760, %v326_v15  ;;  %v7708_v27 = vsub.f32 %v318_v1, %v349_v4  ;;  %s5845_s14 = scalar_lea.sflag [#allocation4], %s7682_s13 }
  0x73   : > { %11218 = vst [vmem:[#allocation12_spill] sm:$0xff] %v7700_v16  ;;  %v7704_v21 = vpack.c.bf16 %v361_v12, %v357_v11  ;;  %v332_v23 = vld [vmem:[#allocation5 + $0x78] sm:$0xff]  ;;  %5973 = vmatprep.subr.bf16.mxu1 %v7700_v16  ;;  %6069 = vmatprep.subr.bf16.mxu0 %v7700_v16  ;;  %v369_v28 = vand.u32 4294901760, %v328_v17  ;;  %v367_v29 = vand.u32 4294901760, %v325_v18  ;;  %v371_v30 = vand.u32 4294901760, %v327_v19  ;;  %v329_v35 = vld [vmem:[#allocation5 + $0x60] sm:$0xff] }
  0x74   : > { %11219 = vst [vmem:[#allocation13_spill] sm:$0xff] %v7702_v20  ;;  %5975 = vmatpush1.bf16.msra.mxu1 %v7702_v20  ;;  %6071 = vmatpush1.bf16.msra.mxu0 %v7702_v20  ;;  %v7712_v31 = vsub.f32 %v320_v2, %v353_v5  ;;  %v7716_v32 = vpack.c.bf16 %v363_v25, %v359_v24  ;;  %v373_v33 = vand.u32 4294901760, %v330_v22  ;;  %v377_v34 = vand.u32 4294901760, %v332_v23  ;;  %v331_v36 = vld [vmem:[#allocation5 + $0x70] sm:$0xff]  ;;  %v334_v41 = vld [vmem:[#allocation5 + $0x88] sm:$0xff]  ;;  %v336_v42 = vld [vmem:[#allocation5 + $0x98] sm:$0xff] }
  0x75   : > { %11220 = vst [vmem:[#allocation14_spill] sm:$0xff] %v7704_v21  ;;  %5977 = vmatprep.subr.bf16.mxu1 %v7704_v21  ;;  %6073 = vmatprep.subr.bf16.mxu0 %v7704_v21  ;;  %v7718_v37 = vsub.f32 %v317_v3, %v351_v7  ;;  %v7720_v38 = vsub.f32 %v319_v6, %v355_v10  ;;  %v333_v47 = vld [vmem:[#allocation5 + $0x80] sm:$0xff]  ;;  %v335_v48 = vld [vmem:[#allocation5 + $0x90] sm:$0xff]  ;;  %v375_v51 = vand.u32 4294901760, %v329_v35  ;;  %v379_v52 = vand.u32 4294901760, %v331_v36  ;;  %v338_v53 = vld [vmem:[#allocation5 + $0xa8] sm:$0xff] }
  0x76   : > { %11221 = vst [vmem:[#allocation15_spill] sm:$0xff] %v7716_v32  ;;  %v7722_v39 = vsub.f32 %v322_v8, %v357_v11  ;;  %v7724_v40 = vpack.c.bf16 %v369_v28, %v365_v26  ;;  %v7726_v43 = vsub.f32 %v324_v9, %v361_v12  ;;  %v7728_v44 = vsub.f32 %v321_v13, %v359_v24  ;;  %v340_v58 = vld [vmem:[#allocation5 + $0xb8] sm:$0xff]  ;;  %v337_v59 = vld [vmem:[#allocation5 + $0xa0] sm:$0xff]  ;;  %v339_v1 = vld [vmem:[#allocation5 + $0xb0] sm:$0xff]  ;;  %p11963_p0 = scmp.ne.s32.totalorder %s11213_s12, 0  ;;  %s7472_s25 = smov [#allocation8]  }
  0x77   : > { %v7730_v45 = vsub.f32 %v323_v14, %v363_v25  ;;  %v7732_v46 = vsub.f32 %v326_v15, %v365_v26  ;;  %v7736_v49 = vsub.f32 %v328_v17, %v369_v28  ;;  %v7738_v50 = vpack.c.bf16 %v371_v30, %v367_v29  ;;  %v342_v2 = vld [vmem:[#allocation5 + $0xc8] sm:$0xff]  ;;  %v344_v3 = vld [vmem:[#allocation5 + $0xd8] sm:$0xff]  ;;  %v341_v12 = vld [vmem:[#allocation5 + $0xc0] sm:$0xff]  ;;  %s7390_s27 = sshll.u32 %s7472_s25, 4  ;;  %s7391_s27 = int_to_ptr.vmem [resolvable:$false] %s7390_s27 }
  0x78   : > { %11222 = vst [vmem:[#allocation16_spill] sm:$0xff] %v7724_v40  ;;  %11223 = vst [vmem:[#allocation17_spill] sm:$0xff] %v7726_v43  ;;  %5979 = vmatpush1.bf16.msra.mxu1 %v7716_v32  ;;  %6075 = vmatpush1.bf16.msra.mxu0 %v7716_v32  ;;  %v7742_v54 = vsub.f32 %v325_v18, %v367_v29  ;;  %v7744_v55 = vpack.c.bf16 %v377_v34, %v373_v33  ;;  %v381_v56 = vand.u32 4294901760, %v334_v41  ;;  %v343_v13 = vld [vmem:[#allocation5 + $0xd0] sm:$0xff]  ;;  %v305_v32 = vld [vmem:[%s7688_s8 + $0x20] sm:$0xff]  ;;  %s7392_s29 = scalar_lea.vmem %s7391_s27, 4096  ;;  %p7393_p5 = scmp.lt.s32.totalorder %s10721_s30, %s7391_s27 }
  0x79   : > { %11224 = vst [vmem:[#allocation18_spill] sm:$0xff] %v7728_v44  ;;  %11225 = vst [vmem:[#allocation19_spill] sm:$0xff] %v7730_v45  ;;  %5981 = vmatprep.subr.bf16.mxu1 %v7724_v40  ;;  %6077 = vmatprep.subr.bf16.mxu0 %v7724_v40  ;;  %v385_v57 = vand.u32 4294901760, %v336_v42  ;;  %v7746_v60 = vsub.f32 %v327_v19, %v371_v30  ;;  %v7748_v61 = vsub.f32 %v330_v22, %v373_v33  ;;  %v301_v30 = vld [vmem:[%s7688_s8] sm:$0xff] }
  0x7a   : > { %11226 = vst [vmem:[#allocation20_spill] sm:$0xff] %v7738_v50  ;;  %11227 = vst [vmem:[#allocation21_spill] sm:$0xff] %v7742_v54  ;;  %v383_v62 = vand.u32 4294901760, %v333_v47  ;;  %v387_v63 = vand.u32 4294901760, %v335_v48  ;;  %v7750_v4 = vsub.f32 %v332_v23, %v377_v34  ;;  %v7752_v5 = vpack.c.bf16 %v379_v52, %v375_v51 }
  0x7b   : > { %11228 = vst [vmem:[#allocation22_spill] sm:$0xff] %v7744_v55  ;;  %v7754_v6 = vsub.f32 %v329_v35, %v375_v51  ;;  %v389_v7 = vand.u32 4294901760, %v338_v53  ;;  %v7758_v8 = vsub.f32 %v331_v36, %v379_v52  ;;  %v7760_v9 = vsub.f32 %v334_v41, %v381_v56  ;;  %v346_v36 = vld [vmem:[#allocation5 + $0xe8] sm:$0xff]  ;;  %v7787_v41 = vld [vmem:[#allocation5 + $0xf8] sm:$0xff]  ;;  %v7799_v52 = vld [vmem:[#allocation5 + $0xe0] sm:$0xff] }
  0x7c   : > { %11229 = vst [vmem:[#allocation23_spill] sm:$0xff] %v7752_v5  ;;  %5983 = vmatpush1.bf16.msra.mxu1 %v7738_v50  ;;  %6079 = vmatpush1.bf16.msra.mxu0 %v7738_v50  ;;  %v393_v10 = vand.u32 4294901760, %v340_v58  ;;  %v391_v11 = vand.u32 4294901760, %v337_v59  ;;  %v7764_v14 = vpack.c.bf16 %v385_v57, %v381_v56  ;;  %v395_v15 = vand.u32 4294901760, %v339_v1 }
  0x7d   : > { %5985 = vmatprep.subr.bf16.mxu1 %v7744_v55  ;;  %6081 = vmatprep.subr.bf16.mxu0 %v7744_v55  ;;  %v397_v17 = vand.u32 4294901760, %v342_v2  ;;  %v401_v18 = vand.u32 4294901760, %v344_v3  ;;  %v7766_v19 = vsub.f32 %v336_v42, %v385_v57  ;;  %v7768_v22 = vpack.c.bf16 %v387_v63, %v383_v62 }
  0x7e   : > { %11230 = vst [vmem:[#allocation24_spill] sm:$0xff] %v7764_v14  ;;  %v7770_v23 = vsub.f32 %v333_v47, %v383_v62  ;;  %v7772_v24 = vsub.f32 %v335_v48, %v387_v63  ;;  %v7774_v25 = vpack.c.bf16 %v393_v10, %v389_v7  ;;  %v7776_v26 = vsub.f32 %v338_v53, %v389_v7 }
  0x7f   : > { %11231 = vst [vmem:[#allocation25_spill] sm:$0xff] %v7768_v22  ;;  %v399_v28 = vand.u32 4294901760, %v341_v12  ;;  %v403_v29 = vand.u32 4294901760, %v343_v13  ;;  %v7781_v33 = vsub.f32 %v340_v58, %v393_v10  ;;  %v7783_v34 = vpack.c.bf16 %v395_v15, %v391_v11  ;;  %v302_v58 = vld [vmem:[%s7688_s8 + $0x8] sm:$0xff] }
  0x80   : > { %11232 = vst [vmem:[#allocation26_spill] sm:$0xff] %v7774_v25  ;;  %5987 = vmatpush1.bf16.msra.mxu1 %v7752_v5  ;;  %6083 = vmatpush1.bf16.msra.mxu0 %v7752_v5  ;;  %v7785_v35 = vsub.f32 %v337_v59, %v391_v11  ;;  %v7791_v42 = vsub.f32 %v339_v1, %v395_v15  ;;  %v7801_v53 = vand.u32 4294901760, %v301_v30  ;;  %v624_v56 = vand.u32 4294901760, %v7708_v27 }
  0x81   : > { %11233 = vst [vmem:[#allocation27_spill] sm:$0xff] %v7783_v34  ;;  %5989 = vmatprep.subr.bf16.mxu1 %v7764_v14  ;;  %6085 = vmatprep.subr.bf16.mxu0 %v7764_v14  ;;  %v7793_v47 = vpack.c.bf16 %v401_v18, %v397_v17  ;;  %v7795_v48 = vsub.f32 %v342_v2, %v397_v17  ;;  %v636_v57 = vand.u32 4294901760, %v7712_v31  ;;  %v405_v63 = vand.u32 4294901760, %v346_v36  ;;  %v7811_v2 = vld [vmem:[#allocation5 + $0xf0] sm:$0xff] }
  0x82   : > { %v7797_v51 = vsub.f32 %v344_v3, %v401_v18  ;;  %11235 = vst [vmem:[#allocation29_spill] sm:$0xff] %v7801_v53  ;;  %v7806_v59 = vpack.c.bf16 %v403_v29, %v399_v28  ;;  %v7808_v62 = vsub.f32 %v341_v12, %v399_v28  ;;  %v10782_v1 = vand.u32 4294901760, %v7787_v41  ;;  %v303_v3 = vld [vmem:[%s7688_s8 + $0x10] sm:$0xff] }
  0x83   : > { %11234 = vst [vmem:[#allocation28_spill] sm:$0xff] %v7793_v47  ;;  %v7816_v7 = vsub.f32 %v343_v13, %v403_v29  ;;  %v7819_v10 = vsub.f32 %v301_v30, %v7801_v53  ;;  %v625_v11 = vsub.f32 %v7708_v27, %v624_v56  ;;  %v630_v12 = vand.u32 4294901760, %v7718_v37 }
  0x84   : > { %11236 = vst [vmem:[#allocation30_spill] sm:$0xff] %v7806_v59  ;;  %5991 = vmatpush1.bf16.msra.mxu1 %v7768_v22  ;;  %6087 = vmatpush1.bf16.msra.mxu0 %v7768_v22  ;;  %v637_v17 = vsub.f32 %v7712_v31, %v636_v57  ;;  %v642_v18 = vand.u32 4294901760, %v7720_v38  ;;  %v7828_v28 = vand.u32 4294901760, %v302_v58  ;;  %v7833_v0 = vand.u32 4294901760, %v303_v3 }
  0x85   : > { %11237 = vst [vmem:[#allocation31_spill] sm:$0xff] %v7819_v10  ;;  %5993 = vmatprep.subr.bf16.mxu1 %v7774_v25  ;;  %6089 = vmatprep.subr.bf16.mxu0 %v7774_v25  ;;  %v10787_v29 = vand.u32 4294901760, %v7819_v10  ;;  %v631_v30 = vsub.f32 %v7718_v37, %v630_v12  ;;  %v7837_v22 = vpack.c.bf16 %v10782_v1, %v405_v63  ;;  %v626_v25 = vand.u32 4294901760, %v625_v11 }
  0x86   : > { %11238 = vst [vmem:[#allocation32_spill] sm:$0xff] %v7828_v28  ;;  %11239 = vst [vmem:[#allocation33_spill] sm:$0xff] %v7833_v0  ;;  %v643_v15 = vsub.f32 %v7720_v38, %v642_v18  ;;  %v7841_v14 = vsub.f32 %v302_v58, %v7828_v28  ;;  %v638_v5 = vand.u32 4294901760, %v637_v17  ;;  %v7849_v1 = vsub.f32 %v303_v3, %v7833_v0  ;;  %v304_v0 = vld [vmem:[%s7688_s8 + $0x18] sm:$0xff] }
  0x87   : > { %11240 = vst [vmem:[#allocation34_spill] sm:$0xff] %v7837_v22  ;;  %v449_v13 = vsub.f32 %v7819_v10, %v10787_v29  ;;  %v648_v11 = vand.u32 4294901760, %v7722_v39  ;;  %v632_v58 = vand.u32 4294901760, %v631_v30  ;;  %v7856_v40 = vsub.f32 %v346_v36, %v405_v63 }
  0x88   : > { %11241 = vst [vmem:[#allocation35_spill] sm:$0xff] %v7841_v14  ;;  %5995 = vmatpush1.bf16.msra.mxu1 %v7783_v34  ;;  %6091 = vmatpush1.bf16.msra.mxu0 %v7783_v34  ;;  %11242 = vst [vmem:[#allocation36_spill] sm:$0xff] %v7849_v1  ;;  %v644_v55 = vand.u32 4294901760, %v643_v15  ;;  %v660_v34 = vand.u32 4294901760, %v7726_v43  ;;  %v654_v3 = vand.u32 4294901760, %v7728_v44  ;;  %v11243_v28 = vand.u32 4294901760, %v7799_v52 }
  0x89   : > { %5997 = vmatprep.subr.bf16.mxu1 %v7793_v47  ;;  %6093 = vmatprep.subr.bf16.mxu0 %v7793_v47  ;;  %v649_v17 = vsub.f32 %v7722_v39, %v648_v11  ;;  %v11244_v47 = vand.u32 4294901760, %v7811_v2  ;;  %v6100_v15 = vpack.c.bf16 %v636_v57, %v624_v56  ;;  %v6102_v50 = vpack.c.bf16 %v642_v18, %v630_v12 }
  0x8a   : > { %v661_v21 = vsub.f32 %v7726_v43, %v660_v34  ;;  %v450_v36 = vand.u32 4294901760, %v449_v13  ;;  %v6004_v63 = vpack.c.bf16 %v638_v5, %v626_v25  ;;  %v655_v29 = vsub.f32 %v7728_v44, %v654_v3  ;;  %v307_v44 = vld [vmem:[%s7688_s8 + $0x30] sm:$0xff] }
  0x8b   : > { %v7867_v30 = vpack.c.bf16 %v11244_v47, %v11243_v28  ;;  %v666_v20 = vand.u32 4294901760, %v7730_v45  ;;  %v6006_v47 = vpack.c.bf16 %v644_v55, %v632_v58  ;;  %v11246_v56 = vand.u32 4294901760, %v7841_v14 }
  0x8c   : > { %5999 = vmatpush1.bf16.msra.mxu1 %v7806_v59  ;;  %6095 = vmatpush1.bf16.msra.mxu0 %v7806_v59  ;;  %v7879_v12 = vand.u32 4294901760, %v304_v0  ;;  %v7881_v18 = vand.u32 4294901760, %v305_v32  ;;  %v11249_v5 = vand.u32 4294901760, %v7849_v1  ;;  %v650_v28 = vand.u32 4294901760, %v649_v17 }
  0x8d   : > { %11245 = vst [vmem:[#allocation37_spill] sm:$0xff] %v7867_v30  ;;  %6001 = vmatprep.subr.bf16.mxu1 %v7837_v22  ;;  %6097 = vmatprep.subr.bf16.mxu0 %v7837_v22  ;;  %v460_v57 = vsub.f32 %v7841_v14, %v11246_v56  ;;  %v662_v13 = vand.u32 4294901760, %v661_v21  ;;  %v667_v59 = vsub.f32 %v7730_v45, %v666_v20  ;;  %v656_v53 = vand.u32 4294901760, %v655_v29  ;;  %v306_v22 = vld [vmem:[%s7688_s8 + $0x28] sm:$0xff] }
  0x8e   : > { %11247 = vst [vmem:[#allocation38_spill] sm:$0xff] %v7879_v12  ;;  %11248 = vst [vmem:[#allocation39_spill] sm:$0xff] %v7881_v18  ;;  %v7886_v25 = vsub.f32 %v7849_v1, %v11249_v5  ;;  %v7890_v55 = vsub.f32 %v304_v0, %v7879_v12  ;;  %v7893_v58 = vsub.f32 %v305_v32, %v7881_v18  ;;  %v672_v56 = vand.u32 4294901760, %v7732_v46 }
  0x8f   : > { %v668_v5 = vand.u32 4294901760, %v667_v59  ;;  %v684_v21 = vand.u32 4294901760, %v7736_v49  ;;  %v678_v17 = vand.u32 4294901760, %v7742_v54  ;;  %v690_v29 = vand.u32 4294901760, %v7746_v60 }
  0x90   : > { %11250 = vst [vmem:[#allocation40_spill] sm:$0xff] %v7890_v55  ;;  %11251 = vst [vmem:[#allocation41_spill] sm:$0xff] %v7893_v58  ;;  %6003 = vmatpush1.bf16.msra.mxu1 %v7867_v30  ;;  %6099 = vmatpush1.bf16.msra.mxu0 %v7867_v30  ;;  %v461_v0 = vand.u32 4294901760, %v460_v57  ;;  %v6104_v32 = vpack.c.bf16 %v660_v34, %v648_v11  ;;  %v673_v12 = vsub.f32 %v7732_v46, %v672_v56 }
  0x91   : > { %6005 = vmatprep.subr.bf16.mxu1 %v6004_v63  ;;  %6101 = vmatprep.subr.bf16.mxu0 %v6100_v15  ;;  %v6008_v16 = vpack.c.bf16 %v662_v13, %v650_v28  ;;  %v685_v45 = vsub.f32 %v7736_v49, %v684_v21  ;;  %v679_v30 = vsub.f32 %v7742_v54, %v678_v17  ;;  %v7906_v59 = vand.u32 4294901760, %v306_v22 }
  0x92   : > { %v11252_v43 = vand.u32 4294901760, %v7819_v10  ;;  %v472_v15 = vand.u32 4294901760, %v7886_v25  ;;  %v674_v11 = vand.u32 4294901760, %v673_v12  ;;  %v691_v63 = vsub.f32 %v7746_v60, %v690_v29  ;;  %v8234_v10 = vld [vmem:[#allocation7 + $0x78] sm:$0xff] }
  0x93   : > { %451 = vmatmul.mubr.f32.vlgmr.msra.gmra.mrb[0].mxu1 %v450_v36  ;;  %v6010_v57 = vpack.c.bf16 %v668_v5, %v656_v53  ;;  %v6106_v28 = vpack.c.bf16 %v666_v20, %v654_v3  ;;  %v686_v13 = vand.u32 4294901760, %v685_v45  ;;  %v6108_v18 = vpack.c.bf16 %v684_v21, %v672_v56  ;;  %v308_v3 = vld [vmem:[%s7688_s8 + $0x38] sm:$0xff] }
  0x94   : > { %1316 = vmatmul.mubr.f32.vlgmr.msra.gmra.mrb[0].mxu0 %v11252_v43  ;;  %6007 = vmatpush1.bf16.msra.mxu1 %v6006_v47  ;;  %v11253_v54 = vmov 0.0   ;;  %v11254_v43 = vand.u32 4294901760, %v7890_v55  ;;  %v680_v25 = vand.u32 4294901760, %v679_v30  ;;  %v692_v34 = vand.u32 4294901760, %v691_v63 }
  0x95   : > { %6103 = vmatpush1.bf16.msra.mxu0 %v6102_v50  ;;  %456 = vmatprep.mubr.f32.mxu1 %v11253_v54  ;;  %v7919_v12 = vand.u32 4294901760, %v307_v44  ;;  %v6012_v50 = vpack.c.bf16 %v686_v13, %v674_v11  ;;  %v7922_v53 = vsub.f32 %v306_v22, %v7906_v59  ;;  %v696_v20 = vand.u32 4294901760, %v7748_v61 }
  0x96   : > { %1321 = vmatprep.mubr.f32.mxu0 %v11253_v54  ;;  %v482_v36 = vsub.f32 %v7890_v55, %v11254_v43  ;;  %6009 = vmatprep.subr.bf16.mxu1 %v6008_v16  ;;  %v708_v45 = vand.u32 4294901760, %v7750_v4  ;;  %v11256_v47 = vand.u32 4294901760, %v7841_v14  ;;  %v11257_v30 = vand.u32 4294901760, %v7893_v58 }
  0x97   : > { %6105 = vmatprep.subr.bf16.mxu0 %v6104_v32  ;;  %11255 = vst [vmem:[#allocation42_spill] sm:$0xff] %v7922_v53  ;;  %462 = vmatmul.mubr.f32.gmra.mrb[2].mxu1 %v461_v0  ;;  %v7935_v16 = vsub.f32 %v307_v44, %v7919_v12  ;;  %v702_v22 = vand.u32 4294901760, %v7754_v6  ;;  %v714_v5 = vand.u32 4294901760, %v7758_v8  ;;  %v6110_v21 = vpack.c.bf16 %v690_v29, %v678_v17  ;;  %v309_v29 = vld [vmem:[%s7688_s8 + $0x40] sm:$0xff] }
  0x98   : > { %1325 = vmatmul.mubr.f32.gmra.mrb[2].mxu0 %v11256_v47  ;;  %v7932_v56 = vsub.f32 %v7893_v58, %v11257_v30  ;;  %467 = vmatprep.mubr.f32.mxu1 %v11253_v54  ;;  %v697_v0 = vsub.f32 %v7748_v61, %v696_v20  ;;  %v709_v32 = vsub.f32 %v7750_v4, %v708_v45  ;;  %v7945_v13 = vand.u32 4294901760, %v308_v3 }
  0x99   : > { %11258 = vst [vmem:[#allocation43_spill] sm:$0xff] %v7935_v16  ;;  %1330 = vmatprep.mubr.f32.mxu0 %v11253_v54  ;;  %6011 = vmatpush1.bf16.msra.mxu1 %v6010_v57  ;;  %v6014_v11 = vpack.c.bf16 %v692_v34, %v680_v25  ;;  %v703_v44 = vsub.f32 %v7754_v6, %v702_v22  ;;  %v10815_v43 = vand.u32 4294901760, %v7922_v53  ;;  %v11259_v14 = vand.u32 4294901760, %v7849_v1  ;;  %v314_v1 = vld [vmem:[%s7688_s8 + $0x68] sm:$0xff] }
  0x9a   : > { %6107 = vmatpush1.bf16.msra.mxu0 %v6106_v28  ;;  %v715_v63 = vsub.f32 %v7758_v8, %v714_v5  ;;  %6013 = vmatprep.subr.bf16.mxu1 %v6012_v50  ;;  %v698_v47 = vand.u32 4294901760, %v697_v0  ;;  %v710_v30 = vand.u32 4294901760, %v709_v32  ;;  %v6112_v17 = vpack.c.bf16 %v708_v45, %v696_v20 }
  0x9b   : > { %6109 = vmatprep.subr.bf16.mxu0 %v6108_v18  ;;  %473 = vmatmul.mubr.f32.gmra.mrb[4].mxu1 %v472_v15  ;;  %v483_v57 = vand.u32 4294901760, %v482_v36  ;;  %v10817_v34 = vand.u32 4294901760, %v7935_v16  ;;  %v704_v28 = vand.u32 4294901760, %v703_v44  ;;  %v6114_v50 = vpack.c.bf16 %v714_v5, %v702_v22 }
  0x9c   : > { %1334 = vmatmul.mubr.f32.gmra.mrb[4].mxu0 %v11259_v14  ;;  %v716_v25 = vand.u32 4294901760, %v715_v63  ;;  %478 = vmatprep.mubr.f32.mxu1 %v11253_v54  ;;  %v6016_v18 = vpack.c.bf16 %v710_v30, %v698_v47  ;;  %v720_v0 = vand.u32 4294901760, %v7760_v9  ;;  %v732_v20 = vand.u32 4294901760, %v7766_v19 }
  0x9d   : > { %1339 = vmatprep.mubr.f32.mxu0 %v11253_v54  ;;  %6015 = vmatpush1.bf16.msra.mxu1 %v6014_v11  ;;  %v7957_v14 = vsub.f32 %v308_v3, %v7945_v13  ;;  %v7959_v36 = vand.u32 4294901760, %v309_v29  ;;  %v726_v45 = vand.u32 4294901760, %v7770_v23  ;;  %v504_v32 = vsub.f32 %v7922_v53, %v10815_v43 }
  0x9e   : > { %6111 = vmatpush1.bf16.msra.mxu0 %v6110_v21  ;;  %v6018_v15 = vpack.c.bf16 %v716_v25, %v704_v28  ;;  %6017 = vmatprep.subr.bf16.mxu1 %v6016_v18  ;;  %v721_v22 = vsub.f32 %v7760_v9, %v720_v0  ;;  %v733_v5 = vsub.f32 %v7766_v19, %v732_v20  ;;  %v738_v21 = vand.u32 4294901760, %v7772_v24  ;;  %v311_v18 = vld [vmem:[%s7688_s8 + $0x50] sm:$0xff] }
  0x9f   : > { %11260 = vst [vmem:[#allocation44_spill] sm:$0xff] %v7957_v14  ;;  %6113 = vmatprep.subr.bf16.mxu0 %v6112_v17  ;;  %v11261_v3 = vand.u32 4294901760, %v7787_v41  ;;  %484 = vmatmul.mubr.f32.gmra.mrb[6].mxu1 %v483_v57  ;;  %v11262_v44 = vand.u32 4294901760, %v7890_v55  ;;  %v494_v63 = vand.u32 4294901760, %v7932_v56  ;;  %v6116_v47 = vpack.c.bf16 %v732_v20, %v720_v0  ;;  %v310_v17 = vld [vmem:[%s7688_s8 + $0x48] sm:$0xff] }
  0xa0   : > { %v727_v30 = vsub.f32 %v7770_v23, %v726_v45  ;;  %489 = vmatprep.mubr.f32.mxu1 %v11253_v54  ;;  %v7983_v28 = vsub.f32 %v7935_v16, %v10817_v34  ;;  %v734_v57 = vand.u32 4294901760, %v733_v5  ;;  %v739_v25 = vsub.f32 %v7772_v24, %v738_v21 }
  0xa1   : > { %v7971_v11 = vsub.f32 %v7787_v41, %v11261_v3  ;;  %1343 = vmatmul.mubr.f32.gmra.mrb[6].mxu0 %v11262_v44  ;;  %v722_v41 = vand.u32 4294901760, %v721_v22  ;;  %6019 = vmatpush1.bf16.msra.mxu1 %v6018_v15  ;;  %v10818_v56 = vand.u32 4294901760, %v7957_v14  ;;  %v7989_v0 = vsub.f32 %v309_v29, %v7959_v36 }
  0xa2   : > { %1348 = vmatprep.mubr.f32.mxu0 %v11253_v54  ;;  %6115 = vmatpush1.bf16.msra.mxu0 %v6114_v50  ;;  %v728_v20 = vand.u32 4294901760, %v727_v30  ;;  %v6118_v3 = vpack.c.bf16 %v738_v21, %v726_v45  ;;  %v505_v44 = vand.u32 4294901760, %v504_v32  ;;  %v740_v55 = vand.u32 4294901760, %v739_v25  ;;  %v312_v25 = vld [vmem:[%s7688_s8 + $0x58] sm:$0xff] }
  0xa3   : > { %11263 = vst [vmem:[#allocation45_spill] sm:$0xff] %v7989_v0  ;;  %v6020_v43 = vpack.c.bf16 %v734_v57, %v722_v41  ;;  %6117 = vmatprep.subr.bf16.mxu0 %v6116_v47  ;;  %v7991_v34 = vand.u32 4294901760, %v310_v17  ;;  %495 = vmatmul.mubr.f32.gmra.mrb[8].mxu1 %v494_v63  ;;  %v11264_v22 = vand.u32 4294901760, %v7893_v58  ;;  %v7995_v5 = vand.u32 4294901760, %v311_v18 }
  0xa4   : > { %v744_v50 = vand.u32 4294901760, %v7776_v26  ;;  %v756_v29 = vand.u32 4294901760, %v7781_v33  ;;  %v750_v15 = vand.u32 4294901760, %v7785_v35  ;;  %v11265_v45 = vand.u32 4294901760, %v7799_v52  ;;  %500 = vmatprep.mubr.f32.mxu1 %v11253_v54 }
  0xa5   : > { %1352 = vmatmul.mubr.f32.gmra.mrb[8].mxu0 %v11264_v22  ;;  %v516_v21 = vand.u32 4294901760, %v7983_v28  ;;  %v6022_v63 = vpack.c.bf16 %v740_v55, %v728_v20  ;;  %v762_v47 = vand.u32 4294901760, %v7791_v42  ;;  %v526_v30 = vsub.f32 %v7957_v14, %v10818_v56  ;;  %6021 = vmatprep.subr.bf16.mxu1 %v6020_v43 }
  0xa6   : > { %v8003_v32 = vsub.f32 %v7799_v52, %v11265_v45  ;;  %1357 = vmatprep.mubr.f32.mxu0 %v11253_v54  ;;  %6119 = vmatpush1.bf16.msra.mxu0 %v6118_v3  ;;  %v745_v52 = vsub.f32 %v7776_v26, %v744_v50  ;;  %v757_v57 = vsub.f32 %v7781_v33, %v756_v29  ;;  %v11267_v45 = vand.u32 4294901760, %v7922_v53  ;;  %v313_v53 = vld [vmem:[%s7688_s8 + $0x60] sm:$0xff] }
  0xa7   : > { %6023 = vmatpush1.bf16.msra.mxu1 %v6022_v63  ;;  %v8017_v22 = vsub.f32 %v310_v17, %v7991_v34  ;;  %v6120_v55 = vpack.c.bf16 %v756_v29, %v744_v50  ;;  %v751_v28 = vsub.f32 %v7785_v35, %v750_v15  ;;  %v763_v20 = vsub.f32 %v7791_v42, %v762_v47 }
  0xa8   : > { %506 = vmatmul.mubr.f32.gmra.mrb[10].mxu1 %v505_v44  ;;  %v8024_v43 = vsub.f32 %v311_v18, %v7995_v5  ;;  %v746_v3 = vand.u32 4294901760, %v745_v52  ;;  %v758_v56 = vand.u32 4294901760, %v757_v57  ;;  %v6122_v41 = vpack.c.bf16 %v762_v47, %v750_v15 }
  0xa9   : > { %11266 = vst [vmem:[#allocation46_spill] sm:$0xff] %v8017_v22  ;;  %1361 = vmatmul.mubr.f32.gmra.mrb[10].mxu0 %v11267_v45  ;;  %v11269_v63 = vand.u32 4294901760, %v7811_v2  ;;  %511 = vmatprep.mubr.f32.mxu1 %v11253_v54  ;;  %v752_v44 = vand.u32 4294901760, %v751_v28  ;;  %v764_v50 = vand.u32 4294901760, %v763_v20  ;;  %v8033_v29 = vand.u32 4294901760, %v312_v25 }
  0xaa   : > { %11268 = vst [vmem:[#allocation47_spill] sm:$0xff] %v8024_v43  ;;  %1366 = vmatprep.mubr.f32.mxu0 %v11253_v54  ;;  %v527_v45 = vand.u32 4294901760, %v526_v30  ;;  %v6024_v18 = vpack.c.bf16 %v758_v56, %v746_v3  ;;  %6121 = vmatprep.subr.bf16.mxu0 %v6120_v55  ;;  %v768_v52 = vand.u32 4294901760, %v7795_v48  ;;  %v780_v15 = vand.u32 4294901760, %v7797_v51 }
  0xab   : > { %v8029_v17 = vsub.f32 %v7811_v2, %v11269_v63  ;;  %v11270_v47 = vand.u32 4294901760, %v7989_v0  ;;  %v6026_v63 = vpack.c.bf16 %v764_v50, %v752_v44  ;;  %6123 = vmatpush1.bf16.msra.mxu0 %v6122_v41  ;;  %v774_v28 = vand.u32 4294901760, %v7808_v62 }
  0xac   : > { %517 = vmatmul.mubr.f32.gmra.mrb[12].mxu1 %v516_v21  ;;  %v11271_v30 = vand.u32 4294901760, %v7935_v16  ;;  %v769_v55 = vsub.f32 %v7795_v48, %v768_v52  ;;  %v781_v20 = vsub.f32 %v7797_v51, %v780_v15  ;;  %v786_v3 = vand.u32 4294901760, %v7816_v7  ;;  %6025 = vmatprep.subr.bf16.mxu1 %v6024_v18 }
  0xad   : > { %v537_v2 = vsub.f32 %v7989_v0, %v11270_v47  ;;  %522 = vmatprep.mubr.f32.mxu1 %v11253_v54  ;;  %v8052_v41 = vsub.f32 %v312_v25, %v8033_v29  ;;  %v6124_v21 = vpack.c.bf16 %v780_v15, %v768_v52  ;;  %v775_v44 = vsub.f32 %v7808_v62, %v774_v28 }
  0xae   : > { %1370 = vmatmul.mubr.f32.gmra.mrb[12].mxu0 %v11271_v30  ;;  %v8055_v50 = vand.u32 4294901760, %v313_v53  ;;  %v770_v47 = vand.u32 4294901760, %v769_v55  ;;  %v782_v30 = vand.u32 4294901760, %v781_v20  ;;  %v787_v56 = vsub.f32 %v7816_v7, %v786_v3  ;;  %6027 = vmatpush1.bf16.msra.mxu1 %v6026_v63 }
  0xaf   : > { %1375 = vmatprep.mubr.f32.mxu0 %v11253_v54  ;;  %11272 = vst [vmem:[#allocation48_spill] sm:$0xff] %v8052_v41  ;;  %v538_v57 = vand.u32 4294901760, %v537_v2  ;;  %6125 = vmatprep.subr.bf16.mxu0 %v6124_v21  ;;  %v776_v16 = vand.u32 4294901760, %v775_v44  ;;  %v6126_v58 = vpack.c.bf16 %v786_v3, %v774_v28  ;;  %v11273_v25 = vand.u32 4294901760, %v7957_v14 }
  0xb0   : > { %528 = vmatmul.mubr.f32.gmra.mrb[14].mxu1 %v527_v45  ;;  %v11274_v52 = vand.u32 4294901760, %v8017_v22  ;;  %v11275_v15 = vand.u32 4294901760, %v8024_v43  ;;  %v6028_v20 = vpack.c.bf16 %v782_v30, %v770_v47  ;;  %v788_v2 = vand.u32 4294901760, %v787_v56 }
  0xb1   : > { %533 = vmatprep.mubr.f32.mxu1 %v11253_v54  ;;  %v792_v63 = vand.u32 4294901760, %v7856_v40  ;;  %v804_v28 = vand.u32 4294901760, %v7971_v11  ;;  %v798_v3 = vand.u32 4294901760, %v8003_v32  ;;  %v8076_v21 = vsub.f32 %v313_v53, %v8055_v50  ;;  %6127 = vmatpush1.bf16.msra.mxu0 %v6126_v58 }
  0xb2   : > { %1379 = vmatmul.mubr.f32.gmra.mrb[14].mxu0 %v11273_v25  ;;  %v548_v18 = vsub.f32 %v8017_v22, %v11274_v52  ;;  %v8067_v55 = vsub.f32 %v8024_v43, %v11275_v15  ;;  %6029 = vmatprep.subr.bf16.mxu1 %v6028_v20  ;;  %v6030_v44 = vpack.c.bf16 %v788_v2, %v776_v16  ;;  %v8078_v56 = vand.u32 4294901760, %v314_v1 }
  0xb3   : > { %1384 = vmatprep.mubr.f32.mxu0 %v11253_v54  ;;  %11276 = vst [vmem:[#allocation49_spill] sm:$0xff] %v8076_v21  ;;  %v810_v47 = vand.u32 4294901760, %v8029_v17  ;;  %v793_v30 = vsub.f32 %v7856_v40, %v792_v63  ;;  %v805_v25 = vsub.f32 %v7971_v11, %v804_v28  ;;  %v6128_v52 = vpack.c.bf16 %v804_v28, %v792_v63 }
  0xb4   : > { %539 = vmatmul.mubr.f32.gmra.mrb[16].mxu1 %v538_v57  ;;  %v11277_v15 = vand.u32 4294901760, %v7989_v0  ;;  %v549_v45 = vand.u32 4294901760, %v548_v18  ;;  %v799_v53 = vsub.f32 %v8003_v32, %v798_v3  ;;  %v560_v20 = vand.u32 4294901760, %v8067_v55  ;;  %v315_v57 = vld [vmem:[%s7688_s8 + $0x70] sm:$0xff] }
  0xb5   : > { %v811_v16 = vsub.f32 %v8029_v17, %v810_v47  ;;  %v6130_v58 = vpack.c.bf16 %v810_v47, %v798_v3  ;;  %544 = vmatprep.mubr.f32.mxu1 %v11253_v54  ;;  %v11278_v2 = vand.u32 4294901760, %v8052_v41  ;;  %v794_v28 = vand.u32 4294901760, %v793_v30  ;;  %6031 = vmatpush1.bf16.msra.mxu1 %v6030_v44  ;;  %v11280_v30 = vld [vmem:[#allocation17_spill] sm:$0xff] }
  0xb6   : > { %1388 = vmatmul.mubr.f32.gmra.mrb[16].mxu0 %v11277_v15  ;;  %v806_v0 = vand.u32 4294901760, %v805_v25  ;;  %v580_v18 = vand.u32 4294901760, %v8076_v21  ;;  %v8096_v15 = vsub.f32 %v314_v1, %v8078_v56  ;;  %6129 = vmatprep.subr.bf16.mxu0 %v6128_v52  ;;  %v800_v3 = vand.u32 4294901760, %v799_v53  ;;  %v11282_v53 = vld [vmem:[#allocation18_spill] sm:$0xff] }
  0xb7   : > { %1393 = vmatprep.mubr.f32.mxu0 %v11253_v54  ;;  %v570_v63 = vsub.f32 %v8052_v41, %v11278_v2  ;;  %v812_v47 = vand.u32 4294901760, %v811_v16  ;;  %6131 = vmatpush1.bf16.msra.mxu0 %v6130_v58  ;;  %v6036_v55 = vpack.c.bf16 %v7712_v31, %v7708_v27  ;;  %v11281_v44 = vand.u32 4294901760, %v8017_v22  ;;  %v11283_v16 = vld [vmem:[#allocation19_spill] sm:$0xff]  ;;  %v11284_v31 = vld [vmem:[#allocation21_spill] sm:$0xff] }
  0xb8   : > { %11279 = vst [vmem:[#allocation50_spill] sm:$0xff] %v8096_v15  ;;  %v6032_v14 = vpack.c.bf16 %v806_v0, %v794_v28  ;;  %550 = vmatmul.mubr.f32.gmra.mrb[18].mxu1 %v549_v45  ;;  %v8106_v1 = vand.u32 4294901760, %v315_v57  ;;  %v316_v27 = vld [vmem:[%s7688_s8 + $0x78] sm:$0xff]  ;;  %v8180_v28 = vld [vmem:[#allocation7 + $0x10] sm:$0xff]  ;;  %v11298_v41 = vld [vmem:[#allocation29_spill] sm:$0xff]  ;;  %s7386_s8 = scalar_lea.vmem %s10721_s30, 2048 }
  0xb9   : > { %v6034_v52 = vpack.c.bf16 %v812_v47, %v800_v3  ;;  %555 = vmatprep.mubr.f32.mxu1 %v11253_v54  ;;  %v11285_v47 = vld [vmem:[#allocation12_spill] sm:$0xff]  ;;  %v571_v25 = vand.u32 4294901760, %v570_v63  ;;  %v8139_v0 = vand.u32 4294901760, %v316_v27  ;;  %v8182_v45 = vld [vmem:[#allocation7 + $0x30] sm:$0xff]  ;;  %p7387_p11 = scmp.ne.s32.totalorder %s10721_s30, %s7386_s8  ;;  %p7394_p9 = scmp.lt.s32.totalorder %s7392_s29, %s7386_s8 }
  0xba   : > { %1397 = vmatmul.mubr.f32.gmra.mrb[18].mxu0 %v11281_v44  ;;  %6033 = vmatprep.subr.bf16.mxu1 %v6032_v14  ;;  %v11286_v14 = vand.u32 4294901760, %v8024_v43  ;;  %v591_v44 = vand.u32 4294901760, %v8096_v15  ;;  %v8137_v58 = vsub.f32 %v315_v57, %v8106_v1 }
  0xbb   : > { %1402 = vmatprep.mubr.f32.mxu0 %v11253_v54  ;;  %6133 = vmatprep.subr.bf16.mxu0 %v11285_v47  ;;  %v581_v47 = vsub.f32 %v8076_v21, %v580_v18  ;;  %v8148_v3 = vsub.f32 %v316_v27, %v8139_v0  ;;  %v8204_v21 = vld [vmem:[#allocation7 + $0x40] sm:$0xff]  ;;  %p7388_p1 = pnand %p7387_p11, %p11963_p0  ;;  %p7395_p12 = por %p7394_p9, %p7393_p5 }
  0xbc   : > { %6035 = vmatpush1.bf16.msra.mxu1 %v6034_v52  ;;  %11287 = vst [vmem:[#allocation17_spill] sm:$0xff] %v8137_v58  ;;  %v592_v52 = vsub.f32 %v8096_v15, %v591_v44  ;;  %v8202_v15 = vld [vmem:[#allocation7 + $0x68] sm:$0xff]  ;;  %11297 = vst [vmem:[#allocation53_spill] sm:$0xff] %v8204_v21 }
  0xbd   : > { %561 = vmatmul.mubr.f32.gmra.mrb[20].mxu1 %v560_v20  ;;  %6037 = vmatprep.subr.bf16.mxu1 %v6036_v55  ;;  %v11288_v20 = vmov %v11278_v2  ;;  %v582_v63 = vand.u32 4294901760, %v581_v47  ;;  %11289 = vst [vmem:[#allocation18_spill] sm:$0xff] %v8148_v3  ;;  %v8184_v2 = vld [vmem:[#allocation7 + $0x48] sm:$0xff]  ;;  %11296 = vst [vmem:[#allocation52_spill] sm:$0xff] %v8202_v15  ;;  %p7389_p3 = pneg %p7388_p1 }
  0xbe   : > { %1406 = vmatmul.mubr.f32.gmra.mrb[20].mxu0 %v11286_v14  ;;  %566 = vmatprep.mubr.f32.mxu1 %v11253_v54  ;;  %v602_v14 = vand.u32 4294901760, %v8137_v58  ;;  %v593_v57 = vand.u32 4294901760, %v592_v52  ;;  %11290 = vst [vmem:[#allocation19_spill] sm:$0xff] %v8184_v2 }
  0xbf   : > { %1411 = vmatprep.mubr.f32.mxu0 %v11253_v54  ;;  %p7396_p2 = pnand %p7395_p12, %p7389_p3 }
  0xc0   : > { %v603_v55 = vsub.f32 %v8137_v58, %v602_v14  ;;  %v11302_v58 = vpack.c.bf16 %v7720_v38, %v7718_v37  ;;  %v11308_v37 = vand.u32 4294901760, %v8180_v28 }
  0xc1   : > { %572 = vmatmul.mubr.f32.gmra.mrb[22].mxu1 %v571_v25  ;;  %v613_v25 = vand.u32 4294901760, %v8148_v3 }
  0xc2   : > { %1415 = vmatmul.mubr.f32.gmra.mrb[22].mxu0 %v11288_v20  ;;  %577 = vmatprep.mubr.f32.mxu1 %v11253_v54  ;;  %v604_v47 = vand.u32 4294901760, %v603_v55  ;;  %v8161_v20 = vld [vmem:[#allocation7 + $0x8] sm:$0xff]  ;;  %v8241_v38 = vsub.f32 %v8180_v28, %v11308_v37  ;;  %v11313_v37 = vand.u32 4294901760, %v8184_v2 }
  0xc3   : > { %1420 = vmatprep.mubr.f32.mxu0 %v11253_v54  ;;  %v614_v27 = vsub.f32 %v8148_v3, %v613_v25  ;;  %v10830_v52 = vand.u32 4294901760, %v8161_v20 }
  0xc4   : > { %11309 = vst [vmem:[#allocation57_spill] sm:$0xff] %v8241_v38  ;;  %v8259_v38 = vsub.f32 %v8184_v2, %v11313_v37  ;;  %v8299_v2 = vld [vmem:[#allocation7 + $0x98] sm:$0xff] }
  0xc5   : > { %583 = vmatmul.mubr.f32.gmra.mrb[24].mxu1 %v582_v63  ;;  %v8163_v63 = vld [vmem:[#allocation7 + $0x28] sm:$0xff] }
  0xc6   : > { %1424 = vmatmul.mubr.f32.gmra.mrb[24].mxu0 %v580_v18  ;;  %588 = vmatprep.mubr.f32.mxu1 %v11253_v54  ;;  %v615_v18 = vand.u32 4294901760, %v614_v27  ;;  %v11292_v55 = vand.u32 4294901760, %v8163_v63  ;;  %11314 = vst [vmem:[#allocation58_spill] sm:$0xff] %v8259_v38 }
  0xc7   : > { %1429 = vmatprep.mubr.f32.mxu0 %v11253_v54 }
  0xc8   : > { %v8194_v3 = vsub.f32 %v8163_v63, %v11292_v55 }
  0xc9   : > { %594 = vmatmul.mubr.f32.gmra.mrb[26].mxu1 %v593_v57  ;;  %v8171_v57 = vld [vmem:[#allocation7 + $0x20] sm:$0xff] }
  0xca   : > { %1433 = vmatmul.mubr.f32.gmra.mrb[26].mxu0 %v591_v44  ;;  %599 = vmatprep.mubr.f32.mxu1 %v11253_v54  ;;  %v8165_v44 = vld [vmem:[#allocation7] sm:$0xff]  ;;  %11293 = vst [vmem:[#allocation12_spill] sm:$0xff] %v8194_v3  ;;  %v10842_v3 = vand.u32 4294901760, %v8182_v45 }
  0xcb   : > { %1438 = vmatprep.mubr.f32.mxu0 %v11253_v54  ;;  %v11294_v27 = vand.u32 4294901760, %v8165_v44 }
  0xcd   : > { %605 = vmatmul.mubr.f32.gmra.mrb[28].mxu1 %v604_v47  ;;  %v8174_v47 = vld [vmem:[#allocation7 + $0x18] sm:$0xff] }
  0xce   : > { %1442 = vmatmul.mubr.f32.gmra.mrb[28].mxu0 %v602_v14  ;;  %610 = vmatprep.mubr.f32.mxu1 %v11253_v54  ;;  %v8189_v14 = vsub.f32 %v8161_v20, %v10830_v52  ;;  %v11299_v52 = vand.u32 4294901760, %v8171_v57  ;;  %v11304_v43 = vand.u32 4294901760, %v8174_v47 }
  0xcf   : > { %1447 = vmatprep.mubr.f32.mxu0 %v11253_v54 }
  0xd0   : > { %11291 = vst [vmem:[#allocation21_spill] sm:$0xff] %v8189_v14  ;;  %v8211_v55 = vsub.f32 %v8171_v57, %v11299_v52  ;;  %v8214_v14 = vld [vmem:[#allocation7 + $0x60] sm:$0xff]  ;;  %v8225_v22 = vsub.f32 %v8174_v47, %v11304_v43  ;;  %v11319_v43 = vand.u32 4294901760, %v8204_v21 }
  0xd1   : > { %616 = vmatmul.mubr.f32.gmra.mrb[30].mxu1 %v615_v18  ;;  %v8199_v18 = vsub.f32 %v8165_v44, %v11294_v27  ;;  %11301 = vst [vmem:[#allocation55_spill] sm:$0xff] %v8214_v14  ;;  %v8216_v27 = vld [vmem:[#allocation7 + $0x58] sm:$0xff] }
  0xd2   : > { %1451 = vmatmul.mubr.f32.gmra.mrb[30].mxu0 %v613_v25  ;;  %846 = vmatprep.mubr.f32.mxu1 %v11253_v54  ;;  %v8176_v25 = vld [vmem:[#allocation7 + $0x38] sm:$0xff]  ;;  %11300 = vst [vmem:[#allocation54_spill] sm:$0xff] %v8211_v55  ;;  %v8284_v38 = vsub.f32 %v8204_v21, %v11319_v43  ;;  %v11323_v37 = vand.u32 4294901760, %v8216_v27  ;;  %v11326_v43 = vpack.c.bf16 %v11283_v16, %v11282_v53  ;;  %v11331_v21 = vld [vmem:[#allocation16_spill] sm:$0xff] }
  0xd3   : > { %1617 = vmatprep.mubr.f32.mxu0 %v11253_v54  ;;  %11295 = vst [vmem:[#allocation51_spill] sm:$0xff] %v8199_v18  ;;  %v11303_v18 = vld [vmem:[#allocation13_spill] sm:$0xff]  ;;  %v11306_v52 = vand.u32 4294901760, %v8176_v25 }
  0xd4   : > { %11305 = vst [vmem:[#allocation13_spill] sm:$0xff] %v8225_v22  ;;  %v8263_v22 = vld [vmem:[#allocation7 + $0x70] sm:$0xff]  ;;  %11320 = vst [vmem:[#allocation61_spill] sm:$0xff] %v8284_v38  ;;  %v11327_v38 = vld [vmem:[#allocation15_spill] sm:$0xff] }
  0xd5   : > { %848 = vmatmul.mubr.f32.vlgmr.msra.gmra.mrb[0].mxu1 %v11298_v41  ;;  %v8230_v55 = vsub.f32 %v8176_v25, %v11306_v52  ;;  %v11310_v52 = vpack.c.bf16 %v11280_v30, %v7722_v39  ;;  %v8265_v39 = vld [vmem:[#allocation7 + $0x88] sm:$0xff]  ;;  %v11315_v30 = vld [vmem:[#allocation32_spill] sm:$0xff] }
  0xd6   : > { %1619 = vmatmul.mubr.f32.vlgmr.msra.gmra.mrb[0].mxu0 %v11298_v41  ;;  %6039 = vmatpush1.bf16.msra.mxu1 %v11302_v58  ;;  %v11311_v41 = vld [vmem:[#allocation14_spill] sm:$0xff]  ;;  %v8277_v58 = vld [vmem:[#allocation7 + $0x80] sm:$0xff] }
  0xd7   : > { %6135 = vmatpush1.bf16.msra.mxu0 %v11303_v18  ;;  %11307 = vst [vmem:[#allocation56_spill] sm:$0xff] %v8230_v55  ;;  %853 = vmatprep.mubr.f32.mxu1 %v11253_v54  ;;  %v8245_v18 = vld [vmem:[#allocation7 + $0x50] sm:$0xff]  ;;  %v8254_v55 = vsub.f32 %v8182_v45, %v10842_v3  ;;  %v8275_v3 = vld [vmem:[#allocation7 + $0xa8] sm:$0xff] }
  0xd8   : > { %1624 = vmatprep.mubr.f32.mxu0 %v11253_v54  ;;  %6041 = vmatprep.subr.bf16.mxu1 %v11310_v52  ;;  %11318 = vst [vmem:[#allocation60_spill] sm:$0xff] %v8275_v3  ;;  %v11332_v53 = vand.u32 4294901760, %v8245_v18 }
  0xd9   : > { %6137 = vmatprep.subr.bf16.mxu0 %v11311_v41  ;;  %11312 = vst [vmem:[#allocation14_spill] sm:$0xff] %v8254_v55  ;;  %855 = vmatmul.mubr.f32.gmra.mrb[2].mxu1 %v11315_v30  ;;  %v11316_v41 = vand.u32 4294901760, %v8202_v15  ;;  %v11321_v55 = vand.u32 4294901760, %v8214_v14 }
  0xda   : > { %1626 = vmatmul.mubr.f32.gmra.mrb[2].mxu0 %v11315_v30  ;;  %860 = vmatprep.mubr.f32.mxu1 %v11253_v54  ;;  %v8312_v30 = vld [vmem:[#allocation7 + $0xb8] sm:$0xff]  ;;  %v8321_v16 = vsub.f32 %v8245_v18, %v11332_v53  ;;  %v11341_v53 = vpack.c.bf16 %v7746_v60, %v11284_v31  ;;  %v8377_v31 = vld [vmem:[#allocation7 + $0xe0] sm:$0xff] }
  0xdb   : > { %v8272_v52 = vsub.f32 %v8202_v15, %v11316_v41  ;;  %1631 = vmatprep.mubr.f32.mxu0 %v11253_v54  ;;  %v8289_v41 = vsub.f32 %v8214_v14, %v11321_v55  ;;  %v8297_v15 = vld [vmem:[#allocation7 + $0xa0] sm:$0xff]  ;;  %6043 = vmatpush1.bf16.msra.mxu1 %v11326_v43  ;;  %v11328_v55 = vand.u32 4294901760, %v8234_v10  ;;  %v11330_v14 = vpack.c.bf16 %v7736_v49, %v7732_v46  ;;  %v8341_v43 = vld [vmem:[#allocation7 + $0xb0] sm:$0xff]  ;;  %v8392_v60 = vld [vmem:[#allocation7 + $0xf8] sm:$0xff] }
  0xdc   : > { %11325 = vst [vmem:[#allocation64_spill] sm:$0xff] %v8297_v15  ;;  %6139 = vmatpush1.bf16.msra.mxu0 %v11327_v38  ;;  %11333 = vst [vmem:[#allocation16_spill] sm:$0xff] %v8321_v16  ;;  %v11337_v49 = vand.u32 4294901760, %v8265_v39  ;;  %v8343_v38 = vld [vmem:[#allocation7 + $0xc8] sm:$0xff]  ;;  %v11342_v16 = vld [vmem:[#allocation20_spill] sm:$0xff] }
  0xdd   : > { %11317 = vst [vmem:[#allocation59_spill] sm:$0xff] %v8272_v52  ;;  %11322 = vst [vmem:[#allocation62_spill] sm:$0xff] %v8289_v41  ;;  %v8294_v52 = vsub.f32 %v8216_v27, %v11323_v37  ;;  %v8308_v41 = vsub.f32 %v8234_v10, %v11328_v55  ;;  %v10854_v37 = vand.u32 4294901760, %v8263_v22  ;;  %6045 = vmatprep.subr.bf16.mxu1 %v11330_v14  ;;  %6141 = vmatprep.subr.bf16.mxu0 %v11331_v21  ;;  %v8325_v55 = vld [vmem:[#allocation7 + $0x90] sm:$0xff]  ;;  %v8355_v14 = vld [vmem:[#allocation7 + $0xc0] sm:$0xff] }
  0xde   : > { %11334 = vst [vmem:[#allocation65_spill] sm:$0xff] %v8325_v55  ;;  %v8337_v21 = vsub.f32 %v8265_v39, %v11337_v49  ;;  %v11347_v49 = vand.u32 4294901760, %v8299_v2 }
  0xdf   : > { %11324 = vst [vmem:[#allocation63_spill] sm:$0xff] %v8294_v52  ;;  %11329 = vst [vmem:[#allocation15_spill] sm:$0xff] %v8308_v41  ;;  %v11335_v52 = vld [vmem:[#allocation33_spill] sm:$0xff]  ;;  %v8332_v46 = vsub.f32 %v8263_v22, %v10854_v37  ;;  %v11339_v37 = vand.u32 4294901760, %v8275_v3  ;;  %6047 = vmatpush1.bf16.msra.mxu1 %v11341_v53  ;;  %v11343_v41 = vand.u32 4294901760, %v8277_v58  ;;  %v11350_v53 = vld [vmem:[#allocation22_spill] sm:$0xff] }
  0xe0   : > { %862 = vmatmul.mubr.f32.gmra.mrb[4].mxu1 %v11335_v52  ;;  %1633 = vmatmul.mubr.f32.gmra.mrb[4].mxu0 %v11335_v52  ;;  %11338 = vst [vmem:[#allocation67_spill] sm:$0xff] %v8337_v21  ;;  %v8353_v21 = vld [vmem:[#allocation7 + $0xe8] sm:$0xff] }
  0xe1   : > { %11336 = vst [vmem:[#allocation66_spill] sm:$0xff] %v8332_v46  ;;  %867 = vmatprep.mubr.f32.mxu1 %v11253_v54  ;;  %1638 = vmatprep.mubr.f32.mxu0 %v11253_v54  ;;  %v8350_v46 = vsub.f32 %v8275_v3, %v11339_v37  ;;  %v8364_v52 = vsub.f32 %v8277_v58, %v11343_v41  ;;  %v11345_v37 = vand.u32 4294901760, %v8297_v15 }
  0xe2   : > { %6143 = vmatpush1.bf16.msra.mxu0 %v11342_v16  ;;  %v8374_v3 = vsub.f32 %v8299_v2, %v11347_v49  ;;  %v8379_v16 = vld [vmem:[#allocation7 + $0xd8] sm:$0xff]  ;;  %v11349_v41 = vpack.c.bf16 %v7750_v4, %v7748_v61  ;;  %v10870_v49 = vand.u32 4294901760, %v8341_v43  ;;  %v11354_v61 = vand.u32 4294901760, %v8325_v55 }
  0xe3   : > { %11340 = vst [vmem:[#allocation68_spill] sm:$0xff] %v8350_v46  ;;  %11344 = vst [vmem:[#allocation20_spill] sm:$0xff] %v8364_v52  ;;  %v8369_v46 = vsub.f32 %v8297_v15, %v11345_v37  ;;  %6145 = vmatprep.subr.bf16.mxu0 %v11350_v53  ;;  %v11351_v37 = vand.u32 4294901760, %v8312_v30  ;;  %v11353_v52 = vld [vmem:[#allocation38_spill] sm:$0xff]  ;;  %v11360_v15 = vld [vmem:[#allocation23_spill] sm:$0xff]  ;;  %v11363_v53 = vpack.c.bf16 %v7766_v19, %v7760_v9 }
  0xe4   : > { %11348 = vst [vmem:[#allocation70_spill] sm:$0xff] %v8374_v3  ;;  %6049 = vmatprep.subr.bf16.mxu1 %v11349_v41  ;;  %869 = vmatmul.mubr.f32.gmra.mrb[6].mxu1 %v11353_v52  ;;  %v8399_v4 = vsub.f32 %v8325_v55, %v11354_v61  ;;  %v8410_v3 = vsub.f32 %v8341_v43, %v10870_v49  ;;  %v11361_v49 = vand.u32 4294901760, %v8353_v21  ;;  %v8433_v41 = vld [vmem:[#allocation7 + $0x128] sm:$0xff]  ;;  %v8455_v19 = vld [vmem:[#allocation7 + $0x100] sm:$0xff] }
  0xe5   : > { %11346 = vst [vmem:[#allocation69_spill] sm:$0xff] %v8369_v46  ;;  %v8388_v46 = vsub.f32 %v8312_v30, %v11351_v37  ;;  %1640 = vmatmul.mubr.f32.gmra.mrb[6].mxu0 %v11353_v52  ;;  %v8403_v37 = vld [vmem:[#allocation7 + $0xd0] sm:$0xff]  ;;  %874 = vmatprep.mubr.f32.mxu1 %v11253_v54  ;;  %v8421_v52 = vld [vmem:[#allocation7 + $0x108] sm:$0xff]  ;;  %v11359_v55 = vpack.c.bf16 %v7758_v8, %v7754_v6  ;;  %v11365_v6 = vand.u32 4294901760, %v8355_v14 }
  0xe6   : > { %11355 = vst [vmem:[#allocation71_spill] sm:$0xff] %v8399_v4  ;;  %1645 = vmatprep.mubr.f32.mxu0 %v11253_v54  ;;  %11356 = vst [vmem:[#allocation72_spill] sm:$0xff] %v8410_v3  ;;  %v8419_v4 = vld [vmem:[#allocation7 + $0xf0] sm:$0xff]  ;;  %6147 = vmatpush1.bf16.msra.mxu0 %v11360_v15  ;;  %v8430_v3 = vsub.f32 %v8353_v21, %v11361_v49  ;;  %v11367_v15 = vand.u32 4294901760, %v8377_v31  ;;  %v11369_v49 = vand.u32 4294901760, %v8379_v16  ;;  %v10879_v9 = vand.u32 4294901760, %v8403_v37 }
  0xe7   : > { %11352 = vst [vmem:[#allocation22_spill] sm:$0xff] %v8388_v46  ;;  %v11357_v46 = vand.u32 4294901760, %v8343_v38  ;;  %6051 = vmatpush1.bf16.msra.mxu1 %v11359_v55  ;;  %v8442_v8 = vsub.f32 %v8355_v14, %v11365_v6  ;;  %v11372_v6 = vand.u32 4294901760, %v8392_v60 }
  0xe8   : > { %11362 = vst [vmem:[#allocation23_spill] sm:$0xff] %v8430_v3  ;;  %6053 = vmatprep.subr.bf16.mxu1 %v11363_v53  ;;  %v8447_v55 = vsub.f32 %v8377_v31, %v11367_v15  ;;  %v8457_v53 = vld [vmem:[#allocation7 + $0x120] sm:$0xff]  ;;  %v11375_v3 = vpack.c.bf16 %v7772_v24, %v7770_v23  ;;  %v11379_v23 = vpack.c.bf16 %v7781_v33, %v7776_v26  ;;  %v11380_v24 = vld [vmem:[#allocation26_spill] sm:$0xff] }
  0xe9   : > { %v8415_v61 = vsub.f32 %v8343_v38, %v11357_v46  ;;  %v8452_v46 = vsub.f32 %v8379_v16, %v11369_v49  ;;  %v8464_v15 = vsub.f32 %v8392_v60, %v11372_v6  ;;  %v11376_v6 = vld [vmem:[#allocation25_spill] sm:$0xff]  ;;  %v11385_v33 = vpack.c.bf16 %v7791_v42, %v7785_v35  ;;  %v11389_v35 = vld [vmem:[#allocation30_spill] sm:$0xff] }
  0xea   : > { %11368 = vst [vmem:[#allocation74_spill] sm:$0xff] %v8447_v55  ;;  %v3884_v55 = vand.u32 4294901760, %v8419_v4  ;;  %v6066_v42 = vpack.c.bf16 %v8029_v17, %v8003_v32  ;;  %v11397_v32 = vld [vmem:[#allocation37_spill] sm:$0xff]  ;;  %v11398_v17 = vand.u32 4294901760, %v8165_v44  ;;  %v11410_v44 = vand.u32 4294901760, %v8234_v10 }
  0xeb   : > { %11358 = vst [vmem:[#allocation73_spill] sm:$0xff] %v8415_v61  ;;  %v11364_v61 = vld [vmem:[#allocation24_spill] sm:$0xff]  ;;  %11370 = vst [vmem:[#allocation75_spill] sm:$0xff] %v8452_v46  ;;  %v8473_v46 = vsub.f32 %v8403_v37, %v10879_v9  ;;  %6055 = vmatpush1.bf16.msra.mxu1 %v11375_v3  ;;  %v10880_v9 = vand.u32 4294901760, %v8455_v19  ;;  %v11381_v3 = vand.u32 4294901760, %v8433_v41  ;;  %v11419_v10 = vand.u32 4294901760, %v8245_v18 }
  0xec   : > { %6149 = vmatprep.subr.bf16.mxu0 %v11364_v61  ;;  %11366 = vst [vmem:[#allocation24_spill] sm:$0xff] %v8442_v8  ;;  %v11371_v61 = vld [vmem:[#allocation39_spill] sm:$0xff]  ;;  %11373 = vst [vmem:[#allocation76_spill] sm:$0xff] %v8464_v15  ;;  %v8483_v49 = vsub.f32 %v8419_v4, %v3884_v55  ;;  %v11378_v15 = vand.u32 4294901760, %v8421_v52  ;;  %v10881_v8 = vand.u32 4294901760, %v8457_v53  ;;  %6057 = vmatprep.subr.bf16.mxu1 %v11379_v23  ;;  %v11457_v4 = vand.u32 4294901760, %v8455_v19 }
  0xed   : > { %876 = vmatmul.mubr.f32.gmra.mrb[8].mxu1 %v11371_v61  ;;  %1647 = vmatmul.mubr.f32.gmra.mrb[8].mxu0 %v11371_v61  ;;  %11374 = vst [vmem:[#allocation77_spill] sm:$0xff] %v8473_v46  ;;  %v11386_v23 = vld [vmem:[#allocation27_spill] sm:$0xff] }
  0xee   : > { %881 = vmatprep.mubr.f32.mxu1 %v11253_v54  ;;  %1652 = vmatprep.mubr.f32.mxu0 %v11253_v54  ;;  %11377 = vst [vmem:[#allocation25_spill] sm:$0xff] %v8483_v49  ;;  %v8488_v61 = vsub.f32 %v8421_v52, %v11378_v15  ;;  %v8506_v15 = vsub.f32 %v8455_v19, %v10880_v9  ;;  %v11388_v9 = vld [vmem:[#allocation28_spill] sm:$0xff]  ;;  %v11429_v18 = vld [vmem:[#allocation35_spill] sm:$0xff] }
  0xef   : > { %6151 = vmatpush1.bf16.msra.mxu0 %v11376_v6  ;;  %v8499_v6 = vsub.f32 %v8433_v41, %v11381_v3  ;;  %v8511_v26 = vsub.f32 %v8457_v53, %v10881_v8  ;;  %6059 = vmatpush1.bf16.msra.mxu1 %v11385_v33  ;;  %v11387_v3 = vpack.c.bf16 %v7797_v51, %v7795_v48  ;;  %v11390_v48 = vld [vmem:[#allocation34_spill] sm:$0xff]  ;;  %v11391_v51 = vand.u32 4294901760, %v8161_v20  ;;  %v11404_v33 = vld [vmem:[#allocation19_spill] sm:$0xff] }
  0xf0   : > { %6153 = vmatprep.subr.bf16.mxu0 %v11380_v24  ;;  %11383 = vst [vmem:[#allocation78_spill] sm:$0xff] %v8506_v15  ;;  %v6062_v24 = vpack.c.bf16 %v7816_v7, %v7808_v62  ;;  %v6064_v8 = vpack.c.bf16 %v7971_v11, %v7856_v40  ;;  %v11392_v40 = vand.u32 4294901760, %v8163_v63  ;;  %v11394_v7 = vand.u32 4294901760, %v8174_v47  ;;  %v11463_v19 = vld [vmem:[#allocation43_spill] sm:$0xff] }
  0xf1   : > { %11382 = vst [vmem:[#allocation26_spill] sm:$0xff] %v8499_v6  ;;  %883 = vmatmul.mubr.f32.gmra.mrb[10].mxu1 %v7906_v59  ;;  %1654 = vmatmul.mubr.f32.gmra.mrb[10].mxu0 %v7906_v59  ;;  %11384 = vst [vmem:[#allocation79_spill] sm:$0xff] %v8511_v26  ;;  %v11395_v11 = vand.u32 4294901760, %v8176_v25  ;;  %v11399_v20 = vand.u32 4294901760, %v8171_v57  ;;  %v11401_v47 = vand.u32 4294901760, %v8180_v28  ;;  %v11402_v25 = vand.u32 4294901760, %v8182_v45 }
  0xf2   : > { %888 = vmatprep.mubr.f32.mxu1 %v11253_v54  ;;  %1659 = vmatprep.mubr.f32.mxu0 %v11253_v54  ;;  %v8539_v62 = vpack.c.bf16 %v11392_v40, %v11391_v51  ;;  %v11412_v57 = vld [vmem:[#allocation31_spill] sm:$0xff]  ;;  %v11413_v51 = vld [vmem:[#allocation29_spill] sm:$0xff] }
  0xf3   : > { %6155 = vmatpush1.bf16.msra.mxu0 %v11386_v23  ;;  %6061 = vmatprep.subr.bf16.mxu1 %v11387_v3  ;;  %v8590_v63 = vpack.c.bf16 %v11399_v20, %v11398_v17  ;;  %v11405_v23 = vand.u32 4294901760, %v11404_v33  ;;  %v11414_v45 = vld [vmem:[#allocation53_spill] sm:$0xff]  ;;  %v11416_v40 = vld [vmem:[#allocation55_spill] sm:$0xff]  ;;  %v11422_v17 = vand.u32 4294901760, %v8265_v39  ;;  %v11423_v20 = vld [vmem:[#allocation60_spill] sm:$0xff]  ;;  %v11426_v33 = vand.u32 4294901760, %v8299_v2 }
  0xf4   : > { %6157 = vmatprep.subr.bf16.mxu0 %v11388_v9  ;;  %6063 = vmatpush1.bf16.msra.mxu1 %v6062_v24  ;;  %11393 = vst [vmem:[#allocation27_spill] sm:$0xff] %v8539_v62  ;;  %v8545_v9 = vpack.c.bf16 %v11395_v11, %v11394_v7  ;;  %v11406_v24 = vld [vmem:[#allocation52_spill] sm:$0xff]  ;;  %v11415_v28 = vand.u32 4294901760, %v11414_v45  ;;  %v11420_v11 = vand.u32 4294901760, %v8263_v22  ;;  %v11431_v39 = vand.u32 4294901760, %v8277_v58 }
  0xf5   : > { %890 = vmatmul.mubr.f32.gmra.mrb[12].mxu1 %v7919_v12  ;;  %1661 = vmatmul.mubr.f32.gmra.mrb[12].mxu0 %v7919_v12  ;;  %11400 = vst [vmem:[#allocation30_spill] sm:$0xff] %v8590_v63  ;;  %v11407_v3 = vand.u32 4294901760, %v11406_v24  ;;  %v11430_v22 = vld [vmem:[#allocation32_spill] sm:$0xff]  ;;  %v11439_v45 = vand.u32 4294901760, %v8343_v38  ;;  %v11442_v58 = vand.u32 4294901760, %v8379_v16  ;;  %v11447_v38 = vand.u32 4294901760, %v8355_v14 }
  0xf6   : > { %895 = vmatprep.mubr.f32.mxu1 %v11253_v54  ;;  %1666 = vmatprep.mubr.f32.mxu0 %v11253_v54  ;;  %11396 = vst [vmem:[#allocation28_spill] sm:$0xff] %v8545_v9  ;;  %v11455_v14 = vld [vmem:[#allocation40_spill] sm:$0xff] }
  0xf7   : > { %6159 = vmatpush1.bf16.msra.mxu0 %v11389_v35  ;;  %6065 = vmatprep.subr.bf16.mxu1 %v6064_v8  ;;  %v8596_v8 = vpack.c.bf16 %v11402_v25, %v11401_v47  ;;  %v8602_v35 = vpack.c.bf16 %v11407_v3, %v11405_v23  ;;  %v11424_v47 = vand.u32 4294901760, %v11423_v20  ;;  %v11427_v23 = vand.u32 4294901760, %v8312_v30  ;;  %v11432_v3 = vld [vmem:[#allocation64_spill] sm:$0xff]  ;;  %v11435_v30 = vld [vmem:[#allocation65_spill] sm:$0xff] }
  0xf8   : > { %6161 = vmatprep.subr.bf16.mxu0 %v11390_v48  ;;  %6067 = vmatpush1.bf16.msra.mxu1 %v6066_v42  ;;  %v11409_v42 = vand.u32 4294901760, %v8216_v27  ;;  %v11417_v27 = vand.u32 4294901760, %v11416_v40  ;;  %v11433_v2 = vand.u32 4294901760, %v11432_v3  ;;  %v11452_v20 = vand.u32 4294901760, %v8421_v52  ;;  %v8770_v3 = vld [vmem:[#allocation7 + $0x130] sm:$0xff] }
  0xf9   : > { %897 = vmatmul.mubr.f32.gmra.mrb[14].mxu1 %v7945_v13  ;;  %1668 = vmatmul.mubr.f32.gmra.mrb[14].mxu0 %v7945_v13  ;;  %11403 = vst [vmem:[#allocation34_spill] sm:$0xff] %v8596_v8  ;;  %11408 = vst [vmem:[#allocation37_spill] sm:$0xff] %v8602_v35  ;;  %v8634_v25 = vpack.c.bf16 %v11424_v47, %v11422_v17  ;;  %v8640_v24 = vpack.c.bf16 %v11427_v23, %v11426_v33  ;;  %v11453_v47 = vand.u32 4294901760, %v8433_v41  ;;  %v11460_v41 = vld [vmem:[#allocation41_spill] sm:$0xff]  ;;  %v11462_v23 = vld [vmem:[#allocation42_spill] sm:$0xff] }
  0xfa   : > { %902 = vmatprep.mubr.f32.mxu1 %v11253_v54  ;;  %1673 = vmatprep.mubr.f32.mxu0 %v11253_v54  ;;  %v8608_v48 = vpack.c.bf16 %v11410_v44, %v11409_v42  ;;  %v8620_v7 = vpack.c.bf16 %v11417_v27, %v11415_v28  ;;  %v8652_v42 = vpack.c.bf16 %v11433_v2, %v11431_v39  ;;  %v11436_v44 = vand.u32 4294901760, %v11435_v30  ;;  %v8768_v39 = vld [vmem:[#allocation7 + $0x110] sm:$0xff] }
  0xfb   : > { %6163 = vmatpush1.bf16.msra.mxu0 %v11397_v32  ;;  %6165 = vmatprep.subr.bf16.mxu1 %v8539_v62  ;;  %v8626_v32 = vpack.c.bf16 %v11420_v11, %v11419_v10  ;;  %11425 = vst [vmem:[#allocation29_spill] sm:$0xff] %v8634_v25  ;;  %11428 = vst [vmem:[#allocation53_spill] sm:$0xff] %v8640_v24  ;;  %v11440_v28 = vand.u32 4294901760, %v8353_v21  ;;  %v11443_v27 = vand.u32 4294901760, %v8392_v60  ;;  %v11445_v11 = vld [vmem:[#allocation36_spill] sm:$0xff]  ;;  %v11448_v21 = vand.u32 4294901760, %v8377_v31 }
  0xfc   : > { %6357 = vmatprep.subr.bf16.mxu0 %v8545_v9  ;;  %11411 = vst [vmem:[#allocation19_spill] sm:$0xff] %v8608_v48  ;;  %11418 = vst [vmem:[#allocation52_spill] sm:$0xff] %v8620_v7  ;;  %v11450_v60 = vand.u32 4294901760, %v8403_v37  ;;  %v8698_v33 = vpack.c.bf16 %v11453_v47, %v11452_v20  ;;  %v11456_v31 = vld [vmem:[#allocation38_spill] sm:$0xff]  ;;  %v11458_v52 = vand.u32 4294901760, %v8457_v53  ;;  %v11464_v53 = vld [vmem:[#allocation44_spill] sm:$0xff] }
  0xfd   : > { %904 = vmatmul.mubr.f32.gmra.mrb[16].mxu1 %v7959_v36  ;;  %1675 = vmatmul.mubr.f32.gmra.mrb[16].mxu0 %v7959_v36  ;;  %11421 = vst [vmem:[#allocation31_spill] sm:$0xff] %v8626_v32  ;;  %11434 = vst [vmem:[#allocation55_spill] sm:$0xff] %v8652_v42  ;;  %v8666_v40 = vpack.c.bf16 %v11440_v28, %v11439_v45  ;;  %v8672_v10 = vpack.c.bf16 %v11443_v27, %v11442_v58  ;;  %v10887_v2 = vand.u32 4294901760, %v8768_v39  ;;  %v8788_v45 = vld [vmem:[#allocation7 + $0x168] sm:$0xff]  ;;  %v8790_v28 = vld [vmem:[#allocation7 + $0x158] sm:$0xff] }
  0xfe   : > { %909 = vmatprep.mubr.f32.mxu1 %v11253_v54  ;;  %1680 = vmatprep.mubr.f32.mxu0 %v11253_v54  ;;  %v8684_v16 = vpack.c.bf16 %v11448_v21, %v11447_v38  ;;  %v8690_v17 = vpack.c.bf16 %v3884_v55, %v11450_v60  ;;  %11454 = vst [vmem:[#allocation36_spill] sm:$0xff] %v8698_v33  ;;  %v11461_v55 = vld [vmem:[#allocation39_spill] sm:$0xff]  ;;  %v10884_v27 = vand.u32 4294901760, %v8788_v45  ;;  %v8800_v21 = vld [vmem:[#allocation7 + $0x140] sm:$0xff]  ;;  %v8804_v20 = vld [vmem:[#allocation7 + $0x150] sm:$0xff] }
  0xff   : > { %11441 = vst [vmem:[#allocation35_spill] sm:$0xff] %v8666_v40  ;;  %11444 = vst [vmem:[#allocation32_spill] sm:$0xff] %v8672_v10  ;;  %v8710_v37 = vpack.c.bf16 %v11458_v52, %v11457_v4  ;;  %v8802_v60 = vld [vmem:[#allocation7 + $0x160] sm:$0xff]  ;;  %v2224_v4 = vld [vmem:[#allocation7 + $0x170] sm:$0xff]  ;;  %v3896_v52 = vand.u32 4294901760, %v8804_v20 }
 0x100   : > { %11449 = vst [vmem:[#allocation64_spill] sm:$0xff] %v8684_v16  ;;  %11451 = vst [vmem:[#allocation65_spill] sm:$0xff] %v8690_v17 }
 0x101   : > { %911 = vmatmul.mubr.f32.gmra.mrb[18].mxu1 %v7991_v34  ;;  %1682 = vmatmul.mubr.f32.gmra.mrb[18].mxu0 %v7991_v34 }
 0x102   : > { %916 = vmatprep.mubr.f32.mxu1 %v11253_v54  ;;  %1687 = vmatprep.mubr.f32.mxu0 %v11253_v54 }
 0x105   : > { %918 = vmatmul.mubr.f32.gmra.mrb[20].mxu1 %v7995_v5  ;;  %1689 = vmatmul.mubr.f32.gmra.mrb[20].mxu0 %v7995_v5 }
 0x106   : > { %923 = vmatprep.mubr.f32.mxu1 %v11253_v54  ;;  %1694 = vmatprep.mubr.f32.mxu0 %v11253_v54 }
 0x109   : > { %925 = vmatmul.mubr.f32.gmra.mrb[22].mxu1 %v8033_v29  ;;  %1696 = vmatmul.mubr.f32.gmra.mrb[22].mxu0 %v8033_v29 }
 0x10a   : > { %930 = vmatprep.mubr.f32.mxu1 %v11253_v54  ;;  %1701 = vmatprep.mubr.f32.mxu0 %v11253_v54 }
 0x10d   : > { %932 = vmatmul.mubr.f32.gmra.mrb[24].mxu1 %v8055_v50  ;;  %1703 = vmatmul.mubr.f32.gmra.mrb[24].mxu0 %v8055_v50 }
 0x10e   : > { %937 = vmatprep.mubr.f32.mxu1 %v11253_v54  ;;  %1708 = vmatprep.mubr.f32.mxu0 %v11253_v54 }
 0x111   : > { %939 = vmatmul.mubr.f32.gmra.mrb[26].mxu1 %v8078_v56  ;;  %1710 = vmatmul.mubr.f32.gmra.mrb[26].mxu0 %v8078_v56 }
 0x112   : > { %944 = vmatprep.mubr.f32.mxu1 %v11253_v54  ;;  %1715 = vmatprep.mubr.f32.mxu0 %v11253_v54 }
 0x115   : > { %946 = vmatmul.mubr.f32.gmra.mrb[28].mxu1 %v8106_v1  ;;  %1717 = vmatmul.mubr.f32.gmra.mrb[28].mxu0 %v8106_v1 }
 0x116   : > { %951 = vmatprep.mubr.f32.mxu1 %v11253_v54  ;;  %1722 = vmatprep.mubr.f32.mxu0 %v11253_v54 }
 0x119   : > { %953 = vmatmul.mubr.f32.gmra.mrb[30].mxu1 %v8139_v0  ;;  %1724 = vmatmul.mubr.f32.gmra.mrb[30].mxu0 %v8139_v0 }
 0x11a   : > { %1087 = vmatprep.mubr.f32.mxu1 %v11253_v54  ;;  %1826 = vmatprep.mubr.f32.mxu0 %v11253_v54 }
 0x11d   : > { %1090 = vmatmul.mubr.f32.vlgmr.msra.gmra.mrb[0].mxu1 %v11412_v57  ;;  %1828 = vmatmul.mubr.f32.vlgmr.msra.gmra.mrb[0].mxu0 %v11413_v51  ;;  %v11437_v57 = vand.u32 4294901760, %v8341_v43  ;;  %v11446_v43 = vld [vmem:[#allocation33_spill] sm:$0xff] }
 0x11e   : > { %1095 = vmatprep.mubr.f32.mxu1 %v11253_v54  ;;  %1833 = vmatprep.mubr.f32.mxu0 %v11253_v54  ;;  %11459 = vst [vmem:[#allocation33_spill] sm:$0xff] %v8710_v37 }
 0x11f   : > { %6167 = vmatpush1.bf16.msra.mxu1 %v8590_v63  ;;  %6359 = vmatpush1.bf16.msra.mxu0 %v8596_v8  ;;  %v8658_v51 = vpack.c.bf16 %v11437_v57, %v11436_v44  ;;  %v8786_v57 = vld [vmem:[#allocation7 + $0x148] sm:$0xff]  ;;  %v2240_v63 = vld [vmem:[#allocation7 + $0x1f0] sm:$0xff] }
 0x120   : > { %6169 = vmatprep.subr.bf16.mxu1 %v8602_v35  ;;  %6361 = vmatprep.subr.bf16.mxu0 %v8608_v48  ;;  %v10885_v58 = vand.u32 4294901760, %v8786_v57  ;;  %v11487_v48 = vand.u32 4294901760, %v8768_v39 }
 0x121   : > { %1098 = vmatmul.mubr.f32.gmra.mrb[2].mxu1 %v11429_v18  ;;  %1835 = vmatmul.mubr.f32.gmra.mrb[2].mxu0 %v11430_v22  ;;  %11438 = vst [vmem:[#allocation60_spill] sm:$0xff] %v8658_v51  ;;  %v8764_v18 = vld [vmem:[#allocation7 + $0x138] sm:$0xff] }
 0x122   : > { %1103 = vmatprep.mubr.f32.mxu1 %v11253_v54  ;;  %1840 = vmatprep.mubr.f32.mxu0 %v11253_v54  ;;  %v8810_v47 = vpack.c.bf16 %v10884_v27, %v10885_v58  ;;  %v2228_v27 = vld [vmem:[#allocation7 + $0x190] sm:$0xff]  ;;  %v8861_v35 = vsub.f32 %v8768_v39, %v11487_v48  ;;  %v11494_v48 = vand.u32 4294901760, %v8786_v57 }
 0x123   : > { %6171 = vmatpush1.bf16.msra.mxu1 %v8620_v7  ;;  %6363 = vmatpush1.bf16.msra.mxu0 %v8626_v32  ;;  %v2232_v58 = vld [vmem:[#allocation7 + $0x1b0] sm:$0xff] }
 0x124   : > { %6173 = vmatprep.subr.bf16.mxu1 %v8634_v25  ;;  %6365 = vmatprep.subr.bf16.mxu0 %v8640_v24  ;;  %11475 = vst [vmem:[#allocation41_spill] sm:$0xff] %v8810_v47  ;;  %v8879_v39 = vsub.f32 %v8786_v57, %v11494_v48  ;;  %v8903_v48 = vsub.f32 %v8804_v20, %v3896_v52 }
 0x125   : > { %1106 = vmatmul.mubr.f32.gmra.mrb[4].mxu1 %v11445_v11  ;;  %1842 = vmatmul.mubr.f32.gmra.mrb[4].mxu0 %v11446_v43  ;;  %v8795_v11 = vld [vmem:[#allocation7 + $0x178] sm:$0xff]  ;;  %v10883_v43 = vand.u32 4294901760, %v8790_v28 }
 0x126   : > { %1111 = vmatprep.mubr.f32.mxu1 %v11253_v54  ;;  %1847 = vmatprep.mubr.f32.mxu0 %v11253_v54  ;;  %v10882_v38 = vand.u32 4294901760, %v8795_v11  ;;  %v11498_v9 = vand.u32 4294901760, %v8795_v11 }
 0x127   : > { %6175 = vmatpush1.bf16.msra.mxu1 %v8652_v42  ;;  %6367 = vmatpush1.bf16.msra.mxu0 %v8658_v51 }
 0x128   : > { %6177 = vmatprep.subr.bf16.mxu1 %v8666_v40  ;;  %6369 = vmatprep.subr.bf16.mxu0 %v8672_v10  ;;  %v2234_v10 = vld [vmem:[#allocation7 + $0x1c0] sm:$0xff]  ;;  %v8894_v62 = vsub.f32 %v8795_v11, %v11498_v9  ;;  %v3916_v9 = vand.u32 4294901760, %v2240_v63 }
 0x129   : > { %1114 = vmatmul.mubr.f32.gmra.mrb[6].mxu1 %v11455_v14  ;;  %1849 = vmatmul.mubr.f32.gmra.mrb[6].mxu0 %v11456_v31  ;;  %v2306_v14 = vand.u32 4294901760, %v8800_v21  ;;  %v2310_v31 = vand.u32 4294901760, %v8802_v60  ;;  %v2238_v40 = vld [vmem:[#allocation7 + $0x1e0] sm:$0xff]  ;;  %v2322_v42 = vand.u32 4294901760, %v2234_v10 }
 0x12a   : > { %1119 = vmatprep.mubr.f32.mxu1 %v11253_v54  ;;  %1854 = vmatprep.mubr.f32.mxu0 %v11253_v54  ;;  %v2326_v24 = vand.u32 4294901760, %v2238_v40  ;;  %11499 = vst [vmem:[#allocation83_spill] sm:$0xff] %v8894_v62 }
 0x12b   : > { %6179 = vmatpush1.bf16.msra.mxu1 %v8684_v16  ;;  %6371 = vmatpush1.bf16.msra.mxu0 %v8690_v17  ;;  %v2241_v16 = vld [vmem:[#allocation7 + $0x1f8] sm:$0xff]  ;;  %v8900_v57 = vsub.f32 %v8802_v60, %v2310_v31 }
 0x12c   : > { %6181 = vmatprep.subr.bf16.mxu1 %v8698_v33 }
 0x12d   : > { %1122 = vmatmul.mubr.f32.gmra.mrb[8].mxu1 %v11460_v41  ;;  %1856 = vmatmul.mubr.f32.gmra.mrb[8].mxu0 %v11461_v55  ;;  %v8819_v41 = vpack.c.bf16 %v10882_v38, %v10883_v43  ;;  %v3900_v55 = vand.u32 4294901760, %v2224_v4 }
 0x12e   : > { %1127 = vmatprep.mubr.f32.mxu1 %v11253_v54  ;;  %1861 = vmatprep.mubr.f32.mxu0 %v11253_v54 }
 0x12f   : > { %6183 = vmatpush1.bf16.msra.mxu1 %v8710_v37  ;;  %11476 = vst [vmem:[#allocation39_spill] sm:$0xff] %v8819_v41  ;;  %v2237_v37 = vld [vmem:[#allocation7 + $0x1d8] sm:$0xff] }
 0x130   : > { %6185 = vmatprep.subr.bf16.mxu1 %v8810_v47  ;;  %v3910_v51 = vand.u32 4294901760, %v2237_v37 }
 0x131   : > { %1130 = vmatmul.mubr.f32.gmra.mrb[10].mxu1 %v11462_v23  ;;  %1863 = vmatmul.mubr.f32.gmra.mrb[10].mxu0 %v7906_v59  ;;  %v11465_v59 = vld [vmem:[#allocation45_spill] sm:$0xff] }
 0x132   : > { %1135 = vmatprep.mubr.f32.mxu1 %v11253_v54  ;;  %1868 = vmatprep.mubr.f32.mxu0 %v11253_v54  ;;  %v8821_v23 = vld [vmem:[#allocation7 + $0x188] sm:$0xff] }
 0x135   : > { %1138 = vmatmul.mubr.f32.gmra.mrb[12].mxu1 %v11463_v19  ;;  %1870 = vmatmul.mubr.f32.gmra.mrb[12].mxu0 %v7919_v12  ;;  %v11466_v12 = vld [vmem:[#allocation46_spill] sm:$0xff]  ;;  %v8823_v19 = vld [vmem:[#allocation7 + $0x1a8] sm:$0xff] }
 0x136   : > { %1143 = vmatprep.mubr.f32.mxu1 %v11253_v54  ;;  %1875 = vmatprep.mubr.f32.mxu0 %v11253_v54 }
 0x139   : > { %1146 = vmatmul.mubr.f32.gmra.mrb[14].mxu1 %v11464_v53  ;;  %1877 = vmatmul.mubr.f32.gmra.mrb[14].mxu0 %v7945_v13  ;;  %v11467_v13 = vld [vmem:[#allocation47_spill] sm:$0xff] }
 0x13a   : > { %1151 = vmatprep.mubr.f32.mxu1 %v11253_v54  ;;  %1882 = vmatprep.mubr.f32.mxu0 %v11253_v54  ;;  %v8825_v53 = vld [vmem:[#allocation7 + $0x198] sm:$0xff] }
 0x13d   : > { %1154 = vmatmul.mubr.f32.gmra.mrb[16].mxu1 %v11465_v59  ;;  %1884 = vmatmul.mubr.f32.gmra.mrb[16].mxu0 %v7959_v36  ;;  %v11468_v36 = vld [vmem:[#allocation48_spill] sm:$0xff]  ;;  %v8828_v59 = vpack.c.bf16 %v2310_v31, %v2306_v14 }
 0x13e   : > { %1159 = vmatprep.mubr.f32.mxu1 %v11253_v54  ;;  %1889 = vmatprep.mubr.f32.mxu0 %v11253_v54 }
 0x13f   : > { %11477 = vst [vmem:[#allocation42_spill] sm:$0xff] %v8828_v59  ;;  %6187 = vmatpush1.bf16.msra.mxu1 %v8828_v59 }
 0x141   : > { %1162 = vmatmul.mubr.f32.gmra.mrb[18].mxu1 %v11466_v12  ;;  %1891 = vmatmul.mubr.f32.gmra.mrb[18].mxu0 %v7991_v34  ;;  %v11469_v34 = vld [vmem:[#allocation49_spill] sm:$0xff]  ;;  %v2312_v12 = vand.u32 4294901760, %v8821_v23 }
 0x142   : > { %1167 = vmatprep.mubr.f32.mxu1 %v11253_v54  ;;  %1896 = vmatprep.mubr.f32.mxu0 %v11253_v54 }
 0x145   : > { %1170 = vmatmul.mubr.f32.gmra.mrb[20].mxu1 %v11467_v13  ;;  %1898 = vmatmul.mubr.f32.gmra.mrb[20].mxu0 %v7995_v5  ;;  %v11470_v5 = vld [vmem:[#allocation50_spill] sm:$0xff]  ;;  %v2316_v13 = vand.u32 4294901760, %v8823_v19 }
 0x146   : > { %1175 = vmatprep.mubr.f32.mxu1 %v11253_v54  ;;  %1903 = vmatprep.mubr.f32.mxu0 %v11253_v54  ;;  %11488 = vst [vmem:[#allocation50_spill] sm:$0xff] %v8861_v35 }
 0x147   : > { %v8914_v11 = vsub.f32 %v8823_v19, %v2316_v13  ;;  %v8935_v19 = vsub.f32 %v2237_v37, %v3910_v51 }
 0x149   : > { %1178 = vmatmul.mubr.f32.gmra.mrb[22].mxu1 %v11468_v36  ;;  %1905 = vmatmul.mubr.f32.gmra.mrb[22].mxu0 %v8033_v29  ;;  %v11471_v29 = vld [vmem:[#allocation17_spill] sm:$0xff]  ;;  %v2233_v36 = vld [vmem:[#allocation7 + $0x1b8] sm:$0xff]  ;;  %11502 = vst [vmem:[#allocation86_spill] sm:$0xff] %v8914_v11  ;;  %11511 = vst [vmem:[#allocation95_spill] sm:$0xff] %v8935_v19 }
 0x14a   : > { %1183 = vmatprep.mubr.f32.mxu1 %v11253_v54  ;;  %1910 = vmatprep.mubr.f32.mxu0 %v11253_v54  ;;  %v3906_v38 = vand.u32 4294901760, %v2233_v36 }
 0x14c   : > { %v8919_v60 = vsub.f32 %v2233_v36, %v3906_v38 }
 0x14d   : > { %1186 = vmatmul.mubr.f32.gmra.mrb[24].mxu1 %v11469_v34  ;;  %1912 = vmatmul.mubr.f32.gmra.mrb[24].mxu0 %v8055_v50  ;;  %v11472_v50 = vld [vmem:[#allocation18_spill] sm:$0xff]  ;;  %v2226_v34 = vld [vmem:[#allocation7 + $0x180] sm:$0xff] }
 0x14e   : > { %1191 = vmatprep.mubr.f32.mxu1 %v11253_v54  ;;  %1917 = vmatprep.mubr.f32.mxu0 %v11253_v54  ;;  %v2314_v43 = vand.u32 4294901760, %v2226_v34  ;;  %11504 = vst [vmem:[#allocation88_spill] sm:$0xff] %v8919_v60 }
 0x150   : > { %v8921_v20 = vsub.f32 %v2226_v34, %v2314_v43  ;;  %v11522_v34 = vld [vmem:[#allocation56_spill] sm:$0xff] }
 0x151   : > { %1194 = vmatmul.mubr.f32.gmra.mrb[26].mxu1 %v11470_v5  ;;  %1919 = vmatmul.mubr.f32.gmra.mrb[26].mxu0 %v8078_v56  ;;  %v8762_v56 = vld [vmem:[#allocation7 + $0x118] sm:$0xff]  ;;  %v2230_v5 = vld [vmem:[#allocation7 + $0x1a0] sm:$0xff] }
 0x152   : > { %1199 = vmatprep.mubr.f32.mxu1 %v11253_v54  ;;  %1924 = vmatprep.mubr.f32.mxu0 %v11253_v54  ;;  %v10889_v22 = vand.u32 4294901760, %v8762_v56  ;;  %v11483_v25 = vand.u32 4294901760, %v8762_v56 }
 0x154   : > { %v8851_v32 = vsub.f32 %v8762_v56, %v11483_v25 }
 0x155   : > { %1202 = vmatmul.mubr.f32.gmra.mrb[28].mxu1 %v11471_v29  ;;  %1926 = vmatmul.mubr.f32.gmra.mrb[28].mxu0 %v8106_v1  ;;  %v10888_v1 = vand.u32 4294901760, %v8764_v18  ;;  %v8833_v29 = vpack.c.bf16 %v3900_v55, %v3896_v52 }
 0x156   : > { %1207 = vmatprep.mubr.f32.mxu1 %v11253_v54  ;;  %1931 = vmatprep.mubr.f32.mxu0 %v11253_v54  ;;  %11484 = vst [vmem:[#allocation48_spill] sm:$0xff] %v8851_v32 }
 0x157   : > { %v8778_v30 = vpack.c.bf16 %v10888_v1, %v10889_v22  ;;  %11478 = vst [vmem:[#allocation43_spill] sm:$0xff] %v8833_v29  ;;  %v3904_v1 = vand.u32 4294901760, %v2228_v27  ;;  %v3908_v22 = vand.u32 4294901760, %v2232_v58 }
 0x159   : > { %1210 = vmatmul.mubr.f32.gmra.mrb[30].mxu1 %v11472_v50  ;;  %1933 = vmatmul.mubr.f32.gmra.mrb[30].mxu0 %v8139_v0  ;;  %v10886_v0 = vand.u32 4294901760, %v8770_v3  ;;  %11473 = vst [vmem:[#allocation40_spill] sm:$0xff] %v8778_v30  ;;  %v3902_v50 = vand.u32 4294901760, %v8825_v53  ;;  %v8845_v33 = vpack.c.bf16 %v3908_v22, %v3904_v1  ;;  %v8925_v31 = vsub.f32 %v2228_v27, %v3904_v1 }
 0x15a   : > { %2360 = vmatprep.mubr.f32.mxu1 %v11253_v54  ;;  %3950 = vmatprep.mubr.f32.mxu0 %v11253_v54  ;;  %v8897_v54 = vsub.f32 %v8800_v21, %v2306_v14 }
 0x15b   : > { %v8784_v44 = vpack.c.bf16 %v10886_v0, %v10887_v2  ;;  %6373 = vmatprep.subr.bf16.mxu0 %v8778_v30  ;;  %v8837_v0 = vpack.c.bf16 %v2316_v13, %v2312_v12  ;;  %v2318_v2 = vand.u32 4294901760, %v2230_v5  ;;  %v8840_v47 = vpack.c.bf16 %v3906_v38, %v3902_v50  ;;  %11482 = vst [vmem:[#allocation47_spill] sm:$0xff] %v8845_v33  ;;  %v11521_v13 = vld [vmem:[#allocation13_spill] sm:$0xff] }
 0x15c   : > { %v8917_v21 = vsub.f32 %v8825_v53, %v3902_v50  ;;  %11506 = vst [vmem:[#allocation90_spill] sm:$0xff] %v8925_v31  ;;  %v10949_v36 = vand.u32 4294901760, %v11521_v13 }
 0x15d   : > { %11474 = vst [vmem:[#allocation38_spill] sm:$0xff] %v8784_v44  ;;  %6375 = vmatpush1.bf16.msra.mxu0 %v8784_v44  ;;  %11479 = vst [vmem:[#allocation44_spill] sm:$0xff] %v8837_v0  ;;  %v2239_v44 = vld [vmem:[#allocation7 + $0x1e8] sm:$0xff]  ;;  %6189 = vmatprep.subr.bf16.mxu1 %v8837_v0  ;;  %v8843_v30 = vpack.c.bf16 %v2318_v2, %v2314_v43  ;;  %v11485_v0 = vand.u32 4294901760, %v8764_v18  ;;  %v8923_v14 = vsub.f32 %v2230_v5, %v2318_v2 }
 0x15e   : > { %6377 = vmatprep.subr.bf16.mxu0 %v8819_v41  ;;  %11480 = vst [vmem:[#allocation45_spill] sm:$0xff] %v8840_v47  ;;  %v2235_v41 = vld [vmem:[#allocation7 + $0x1c8] sm:$0xff]  ;;  %v2324_v59 = vand.u32 4294901760, %v2239_v44  ;;  %11503 = vst [vmem:[#allocation87_spill] sm:$0xff] %v8917_v21  ;;  %v8940_v43 = vsub.f32 %v2234_v10, %v2322_v42  ;;  %v8942_v2 = vsub.f32 %v2238_v40, %v2326_v24  ;;  %v10954_v5 = vand.u32 4294901760, %v11522_v34 }
 0x15f   : > { %11481 = vst [vmem:[#allocation46_spill] sm:$0xff] %v8843_v30  ;;  %v2320_v17 = vand.u32 4294901760, %v2235_v41  ;;  %v8856_v7 = vsub.f32 %v8764_v18, %v11485_v0  ;;  %6191 = vmatpush1.bf16.msra.mxu1 %v8843_v30  ;;  %v8874_v18 = vpack.c.bf16 %v2326_v24, %v2322_v42  ;;  %v2236_v0 = vld [vmem:[#allocation7 + $0x1d0] sm:$0xff]  ;;  %11505 = vst [vmem:[#allocation89_spill] sm:$0xff] %v8923_v14 }
 0x160   : > { %11513 = vst [vmem:[#allocation97_spill] sm:$0xff] %v8940_v43  ;;  %11514 = vst [vmem:[#allocation98_spill] sm:$0xff] %v8942_v2 }
 0x161   : > { %6379 = vmatpush1.bf16.msra.mxu0 %v8833_v29  ;;  %v3914_v29 = vand.u32 4294901760, %v2241_v16  ;;  %11486 = vst [vmem:[#allocation49_spill] sm:$0xff] %v8856_v7  ;;  %v8870_v25 = vpack.c.bf16 %v2324_v59, %v2320_v17  ;;  %11493 = vst [vmem:[#allocation81_spill] sm:$0xff] %v8874_v18 }
 0x162   : > { %6381 = vmatprep.subr.bf16.mxu0 %v8840_v47  ;;  %v11489_v47 = vand.u32 4294901760, %v8770_v3 }
 0x163   : > { %11491 = vst [vmem:[#allocation18_spill] sm:$0xff] %v8870_v25  ;;  %v8872_v56 = vpack.c.bf16 %v3914_v29, %v3910_v51  ;;  %6193 = vmatprep.subr.bf16.mxu1 %v8870_v25  ;;  %v8937_v53 = vsub.f32 %v2241_v16, %v3914_v29  ;;  %v11520_v51 = vld [vmem:[#allocation54_spill] sm:$0xff]  ;;  %v11523_v29 = vld [vmem:[#allocation57_spill] sm:$0xff]  ;;  %v11532_v25 = vld [vmem:[#allocation15_spill] sm:$0xff] }
 0x164   : > { %v8866_v8 = vsub.f32 %v8770_v3, %v11489_v47  ;;  %v11495_v3 = vand.u32 4294901760, %v8788_v45  ;;  %6195 = vmatpush1.bf16.msra.mxu1 %v8874_v18  ;;  %v10948_v37 = vand.u32 4294901760, %v11520_v51  ;;  %v10957_v50 = vand.u32 4294901760, %v11523_v29 }
 0x165   : > { %6383 = vmatpush1.bf16.msra.mxu0 %v8845_v33  ;;  %11492 = vst [vmem:[#allocation80_spill] sm:$0xff] %v8872_v56  ;;  %v11496_v33 = vand.u32 4294901760, %v8790_v28  ;;  %11512 = vst [vmem:[#allocation96_spill] sm:$0xff] %v8937_v53 }
 0x166   : > { %11490 = vst [vmem:[#allocation17_spill] sm:$0xff] %v8866_v8  ;;  %v8884_v47 = vsub.f32 %v8788_v45, %v11495_v3  ;;  %v8905_v45 = vsub.f32 %v2224_v4, %v3900_v55  ;;  %6385 = vmatprep.subr.bf16.mxu0 %v8872_v56  ;;  %v8927_v4 = vsub.f32 %v2232_v58, %v3908_v22  ;;  %v11517_v58 = vld [vmem:[#allocation21_spill] sm:$0xff] }
 0x167   : > { %v8889_v30 = vsub.f32 %v8790_v28, %v11496_v33  ;;  %v3912_v33 = vand.u32 4294901760, %v2236_v0  ;;  %v8911_v28 = vsub.f32 %v8821_v23, %v2312_v12  ;;  %v8931_v55 = vsub.f32 %v2235_v41, %v2320_v17  ;;  %v11518_v17 = vld [vmem:[#allocation12_spill] sm:$0xff] }
 0x168   : > { %11500 = vst [vmem:[#allocation84_spill] sm:$0xff] %v8905_v45  ;;  %11507 = vst [vmem:[#allocation91_spill] sm:$0xff] %v8927_v4  ;;  %v8933_v23 = vsub.f32 %v2239_v44, %v2324_v59  ;;  %v8946_v22 = vsub.f32 %v2240_v63, %v3916_v9  ;;  %v10951_v27 = vand.u32 4294901760, %v11517_v58  ;;  %v10950_v38 = vand.u32 4294901760, %v11518_v17  ;;  %v11519_v44 = vld [vmem:[#allocation51_spill] sm:$0xff] }
 0x169   : > { %11497 = vst [vmem:[#allocation82_spill] sm:$0xff] %v8889_v30  ;;  %11501 = vst [vmem:[#allocation85_spill] sm:$0xff] %v8911_v28  ;;  %v8929_v52 = vpack.c.bf16 %v3916_v9, %v3912_v33  ;;  %v8944_v1 = vsub.f32 %v2236_v0, %v3912_v33  ;;  %v10947_v41 = vand.u32 4294901760, %v11519_v44  ;;  %v2558_v42 = vsub.f32 %v11520_v51, %v10948_v37  ;;  %v11524_v0 = vld [vmem:[#allocation14_spill] sm:$0xff] }
 0x16a   : > { %11509 = vst [vmem:[#allocation93_spill] sm:$0xff] %v8931_v55  ;;  %11510 = vst [vmem:[#allocation94_spill] sm:$0xff] %v8933_v23  ;;  %v2540_v16 = vsub.f32 %v11517_v58, %v10951_v27  ;;  %v2552_v24 = vsub.f32 %v11518_v17, %v10950_v38  ;;  %v10958_v3 = vand.u32 4294901760, %v11524_v0  ;;  %v11578_v51 = vld [vmem:[#allocation62_spill] sm:$0xff]  ;;  %v11579_v17 = vld [vmem:[#allocation63_spill] sm:$0xff] }
 0x16b   : > { %11508 = vst [vmem:[#allocation92_spill] sm:$0xff] %v8929_v52  ;;  %6387 = vmatpush1.bf16.msra.mxu0 %v8929_v52  ;;  %11515 = vst [vmem:[#allocation99_spill] sm:$0xff] %v8944_v1  ;;  %v2546_v63 = vsub.f32 %v11519_v44, %v10947_v41  ;;  %v2559_v12 = vand.u32 4294901760, %v2558_v42  ;;  %v4130_v41 = vsub.f32 %v11521_v13, %v10949_v36  ;;  %v11526_v42 = vld [vmem:[#allocation58_spill] sm:$0xff]  ;;  %v11585_v13 = vld [vmem:[#allocation20_spill] sm:$0xff] }
 0x16c   : > { %11516 = vst [vmem:[#allocation100_spill] sm:$0xff] %v8946_v22  ;;  %v2541_v40 = vand.u32 4294901760, %v2540_v16  ;;  %v2553_v10 = vand.u32 4294901760, %v2552_v24  ;;  %v4142_v16 = vsub.f32 %v11522_v34, %v10954_v5  ;;  %v4136_v24 = vsub.f32 %v11523_v29, %v10957_v50  ;;  %v11529_v36 = vld [vmem:[#allocation62_spill] sm:$0xff]  ;;  %v11586_v34 = vld [vmem:[#allocation69_spill] sm:$0xff]  ;;  %v11590_v44 = vld [vmem:[#allocation72_spill] sm:$0xff] }
 0x16d   : > { %v2547_v59 = vand.u32 4294901760, %v2546_v63  ;;  %v4148_v63 = vsub.f32 %v11524_v0, %v10958_v3  ;;  %v10968_v38 = vand.u32 4294901760, %v11529_v36  ;;  %v4131_v27 = vand.u32 4294901760, %v4130_v41 }
 0x16e   : > { %v6196_v33 = vpack.c.bf16 %v2553_v10, %v2541_v40  ;;  %v10963_v40 = vand.u32 4294901760, %v11526_v42  ;;  %v11527_v10 = vld [vmem:[#allocation59_spill] sm:$0xff]  ;;  %v4143_v52 = vand.u32 4294901760, %v4142_v16  ;;  %v4137_v5 = vand.u32 4294901760, %v4136_v24 }
 0x16f   : > { %v8968_v9 = vpack.c.bf16 %v2559_v12, %v2547_v59  ;;  %v10969_v59 = vand.u32 4294901760, %v11527_v10  ;;  %v11528_v12 = vld [vmem:[#allocation61_spill] sm:$0xff]  ;;  %v4149_v18 = vand.u32 4294901760, %v4148_v63  ;;  %v2582_v56 = vsub.f32 %v11529_v36, %v10968_v38  ;;  %v11531_v24 = vld [vmem:[#allocation63_spill] sm:$0xff] }
 0x170   : > { %6197 = vmatprep.subr.bf16.mxu1 %v6196_v33  ;;  %v10967_v37 = vand.u32 4294901760, %v11528_v12  ;;  %v2564_v50 = vsub.f32 %v11526_v42, %v10963_v40  ;;  %v6388_v41 = vpack.c.bf16 %v4143_v52, %v4131_v27  ;;  %v10971_v63 = vand.u32 4294901760, %v11531_v24  ;;  %v11533_v52 = vld [vmem:[#allocation16_spill] sm:$0xff]  ;;  %v11534_v27 = vld [vmem:[#allocation66_spill] sm:$0xff] }
 0x171   : > { %11525 = vst [vmem:[#allocation101_spill] sm:$0xff] %v8968_v9  ;;  %v2576_v33 = vsub.f32 %v11527_v10, %v10969_v59  ;;  %v8998_v16 = vpack.c.bf16 %v4149_v18, %v4137_v5  ;;  %v10972_v9 = vand.u32 4294901760, %v11532_v25  ;;  %v2583_v29 = vand.u32 4294901760, %v2582_v56  ;;  %v11538_v56 = vld [vmem:[#allocation68_spill] sm:$0xff]  ;;  %v11591_v10 = vld [vmem:[#allocation73_spill] sm:$0xff] }
 0x172   : > { %v2570_v3 = vsub.f32 %v11528_v12, %v10967_v37  ;;  %v2565_v40 = vand.u32 4294901760, %v2564_v50  ;;  %6389 = vmatprep.subr.bf16.mxu0 %v6388_v41  ;;  %v4154_v37 = vsub.f32 %v11531_v24, %v10971_v63  ;;  %v10973_v18 = vand.u32 4294901760, %v11533_v52  ;;  %v11537_v50 = vld [vmem:[#allocation67_spill] sm:$0xff] }
 0x173   : > { %11530 = vst [vmem:[#allocation102_spill] sm:$0xff] %v8998_v16  ;;  %v2577_v42 = vand.u32 4294901760, %v2576_v33  ;;  %v4166_v38 = vsub.f32 %v11532_v25, %v10972_v9  ;;  %v10977_v5 = vand.u32 4294901760, %v11534_v27  ;;  %v10979_v33 = vand.u32 4294901760, %v11538_v56 }
 0x174   : > { %v2571_v0 = vand.u32 4294901760, %v2570_v3  ;;  %v10978_v3 = vand.u32 4294901760, %v11537_v50  ;;  %v4155_v41 = vand.u32 4294901760, %v4154_v37  ;;  %v4160_v63 = vsub.f32 %v11533_v52, %v10973_v18  ;;  %v11540_v37 = vld [vmem:[#allocation69_spill] sm:$0xff]  ;;  %v11542_v52 = vld [vmem:[#allocation70_spill] sm:$0xff] }
 0x175   : > { %v9010_v59 = vpack.c.bf16 %v2577_v42, %v2565_v40  ;;  %v4167_v36 = vand.u32 4294901760, %v4166_v38  ;;  %v4172_v9 = vsub.f32 %v11534_v27, %v10977_v5  ;;  %v10986_v38 = vand.u32 4294901760, %v11540_v37  ;;  %v11547_v27 = vld [vmem:[#allocation72_spill] sm:$0xff] }
 0x176   : > { %v9012_v16 = vpack.c.bf16 %v2583_v29, %v2571_v0  ;;  %v2588_v42 = vsub.f32 %v11537_v50, %v10978_v3  ;;  %v2600_v29 = vsub.f32 %v11538_v56, %v10979_v33  ;;  %v11539_v0 = vld [vmem:[#allocation20_spill] sm:$0xff]  ;;  %v10985_v25 = vand.u32 4294901760, %v11542_v52 }
 0x177   : > { %11535 = vst [vmem:[#allocation103_spill] sm:$0xff] %v9010_v59  ;;  %v10983_v40 = vand.u32 4294901760, %v11539_v0  ;;  %v4161_v59 = vand.u32 4294901760, %v4160_v63  ;;  %v4173_v18 = vand.u32 4294901760, %v4172_v9  ;;  %v2606_v33 = vsub.f32 %v11540_v37, %v10986_v38  ;;  %v11544_v63 = vld [vmem:[#allocation22_spill] sm:$0xff] }
 0x178   : > { %11536 = vst [vmem:[#allocation104_spill] sm:$0xff] %v9012_v16  ;;  %v9030_v16 = vpack.c.bf16 %v4167_v36, %v4155_v41  ;;  %v2589_v24 = vand.u32 4294901760, %v2588_v42  ;;  %v2601_v5 = vand.u32 4294901760, %v2600_v29  ;;  %v4178_v36 = vsub.f32 %v11542_v52, %v10985_v25  ;;  %v11545_v41 = vld [vmem:[#allocation71_spill] sm:$0xff]  ;;  %v11548_v25 = vld [vmem:[#allocation73_spill] sm:$0xff] }
 0x179   : > { %v2594_v3 = vsub.f32 %v11539_v0, %v10983_v40  ;;  %v9039_v56 = vpack.c.bf16 %v4173_v18, %v4161_v59  ;;  %v10988_v9 = vand.u32 4294901760, %v11544_v63  ;;  %v2607_v50 = vand.u32 4294901760, %v2606_v33  ;;  %v11551_v33 = vld [vmem:[#allocation24_spill] sm:$0xff] }
 0x17a   : > { %11541 = vst [vmem:[#allocation105_spill] sm:$0xff] %v9030_v16  ;;  %v10990_v16 = vand.u32 4294901760, %v11545_v41  ;;  %v9046_v42 = vpack.c.bf16 %v2601_v5, %v2589_v24  ;;  %v10992_v40 = vand.u32 4294901760, %v11547_v27  ;;  %v4179_v0 = vand.u32 4294901760, %v4178_v36  ;;  %v11550_v5 = vld [vmem:[#allocation23_spill] sm:$0xff] }
 0x17b   : > { %11543 = vst [vmem:[#allocation106_spill] sm:$0xff] %v9039_v56  ;;  %v2595_v29 = vand.u32 4294901760, %v2594_v3  ;;  %v4190_v59 = vsub.f32 %v11544_v63, %v10988_v9  ;;  %v10994_v38 = vand.u32 4294901760, %v11548_v25  ;;  %v10998_v3 = vand.u32 4294901760, %v11550_v5  ;;  %v11552_v63 = vld [vmem:[#allocation74_spill] sm:$0xff] }
 0x17c   : > { %11546 = vst [vmem:[#allocation107_spill] sm:$0xff] %v9046_v42  ;;  %v4184_v18 = vsub.f32 %v11545_v41, %v10990_v16  ;;  %v4196_v24 = vsub.f32 %v11547_v27, %v10992_v40  ;;  %v10999_v36 = vand.u32 4294901760, %v11551_v33  ;;  %v11000_v16 = vand.u32 4294901760, %v11552_v63  ;;  %v11553_v40 = vld [vmem:[#allocation75_spill] sm:$0xff] }
 0x17d   : > { %v9056_v56 = vpack.c.bf16 %v2607_v50, %v2595_v29  ;;  %v4191_v42 = vand.u32 4294901760, %v4190_v59  ;;  %v2612_v9 = vsub.f32 %v11548_v25, %v10994_v38  ;;  %v2624_v50 = vsub.f32 %v11550_v5, %v10998_v3  ;;  %v11555_v38 = vld [vmem:[#allocation76_spill] sm:$0xff] }
 0x17e   : > { %v4185_v52 = vand.u32 4294901760, %v4184_v18  ;;  %v4197_v41 = vand.u32 4294901760, %v4196_v24  ;;  %v2618_v29 = vsub.f32 %v11551_v33, %v10999_v36  ;;  %v2630_v18 = vsub.f32 %v11552_v63, %v11000_v16 }
 0x17f   : > { %11549 = vst [vmem:[#allocation108_spill] sm:$0xff] %v9056_v56  ;;  %v11003_v56 = vand.u32 4294901760, %v11553_v40  ;;  %v9074_v27 = vpack.c.bf16 %v4191_v42, %v4179_v0  ;;  %v2613_v59 = vand.u32 4294901760, %v2612_v9  ;;  %v11001_v25 = vand.u32 4294901760, %v11555_v38 }
 0x180   : > { %v9080_v24 = vpack.c.bf16 %v4197_v41, %v4185_v52  ;;  %v2625_v37 = vand.u32 4294901760, %v2624_v50  ;;  %v2619_v12 = vand.u32 4294901760, %v2618_v29  ;;  %v2631_v36 = vand.u32 4294901760, %v2630_v18 }
 0x181   : > { %11554 = vst [vmem:[#allocation23_spill] sm:$0xff] %v9074_v27  ;;  %v4202_v3 = vsub.f32 %v11553_v40, %v11003_v56  ;;  %v4214_v0 = vsub.f32 %v11555_v38, %v11001_v25  ;;  %v11002_v9 = vand.u32 4294901760, %v8473_v46  ;;  %v11004_v42 = vand.u32 4294901760, %v8483_v49 }
 0x182   : > { %11556 = vst [vmem:[#allocation24_spill] sm:$0xff] %v9080_v24  ;;  %v9090_v16 = vpack.c.bf16 %v2625_v37, %v2613_v59  ;;  %v11005_v52 = vand.u32 4294901760, %v8488_v61  ;;  %v11006_v41 = vand.u32 4294901760, %v8499_v6  ;;  %v9094_v50 = vpack.c.bf16 %v2631_v36, %v2619_v12 }
 0x183   : > { %v4203_v27 = vand.u32 4294901760, %v4202_v3  ;;  %v4215_v29 = vand.u32 4294901760, %v4214_v0  ;;  %v4208_v18 = vsub.f32 %v8473_v46, %v11002_v9  ;;  %v4220_v25 = vsub.f32 %v8483_v49, %v11004_v42 }
 0x184   : > { %11557 = vst [vmem:[#allocation74_spill] sm:$0xff] %v9090_v16  ;;  %11558 = vst [vmem:[#allocation75_spill] sm:$0xff] %v9094_v50  ;;  %v2636_v37 = vsub.f32 %v8488_v61, %v11005_v52  ;;  %v2648_v3 = vsub.f32 %v8499_v6, %v11006_v41  ;;  %v11007_v12 = vand.u32 4294901760, %v8506_v15  ;;  %v11008_v36 = vand.u32 4294901760, %v8511_v26 }
 0x185   : > { %v9110_v59 = vpack.c.bf16 %v4215_v29, %v4203_v27  ;;  %v4209_v0 = vand.u32 4294901760, %v4208_v18  ;;  %v4221_v9 = vand.u32 4294901760, %v4220_v25  ;;  %v11009_v56 = vand.u32 4294901760, %v8851_v32 }
 0x186   : > { %v2637_v50 = vand.u32 4294901760, %v2636_v37  ;;  %v2649_v42 = vand.u32 4294901760, %v2648_v3  ;;  %v2642_v52 = vsub.f32 %v8506_v15, %v11007_v12  ;;  %v2654_v41 = vsub.f32 %v8511_v26, %v11008_v36 }
 0x187   : > { %11559 = vst [vmem:[#allocation109_spill] sm:$0xff] %v9110_v59  ;;  %v9119_v16 = vpack.c.bf16 %v4221_v9, %v4209_v0  ;;  %v4226_v27 = vsub.f32 %v8851_v32, %v11009_v56  ;;  %v11010_v25 = vand.u32 4294901760, %v8856_v7  ;;  %v11011_v29 = vand.u32 4294901760, %v8861_v35 }
 0x188   : > { %v9126_v18 = vpack.c.bf16 %v2649_v42, %v2637_v50  ;;  %v2643_v37 = vand.u32 4294901760, %v2642_v52  ;;  %v2655_v3 = vand.u32 4294901760, %v2654_v41  ;;  %v11012_v12 = vand.u32 4294901760, %v8866_v8 }
 0x189   : > { %11560 = vst [vmem:[#allocation110_spill] sm:$0xff] %v9119_v16  ;;  %v4227_v59 = vand.u32 4294901760, %v4226_v27  ;;  %v4238_v9 = vsub.f32 %v8856_v7, %v11010_v25  ;;  %v4232_v0 = vsub.f32 %v8861_v35, %v11011_v29  ;;  %v11013_v36 = vand.u32 4294901760, %v8879_v39 }
 0x18a   : > { %11561 = vst [vmem:[#allocation111_spill] sm:$0xff] %v9126_v18  ;;  %v9136_v56 = vpack.c.bf16 %v2655_v3, %v2643_v37  ;;  %v4244_v42 = vsub.f32 %v8866_v8, %v11012_v12  ;;  %v11014_v52 = vand.u32 4294901760, %v8884_v47  ;;  %v11015_v41 = vand.u32 4294901760, %v8889_v30 }
 0x18b   : > { %v4239_v50 = vand.u32 4294901760, %v4238_v9  ;;  %v4233_v27 = vand.u32 4294901760, %v4232_v0  ;;  %v2660_v25 = vsub.f32 %v8879_v39, %v11013_v36  ;;  %v11016_v29 = vand.u32 4294901760, %v8894_v62 }
 0x18c   : > { %11562 = vst [vmem:[#allocation112_spill] sm:$0xff] %v9136_v56  ;;  %v4245_v18 = vand.u32 4294901760, %v4244_v42  ;;  %v2672_v37 = vsub.f32 %v8884_v47, %v11014_v52  ;;  %v4250_v3 = vsub.f32 %v8889_v30, %v11015_v41  ;;  %v11019_v12 = vand.u32 4294901760, %v8897_v54 }
 0x18d   : > { %v9154_v56 = vpack.c.bf16 %v4239_v50, %v4227_v59  ;;  %v2661_v9 = vand.u32 4294901760, %v2660_v25  ;;  %v4262_v0 = vsub.f32 %v8894_v62, %v11016_v29  ;;  %v11017_v36 = vand.u32 4294901760, %v8900_v57 }
 0x18e   : > { %v9160_v42 = vpack.c.bf16 %v4245_v18, %v4233_v27  ;;  %v2673_v16 = vand.u32 4294901760, %v2672_v37  ;;  %v4251_v24 = vand.u32 4294901760, %v4250_v3  ;;  %v2666_v52 = vsub.f32 %v8897_v54, %v11019_v12 }
 0x18f   : > { %11563 = vst [vmem:[#allocation113_spill] sm:$0xff] %v9154_v56  ;;  %v4263_v41 = vand.u32 4294901760, %v4262_v0  ;;  %v2678_v59 = vsub.f32 %v8900_v57, %v11017_v36  ;;  %v11018_v25 = vand.u32 4294901760, %v8903_v48  ;;  %v11020_v50 = vand.u32 4294901760, %v8905_v45 }
 0x190   : > { %11564 = vst [vmem:[#allocation114_spill] sm:$0xff] %v9160_v42  ;;  %v9170_v29 = vpack.c.bf16 %v2673_v16, %v2661_v9  ;;  %v2667_v56 = vand.u32 4294901760, %v2666_v52  ;;  %v11021_v18 = vand.u32 4294901760, %v8911_v28  ;;  %v11022_v27 = vand.u32 4294901760, %v8914_v11 }
 0x191   : > { %v9174_v37 = vpack.c.bf16 %v4263_v41, %v4251_v24  ;;  %v2679_v3 = vand.u32 4294901760, %v2678_v59  ;;  %v4256_v0 = vsub.f32 %v8903_v48, %v11018_v25  ;;  %v4268_v36 = vsub.f32 %v8905_v45, %v11020_v50 }
 0x192   : > { %11565 = vst [vmem:[#allocation115_spill] sm:$0xff] %v9170_v29  ;;  %v2684_v16 = vsub.f32 %v8911_v28, %v11021_v18  ;;  %v2696_v52 = vsub.f32 %v8914_v11, %v11022_v27  ;;  %v11023_v24 = vand.u32 4294901760, %v8917_v21  ;;  %v11025_v41 = vand.u32 4294901760, %v8919_v60 }
 0x193   : > { %11566 = vst [vmem:[#allocation116_spill] sm:$0xff] %v9174_v37  ;;  %v9190_v9 = vpack.c.bf16 %v2679_v3, %v2667_v56  ;;  %v4257_v59 = vand.u32 4294901760, %v4256_v0  ;;  %v4269_v25 = vand.u32 4294901760, %v4268_v36  ;;  %v11024_v12 = vand.u32 4294901760, %v8921_v20 }
 0x194   : > { %v2685_v37 = vand.u32 4294901760, %v2684_v16  ;;  %v2697_v50 = vand.u32 4294901760, %v2696_v52  ;;  %v4274_v18 = vsub.f32 %v8917_v21, %v11023_v24  ;;  %v4286_v27 = vsub.f32 %v8919_v60, %v11025_v41 }
 0x195   : > { %11567 = vst [vmem:[#allocation117_spill] sm:$0xff] %v9190_v9  ;;  %v9199_v42 = vpack.c.bf16 %v4269_v25, %v4257_v59  ;;  %v2690_v56 = vsub.f32 %v8921_v20, %v11024_v12  ;;  %v11026_v36 = vand.u32 4294901760, %v8923_v14  ;;  %v11027_v3 = vand.u32 4294901760, %v8925_v31 }
 0x196   : > { %v9206_v0 = vpack.c.bf16 %v2697_v50, %v2685_v37  ;;  %v4275_v16 = vand.u32 4294901760, %v4274_v18  ;;  %v4287_v52 = vand.u32 4294901760, %v4286_v27  ;;  %v11028_v24 = vand.u32 4294901760, %v8927_v4 }
 0x197   : > { %11568 = vst [vmem:[#allocation118_spill] sm:$0xff] %v9199_v42  ;;  %v2691_v9 = vand.u32 4294901760, %v2690_v56  ;;  %v2702_v25 = vsub.f32 %v8923_v14, %v11026_v36  ;;  %v4280_v59 = vsub.f32 %v8925_v31, %v11027_v3  ;;  %v11029_v12 = vand.u32 4294901760, %v8931_v55 }
 0x198   : > { %11569 = vst [vmem:[#allocation119_spill] sm:$0xff] %v9206_v0  ;;  %v9216_v41 = vpack.c.bf16 %v4287_v52, %v4275_v16  ;;  %v4292_v50 = vsub.f32 %v8927_v4, %v11028_v24  ;;  %v11030_v18 = vand.u32 4294901760, %v8933_v23  ;;  %v11031_v27 = vand.u32 4294901760, %v8935_v19 }
 0x199   : > { %v2703_v37 = vand.u32 4294901760, %v2702_v25  ;;  %v4281_v56 = vand.u32 4294901760, %v4280_v59  ;;  %v2708_v36 = vsub.f32 %v8931_v55, %v11029_v12  ;;  %v11032_v3 = vand.u32 4294901760, %v8937_v53 }
 0x19a   : > { %11570 = vst [vmem:[#allocation120_spill] sm:$0xff] %v9216_v41  ;;  %v4293_v0 = vand.u32 4294901760, %v4292_v50  ;;  %v2720_v16 = vsub.f32 %v8933_v23, %v11030_v18  ;;  %v4298_v52 = vsub.f32 %v8935_v19, %v11031_v27  ;;  %v11034_v24 = vand.u32 4294901760, %v8940_v43 }
 0x19b   : > { %v9234_v41 = vpack.c.bf16 %v2703_v37, %v2691_v9  ;;  %v2709_v25 = vand.u32 4294901760, %v2708_v36  ;;  %v4310_v59 = vsub.f32 %v8937_v53, %v11032_v3  ;;  %v11033_v12 = vand.u32 4294901760, %v8942_v2 }
 0x19c   : > { %v9240_v50 = vpack.c.bf16 %v4293_v0, %v4281_v56  ;;  %v2721_v42 = vand.u32 4294901760, %v2720_v16  ;;  %v4299_v29 = vand.u32 4294901760, %v4298_v52  ;;  %v2714_v18 = vsub.f32 %v8940_v43, %v11034_v24  ;;  %v9312_v0 = vld [vmem:[%s10768_s2] ss:$0 sm:$0xff] }
 0x19d   : > { %11571 = vst [vmem:[#allocation121_spill] sm:$0xff] %v9234_v41  ;;  %v4311_v27 = vand.u32 4294901760, %v4310_v59  ;;  %v2726_v9 = vsub.f32 %v8942_v2, %v11033_v12  ;;  %v11036_v36 = vand.u32 4294901760, %v8944_v1  ;;  %v11040_v37 = vand.u32 4294901760, %v8946_v22 }
 0x19e   : > { %v9250_v3 = vpack.c.bf16 %v2721_v42, %v2709_v25  ;;  %v2715_v41 = vand.u32 4294901760, %v2714_v18  ;;  %v11582_v42 = vld [vmem:[#allocation66_spill] sm:$0xff] }
 0x19f   : > { %v9256_v16 = vpack.c.bf16 %v4311_v27, %v4299_v29  ;;  %v2727_v52 = vand.u32 4294901760, %v2726_v9  ;;  %v4304_v59 = vsub.f32 %v8944_v1, %v11036_v36  ;;  %v4316_v12 = vsub.f32 %v8946_v22, %v11040_v37  ;;  %v11577_v36 = vld [vmem:[#allocation61_spill] sm:$0xff]  ;;  %v11580_v37 = vld [vmem:[#allocation15_spill] sm:$0xff] }
 0x1a0   : > { %11572 = vst [vmem:[#allocation122_spill] sm:$0xff] %v9250_v3  ;;  %v11581_v3 = vld [vmem:[#allocation16_spill] sm:$0xff]  ;;  %v11604_v1 = vmov 0.0  }
 0x1a1   : > { %11573 = vst [vmem:[#allocation123_spill] sm:$0xff] %v9256_v16  ;;  %v9266_v18 = vpack.c.bf16 %v2727_v52, %v2715_v41  ;;  %v4305_v25 = vand.u32 4294901760, %v4304_v59  ;;  %v4317_v24 = vand.u32 4294901760, %v4316_v12  ;;  %v11583_v52 = vld [vmem:[#allocation67_spill] sm:$0xff]  ;;  %v11584_v59 = vld [vmem:[#allocation68_spill] sm:$0xff] }
 0x1a2   : > { %v9305_v16 = vld [vmem:[%s10769_s3] ss:$0 sm:$0xff] }
 0x1a3   : > { %v9270_v27 = vpack.c.bf16 %v4317_v24, %v4305_v25  ;;  %v11587_v24 = vld [vmem:[#allocation70_spill] sm:$0xff] }
 0x1a4   : > { %v11588_v25 = vld [vmem:[#allocation22_spill] sm:$0xff] }
 0x1f0   : > { %v1091_v56 = vpop.f32.mrb[0].mxu1  ;;  %v1829_v58 = vpop.f32.mrb[0].mxu0 }
 0x1f1   : > { %v6548_v12 = vadd.f32 %v1829_v58, %v1091_v56  ;;  %v1093_v46 = vpop.f32.mrb[1].mxu1  ;;  %v1831_v49 = vpop.f32.mrb[1].mxu0 }
 0x1f2   : > { %v6549_v29 = vadd.f32 %v1831_v49, %v1093_v46 }
 0x1f3   : > { %v2146_v9 = vadd.f32 %v6548_v12, %v9305_v16 }
 0x1f4   : > { %v1099_v32 = vpop.f32.mrb[2].mxu1  ;;  %v1836_v41 = vpop.f32.mrb[2].mxu0  ;;  %v9320_v58 = vadd.f32 %v6549_v29, %v9312_v0 }
 0x1f5   : > { %v2162_v49 = vmax.f32 %v2146_v9, 0.0  ;;  %v6550_v12 = vadd.f32 %v1836_v41, %v1099_v32  ;;  %v1101_v35 = vpop.f32.mrb[3].mxu1  ;;  %v1838_v8 = vpop.f32.mrb[3].mxu0 }
 0x1f6   : > { %11592 = vst [vmem:[#allocation61_spill] sm:$0xff] %v9320_v58  ;;  %v6551_v7 = vadd.f32 %v1838_v8, %v1101_v35  ;;  %v1963_v15 = vsel %vm1962_vm0, %v9320_v58, -inf }
 0x1f7   : > { %v9328_v26 = vand.u32 4294901760, %v2162_v49  ;;  %v2147_v30 = vadd.f32 %v6550_v12, %v9305_v16  ;;  %1964 = vmax.xlane.f32.xlu0 %v1963_v15 }
 0x1f8   : > { %v1107_v46 = vpop.f32.mrb[4].mxu1  ;;  %v1843_v9 = vpop.f32.mrb[4].mxu0  ;;  %v9336_v32 = vadd.f32 %v6551_v7, %v9312_v0 }
 0x1f9   : > { %11593 = vst [vmem:[#allocation62_spill] sm:$0xff] %v9328_v26  ;;  %v9343_v41 = vsub.f32 %v2162_v49, %v9328_v26  ;;  %v2163_v15 = vmax.f32 %v2147_v30, 0.0  ;;  %v6552_v12 = vadd.f32 %v1843_v9, %v1107_v46  ;;  %v1109_v29 = vpop.f32.mrb[5].mxu1  ;;  %v1845_v58 = vpop.f32.mrb[5].mxu0 }
 0x1fa   : > { %11594 = vst [vmem:[#allocation63_spill] sm:$0xff] %v9336_v32  ;;  %v6553_v28 = vadd.f32 %v1845_v58, %v1109_v29  ;;  %v1966_v56 = vsel %vm1962_vm0, %v9336_v32, -inf }
 0x1fb   : > { %11595 = vst [vmem:[#allocation15_spill] sm:$0xff] %v9343_v41  ;;  %v9348_v7 = vand.u32 4294901760, %v9343_v41  ;;  %v9350_v21 = vand.u32 4294901760, %v2163_v15  ;;  %v2148_v8 = vadd.f32 %v6552_v12, %v9305_v16  ;;  %1967 = vmax.xlane.f32.xlu0 %v1966_v56 }
 0x1fc   : > { %v1115_v35 = vpop.f32.mrb[6].mxu1  ;;  %v1850_v30 = vpop.f32.mrb[6].mxu0  ;;  %v9356_v46 = vadd.f32 %v6553_v28, %v9312_v0 }
 0x1fd   : > { %11596 = vst [vmem:[#allocation16_spill] sm:$0xff] %v9348_v7  ;;  %11597 = vst [vmem:[#allocation66_spill] sm:$0xff] %v9350_v21  ;;  %v9365_v12 = vsub.f32 %v2163_v15, %v9350_v21  ;;  %v2164_v56 = vmax.f32 %v2148_v8, 0.0  ;;  %v6554_v32 = vadd.f32 %v1850_v30, %v1115_v35  ;;  %v1117_v49 = vpop.f32.mrb[7].mxu1  ;;  %v1852_v55 = vpop.f32.mrb[7].mxu0  ;;  %v2364_v28 = vsub.f32 %v9343_v41, %v9348_v7 }
 0x1fe   : > { %11598 = vst [vmem:[#allocation67_spill] sm:$0xff] %v9356_v46  ;;  %v6555_v23 = vadd.f32 %v1852_v55, %v1117_v49  ;;  %v1969_v58 = vsel %vm1962_vm0, %v9356_v46, -inf }
 0x1ff   : > { %11599 = vst [vmem:[#allocation68_spill] sm:$0xff] %v9365_v12  ;;  %v9371_v19 = vand.u32 4294901760, %v2164_v56  ;;  %v2149_v29 = vadd.f32 %v6554_v32, %v9305_v16  ;;  %1970 = vmax.xlane.f32.xlu1 %v1969_v58  ;;  %v2365_v9 = vand.u32 4294901760, %v2364_v28  ;;  %v9375_v15 = vand.u32 4294901760, %v9365_v12 }
 0x200   : > { %v1123_v8 = vpop.f32.mrb[8].mxu1  ;;  %v1857_v35 = vpop.f32.mrb[8].mxu0  ;;  %v9378_v30 = vadd.f32 %v6555_v23, %v9312_v0 }
 0x201   : > { %11600 = vst [vmem:[#allocation20_spill] sm:$0xff] %v9371_v19  ;;  %11601 = vst [vmem:[#allocation69_spill] sm:$0xff] %v9375_v15  ;;  %v9381_v7 = vsub.f32 %v2164_v56, %v9371_v19  ;;  %v2165_v55 = vmax.f32 %v2149_v29, 0.0  ;;  %v6556_v49 = vadd.f32 %v1857_v35, %v1123_v8  ;;  %v1125_v46 = vpop.f32.mrb[9].mxu1  ;;  %v1859_v41 = vpop.f32.mrb[9].mxu0  ;;  %2366 = vmatmul.mubr.f32.vlgmr.msra.gmra.mrb[32].mxu1 %v2365_v9  ;;  %3956 = vmatmul.mubr.f32.vlgmr.msra.gmra.mrb[32].mxu0 %v2365_v9  ;;  %v11607_v9 = vld [vmem:[#allocation101_spill] sm:$0xff] }
 0x202   : > { %11602 = vst [vmem:[#allocation70_spill] sm:$0xff] %v9378_v30  ;;  %v2375_v32 = vsub.f32 %v9365_v12, %v9375_v15  ;;  %v6557_v58 = vadd.f32 %v1859_v41, %v1125_v46  ;;  %v1972_v28 = vsel %vm1962_vm0, %v9378_v30, -inf  ;;  %2371 = vmatprep.mubr.f32.mxu1 %v11604_v1  ;;  %3961 = vmatprep.mubr.f32.mxu0 %v11604_v1  ;;  %v11609_v15 = vld [vmem:[#allocation102_spill] sm:$0xff]  ;;  %v11610_v30 = vld [vmem:[#allocation103_spill] sm:$0xff] }
 0x203   : > { %11603 = vst [vmem:[#allocation22_spill] sm:$0xff] %v9381_v7  ;;  %v9389_v23 = vand.u32 4294901760, %v2165_v55  ;;  %v2150_v29 = vadd.f32 %v6556_v49, %v9305_v16  ;;  %1973 = vmax.xlane.f32.xlu1 %v1972_v28  ;;  %v9393_v8 = vand.u32 4294901760, %v9381_v7  ;;  %6199 = vmatpush1.bf16.msra.mxu1 %v11607_v9 }
 0x204   : > { %v2376_v56 = vand.u32 4294901760, %v2375_v32  ;;  %v1131_v35 = vpop.f32.mrb[10].mxu1  ;;  %v1864_v41 = vpop.f32.mrb[10].mxu0  ;;  %v9397_v46 = vadd.f32 %v6557_v58, %v9312_v0  ;;  %6391 = vmatpush1.bf16.msra.mxu0 %v11609_v15  ;;  %6201 = vmatprep.subr.bf16.mxu1 %v11610_v30 }
 0x205   : > { %11605 = vst [vmem:[#allocation72_spill] sm:$0xff] %v9389_v23  ;;  %11606 = vst [vmem:[#allocation73_spill] sm:$0xff] %v9393_v8  ;;  %v9402_v12 = vsub.f32 %v2165_v55, %v9389_v23  ;;  %v2166_v49 = vmax.f32 %v2150_v29, 0.0  ;;  %v6558_v28 = vadd.f32 %v1864_v41, %v1131_v35  ;;  %v1133_v32 = vpop.f32.mrb[11].mxu1  ;;  %v1866_v22 = vpop.f32.mrb[11].mxu0  ;;  %v2386_v9 = vsub.f32 %v9381_v7, %v9393_v8  ;;  %v11617_v8 = vld [vmem:[#allocation107_spill] sm:$0xff] }
 0x206   : > { %11608 = vst [vmem:[#allocation101_spill] sm:$0xff] %v9397_v46  ;;  %2377 = vmatmul.mubr.f32.gmra.mrb[34].mxu1 %v2376_v56  ;;  %3967 = vmatmul.mubr.f32.gmra.mrb[34].mxu0 %v2376_v56  ;;  %v6559_v43 = vadd.f32 %v1866_v22, %v1133_v32  ;;  %v1975_v58 = vsel %vm1962_vm0, %v9397_v46, -inf  ;;  %v11614_v56 = vld [vmem:[#allocation104_spill] sm:$0xff]  ;;  %v11616_v32 = vld [vmem:[#allocation105_spill] sm:$0xff] }
 0x207   : > { %11611 = vst [vmem:[#allocation102_spill] sm:$0xff] %v9402_v12  ;;  %2382 = vmatprep.mubr.f32.mxu1 %v11604_v1  ;;  %3972 = vmatprep.mubr.f32.mxu0 %v11604_v1  ;;  %v9410_v15 = vand.u32 4294901760, %v2166_v49  ;;  %v2151_v30 = vadd.f32 %v6558_v28, %v9305_v16  ;;  %v2387_v55 = vand.u32 4294901760, %v2386_v9  ;;  %v9414_v29 = vand.u32 4294901760, %v9402_v12 }
 0x208   : > { %1976 = vmax.xlane.f32.xlu0 %v1975_v58  ;;  %6203 = vmatpush1.bf16.msra.mxu1 %v11614_v56  ;;  %v1139_v35 = vpop.f32.mrb[12].mxu1  ;;  %v1871_v22 = vpop.f32.mrb[12].mxu0  ;;  %v9418_v41 = vadd.f32 %v6559_v43, %v9312_v0 }
 0x209   : > { %11612 = vst [vmem:[#allocation103_spill] sm:$0xff] %v9410_v15  ;;  %11613 = vst [vmem:[#allocation124_spill] sm:$0xff] %v9414_v29  ;;  %6393 = vmatprep.subr.bf16.mxu0 %v11616_v32  ;;  %6205 = vmatprep.subr.bf16.mxu1 %v11617_v8  ;;  %v9423_v46 = vsub.f32 %v2166_v49, %v9410_v15  ;;  %v2167_v28 = vmax.f32 %v2151_v30, 0.0  ;;  %v6560_v58 = vadd.f32 %v1871_v22, %v1139_v35  ;;  %v1141_v9 = vpop.f32.mrb[13].mxu1  ;;  %v1873_v7 = vpop.f32.mrb[13].mxu0 }
 0x20a   : > { %11615 = vst [vmem:[#allocation104_spill] sm:$0xff] %v9418_v41  ;;  %2388 = vmatmul.mubr.f32.gmra.mrb[36].mxu1 %v2387_v55  ;;  %3978 = vmatmul.mubr.f32.gmra.mrb[36].mxu0 %v2387_v55  ;;  %v2397_v56 = vsub.f32 %v9402_v12, %v9414_v29  ;;  %v6561_v2 = vadd.f32 %v1873_v7, %v1141_v9  ;;  %v1978_v43 = vsel %vm1962_vm0, %v9418_v41, -inf  ;;  %v11621_v55 = vld [vmem:[#allocation106_spill] sm:$0xff]  ;;  %v11623_v9 = vld [vmem:[#allocation108_spill] sm:$0xff]  ;;  %v11624_v29 = vld [vmem:[#allocation23_spill] sm:$0xff] }
 0x20b   : > { %11618 = vst [vmem:[#allocation105_spill] sm:$0xff] %v9423_v46  ;;  %2393 = vmatprep.mubr.f32.mxu1 %v11604_v1  ;;  %3983 = vmatprep.mubr.f32.mxu0 %v11604_v1  ;;  %v9431_v8 = vand.u32 4294901760, %v2167_v28  ;;  %v2152_v49 = vadd.f32 %v6560_v58, %v9305_v16  ;;  %v9435_v35 = vand.u32 4294901760, %v9423_v46 }
 0x20c   : > { %1979 = vmax.xlane.f32.xlu1 %v1978_v43  ;;  %v2398_v30 = vand.u32 4294901760, %v2397_v56  ;;  %6395 = vmatpush1.bf16.msra.mxu0 %v11621_v55  ;;  %v1147_v22 = vpop.f32.mrb[14].mxu1  ;;  %v1878_v7 = vpop.f32.mrb[14].mxu0  ;;  %v9439_v32 = vadd.f32 %v6561_v2, %v9312_v0 }
 0x20d   : > { %11619 = vst [vmem:[#allocation107_spill] sm:$0xff] %v9431_v8  ;;  %11620 = vst [vmem:[#allocation125_spill] sm:$0xff] %v9435_v35  ;;  %6207 = vmatpush1.bf16.msra.mxu1 %v11623_v9  ;;  %6397 = vmatprep.subr.bf16.mxu0 %v11624_v29  ;;  %v9444_v41 = vsub.f32 %v2167_v28, %v9431_v8  ;;  %v2168_v58 = vmax.f32 %v2152_v49, 0.0  ;;  %v6562_v43 = vadd.f32 %v1878_v7, %v1147_v22  ;;  %v1149_v56 = vpop.f32.mrb[15].mxu1  ;;  %v1880_v12 = vpop.f32.mrb[15].mxu0 }
 0x20e   : > { %11622 = vst [vmem:[#allocation106_spill] sm:$0xff] %v9439_v32  ;;  %2399 = vmatmul.mubr.f32.gmra.mrb[38].mxu1 %v2398_v30  ;;  %3989 = vmatmul.mubr.f32.gmra.mrb[38].mxu0 %v2398_v30  ;;  %v2408_v55 = vsub.f32 %v9423_v46, %v9435_v35  ;;  %v6563_v53 = vadd.f32 %v1880_v12, %v1149_v56  ;;  %v1981_v2 = vsel %vm1962_vm0, %v9439_v32, -inf  ;;  %v11628_v30 = vld [vmem:[#allocation24_spill] sm:$0xff]  ;;  %v11630_v56 = vld [vmem:[#allocation74_spill] sm:$0xff]  ;;  %v11631_v35 = vld [vmem:[#allocation109_spill] sm:$0xff] }
 0x20f   : > { %11625 = vst [vmem:[#allocation108_spill] sm:$0xff] %v9444_v41  ;;  %2404 = vmatprep.mubr.f32.mxu1 %v11604_v1  ;;  %3994 = vmatprep.mubr.f32.mxu0 %v11604_v1  ;;  %v9452_v29 = vand.u32 4294901760, %v2168_v58  ;;  %v2153_v28 = vadd.f32 %v6562_v43, %v9305_v16  ;;  %v9456_v22 = vand.u32 4294901760, %v9444_v41 }
 0x210   : > { %1982 = vmax.xlane.f32.xlu0 %v1981_v2  ;;  %v2409_v49 = vand.u32 4294901760, %v2408_v55  ;;  %6399 = vmatpush1.bf16.msra.mxu0 %v11628_v30  ;;  %v1155_v7 = vpop.f32.mrb[16].mxu1  ;;  %v1885_v12 = vpop.f32.mrb[16].mxu0  ;;  %v9460_v9 = vadd.f32 %v6563_v53, %v9312_v0 }
 0x211   : > { %11626 = vst [vmem:[#allocation23_spill] sm:$0xff] %v9452_v29  ;;  %11627 = vst [vmem:[#allocation126_spill] sm:$0xff] %v9456_v22  ;;  %6209 = vmatprep.subr.bf16.mxu1 %v11630_v56  ;;  %6401 = vmatprep.subr.bf16.mxu0 %v11631_v35  ;;  %v9465_v32 = vsub.f32 %v2168_v58, %v9452_v29  ;;  %v2169_v43 = vmax.f32 %v2153_v28, 0.0  ;;  %v6564_v2 = vadd.f32 %v1885_v12, %v1155_v7  ;;  %v1157_v55 = vpop.f32.mrb[17].mxu1  ;;  %v1887_v46 = vpop.f32.mrb[17].mxu0 }
 0x212   : > { %11629 = vst [vmem:[#allocation24_spill] sm:$0xff] %v9460_v9  ;;  %2410 = vmatmul.mubr.f32.gmra.mrb[40].mxu1 %v2409_v49  ;;  %4000 = vmatmul.mubr.f32.gmra.mrb[40].mxu0 %v2409_v49  ;;  %v2419_v30 = vsub.f32 %v9444_v41, %v9456_v22  ;;  %v6565_v31 = vadd.f32 %v1887_v46, %v1157_v55  ;;  %v1984_v53 = vsel %vm1962_vm0, %v9460_v9, -inf  ;;  %v11635_v49 = vld [vmem:[#allocation75_spill] sm:$0xff]  ;;  %v11637_v55 = vld [vmem:[#allocation110_spill] sm:$0xff] }
 0x213   : > { %11632 = vst [vmem:[#allocation74_spill] sm:$0xff] %v9465_v32  ;;  %2415 = vmatprep.mubr.f32.mxu1 %v11604_v1  ;;  %4005 = vmatprep.mubr.f32.mxu0 %v11604_v1  ;;  %v9473_v35 = vand.u32 4294901760, %v2169_v43  ;;  %v2154_v58 = vadd.f32 %v6564_v2, %v9305_v16  ;;  %v9477_v7 = vand.u32 4294901760, %v9465_v32  ;;  %v11638_v22 = vld [vmem:[#allocation111_spill] sm:$0xff] }
 0x214   : > { %1985 = vmax.xlane.f32.xlu1 %v1984_v53  ;;  %v2420_v28 = vand.u32 4294901760, %v2419_v30  ;;  %6211 = vmatpush1.bf16.msra.mxu1 %v11635_v49  ;;  %v1163_v12 = vpop.f32.mrb[18].mxu1  ;;  %v1892_v46 = vpop.f32.mrb[18].mxu0  ;;  %v9481_v56 = vadd.f32 %v6565_v31, %v9312_v0 }
 0x215   : > { %11633 = vst [vmem:[#allocation109_spill] sm:$0xff] %v9473_v35  ;;  %11634 = vst [vmem:[#allocation127_spill] sm:$0xff] %v9477_v7  ;;  %6403 = vmatpush1.bf16.msra.mxu0 %v11637_v55  ;;  %6213 = vmatprep.subr.bf16.mxu1 %v11638_v22  ;;  %v9486_v9 = vsub.f32 %v2169_v43, %v9473_v35  ;;  %v2170_v2 = vmax.f32 %v2154_v58, 0.0  ;;  %v6566_v53 = vadd.f32 %v1892_v46, %v1163_v12  ;;  %v1165_v30 = vpop.f32.mrb[19].mxu1  ;;  %v1894_v41 = vpop.f32.mrb[19].mxu0 }
 0x216   : > { %11636 = vst [vmem:[#allocation75_spill] sm:$0xff] %v9481_v56  ;;  %2421 = vmatmul.mubr.f32.gmra.mrb[42].mxu1 %v2420_v28  ;;  %4011 = vmatmul.mubr.f32.gmra.mrb[42].mxu0 %v2420_v28  ;;  %v2430_v49 = vsub.f32 %v9465_v32, %v9477_v7  ;;  %v6567_v4 = vadd.f32 %v1894_v41, %v1165_v30  ;;  %v1987_v31 = vsel %vm1962_vm0, %v9481_v56, -inf  ;;  %v11642_v28 = vld [vmem:[#allocation112_spill] sm:$0xff]  ;;  %v11644_v30 = vld [vmem:[#allocation113_spill] sm:$0xff]  ;;  %v11645_v7 = vld [vmem:[#allocation115_spill] sm:$0xff] }
 0x217   : > { %11639 = vst [vmem:[#allocation110_spill] sm:$0xff] %v9486_v9  ;;  %2426 = vmatprep.mubr.f32.mxu1 %v11604_v1  ;;  %4016 = vmatprep.mubr.f32.mxu0 %v11604_v1  ;;  %v9494_v22 = vand.u32 4294901760, %v2170_v2  ;;  %v2155_v43 = vadd.f32 %v6566_v53, %v9305_v16  ;;  %v9498_v12 = vand.u32 4294901760, %v9486_v9 }
 0x218   : > { %1988 = vmax.xlane.f32.xlu0 %v1987_v31  ;;  %v2431_v58 = vand.u32 4294901760, %v2430_v49  ;;  %6215 = vmatpush1.bf16.msra.mxu1 %v11642_v28  ;;  %v1171_v46 = vpop.f32.mrb[20].mxu1  ;;  %v1899_v41 = vpop.f32.mrb[20].mxu0  ;;  %v9502_v55 = vadd.f32 %v6567_v4, %v9312_v0 }
 0x219   : > { %11640 = vst [vmem:[#allocation111_spill] sm:$0xff] %v9494_v22  ;;  %11641 = vst [vmem:[#allocation128_spill] sm:$0xff] %v9498_v12  ;;  %6405 = vmatprep.subr.bf16.mxu0 %v11644_v30  ;;  %6217 = vmatprep.subr.bf16.mxu1 %v11645_v7  ;;  %v9507_v56 = vsub.f32 %v2170_v2, %v9494_v22  ;;  %v2171_v53 = vmax.f32 %v2155_v43, 0.0  ;;  %v6568_v31 = vadd.f32 %v1899_v41, %v1171_v46  ;;  %v1173_v49 = vpop.f32.mrb[21].mxu1  ;;  %v1901_v32 = vpop.f32.mrb[21].mxu0 }
 0x21a   : > { %11643 = vst [vmem:[#allocation112_spill] sm:$0xff] %v9502_v55  ;;  %2432 = vmatmul.mubr.f32.gmra.mrb[44].mxu1 %v2431_v58  ;;  %4022 = vmatmul.mubr.f32.gmra.mrb[44].mxu0 %v2431_v58  ;;  %v2441_v28 = vsub.f32 %v9486_v9, %v9498_v12  ;;  %v6569_v35 = vadd.f32 %v1901_v32, %v1173_v49  ;;  %v1990_v4 = vsel %vm1962_vm0, %v9502_v55, -inf  ;;  %v11649_v58 = vld [vmem:[#allocation114_spill] sm:$0xff]  ;;  %v11651_v49 = vld [vmem:[#allocation116_spill] sm:$0xff]  ;;  %v11652_v12 = vld [vmem:[#allocation117_spill] sm:$0xff] }
 0x21b   : > { %11646 = vst [vmem:[#allocation113_spill] sm:$0xff] %v9507_v56  ;;  %2437 = vmatprep.mubr.f32.mxu1 %v11604_v1  ;;  %4027 = vmatprep.mubr.f32.mxu0 %v11604_v1  ;;  %v9515_v7 = vand.u32 4294901760, %v2171_v53  ;;  %v2156_v2 = vadd.f32 %v6568_v31, %v9305_v16  ;;  %v9519_v46 = vand.u32 4294901760, %v9507_v56 }
 0x21c   : > { %1991 = vmax.xlane.f32.xlu1 %v1990_v4  ;;  %v2442_v43 = vand.u32 4294901760, %v2441_v28  ;;  %6407 = vmatpush1.bf16.msra.mxu0 %v11649_v58  ;;  %v1179_v41 = vpop.f32.mrb[22].mxu1  ;;  %v1906_v32 = vpop.f32.mrb[22].mxu0  ;;  %v9523_v30 = vadd.f32 %v6569_v35, %v9312_v0 }
 0x21d   : > { %11647 = vst [vmem:[#allocation115_spill] sm:$0xff] %v9515_v7  ;;  %11648 = vst [vmem:[#allocation129_spill] sm:$0xff] %v9519_v46  ;;  %6409 = vmatprep.subr.bf16.mxu0 %v11651_v49  ;;  %6219 = vmatpush1.bf16.msra.mxu1 %v11652_v12  ;;  %v9528_v55 = vsub.f32 %v2171_v53, %v9515_v7  ;;  %v2172_v31 = vmax.f32 %v2156_v2, 0.0  ;;  %v6570_v4 = vadd.f32 %v1906_v32, %v1179_v41  ;;  %v1181_v28 = vpop.f32.mrb[23].mxu1  ;;  %v1908_v9 = vpop.f32.mrb[23].mxu0 }
 0x21e   : > { %11650 = vst [vmem:[#allocation114_spill] sm:$0xff] %v9523_v30  ;;  %2443 = vmatmul.mubr.f32.gmra.mrb[46].mxu1 %v2442_v43  ;;  %4033 = vmatmul.mubr.f32.gmra.mrb[46].mxu0 %v2442_v43  ;;  %v2452_v58 = vsub.f32 %v9507_v56, %v9519_v46  ;;  %v6571_v22 = vadd.f32 %v1908_v9, %v1181_v28  ;;  %v1993_v35 = vsel %vm1962_vm0, %v9523_v30, -inf  ;;  %v11656_v43 = vld [vmem:[#allocation118_spill] sm:$0xff]  ;;  %v11658_v28 = vld [vmem:[#allocation119_spill] sm:$0xff]  ;;  %v11659_v46 = vld [vmem:[#allocation120_spill] sm:$0xff] }
 0x21f   : > { %11653 = vst [vmem:[#allocation116_spill] sm:$0xff] %v9528_v55  ;;  %2448 = vmatprep.mubr.f32.mxu1 %v11604_v1  ;;  %4038 = vmatprep.mubr.f32.mxu0 %v11604_v1  ;;  %v9536_v12 = vand.u32 4294901760, %v2172_v31  ;;  %v2157_v53 = vadd.f32 %v6570_v4, %v9305_v16  ;;  %v9540_v41 = vand.u32 4294901760, %v9528_v55 }
 0x220   : > { %1994 = vmax.xlane.f32.xlu0 %v1993_v35  ;;  %v2453_v2 = vand.u32 4294901760, %v2452_v58  ;;  %6411 = vmatpush1.bf16.msra.mxu0 %v11656_v43  ;;  %v1187_v32 = vpop.f32.mrb[24].mxu1  ;;  %v1913_v9 = vpop.f32.mrb[24].mxu0  ;;  %v9544_v49 = vadd.f32 %v6571_v22, %v9312_v0 }
 0x221   : > { %11654 = vst [vmem:[#allocation117_spill] sm:$0xff] %v9536_v12  ;;  %11655 = vst [vmem:[#allocation130_spill] sm:$0xff] %v9540_v41  ;;  %6221 = vmatprep.subr.bf16.mxu1 %v11658_v28  ;;  %6413 = vmatprep.subr.bf16.mxu0 %v11659_v46  ;;  %v9549_v30 = vsub.f32 %v2172_v31, %v9536_v12  ;;  %v2173_v4 = vmax.f32 %v2157_v53, 0.0  ;;  %v6572_v35 = vadd.f32 %v1913_v9, %v1187_v32  ;;  %v1189_v58 = vpop.f32.mrb[25].mxu1  ;;  %v1915_v56 = vpop.f32.mrb[25].mxu0 }
 0x222   : > { %11657 = vst [vmem:[#allocation118_spill] sm:$0xff] %v9544_v49  ;;  %2454 = vmatmul.mubr.f32.gmra.mrb[48].mxu1 %v2453_v2  ;;  %4044 = vmatmul.mubr.f32.gmra.mrb[48].mxu0 %v2453_v2  ;;  %v2463_v43 = vsub.f32 %v9528_v55, %v9540_v41  ;;  %v6573_v7 = vadd.f32 %v1915_v56, %v1189_v58  ;;  %v1996_v22 = vsel %vm1962_vm0, %v9544_v49, -inf  ;;  %v11663_v2 = vld [vmem:[#allocation121_spill] sm:$0xff]  ;;  %v11665_v58 = vld [vmem:[#allocation122_spill] sm:$0xff] }
 0x223   : > { %11660 = vst [vmem:[#allocation119_spill] sm:$0xff] %v9549_v30  ;;  %2459 = vmatprep.mubr.f32.mxu1 %v11604_v1  ;;  %4049 = vmatprep.mubr.f32.mxu0 %v11604_v1  ;;  %v9557_v46 = vand.u32 4294901760, %v2173_v4  ;;  %v2158_v31 = vadd.f32 %v6572_v35, %v9305_v16  ;;  %v9561_v32 = vand.u32 4294901760, %v9549_v30 }
 0x224   : > { %1997 = vmax.xlane.f32.xlu1 %v1996_v22  ;;  %v2464_v53 = vand.u32 4294901760, %v2463_v43  ;;  %6223 = vmatpush1.bf16.msra.mxu1 %v11663_v2  ;;  %v1195_v9 = vpop.f32.mrb[26].mxu1  ;;  %v1920_v56 = vpop.f32.mrb[26].mxu0  ;;  %v9565_v28 = vadd.f32 %v6573_v7, %v9312_v0 }
 0x225   : > { %11661 = vst [vmem:[#allocation120_spill] sm:$0xff] %v9557_v46  ;;  %11662 = vst [vmem:[#allocation131_spill] sm:$0xff] %v9561_v32  ;;  %6415 = vmatpush1.bf16.msra.mxu0 %v9240_v50  ;;  %6225 = vmatprep.subr.bf16.mxu1 %v11665_v58  ;;  %v9570_v41 = vsub.f32 %v2173_v4, %v9557_v46  ;;  %v2174_v35 = vmax.f32 %v2158_v31, 0.0  ;;  %v6574_v22 = vadd.f32 %v1920_v56, %v1195_v9  ;;  %v1197_v43 = vpop.f32.mrb[27].mxu1  ;;  %v1922_v49 = vpop.f32.mrb[27].mxu0 }
 0x226   : > { %11664 = vst [vmem:[#allocation121_spill] sm:$0xff] %v9565_v28  ;;  %2465 = vmatmul.mubr.f32.gmra.mrb[50].mxu1 %v2464_v53  ;;  %4055 = vmatmul.mubr.f32.gmra.mrb[50].mxu0 %v2464_v53  ;;  %v2474_v2 = vsub.f32 %v9549_v30, %v9561_v32  ;;  %v6575_v55 = vadd.f32 %v1922_v49, %v1197_v43  ;;  %v1999_v7 = vsel %vm1962_vm0, %v9565_v28, -inf  ;;  %v11669_v53 = vld [vmem:[#allocation123_spill] sm:$0xff] }
 0x227   : > { %11666 = vst [vmem:[#allocation122_spill] sm:$0xff] %v9570_v41  ;;  %2470 = vmatprep.mubr.f32.mxu1 %v11604_v1  ;;  %4060 = vmatprep.mubr.f32.mxu0 %v11604_v1  ;;  %v9578_v50 = vand.u32 4294901760, %v2174_v35  ;;  %v2159_v4 = vadd.f32 %v6574_v22, %v9305_v16  ;;  %v9582_v9 = vand.u32 4294901760, %v9570_v41 }
 0x228   : > { %2000 = vmax.xlane.f32.xlu0 %v1999_v7  ;;  %v2475_v31 = vand.u32 4294901760, %v2474_v2  ;;  %6417 = vmatprep.subr.bf16.mxu0 %v11669_v53  ;;  %v1203_v56 = vpop.f32.mrb[28].mxu1  ;;  %v1927_v49 = vpop.f32.mrb[28].mxu0  ;;  %v9586_v58 = vadd.f32 %v6575_v55, %v9312_v0 }
 0x229   : > { %11667 = vst [vmem:[#allocation132_spill] sm:$0xff] %v9578_v50  ;;  %11668 = vst [vmem:[#allocation133_spill] sm:$0xff] %v9582_v9  ;;  %6227 = vmatpush1.bf16.msra.mxu1 %v9266_v18  ;;  %6419 = vmatpush1.bf16.msra.mxu0 %v9270_v27  ;;  %v9591_v43 = vsub.f32 %v2174_v35, %v9578_v50  ;;  %v2175_v22 = vmax.f32 %v2159_v4, 0.0  ;;  %v6576_v7 = vadd.f32 %v1927_v49, %v1203_v56  ;;  %v1205_v2 = vpop.f32.mrb[29].mxu1  ;;  %v1929_v32 = vpop.f32.mrb[29].mxu0  ;;  %v11674_v56 = vld [vmem:[#allocation21_spill] sm:$0xff] }
 0x22a   : > { %11670 = vst [vmem:[#allocation123_spill] sm:$0xff] %v9586_v58  ;;  %2476 = vmatmul.mubr.f32.gmra.mrb[52].mxu1 %v2475_v31  ;;  %4066 = vmatmul.mubr.f32.gmra.mrb[52].mxu0 %v2475_v31  ;;  %v2485_v53 = vsub.f32 %v9570_v41, %v9582_v9  ;;  %v6577_v28 = vadd.f32 %v1929_v32, %v1205_v2  ;;  %v2002_v55 = vsel %vm1962_vm0, %v9586_v58, -inf  ;;  %v11673_v31 = vld [vmem:[#allocation12_spill] sm:$0xff]  ;;  %v11677_v41 = vld [vmem:[#allocation13_spill] sm:$0xff] }
 0x22b   : > { %2481 = vmatprep.mubr.f32.mxu1 %v11604_v1  ;;  %4071 = vmatprep.mubr.f32.mxu0 %v11604_v1  ;;  %v9599_v18 = vand.u32 4294901760, %v2175_v22  ;;  %v2160_v27 = vadd.f32 %v6576_v7, %v9305_v16  ;;  %v9603_v4 = vand.u32 4294901760, %v9591_v43  ;;  %v11675_v49 = vpack.c.bf16 %v11673_v31, %v11674_v56  ;;  %v11676_v58 = vld [vmem:[#allocation56_spill] sm:$0xff] }
 0x22c   : > { %2003 = vmax.xlane.f32.xlu1 %v2002_v55  ;;  %v2486_v35 = vand.u32 4294901760, %v2485_v53  ;;  %v1211_v32 = vpop.f32.mrb[30].mxu1  ;;  %v1934_v2 = vpop.f32.mrb[30].mxu0  ;;  %v9609_v9 = vadd.f32 %v6577_v28, %v9312_v0  ;;  %v11678_v30 = vpack.c.bf16 %v11676_v58, %v11677_v41 }
 0x22d   : > { %11671 = vst [vmem:[#allocation134_spill] sm:$0xff] %v9599_v18  ;;  %11672 = vst [vmem:[#allocation135_spill] sm:$0xff] %v9603_v4  ;;  %6229 = vmatprep.subr.bf16.mxu1 %v11675_v49  ;;  %v9615_v7 = vsub.f32 %v2175_v22, %v9599_v18  ;;  %v2176_v53 = vmax.f32 %v2160_v27, 0.0  ;;  %v6578_v55 = vadd.f32 %v1934_v2, %v1211_v32  ;;  %v1213_v50 = vpop.f32.mrb[31].mxu1  ;;  %v1936_v46 = vpop.f32.mrb[31].mxu0 }
 0x22e   : > { %6421 = vmatprep.subr.bf16.mxu0 %v11678_v30  ;;  %2487 = vmatmul.mubr.f32.gmra.mrb[54].mxu1 %v2486_v35  ;;  %v2496_v49 = vsub.f32 %v9591_v43, %v9603_v4  ;;  %v6579_v31 = vadd.f32 %v1936_v46, %v1213_v50  ;;  %v2005_v28 = vsel %vm1962_vm0, %v9609_v9, -inf  ;;  %v11709_v4 = vld [vmem:[#allocation48_spill] sm:$0xff] }
 0x22f   : > { %4077 = vmatmul.mubr.f32.gmra.mrb[54].mxu0 %v2486_v35  ;;  %2492 = vmatprep.mubr.f32.mxu1 %v11604_v1  ;;  %v9623_v30 = vand.u32 4294901760, %v2176_v53  ;;  %v2161_v22 = vadd.f32 %v6578_v55, %v9305_v16  ;;  %v9627_v32 = vand.u32 4294901760, %v9615_v7 }
 0x230   : > { %4082 = vmatprep.mubr.f32.mxu0 %v11604_v1  ;;  %2006 = vmax.xlane.f32.xlu0 %v2005_v28  ;;  %v2497_v27 = vand.u32 4294901760, %v2496_v49  ;;  %v9630_v35 = vadd.f32 %v6579_v31, %v9312_v0 }
 0x231   : > { %11679 = vst [vmem:[#allocation21_spill] sm:$0xff] %v9623_v30  ;;  %11680 = vst [vmem:[#allocation56_spill] sm:$0xff] %v9627_v32  ;;  %v9633_v46 = vsub.f32 %v2176_v53, %v9623_v30  ;;  %v2177_v50 = vmax.f32 %v2161_v22, 0.0  ;;  %v2507_v2 = vsub.f32 %v9615_v7, %v9627_v32  ;;  %v11693_v32 = vpack.c.bf16 %v11580_v37, %v11579_v17 }
 0x232   : > { %2498 = vmatmul.mubr.f32.gmra.mrb[56].mxu1 %v2497_v27  ;;  %v2008_v16 = vsel %vm1962_vm0, %v9630_v35, -inf }
 0x233   : > { %4088 = vmatmul.mubr.f32.gmra.mrb[56].mxu0 %v2497_v27  ;;  %2503 = vmatprep.mubr.f32.mxu1 %v11604_v1  ;;  %v9641_v55 = vand.u32 4294901760, %v2177_v50  ;;  %v2508_v0 = vand.u32 4294901760, %v2507_v2  ;;  %v9644_v31 = vand.u32 4294901760, %v9633_v46  ;;  %v11684_v2 = vld [vmem:[#allocation54_spill] sm:$0xff] }
 0x234   : > { %4093 = vmatprep.mubr.f32.mxu0 %v11604_v1  ;;  %2009 = vmax.xlane.f32.xlu1 %v2008_v16  ;;  %v11685_v16 = vld [vmem:[#allocation51_spill] sm:$0xff] }
 0x235   : > { %11681 = vst [vmem:[#allocation13_spill] sm:$0xff] %v9641_v55  ;;  %11682 = vst [vmem:[#allocation136_spill] sm:$0xff] %v9644_v31  ;;  %v9647_v53 = vsub.f32 %v2177_v50, %v9641_v55  ;;  %v2518_v49 = vsub.f32 %v9633_v46, %v9644_v31 }
 0x236   : > { %2509 = vmatmul.mubr.f32.gmra.mrb[58].mxu1 %v2508_v0 }
 0x237   : > { %4099 = vmatmul.mubr.f32.gmra.mrb[58].mxu0 %v2508_v0  ;;  %2514 = vmatprep.mubr.f32.mxu1 %v11604_v1  ;;  %v2519_v28 = vand.u32 4294901760, %v2518_v49  ;;  %v9654_v22 = vand.u32 4294901760, %v9647_v53  ;;  %v11686_v0 = vpack.c.bf16 %v11684_v2, %v11685_v16  ;;  %v11687_v49 = vld [vmem:[#allocation14_spill] sm:$0xff] }
 0x238   : > { %4104 = vmatprep.mubr.f32.mxu0 %v11604_v1 }
 0x239   : > { %11683 = vst [vmem:[#allocation137_spill] sm:$0xff] %v9654_v22  ;;  %v2529_v27 = vsub.f32 %v9647_v53, %v9654_v22  ;;  %v11691_v22 = vld [vmem:[#allocation58_spill] sm:$0xff] }
 0x23a   : > { %2520 = vmatmul.mubr.f32.gmra.mrb[60].mxu1 %v2519_v28 }
 0x23b   : > { %4110 = vmatmul.mubr.f32.gmra.mrb[60].mxu0 %v2519_v28  ;;  %2525 = vmatprep.mubr.f32.mxu1 %v11604_v1  ;;  %v2530_v50 = vand.u32 4294901760, %v2529_v27  ;;  %v11688_v28 = vld [vmem:[#allocation57_spill] sm:$0xff] }
 0x23c   : > { %4115 = vmatprep.mubr.f32.mxu0 %v11604_v1  ;;  %v11689_v27 = vpack.c.bf16 %v11687_v49, %v11688_v28 }
 0x23e   : > { %2531 = vmatmul.mubr.f32.gmra.mrb[62].mxu1 %v2530_v50 }
 0x23f   : > { %4121 = vmatmul.mubr.f32.gmra.mrb[62].mxu0 %v2530_v50  ;;  %2761 = vmatprep.mubr.f32.mxu1 %v11604_v1  ;;  %v11690_v50 = vld [vmem:[#allocation59_spill] sm:$0xff] }
 0x240   : > { %4351 = vmatprep.mubr.f32.mxu0 %v11604_v1  ;;  %v11692_v31 = vpack.c.bf16 %v11690_v50, %v11691_v22 }
 0x242   : > { %2763 = vmatmul.mubr.f32.vlgmr.msra.gmra.mrb[32].mxu1 %v9328_v26 }
 0x243   : > { %4353 = vmatmul.mubr.f32.vlgmr.msra.gmra.mrb[32].mxu0 %v9328_v26  ;;  %2768 = vmatprep.mubr.f32.mxu1 %v11604_v1 }
 0x244   : > { %4358 = vmatprep.mubr.f32.mxu0 %v11604_v1  ;;  %6231 = vmatpush1.bf16.msra.mxu1 %v11686_v0  ;;  %v11694_v0 = vpack.c.bf16 %v11578_v51, %v11577_v36 }
 0x245   : > { %6423 = vmatpush1.bf16.msra.mxu0 %v11689_v27  ;;  %6233 = vmatprep.subr.bf16.mxu1 %v11692_v31  ;;  %v11695_v27 = vpack.c.bf16 %v11582_v42, %v11581_v3  ;;  %v11696_v31 = vpack.c.bf16 %v11584_v59, %v11583_v52 }
 0x246   : > { %6425 = vmatprep.subr.bf16.mxu0 %v11693_v32  ;;  %2770 = vmatmul.mubr.f32.gmra.mrb[34].mxu1 %v9350_v21  ;;  %v11697_v32 = vpack.c.bf16 %v11588_v25, %v11587_v24 }
 0x247   : > { %4360 = vmatmul.mubr.f32.gmra.mrb[34].mxu0 %v9350_v21  ;;  %2775 = vmatprep.mubr.f32.mxu1 %v11604_v1 }
 0x248   : > { %4365 = vmatprep.mubr.f32.mxu0 %v11604_v1  ;;  %6235 = vmatpush1.bf16.msra.mxu1 %v11694_v0  ;;  %v11698_v0 = vpack.c.bf16 %v11586_v34, %v11585_v13 }
 0x249   : > { %6427 = vmatpush1.bf16.msra.mxu0 %v11695_v27  ;;  %6237 = vmatprep.subr.bf16.mxu1 %v11696_v31  ;;  %v11699_v27 = vld [vmem:[#allocation71_spill] sm:$0xff]  ;;  %v11701_v31 = vpack.c.bf16 %v11550_v5, %v11591_v10 }
 0x24a   : > { %6429 = vmatprep.subr.bf16.mxu0 %v11697_v32  ;;  %2777 = vmatmul.mubr.f32.gmra.mrb[36].mxu1 %v9371_v19  ;;  %v11700_v21 = vpack.c.bf16 %v11590_v44, %v11699_v27  ;;  %v11702_v32 = vpack.c.bf16 %v11555_v38, %v11553_v40 }
 0x24b   : > { %4367 = vmatmul.mubr.f32.gmra.mrb[36].mxu0 %v9371_v19  ;;  %2782 = vmatprep.mubr.f32.mxu1 %v11604_v1  ;;  %v11705_v19 = vld [vmem:[#allocation77_spill] sm:$0xff] }
 0x24c   : > { %4372 = vmatprep.mubr.f32.mxu0 %v11604_v1  ;;  %6239 = vmatpush1.bf16.msra.mxu1 %v11698_v0  ;;  %v11703_v0 = vpack.c.bf16 %v11552_v63, %v11551_v33 }
 0x24d   : > { %6431 = vmatpush1.bf16.msra.mxu0 %v11700_v21  ;;  %6241 = vmatprep.subr.bf16.mxu1 %v11701_v31  ;;  %v11704_v21 = vld [vmem:[#allocation25_spill] sm:$0xff]  ;;  %v11707_v31 = vpack.c.bf16 %v8499_v6, %v8488_v61 }
 0x24e   : > { %6433 = vmatprep.subr.bf16.mxu0 %v11702_v32  ;;  %2784 = vmatmul.mubr.f32.gmra.mrb[38].mxu1 %v9389_v23  ;;  %v11706_v26 = vpack.c.bf16 %v11704_v21, %v11705_v19  ;;  %v11708_v32 = vld [vmem:[#allocation49_spill] sm:$0xff]  ;;  %v11715_v19 = vld [vmem:[#allocation50_spill] sm:$0xff] }
 0x24f   : > { %4374 = vmatmul.mubr.f32.gmra.mrb[38].mxu0 %v9389_v23  ;;  %2789 = vmatprep.mubr.f32.mxu1 %v11604_v1  ;;  %v11710_v38 = vpack.c.bf16 %v11708_v32, %v11709_v4  ;;  %v11712_v23 = vld [vmem:[#allocation78_spill] sm:$0xff] }
 0x250   : > { %4379 = vmatprep.mubr.f32.mxu0 %v11604_v1  ;;  %6243 = vmatpush1.bf16.msra.mxu1 %v11703_v0  ;;  %v11711_v0 = vld [vmem:[#allocation79_spill] sm:$0xff] }
 0x251   : > { %6435 = vmatpush1.bf16.msra.mxu0 %v11706_v26  ;;  %6245 = vmatprep.subr.bf16.mxu1 %v11707_v31  ;;  %v11713_v21 = vpack.c.bf16 %v11711_v0, %v11712_v23  ;;  %v11714_v26 = vld [vmem:[#allocation17_spill] sm:$0xff]  ;;  %v11717_v31 = vpack.c.bf16 %v8884_v47, %v8879_v39 }
 0x252   : > { %6437 = vmatprep.subr.bf16.mxu0 %v11710_v38  ;;  %2791 = vmatmul.mubr.f32.gmra.mrb[40].mxu1 %v9410_v15  ;;  %v11716_v6 = vpack.c.bf16 %v11714_v26, %v11715_v19  ;;  %v11718_v38 = vld [vmem:[#allocation82_spill] sm:$0xff] }
 0x253   : > { %4381 = vmatmul.mubr.f32.gmra.mrb[40].mxu0 %v9410_v15  ;;  %2796 = vmatprep.mubr.f32.mxu1 %v11604_v1  ;;  %v11719_v32 = vpack.c.bf16 %v8894_v62, %v11718_v38 }
 0x254   : > { %4386 = vmatprep.mubr.f32.mxu0 %v11604_v1  ;;  %6247 = vmatpush1.bf16.msra.mxu1 %v11713_v21  ;;  %v11720_v21 = vpack.c.bf16 %v8900_v57, %v8897_v54 }
 0x255   : > { %6439 = vmatpush1.bf16.msra.mxu0 %v11716_v6  ;;  %6249 = vmatprep.subr.bf16.mxu1 %v11717_v31  ;;  %v11721_v6 = vpack.c.bf16 %v8905_v45, %v8903_v48  ;;  %v11722_v31 = vld [vmem:[#allocation85_spill] sm:$0xff] }
 0x256   : > { %6441 = vmatprep.subr.bf16.mxu0 %v11719_v32  ;;  %2798 = vmatmul.mubr.f32.gmra.mrb[42].mxu1 %v9431_v8  ;;  %v11723_v15 = vpack.c.bf16 %v8914_v11, %v11722_v31  ;;  %v11724_v32 = vld [vmem:[#allocation87_spill] sm:$0xff]  ;;  %v11731_v31 = vld [vmem:[#allocation93_spill] sm:$0xff] }
 0x257   : > { %4388 = vmatmul.mubr.f32.gmra.mrb[42].mxu0 %v9431_v8  ;;  %2803 = vmatprep.mubr.f32.mxu1 %v11604_v1  ;;  %v11725_v62 = vpack.c.bf16 %v8919_v60, %v11724_v32  ;;  %v11728_v8 = vld [vmem:[#allocation90_spill] sm:$0xff]  ;;  %v11734_v32 = vld [vmem:[#allocation95_spill] sm:$0xff] }
 0x258   : > { %4393 = vmatprep.mubr.f32.mxu0 %v11604_v1  ;;  %6251 = vmatpush1.bf16.msra.mxu1 %v11720_v21  ;;  %v11726_v21 = vpack.c.bf16 %v8923_v14, %v8921_v20  ;;  %v11738_v14 = vld [vmem:[#allocation97_spill] sm:$0xff] }
 0x259   : > { %6443 = vmatpush1.bf16.msra.mxu0 %v11721_v6  ;;  %6253 = vmatprep.subr.bf16.mxu1 %v11723_v15  ;;  %v11727_v6 = vld [vmem:[#allocation91_spill] sm:$0xff]  ;;  %v11730_v15 = vld [vmem:[#allocation94_spill] sm:$0xff] }
 0x25a   : > { %6445 = vmatprep.subr.bf16.mxu0 %v11725_v62  ;;  %2805 = vmatmul.mubr.f32.gmra.mrb[44].mxu1 %v9452_v29  ;;  %v11729_v11 = vpack.c.bf16 %v11727_v6, %v11728_v8  ;;  %v11732_v60 = vpack.c.bf16 %v11730_v15, %v11731_v31  ;;  %v11733_v62 = vld [vmem:[#allocation96_spill] sm:$0xff]  ;;  %v11741_v8 = vld [vmem:[#allocation99_spill] sm:$0xff]  ;;  %v11803_v31 = vld [vmem:[#allocation113_spill] sm:$0xff] }
 0x25b   : > { %4395 = vmatmul.mubr.f32.gmra.mrb[44].mxu0 %v9452_v29  ;;  %2810 = vmatprep.mubr.f32.mxu1 %v11604_v1  ;;  %v11735_v45 = vpack.c.bf16 %v11733_v62, %v11734_v32  ;;  %v11736_v29 = vld [vmem:[#allocation109_spill] sm:$0xff]  ;;  %v11744_v62 = vld [vmem:[#allocation28_spill] sm:$0xff] }
 0x25c   : > { %4400 = vmatprep.mubr.f32.mxu0 %v11604_v1  ;;  %6255 = vmatpush1.bf16.msra.mxu1 %v11726_v21  ;;  %v11737_v21 = vld [vmem:[#allocation98_spill] sm:$0xff] }
 0x25d   : > { %6447 = vmatpush1.bf16.msra.mxu0 %v11729_v11  ;;  %6257 = vmatprep.subr.bf16.mxu1 %v11732_v60  ;;  %v11739_v6 = vpack.c.bf16 %v11737_v21, %v11738_v14  ;;  %v11740_v11 = vld [vmem:[#allocation100_spill] sm:$0xff]  ;;  %v11743_v60 = vld [vmem:[#allocation27_spill] sm:$0xff]  ;;  %v11800_v21 = vand.u32 4294901760, %v11677_v41 }
 0x25e   : > { %6449 = vmatprep.subr.bf16.mxu0 %v11735_v45  ;;  %2812 = vmatmul.mubr.f32.gmra.mrb[46].mxu1 %v11736_v29  ;;  %v11742_v15 = vpack.c.bf16 %v11740_v11, %v11741_v8  ;;  %v11745_v45 = vld [vmem:[#allocation111_spill] sm:$0xff]  ;;  %v11758_v11 = vld [vmem:[#allocation29_spill] sm:$0xff]  ;;  %v11780_v8 = vld [vmem:[#allocation108_spill] sm:$0xff] }
 0x25f   : > { %4402 = vmatmul.mubr.f32.gmra.mrb[46].mxu0 %v11736_v29  ;;  %2817 = vmatprep.mubr.f32.mxu1 %v11604_v1  ;;  %v11746_v29 = vld [vmem:[#allocation115_spill] sm:$0xff] }
 0x260   : > { %4407 = vmatprep.mubr.f32.mxu0 %v11604_v1  ;;  %6259 = vmatpush1.bf16.msra.mxu1 %v11739_v6  ;;  %v11747_v6 = vld [vmem:[#allocation120_spill] sm:$0xff] }
 0x261   : > { %6451 = vmatpush1.bf16.msra.mxu0 %v11742_v15  ;;  %6261 = vmatprep.subr.bf16.mxu1 %v11743_v60  ;;  %v11748_v15 = vld [vmem:[#allocation132_spill] sm:$0xff] }
 0x262   : > { %6453 = vmatprep.subr.bf16.mxu0 %v11744_v62  ;;  %2819 = vmatmul.mubr.f32.gmra.mrb[48].mxu1 %v11745_v45  ;;  %v11755_v62 = vld [vmem:[#allocation68_spill] sm:$0xff] }
 0x263   : > { %4409 = vmatmul.mubr.f32.gmra.mrb[48].mxu0 %v11745_v45  ;;  %2824 = vmatprep.mubr.f32.mxu1 %v11604_v1  ;;  %v11756_v60 = vld [vmem:[#allocation52_spill] sm:$0xff] }
 0x264   : > { %4414 = vmatprep.mubr.f32.mxu0 %v11604_v1 }
 0x266   : > { %2826 = vmatmul.mubr.f32.gmra.mrb[50].mxu1 %v11746_v29 }
 0x267   : > { %4416 = vmatmul.mubr.f32.gmra.mrb[50].mxu0 %v11746_v29  ;;  %2831 = vmatprep.mubr.f32.mxu1 %v11604_v1  ;;  %v11754_v29 = vld [vmem:[#allocation61_spill] sm:$0xff] }
 0x268   : > { %4421 = vmatprep.mubr.f32.mxu0 %v11604_v1 }
 0x26a   : > { %2833 = vmatmul.mubr.f32.gmra.mrb[52].mxu1 %v9536_v12 }
 0x26b   : > { %4423 = vmatmul.mubr.f32.gmra.mrb[52].mxu0 %v9536_v12  ;;  %2838 = vmatprep.mubr.f32.mxu1 %v11604_v1  ;;  %v11752_v12 = vld [vmem:[#allocation37_spill] sm:$0xff] }
 0x26c   : > { %4428 = vmatprep.mubr.f32.mxu0 %v11604_v1 }
 0x26e   : > { %2840 = vmatmul.mubr.f32.gmra.mrb[54].mxu1 %v11747_v6 }
 0x26f   : > { %4430 = vmatmul.mubr.f32.gmra.mrb[54].mxu0 %v11747_v6  ;;  %2845 = vmatprep.mubr.f32.mxu1 %v11604_v1 }
 0x270   : > { %4435 = vmatprep.mubr.f32.mxu0 %v11604_v1 }
 0x272   : > { %2847 = vmatmul.mubr.f32.gmra.mrb[56].mxu1 %v11748_v15 }
 0x273   : > { %4437 = vmatmul.mubr.f32.gmra.mrb[56].mxu0 %v11748_v15  ;;  %2852 = vmatprep.mubr.f32.mxu1 %v11604_v1  ;;  %v11751_v15 = vld [vmem:[#allocation34_spill] sm:$0xff] }
 0x274   : > { %4442 = vmatprep.mubr.f32.mxu0 %v11604_v1 }
 0x276   : > { %2854 = vmatmul.mubr.f32.gmra.mrb[58].mxu1 %v9599_v18 }
 0x277   : > { %4444 = vmatmul.mubr.f32.gmra.mrb[58].mxu0 %v9599_v18  ;;  %2859 = vmatprep.mubr.f32.mxu1 %v11604_v1  ;;  %v11749_v18 = vld [vmem:[#allocation15_spill] sm:$0xff] }
 0x278   : > { %4449 = vmatprep.mubr.f32.mxu0 %v11604_v1 }
 0x27a   : > { %2861 = vmatmul.mubr.f32.gmra.mrb[60].mxu1 %v9623_v30 }
 0x27b   : > { %4451 = vmatmul.mubr.f32.gmra.mrb[60].mxu0 %v9623_v30  ;;  %2866 = vmatprep.mubr.f32.mxu1 %v11604_v1  ;;  %v11750_v30 = vld [vmem:[#allocation30_spill] sm:$0xff] }
 0x27c   : > { %4456 = vmatprep.mubr.f32.mxu0 %v11604_v1 }
 0x27e   : > { %2868 = vmatmul.mubr.f32.gmra.mrb[62].mxu1 %v9641_v55 }
 0x27f   : > { %4458 = vmatmul.mubr.f32.gmra.mrb[62].mxu0 %v9641_v55  ;;  %3002 = vmatprep.mubr.f32.mxu1 %v11604_v1  ;;  %v11753_v55 = vld [vmem:[#allocation19_spill] sm:$0xff] }
 0x280   : > { %4592 = vmatprep.mubr.f32.mxu0 %v11604_v1 }
 0x282   : > { %3005 = vmatmul.mubr.f32.vlgmr.msra.gmra.mrb[32].mxu1 %v11749_v18 }
 0x283   : > { %4595 = vmatmul.mubr.f32.vlgmr.msra.gmra.mrb[32].mxu0 %v11749_v18  ;;  %3010 = vmatprep.mubr.f32.mxu1 %v11604_v1 }
 0x284   : > { %4600 = vmatprep.mubr.f32.mxu0 %v11604_v1  ;;  %6263 = vmatpush1.bf16.msra.mxu1 %v11750_v30  ;;  %v1965_v6 = vpop.xlane.xlu0 %1964  ;;  %v11757_v30 = vld [vmem:[#allocation31_spill] sm:$0xff] }
 0x285   : > { %6455 = vmatpush1.bf16.msra.mxu0 %v11751_v15  ;;  %6265 = vmatprep.subr.bf16.mxu1 %v11752_v12  ;;  %v2011_v45 = vsub.f32 %v11754_v29, %v1965_v6  ;;  %v11759_v12 = vld [vmem:[#allocation53_spill] sm:$0xff]  ;;  %v11760_v29 = vld [vmem:[#allocation63_spill] sm:$0xff] }
 0x286   : > { %6457 = vmatprep.subr.bf16.mxu0 %v11753_v55  ;;  %3013 = vmatmul.mubr.f32.gmra.mrb[34].mxu1 %v11755_v62  ;;  %v11761_v55 = vld [vmem:[#allocation22_spill] sm:$0xff] }
 0x287   : > { %4603 = vmatmul.mubr.f32.gmra.mrb[34].mxu0 %v11755_v62  ;;  %3018 = vmatprep.mubr.f32.mxu1 %v11604_v1  ;;  %v2027_v18 = vmul.f32 1.442695, %v2011_v45  ;;  %v11762_v45 = vld [vmem:[#allocation55_spill] sm:$0xff] }
 0x288   : > { %4608 = vmatprep.mubr.f32.mxu0 %v11604_v1  ;;  %6267 = vmatpush1.bf16.msra.mxu1 %v11756_v60  ;;  %v1968_v15 = vpop.xlane.xlu0 %1967 }
 0x289   : > { %6459 = vmatpush1.bf16.msra.mxu0 %v11757_v30  ;;  %6269 = vmatprep.subr.bf16.mxu1 %v11758_v11  ;;  %7236 = vpow2.f32 %v2027_v18  ;;  %v2012_v6 = vsub.f32 %v11760_v29, %v1968_v15  ;;  %v11763_v30 = vld [vmem:[#allocation60_spill] sm:$0xff]  ;;  %v11764_v11 = vld [vmem:[#allocation35_spill] sm:$0xff]  ;;  %v11767_v29 = vld [vmem:[#allocation102_spill] sm:$0xff] }
 0x28a   : > { %6461 = vmatprep.subr.bf16.mxu0 %v11759_v12  ;;  %3021 = vmatmul.mubr.f32.gmra.mrb[36].mxu1 %v11761_v55  ;;  %v11765_v12 = vld [vmem:[#allocation32_spill] sm:$0xff]  ;;  %v11766_v15 = vld [vmem:[#allocation67_spill] sm:$0xff] }
 0x28b   : > { %4611 = vmatmul.mubr.f32.gmra.mrb[36].mxu0 %v11761_v55  ;;  %3026 = vmatprep.mubr.f32.mxu1 %v11604_v1  ;;  %v2029_v62 = vmul.f32 1.442695, %v2012_v6  ;;  %v11768_v6 = vld [vmem:[#allocation64_spill] sm:$0xff] }
 0x28c   : > { %4616 = vmatprep.mubr.f32.mxu0 %v11604_v1  ;;  %6271 = vmatpush1.bf16.msra.mxu1 %v11762_v45  ;;  %v1971_v60 = vpop.xlane.xlu1 %1970 }
 0x28d   : > { %6463 = vmatpush1.bf16.msra.mxu0 %v11763_v30  ;;  %6273 = vmatprep.subr.bf16.mxu1 %v11764_v11  ;;  %7238 = vpow2.f32 %v2029_v62  ;;  %v2013_v18 = vsub.f32 %v11766_v15, %v1971_v60  ;;  %v11769_v30 = vld [vmem:[#allocation65_spill] sm:$0xff]  ;;  %v11770_v11 = vld [vmem:[#allocation36_spill] sm:$0xff]  ;;  %v11772_v60 = vld [vmem:[#allocation70_spill] sm:$0xff] }
 0x28e   : > { %6465 = vmatprep.subr.bf16.mxu0 %v11765_v12  ;;  %3029 = vmatmul.mubr.f32.gmra.mrb[38].mxu1 %v11767_v29  ;;  %v11771_v12 = vld [vmem:[#allocation40_spill] sm:$0xff]  ;;  %v11773_v15 = vld [vmem:[#allocation105_spill] sm:$0xff] }
 0x28f   : > { %4619 = vmatmul.mubr.f32.gmra.mrb[38].mxu0 %v11767_v29  ;;  %3034 = vmatprep.mubr.f32.mxu1 %v11604_v1  ;;  %v2031_v55 = vmul.f32 1.442695, %v2013_v18 }
 0x290   : > { %4624 = vmatprep.mubr.f32.mxu0 %v11604_v1  ;;  %6275 = vmatpush1.bf16.msra.mxu1 %v11768_v6  ;;  %v1974_v45 = vpop.xlane.xlu1 %1973  ;;  %v11776_v6 = vld [vmem:[#allocation38_spill] sm:$0xff] }
 0x291   : > { %6467 = vmatpush1.bf16.msra.mxu0 %v11769_v30  ;;  %6277 = vmatprep.subr.bf16.mxu1 %v11770_v11  ;;  %7240 = vpow2.f32 %v2031_v55  ;;  %v2014_v62 = vsub.f32 %v11772_v60, %v1974_v45  ;;  %v11775_v30 = vld [vmem:[#allocation33_spill] sm:$0xff]  ;;  %v11778_v60 = vld [vmem:[#allocation39_spill] sm:$0xff] }
 0x292   : > { %6469 = vmatprep.subr.bf16.mxu0 %v11771_v12  ;;  %3037 = vmatmul.mubr.f32.gmra.mrb[40].mxu1 %v11773_v15  ;;  %v11777_v45 = vld [vmem:[#allocation41_spill] sm:$0xff] }
 0x293   : > { %4627 = vmatmul.mubr.f32.gmra.mrb[40].mxu0 %v11773_v15  ;;  %3042 = vmatprep.mubr.f32.mxu1 %v11604_v1  ;;  %v9858_v18 = vpop.eup %7236  ;;  %v2033_v29 = vmul.f32 1.442695, %v2014_v62  ;;  %v11779_v15 = vld [vmem:[#allocation101_spill] sm:$0xff] }
 0x294   : > { %4632 = vmatprep.mubr.f32.mxu0 %v11604_v1  ;;  %11774 = vst [vmem:[#allocation54_spill] sm:$0xff] %v9858_v18  ;;  %6279 = vmatpush1.bf16.msra.mxu1 %v11775_v30  ;;  %v2059_v55 = vsel %vm1962_vm0, %v9858_v18, 0.0  ;;  %v11782_v18 = vld [vmem:[#allocation42_spill] sm:$0xff] }
 0x295   : > { %6471 = vmatpush1.bf16.msra.mxu0 %v11776_v6  ;;  %v1977_v11 = vpop.xlane.xlu0 %1976  ;;  %6281 = vmatprep.subr.bf16.mxu1 %v11777_v45  ;;  %7242 = vpow2.f32 %v2033_v29 }
 0x296   : > { %6473 = vmatprep.subr.bf16.mxu0 %v11778_v60  ;;  %v2015_v12 = vsub.f32 %v11779_v15, %v1977_v11  ;;  %2060 = vadd.xlane.f32.xlu0 %v2059_v55  ;;  %v11783_v60 = vld [vmem:[#allocation43_spill] sm:$0xff]  ;;  %v11784_v11 = vld [vmem:[#allocation44_spill] sm:$0xff]  ;;  %v11786_v15 = vld [vmem:[#allocation74_spill] sm:$0xff] }
 0x297   : > { %3045 = vmatmul.mubr.f32.gmra.mrb[42].mxu1 %v11780_v8  ;;  %4635 = vmatmul.mubr.f32.gmra.mrb[42].mxu0 %v11780_v8  ;;  %v9870_v62 = vpop.eup %7238  ;;  %v11785_v55 = vld [vmem:[#allocation104_spill] sm:$0xff] }
 0x298   : > { %3050 = vmatprep.mubr.f32.mxu1 %v11604_v1  ;;  %11781 = vst [vmem:[#allocation51_spill] sm:$0xff] %v9870_v62  ;;  %v2035_v6 = vmul.f32 1.442695, %v2015_v12  ;;  %4640 = vmatprep.mubr.f32.mxu0 %v11604_v1  ;;  %v2062_v29 = vsel %vm1962_vm0, %v9870_v62, 0.0  ;;  %v11788_v62 = vld [vmem:[#allocation45_spill] sm:$0xff] }
 0x299   : > { %6283 = vmatpush1.bf16.msra.mxu1 %v11782_v18  ;;  %v1980_v45 = vpop.xlane.xlu1 %1979  ;;  %6475 = vmatpush1.bf16.msra.mxu0 %v11783_v60 }
 0x29a   : > { %6285 = vmatprep.subr.bf16.mxu1 %v11784_v11  ;;  %7244 = vpow2.f32 %v2035_v6  ;;  %v2016_v8 = vsub.f32 %v11785_v55, %v1980_v45  ;;  %2063 = vadd.xlane.f32.xlu1 %v2062_v29  ;;  %v11789_v11 = vld [vmem:[#allocation46_spill] sm:$0xff]  ;;  %v11790_v45 = vld [vmem:[#allocation47_spill] sm:$0xff] }
 0x29b   : > { %3053 = vmatmul.mubr.f32.gmra.mrb[44].mxu1 %v11786_v15  ;;  %4643 = vmatmul.mubr.f32.gmra.mrb[44].mxu0 %v11786_v15  ;;  %v9882_v12 = vpop.eup %7240  ;;  %v11791_v29 = vld [vmem:[#allocation106_spill] sm:$0xff] }
 0x29c   : > { %3058 = vmatprep.mubr.f32.mxu1 %v11604_v1  ;;  %11787 = vst [vmem:[#allocation14_spill] sm:$0xff] %v9882_v12  ;;  %v2037_v18 = vmul.f32 1.442695, %v2016_v8  ;;  %4648 = vmatprep.mubr.f32.mxu0 %v11604_v1  ;;  %v2065_v6 = vsel %vm1962_vm0, %v9882_v12, 0.0  ;;  %v11792_v15 = vld [vmem:[#allocation110_spill] sm:$0xff] }
 0x29d   : > { %6477 = vmatprep.subr.bf16.mxu0 %v11788_v62  ;;  %v1983_v60 = vpop.xlane.xlu0 %1982  ;;  %6287 = vmatpush1.bf16.msra.mxu1 %v11789_v11  ;;  %v11794_v12 = vld [vmem:[#allocation18_spill] sm:$0xff] }
 0x29e   : > { %6479 = vmatpush1.bf16.msra.mxu0 %v11790_v45  ;;  %7246 = vpow2.f32 %v2037_v18  ;;  %v2017_v55 = vsub.f32 %v11791_v29, %v1983_v60  ;;  %2066 = vadd.xlane.f32.xlu0 %v2065_v6  ;;  %v11795_v45 = vld [vmem:[#allocation80_spill] sm:$0xff]  ;;  %v11796_v60 = vld [vmem:[#allocation81_spill] sm:$0xff]  ;;  %v11797_v6 = vand.u32 4294901760, %v11674_v56 }
 0x29f   : > { %3061 = vmatmul.mubr.f32.gmra.mrb[46].mxu1 %v11792_v15  ;;  %4651 = vmatmul.mubr.f32.gmra.mrb[46].mxu0 %v11792_v15  ;;  %v9894_v8 = vpop.eup %7242  ;;  %v11798_v29 = vld [vmem:[#allocation12_spill] sm:$0xff] }
 0x2a0   : > { %3066 = vmatprep.mubr.f32.mxu1 %v11604_v1  ;;  %11793 = vst [vmem:[#allocation57_spill] sm:$0xff] %v9894_v8  ;;  %v2039_v62 = vmul.f32 1.442695, %v2017_v55  ;;  %4656 = vmatprep.mubr.f32.mxu0 %v11604_v1  ;;  %v2068_v18 = vsel %vm1962_vm0, %v9894_v8, 0.0  ;;  %v11799_v15 = vand.u32 4294901760, %v11798_v29  ;;  %v11801_v55 = vand.u32 4294901760, %v11676_v58 }
 0x2a1   : > { %6289 = vmatprep.subr.bf16.mxu1 %v11794_v12  ;;  %v1986_v11 = vpop.xlane.xlu1 %1985  ;;  %6481 = vmatprep.subr.bf16.mxu0 %v11795_v45  ;;  %v11802_v12 = vld [vmem:[#allocation24_spill] sm:$0xff]  ;;  %v11808_v29 = vld [vmem:[#allocation119_spill] sm:$0xff] }
 0x2a2   : > { %6291 = vmatpush1.bf16.msra.mxu1 %v11796_v60  ;;  %v6292_v30 = vpack.c.bf16 %v11799_v15, %v11797_v6  ;;  %v6484_v14 = vpack.c.bf16 %v11801_v55, %v11800_v21  ;;  %7248 = vpow2.f32 %v2039_v62  ;;  %v2018_v32 = vsub.f32 %v11802_v12, %v1986_v11  ;;  %2069 = vadd.xlane.f32.xlu1 %v2068_v18  ;;  %v11804_v6 = vld [vmem:[#allocation92_spill] sm:$0xff]  ;;  %v11805_v21 = vld [vmem:[#allocation75_spill] sm:$0xff] }
 0x2a3   : > { %3069 = vmatmul.mubr.f32.gmra.mrb[48].mxu1 %v11803_v31  ;;  %4659 = vmatmul.mubr.f32.gmra.mrb[48].mxu0 %v11803_v31  ;;  %v11806_v31 = vld [vmem:[#allocation116_spill] sm:$0xff] }
 0x2a4   : > { %3074 = vmatprep.mubr.f32.mxu1 %v11604_v1  ;;  %v9914_v8 = vpop.eup %7244  ;;  %v2041_v56 = vmul.f32 1.442695, %v2018_v32  ;;  %4664 = vmatprep.mubr.f32.mxu0 %v11604_v1 }
 0x2a5   : > { %6483 = vmatpush1.bf16.msra.mxu0 %v11804_v6  ;;  %v1989_v41 = vpop.xlane.xlu0 %1988  ;;  %v2071_v58 = vsel %vm1962_vm0, %v9914_v8, 0.0  ;;  %6293 = vmatprep.subr.bf16.mxu1 %v6292_v30 }
 0x2a6   : > { %6485 = vmatprep.subr.bf16.mxu0 %v6484_v14  ;;  %7250 = vpow2.f32 %v2041_v56  ;;  %v2019_v62 = vsub.f32 %v11805_v21, %v1989_v41  ;;  %2072 = vadd.xlane.f32.xlu0 %v2071_v58  ;;  %v11807_v14 = vld [vmem:[#allocation112_spill] sm:$0xff]  ;;  %v11809_v58 = vld [vmem:[#allocation114_spill] sm:$0xff] }
 0x2a7   : > { %3077 = vmatmul.mubr.f32.gmra.mrb[50].mxu1 %v11806_v31  ;;  %4667 = vmatmul.mubr.f32.gmra.mrb[50].mxu0 %v11806_v31 }
 0x2a8   : > { %3082 = vmatprep.mubr.f32.mxu1 %v11604_v1  ;;  %v9924_v32 = vpop.eup %7246  ;;  %v2043_v11 = vmul.f32 1.442695, %v2019_v62  ;;  %4672 = vmatprep.mubr.f32.mxu0 %v11604_v1  ;;  %v11810_v62 = vld [vmem:[#allocation122_spill] sm:$0xff] }
 0x2a9   : > { %v1992_v12 = vpop.xlane.xlu1 %1991  ;;  %v2074_v30 = vsel %vm1962_vm0, %v9924_v32, 0.0 }
 0x2aa   : > { %7252 = vpow2.f32 %v2043_v11  ;;  %v2020_v18 = vsub.f32 %v11807_v14, %v1992_v12  ;;  %2075 = vadd.xlane.f32.xlu1 %v2074_v30  ;;  %v11206_v14 = vmov 1  }
 0x2ab   : > { %3085 = vmatmul.mubr.f32.gmra.mrb[52].mxu1 %v11808_v29  ;;  %4675 = vmatmul.mubr.f32.gmra.mrb[52].mxu0 %v11808_v29  ;;  %v11811_v29 = vld [vmem:[#allocation118_spill] sm:$0xff] }
 0x2ac   : > { %3090 = vmatprep.mubr.f32.mxu1 %v11604_v1  ;;  %v9933_v15 = vpop.eup %7248  ;;  %v2045_v55 = vmul.f32 1.442695, %v2020_v18  ;;  %4680 = vmatprep.mubr.f32.mxu0 %v11604_v1  ;;  %v11204_v18 = vmov 0  }
 0x2ad   : > { %v1995_v56 = vpop.xlane.xlu0 %1994  ;;  %v2077_v41 = vsel %vm1962_vm0, %v9933_v15, 0.0  ;;  %7173 = vset.pattern.permute.xlu1 %v11206_v14  ;;  %7172 = vset.pattern.permute.xlu0 %v11204_v18  ;;  %v11820_v14 = vld [vmem:[#allocation16_spill] sm:$0xff] }
 0x2ae   : > { %7254 = vpow2.f32 %v2045_v55  ;;  %v2021_v21 = vsub.f32 %v11809_v58, %v1995_v56  ;;  %2078 = vadd.xlane.f32.xlu0 %v2077_v41 }
 0x2af   : > { %3093 = vmatmul.mubr.f32.gmra.mrb[54].mxu1 %v11810_v62  ;;  %4683 = vmatmul.mubr.f32.gmra.mrb[54].mxu0 %v11810_v62  ;;  %v11812_v62 = vld [vmem:[#allocation121_spill] sm:$0xff] }
 0x2b0   : > { %3098 = vmatprep.mubr.f32.mxu1 %v11604_v1  ;;  %v9942_v31 = vpop.eup %7250  ;;  %v2047_v11 = vmul.f32 1.442695, %v2021_v21  ;;  %4688 = vmatprep.mubr.f32.mxu0 %v11604_v1 }
 0x2b1   : > { %v1998_v12 = vpop.xlane.xlu1 %1997  ;;  %v2080_v30 = vsel %vm1962_vm0, %v9942_v31, 0.0 }
 0x2b2   : > { %7256 = vpow2.f32 %v2047_v11  ;;  %v2022_v55 = vsub.f32 %v11811_v29, %v1998_v12  ;;  %2081 = vadd.xlane.f32.xlu1 %v2080_v30 }
 0x2b3   : > { %3101 = vmatmul.mubr.f32.gmra.mrb[56].mxu1 %v9591_v43  ;;  %4691 = vmatmul.mubr.f32.gmra.mrb[56].mxu0 %v9591_v43 }
 0x2b4   : > { %3106 = vmatprep.mubr.f32.mxu1 %v11604_v1  ;;  %v9953_v56 = vpop.eup %7252  ;;  %v2049_v41 = vmul.f32 1.442695, %v2022_v55  ;;  %4696 = vmatprep.mubr.f32.mxu0 %v11604_v1  ;;  %v11813_v55 = vld [vmem:[#allocation123_spill] sm:$0xff] }
 0x2b5   : > { %v2001_v58 = vpop.xlane.xlu0 %2000  ;;  %v2083_v21 = vsel %vm1962_vm0, %v9953_v56, 0.0 }
 0x2b6   : > { %7258 = vpow2.f32 %v2049_v41  ;;  %v2023_v11 = vsub.f32 %v11812_v62, %v2001_v58  ;;  %2084 = vadd.xlane.f32.xlu0 %v2083_v21 }
 0x2b7   : > { %3109 = vmatmul.mubr.f32.gmra.mrb[58].mxu1 %v9615_v7  ;;  %4699 = vmatmul.mubr.f32.gmra.mrb[58].mxu0 %v9615_v7 }
 0x2b8   : > { %3114 = vmatprep.mubr.f32.mxu1 %v11604_v1  ;;  %v9962_v43 = vpop.eup %7254  ;;  %v2051_v12 = vmul.f32 1.442695, %v2023_v11  ;;  %4704 = vmatprep.mubr.f32.mxu0 %v11604_v1 }
 0x2b9   : > { %v2004_v30 = vpop.xlane.xlu1 %2003  ;;  %v2086_v29 = vsel %vm1962_vm0, %v9962_v43, 0.0 }
 0x2ba   : > { %7260 = vpow2.f32 %v2051_v12  ;;  %v2024_v41 = vsub.f32 %v11813_v55, %v2004_v30  ;;  %2087 = vadd.xlane.f32.xlu1 %v2086_v29  ;;  %v11814_v30 = vand.u32 4294901760, %v11685_v16  ;;  %v11815_v29 = vand.u32 4294901760, %v11684_v2 }
 0x2bb   : > { %3117 = vmatmul.mubr.f32.gmra.mrb[60].mxu1 %v9633_v46  ;;  %4707 = vmatmul.mubr.f32.gmra.mrb[60].mxu0 %v9633_v46 }
 0x2bc   : > { %3122 = vmatprep.mubr.f32.mxu1 %v11604_v1  ;;  %v9971_v7 = vpop.eup %7256  ;;  %v2053_v58 = vmul.f32 1.442695, %v2024_v41  ;;  %4712 = vmatprep.mubr.f32.mxu0 %v11604_v1  ;;  %v6294_v55 = vpack.c.bf16 %v11815_v29, %v11814_v30  ;;  %v11825_v29 = vand.u32 4294901760, %v11583_v52 }
 0x2bd   : > { %v2007_v21 = vpop.xlane.xlu0 %2006  ;;  %v2089_v62 = vsel %vm1962_vm0, %v9971_v7, 0.0 }
 0x2be   : > { %7262 = vpow2.f32 %v2053_v58  ;;  %v2025_v11 = vsub.f32 %v9609_v9, %v2007_v21  ;;  %2090 = vadd.xlane.f32.xlu0 %v2089_v62  ;;  %v11816_v58 = vand.u32 4294901760, %v11688_v28  ;;  %v11818_v62 = vand.u32 4294901760, %v11691_v22 }
 0x2bf   : > { %3125 = vmatmul.mubr.f32.gmra.mrb[62].mxu1 %v9647_v53  ;;  %4715 = vmatmul.mubr.f32.gmra.mrb[62].mxu0 %v9647_v53  ;;  %v11817_v53 = vand.u32 4294901760, %v11687_v49  ;;  %v11821_v22 = vand.u32 4294901760, %v11577_v36  ;;  %v11822_v49 = vand.u32 4294901760, %v11578_v51  ;;  %v11827_v36 = vld [vmem:[#allocation69_spill] sm:$0xff] }
 0x2c0   : > { %3227 = vmatprep.mubr.f32.mxu1 %v11604_v1  ;;  %v9980_v46 = vpop.eup %7258  ;;  %v2055_v12 = vmul.f32 1.442695, %v2025_v11  ;;  %4817 = vmatprep.mubr.f32.mxu0 %v11604_v1  ;;  %v11819_v11 = vand.u32 4294901760, %v11690_v50 }
 0x2c1   : > { %v2010_v41 = vpop.xlane.xlu1 %2009  ;;  %v2092_v9 = vsel %vm1962_vm0, %v9980_v46, 0.0  ;;  %v6486_v21 = vpack.c.bf16 %v11817_v53, %v11816_v58  ;;  %v6298_v50 = vpack.c.bf16 %v11822_v49, %v11821_v22  ;;  %v11832_v53 = vand.u32 4294901760, %v11587_v24  ;;  %v11840_v49 = vld [vmem:[#allocation76_spill] sm:$0xff] }
 0x2c2   : > { %v6296_v18 = vpack.c.bf16 %v11819_v11, %v11818_v62  ;;  %7264 = vpow2.f32 %v2055_v12  ;;  %v2026_v16 = vsub.f32 %v9630_v35, %v2010_v41  ;;  %2093 = vadd.xlane.f32.xlu1 %v2092_v9  ;;  %v11824_v12 = vand.u32 4294901760, %v11580_v37  ;;  %v11834_v11 = vld [vmem:[#allocation73_spill] sm:$0xff] }
 0x2c3   : > { %3231 = vmatmul.mubr.f32.vlgmr.msra.gmra.mrb[32].mxu1 %v11820_v14  ;;  %4821 = vmatmul.mubr.f32.vlgmr.msra.gmra.mrb[32].mxu0 %v11820_v14  ;;  %v11823_v14 = vand.u32 4294901760, %v11579_v17  ;;  %v11826_v41 = vand.u32 4294901760, %v11584_v59  ;;  %v11828_v17 = vand.u32 4294901760, %v11581_v3  ;;  %v11829_v37 = vand.u32 4294901760, %v11582_v42 }
 0x2c4   : > { %3236 = vmatprep.mubr.f32.mxu1 %v11604_v1  ;;  %v10001_v2 = vpop.eup %7260  ;;  %v2057_v28 = vmul.f32 1.442695, %v2026_v16  ;;  %4826 = vmatprep.mubr.f32.mxu0 %v11604_v1  ;;  %v11831_v9 = vand.u32 4294901760, %v11586_v34  ;;  %v11836_v34 = vand.u32 4294901760, %v11590_v44  ;;  %v11838_v16 = vand.u32 4294901760, %v11550_v5 }
 0x2c5   : > { %6295 = vmatpush1.bf16.msra.mxu1 %v6294_v55  ;;  %v2095_v35 = vsel %vm1962_vm0, %v10001_v2, 0.0  ;;  %6487 = vmatpush1.bf16.msra.mxu0 %v6486_v21  ;;  %v6488_v30 = vpack.c.bf16 %v11824_v12, %v11823_v14  ;;  %v6300_v55 = vpack.c.bf16 %v11826_v41, %v11825_v29  ;;  %v6490_v52 = vpack.c.bf16 %v11829_v37, %v11828_v17  ;;  %v11845_v12 = vld [vmem:[#allocation77_spill] sm:$0xff]  ;;  %v11850_v17 = vld [vmem:[#allocation26_spill] sm:$0xff] }
 0x2c6   : > { %6297 = vmatprep.subr.bf16.mxu1 %v6296_v18  ;;  %7266 = vpow2.f32 %v2057_v28  ;;  %2096 = vadd.xlane.f32.xlu0 %v2095_v35  ;;  %v11830_v18 = vand.u32 4294901760, %v11585_v13  ;;  %v11833_v21 = vand.u32 4294901760, %v11588_v25  ;;  %v11835_v13 = vand.u32 4294901760, %v11699_v27  ;;  %v11842_v27 = vld [vmem:[#allocation124_spill] sm:$0xff]  ;;  %v11847_v29 = vld [vmem:[#allocation25_spill] sm:$0xff] }
 0x2c7   : > { %3240 = vmatmul.mubr.f32.gmra.mrb[34].mxu1 %v11827_v36  ;;  %4830 = vmatmul.mubr.f32.gmra.mrb[34].mxu0 %v11827_v36  ;;  %v11837_v25 = vand.u32 4294901760, %v11591_v10  ;;  %v11839_v22 = vand.u32 4294901760, %v11553_v40  ;;  %v11843_v10 = vand.u32 4294901760, %v11551_v33  ;;  %v11844_v5 = vand.u32 4294901760, %v11552_v63  ;;  %v11854_v33 = vld [vmem:[#allocation49_spill] sm:$0xff] }
 0x2c8   : > { %3245 = vmatprep.mubr.f32.mxu1 %v11604_v1  ;;  %v10021_v51 = vpop.eup %7262  ;;  %4835 = vmatprep.mubr.f32.mxu0 %v11604_v1  ;;  %v6302_v58 = vpack.c.bf16 %v11831_v9, %v11830_v18  ;;  %v6492_v62 = vpack.c.bf16 %v11833_v21, %v11832_v53  ;;  %v6494_v42 = vpack.c.bf16 %v11836_v34, %v11835_v13  ;;  %v11848_v41 = vand.u32 4294901760, %v11847_v29 }
 0x2c9   : > { %6299 = vmatpush1.bf16.msra.mxu1 %v6298_v50  ;;  %v2098_v59 = vsel %vm1962_vm0, %v10021_v51, 0.0  ;;  %6489 = vmatprep.subr.bf16.mxu0 %v6488_v30  ;;  %v6304_v28 = vpack.c.bf16 %v11838_v16, %v11837_v25  ;;  %v11841_v50 = vand.u32 4294901760, %v11840_v49  ;;  %v6306_v40 = vpack.c.bf16 %v11844_v5, %v11843_v10  ;;  %v11875_v10 = vld [vmem:[#allocation127_spill] sm:$0xff] }
 0x2ca   : > { %6301 = vmatprep.subr.bf16.mxu1 %v6300_v55  ;;  %2099 = vadd.xlane.f32.xlu1 %v2098_v59  ;;  %v11846_v30 = vand.u32 4294901760, %v11845_v12  ;;  %v11849_v36 = vand.u32 4294901760, %v8488_v61  ;;  %v11851_v37 = vand.u32 4294901760, %v11850_v17  ;;  %v11852_v59 = vld [vmem:[#allocation125_spill] sm:$0xff]  ;;  %v11853_v63 = vand.u32 4294901760, %v11709_v4  ;;  %v11876_v5 = vld [vmem:[#allocation87_spill] sm:$0xff] }
 0x2cb   : > { %3249 = vmatmul.mubr.f32.gmra.mrb[36].mxu1 %v11834_v11  ;;  %4839 = vmatmul.mubr.f32.gmra.mrb[36].mxu0 %v11834_v11  ;;  %v6496_v35 = vpack.c.bf16 %v11841_v50, %v11839_v22  ;;  %v11855_v18 = vand.u32 4294901760, %v11854_v33  ;;  %v11856_v61 = vand.u32 4294901760, %v11712_v23  ;;  %v11858_v21 = vand.u32 4294901760, %v11715_v19  ;;  %v11871_v22 = vld [vmem:[#allocation85_spill] sm:$0xff]  ;;  %v11873_v50 = vld [vmem:[#allocation86_spill] sm:$0xff] }
 0x2cc   : > { %3254 = vmatprep.mubr.f32.mxu1 %v11604_v1  ;;  %v10041_v3 = vpop.eup %7264  ;;  %4844 = vmatprep.mubr.f32.mxu0 %v11604_v1  ;;  %v6498_v55 = vpack.c.bf16 %v11848_v41, %v11846_v30  ;;  %v11859_v4 = vand.u32 4294901760, %v11714_v26  ;;  %v11860_v11 = vand.u32 4294901760, %v8879_v39  ;;  %v11861_v13 = vand.u32 4294901760, %v8884_v47  ;;  %v11881_v12 = vld [vmem:[#allocation89_spill] sm:$0xff]  ;;  %v11883_v41 = vld [vmem:[#allocation90_spill] sm:$0xff] }
 0x2cd   : > { %6491 = vmatpush1.bf16.msra.mxu0 %v6490_v52  ;;  %v2101_v24 = vsel %vm1962_vm0, %v10041_v3, 0.0  ;;  %6303 = vmatpush1.bf16.msra.mxu1 %v6302_v58  ;;  %v6308_v52 = vpack.c.bf16 %v11851_v37, %v11849_v36  ;;  %v6500_v9 = vpack.c.bf16 %v11855_v18, %v11853_v63  ;;  %v11857_v58 = vand.u32 4294901760, %v11711_v0  ;;  %v11885_v36 = vld [vmem:[#allocation91_spill] sm:$0xff]  ;;  %v11889_v63 = vld [vmem:[#allocation94_spill] sm:$0xff] }
 0x2ce   : > { %6493 = vmatprep.subr.bf16.mxu0 %v6492_v62  ;;  %2102 = vadd.xlane.f32.xlu0 %v2101_v24  ;;  %v6502_v62 = vpack.c.bf16 %v11859_v4, %v11858_v21  ;;  %v6312_v34 = vpack.c.bf16 %v11861_v13, %v11860_v11  ;;  %v11863_v23 = vand.u32 4294901760, %v11718_v38  ;;  %v11864_v24 = vld [vmem:[#allocation83_spill] sm:$0xff]  ;;  %v11866_v39 = vand.u32 4294901760, %v8897_v54  ;;  %v11869_v38 = vld [vmem:[#allocation84_spill] sm:$0xff]  ;;  %v11896_v4 = vld [vmem:[#allocation97_spill] sm:$0xff] }
 0x2cf   : > { %3258 = vmatmul.mubr.f32.gmra.mrb[38].mxu1 %v11842_v27  ;;  %4848 = vmatmul.mubr.f32.gmra.mrb[38].mxu0 %v11842_v27  ;;  %v6310_v53 = vpack.c.bf16 %v11857_v58, %v11856_v61  ;;  %v11865_v0 = vand.u32 4294901760, %v11864_v24  ;;  %v11867_v47 = vand.u32 4294901760, %v8900_v57  ;;  %v11868_v26 = vand.u32 4294901760, %v8903_v48  ;;  %v11892_v61 = vld [vmem:[#allocation95_spill] sm:$0xff]  ;;  %v11894_v58 = vld [vmem:[#allocation96_spill] sm:$0xff]  ;;  %v11898_v11 = vld [vmem:[#allocation98_spill] sm:$0xff] }
 0x2d0   : > { %3263 = vmatprep.mubr.f32.mxu1 %v11604_v1  ;;  %v10061_v44 = vpop.eup %7266  ;;  %4853 = vmatprep.mubr.f32.mxu0 %v11604_v1  ;;  %v11870_v16 = vand.u32 4294901760, %v11869_v38  ;;  %v11872_v49 = vand.u32 4294901760, %v11871_v22  ;;  %v11877_v54 = vand.u32 4294901760, %v11876_v5  ;;  %v11880_v48 = vand.u32 4294901760, %v8921_v20  ;;  %v11902_v24 = vld [vmem:[#allocation100_spill] sm:$0xff]  ;;  %v11908_v38 = vld [vmem:[#allocation131_spill] sm:$0xff] }
 0x2d1   : > { %6495 = vmatpush1.bf16.msra.mxu0 %v6494_v42  ;;  %v2104_v14 = vsel %vm1962_vm0, %v10061_v44, 0.0  ;;  %6305 = vmatprep.subr.bf16.mxu1 %v6304_v28  ;;  %v11862_v42 = vld [vmem:[#allocation126_spill] sm:$0xff]  ;;  %v6504_v25 = vpack.c.bf16 %v11865_v0, %v11863_v23  ;;  %v6314_v19 = vpack.c.bf16 %v11867_v47, %v11866_v39  ;;  %v11882_v30 = vand.u32 4294901760, %v11881_v12  ;;  %v11904_v39 = vld [vmem:[#allocation129_spill] sm:$0xff]  ;;  %v11905_v47 = vld [vmem:[#allocation27_spill] sm:$0xff] }
 0x2d2   : > { %6497 = vmatprep.subr.bf16.mxu0 %v6496_v35  ;;  %2105 = vadd.xlane.f32.xlu1 %v2104_v14  ;;  %v6506_v28 = vpack.c.bf16 %v11870_v16, %v11868_v26  ;;  %v11874_v35 = vand.u32 4294901760, %v11873_v50  ;;  %v11886_v17 = vand.u32 4294901760, %v11885_v36  ;;  %v11890_v33 = vand.u32 4294901760, %v11889_v63  ;;  %v11907_v26 = vld [vmem:[#allocation28_spill] sm:$0xff]  ;;  %v11909_v16 = vld [vmem:[#allocation133_spill] sm:$0xff]  ;;  %v11933_v63 = vld [vmem:[#allocation103_spill] sm:$0xff] }
 0x2d3   : > { %3267 = vmatmul.mubr.f32.gmra.mrb[40].mxu1 %v11852_v59  ;;  %4857 = vmatmul.mubr.f32.gmra.mrb[40].mxu0 %v11852_v59  ;;  %v6318_v29 = vpack.c.bf16 %v11882_v30, %v11880_v48  ;;  %v11893_v20 = vand.u32 4294901760, %v11892_v61  ;;  %v11899_v13 = vand.u32 4294901760, %v11898_v11  ;;  %v11903_v0 = vand.u32 4294901760, %v11902_v24  ;;  %v11911_v22 = vld [vmem:[#allocation56_spill] sm:$0xff]  ;;  %v11913_v50 = vld [vmem:[#allocation137_spill] sm:$0xff]  ;;  %v11949_v24 = vld [vmem:[#allocation111_spill] sm:$0xff] }
 0x2d4   : > { %3272 = vmatprep.mubr.f32.mxu1 %v11604_v1  ;;  %4862 = vmatprep.mubr.f32.mxu0 %v11604_v1  ;;  %v6316_v27 = vpack.c.bf16 %v11874_v35, %v11872_v49  ;;  %v11912_v49 = vld [vmem:[#allocation136_spill] sm:$0xff]  ;;  %v11914_v35 = vld [vmem:[#allocation62_spill] sm:$0xff]  ;;  %v11917_v5 = vld [vmem:[#allocation37_spill] sm:$0xff] }
 0x2d5   : > { %6307 = vmatpush1.bf16.msra.mxu1 %v6306_v40  ;;  %6499 = vmatpush1.bf16.msra.mxu0 %v6498_v55  ;;  %v11878_v40 = vld [vmem:[#allocation88_spill] sm:$0xff]  ;;  %v11884_v55 = vand.u32 4294901760, %v11883_v41  ;;  %v11922_v48 = vld [vmem:[#allocation29_spill] sm:$0xff] }
 0x2d6   : > { %6309 = vmatprep.subr.bf16.mxu1 %v6308_v52  ;;  %6501 = vmatprep.subr.bf16.mxu0 %v6500_v9  ;;  %v11879_v57 = vand.u32 4294901760, %v11878_v40  ;;  %v11887_v52 = vld [vmem:[#allocation93_spill] sm:$0xff]  ;;  %v11891_v9 = vld [vmem:[#allocation128_spill] sm:$0xff]  ;;  %v11919_v40 = vld [vmem:[#allocation19_spill] sm:$0xff] }
 0x2d7   : > { %3276 = vmatmul.mubr.f32.gmra.mrb[42].mxu1 %v11862_v42  ;;  %4866 = vmatmul.mubr.f32.gmra.mrb[42].mxu0 %v11862_v42  ;;  %v6510_v37 = vpack.c.bf16 %v11886_v17, %v11884_v55  ;;  %v11888_v59 = vand.u32 4294901760, %v11887_v52  ;;  %v11900_v42 = vld [vmem:[#allocation99_spill] sm:$0xff]  ;;  %v11923_v12 = vld [vmem:[#allocation20_spill] sm:$0xff]  ;;  %v11924_v30 = vld [vmem:[#allocation53_spill] sm:$0xff] }
 0x2d8   : > { %3281 = vmatprep.mubr.f32.mxu1 %v11604_v1  ;;  %4871 = vmatprep.mubr.f32.mxu0 %v11604_v1  ;;  %v6508_v14 = vpack.c.bf16 %v11879_v57, %v11877_v54  ;;  %v11901_v23 = vand.u32 4294901760, %v11900_v42  ;;  %v11918_v54 = vld [vmem:[#allocation66_spill] sm:$0xff]  ;;  %v11920_v57 = vld [vmem:[#allocation52_spill] sm:$0xff]  ;;  %v11927_v55 = vld [vmem:[#allocation35_spill] sm:$0xff] }
 0x2d9   : > { %6311 = vmatpush1.bf16.msra.mxu1 %v6310_v53  ;;  %6503 = vmatpush1.bf16.msra.mxu0 %v6502_v62  ;;  %v6320_v18 = vpack.c.bf16 %v11890_v33, %v11888_v59  ;;  %v11895_v53 = vand.u32 4294901760, %v11894_v58  ;;  %v11897_v62 = vand.u32 4294901760, %v11896_v4  ;;  %v11926_v41 = vld [vmem:[#allocation60_spill] sm:$0xff]  ;;  %v11931_v52 = vld [vmem:[#allocation65_spill] sm:$0xff]  ;;  %v11939_v58 = vld [vmem:[#allocation39_spill] sm:$0xff] }
 0x2da   : > { %6313 = vmatprep.subr.bf16.mxu1 %v6312_v34  ;;  %6505 = vmatprep.subr.bf16.mxu0 %v6504_v25  ;;  %v6514_v25 = vpack.c.bf16 %v11903_v0, %v11901_v23  ;;  %v11928_v36 = vld [vmem:[#allocation72_spill] sm:$0xff]  ;;  %v11937_v61 = vld [vmem:[#allocation41_spill] sm:$0xff]  ;;  %v11947_v42 = vld [vmem:[#allocation18_spill] sm:$0xff] }
 0x2db   : > { %3285 = vmatmul.mubr.f32.gmra.mrb[44].mxu1 %v11875_v10  ;;  %4875 = vmatmul.mubr.f32.gmra.mrb[44].mxu0 %v11875_v10  ;;  %v6512_v21 = vpack.c.bf16 %v11895_v53, %v11893_v20  ;;  %v6322_v34 = vpack.c.bf16 %v11899_v13, %v11897_v62  ;;  %v11916_v10 = vld [vmem:[#allocation34_spill] sm:$0xff]  ;;  %v11929_v17 = vld [vmem:[#allocation32_spill] sm:$0xff]  ;;  %v11938_v20 = vld [vmem:[#allocation107_spill] sm:$0xff] }
 0x2dc   : > { %3290 = vmatprep.mubr.f32.mxu1 %v11604_v1  ;;  %4880 = vmatprep.mubr.f32.mxu0 %v11604_v1  ;;  %v11932_v59 = vld [vmem:[#allocation36_spill] sm:$0xff]  ;;  %v11940_v53 = vld [vmem:[#allocation42_spill] sm:$0xff]  ;;  %v11943_v62 = vld [vmem:[#allocation23_spill] sm:$0xff] }
 0x2dd   : > { %6315 = vmatpush1.bf16.msra.mxu1 %v6314_v19  ;;  %6507 = vmatpush1.bf16.msra.mxu0 %v6506_v28  ;;  %v11906_v19 = vld [vmem:[#allocation130_spill] sm:$0xff]  ;;  %v11910_v28 = vld [vmem:[#allocation135_spill] sm:$0xff]  ;;  %v11934_v33 = vld [vmem:[#allocation40_spill] sm:$0xff] }
 0x2de   : > { %6317 = vmatprep.subr.bf16.mxu1 %v6316_v27  ;;  %6509 = vmatprep.subr.bf16.mxu0 %v6508_v14  ;;  %v11915_v27 = vld [vmem:[#allocation30_spill] sm:$0xff]  ;;  %v11921_v14 = vld [vmem:[#allocation31_spill] sm:$0xff]  ;;  %v11942_v4 = vld [vmem:[#allocation44_spill] sm:$0xff] }
 0x2df   : > { %3294 = vmatmul.mubr.f32.gmra.mrb[46].mxu1 %v11891_v9  ;;  %4884 = vmatmul.mubr.f32.gmra.mrb[46].mxu0 %v11891_v9  ;;  %v11936_v9 = vld [vmem:[#allocation38_spill] sm:$0xff]  ;;  %v11944_v11 = vld [vmem:[#allocation45_spill] sm:$0xff] }
 0x2e0   : > { %3299 = vmatprep.mubr.f32.mxu1 %v11604_v1  ;;  %4889 = vmatprep.mubr.f32.mxu0 %v11604_v1  ;;  %v11945_v13 = vld [vmem:[#allocation46_spill] sm:$0xff]  ;;  %v11948_v23 = vld [vmem:[#allocation109_spill] sm:$0xff] }
 0x2e1   : > { %6319 = vmatpush1.bf16.msra.mxu1 %v6318_v29  ;;  %6511 = vmatpush1.bf16.msra.mxu0 %v6510_v37  ;;  %v11925_v29 = vld [vmem:[#allocation55_spill] sm:$0xff]  ;;  %v11930_v37 = vld [vmem:[#allocation64_spill] sm:$0xff] }
 0x2e2   : > { %6321 = vmatprep.subr.bf16.mxu1 %v6320_v18  ;;  %6513 = vmatprep.subr.bf16.mxu0 %v6512_v21  ;;  %v11935_v18 = vld [vmem:[#allocation33_spill] sm:$0xff]  ;;  %v11941_v21 = vld [vmem:[#allocation43_spill] sm:$0xff] }
 0x2e3   : > { %3303 = vmatmul.mubr.f32.gmra.mrb[48].mxu1 %v11904_v39  ;;  %4893 = vmatmul.mubr.f32.gmra.mrb[48].mxu0 %v11904_v39  ;;  %v11952_v39 = vld [vmem:[#allocation120_spill] sm:$0xff] }
 0x2e4   : > { %3308 = vmatprep.mubr.f32.mxu1 %v11604_v1  ;;  %4898 = vmatprep.mubr.f32.mxu0 %v11604_v1 }
 0x2e5   : > { %6323 = vmatpush1.bf16.msra.mxu1 %v6322_v34  ;;  %6515 = vmatpush1.bf16.msra.mxu0 %v6514_v25  ;;  %v11946_v34 = vld [vmem:[#allocation47_spill] sm:$0xff] }
 0x2e6   : > { %6325 = vmatprep.subr.bf16.mxu1 %v11905_v47  ;;  %6517 = vmatprep.subr.bf16.mxu0 %v11907_v26  ;;  %v11953_v47 = vld [vmem:[#allocation54_spill] sm:$0xff]  ;;  %v11954_v26 = vld [vmem:[#allocation132_spill] sm:$0xff] }
 0x2e7   : > { %3312 = vmatmul.mubr.f32.gmra.mrb[50].mxu1 %v11906_v19  ;;  %4902 = vmatmul.mubr.f32.gmra.mrb[50].mxu0 %v11906_v19 }
 0x2e8   : > { %3317 = vmatprep.mubr.f32.mxu1 %v11604_v1  ;;  %4907 = vmatprep.mubr.f32.mxu0 %v11604_v1 }
 0x2eb   : > { %3321 = vmatmul.mubr.f32.gmra.mrb[52].mxu1 %v11908_v38  ;;  %4911 = vmatmul.mubr.f32.gmra.mrb[52].mxu0 %v11908_v38 }
 0x2ec   : > { %3326 = vmatprep.mubr.f32.mxu1 %v11604_v1  ;;  %4916 = vmatprep.mubr.f32.mxu0 %v11604_v1 }
 0x2ef   : > { %3330 = vmatmul.mubr.f32.gmra.mrb[54].mxu1 %v11909_v16  ;;  %4920 = vmatmul.mubr.f32.gmra.mrb[54].mxu0 %v11909_v16 }
 0x2f0   : > { %3335 = vmatprep.mubr.f32.mxu1 %v11604_v1  ;;  %4925 = vmatprep.mubr.f32.mxu0 %v11604_v1 }
 0x2f3   : > { %3339 = vmatmul.mubr.f32.gmra.mrb[56].mxu1 %v11910_v28  ;;  %4929 = vmatmul.mubr.f32.gmra.mrb[56].mxu0 %v11910_v28  ;;  %v7470_v28 = vmov 2  }
 0x2f4   : > { %3344 = vmatprep.mubr.f32.mxu1 %v11604_v1  ;;  %4934 = vmatprep.mubr.f32.mxu0 %v11604_v1 }
 0x2f7   : > { %3348 = vmatmul.mubr.f32.gmra.mrb[58].mxu1 %v11911_v22  ;;  %4938 = vmatmul.mubr.f32.gmra.mrb[58].mxu0 %v11911_v22  ;;  %v7471_v22 = vmov 3  }
 0x2f8   : > { %3353 = vmatprep.mubr.f32.mxu1 %v11604_v1  ;;  %4943 = vmatprep.mubr.f32.mxu0 %v11604_v1 }
 0x2fb   : > { %3357 = vmatmul.mubr.f32.gmra.mrb[60].mxu1 %v11912_v49  ;;  %4947 = vmatmul.mubr.f32.gmra.mrb[60].mxu0 %v11912_v49  ;;  %v11955_v49 = vld [vmem:[#allocation134_spill] sm:$0xff] }
 0x2fc   : > { %3362 = vmatprep.mubr.f32.mxu1 %v11604_v1  ;;  %4952 = vmatprep.mubr.f32.mxu0 %v11604_v1 }
 0x2ff   : > { %3366 = vmatmul.mubr.f32.gmra.mrb[62].mxu1 %v11913_v50  ;;  %4956 = vmatmul.mubr.f32.gmra.mrb[62].mxu0 %v11913_v50 }
 0x300   : > { %3532 = vmatprep.mubr.f32.mxu1 %v11604_v1  ;;  %5122 = vmatprep.mubr.f32.mxu0 %v11604_v1 }
 0x303   : > { %3534 = vmatmul.mubr.f32.vlgmr.msra.gmra.mrb[32].mxu1 %v11914_v35  ;;  %5124 = vmatmul.mubr.f32.vlgmr.msra.gmra.mrb[32].mxu0 %v11914_v35 }
 0x304   : > { %3539 = vmatprep.mubr.f32.mxu1 %v11604_v1  ;;  %5129 = vmatprep.mubr.f32.mxu0 %v11604_v1 }
 0x305   : > { %6327 = vmatpush1.bf16.msra.mxu1 %v11915_v27  ;;  %6519 = vmatpush1.bf16.msra.mxu0 %v11916_v10  ;;  %v11956_v10 = vmov 1  }
 0x306   : > { %6329 = vmatprep.subr.bf16.mxu1 %v11917_v5  ;;  %6521 = vmatprep.subr.bf16.mxu0 %v11919_v40  ;;  %v11957_v5 = vld [vmem:[#allocation21_spill] sm:$0xff]  ;;  %v11958_v40 = vld [vmem:[#allocation51_spill] sm:$0xff] }
 0x307   : > { %3541 = vmatmul.mubr.f32.gmra.mrb[34].mxu1 %v11918_v54  ;;  %5131 = vmatmul.mubr.f32.gmra.mrb[34].mxu0 %v11918_v54 }
 0x308   : > { %3546 = vmatprep.mubr.f32.mxu1 %v11604_v1  ;;  %5136 = vmatprep.mubr.f32.mxu0 %v11604_v1 }
 0x309   : > { %6331 = vmatpush1.bf16.msra.mxu1 %v11920_v57  ;;  %6523 = vmatpush1.bf16.msra.mxu0 %v11921_v14  ;;  %v11959_v14 = vmov 0  }
 0x30a   : > { %6333 = vmatprep.subr.bf16.mxu1 %v11922_v48  ;;  %6525 = vmatprep.subr.bf16.mxu0 %v11924_v30  ;;  %v11960_v48 = vld [vmem:[#allocation13_spill] sm:$0xff] }
 0x30b   : > { %3548 = vmatmul.mubr.f32.gmra.mrb[36].mxu1 %v11923_v12  ;;  %5138 = vmatmul.mubr.f32.gmra.mrb[36].mxu0 %v11923_v12 }
 0x30c   : > { %3553 = vmatprep.mubr.f32.mxu1 %v11604_v1  ;;  %5143 = vmatprep.mubr.f32.mxu0 %v11604_v1 }
 0x30d   : > { %6335 = vmatpush1.bf16.msra.mxu1 %v11925_v29  ;;  %6527 = vmatpush1.bf16.msra.mxu0 %v11926_v41 }
 0x30e   : > { %6337 = vmatprep.subr.bf16.mxu1 %v11927_v55  ;;  %6529 = vmatprep.subr.bf16.mxu0 %v11929_v17  ;;  %v11961_v55 = vld [vmem:[#allocation14_spill] sm:$0xff] }
 0x30f   : > { %3555 = vmatmul.mubr.f32.gmra.mrb[38].mxu1 %v11928_v36  ;;  %5145 = vmatmul.mubr.f32.gmra.mrb[38].mxu0 %v11928_v36 }
 0x310   : > { %3560 = vmatprep.mubr.f32.mxu1 %v11604_v1  ;;  %5150 = vmatprep.mubr.f32.mxu0 %v11604_v1 }
 0x311   : > { %6339 = vmatpush1.bf16.msra.mxu1 %v11930_v37  ;;  %6531 = vmatpush1.bf16.msra.mxu0 %v11931_v52  ;;  %v11962_v37 = vld [vmem:[#allocation57_spill] sm:$0xff] }
 0x312   : > { %6341 = vmatprep.subr.bf16.mxu1 %v11932_v59  ;;  %6533 = vmatprep.subr.bf16.mxu0 %v11934_v33 }
 0x313   : > { %3562 = vmatmul.mubr.f32.gmra.mrb[40].mxu1 %v11933_v63  ;;  %5152 = vmatmul.mubr.f32.gmra.mrb[40].mxu0 %v11933_v63 }
 0x314   : > { %3567 = vmatprep.mubr.f32.mxu1 %v11604_v1  ;;  %5157 = vmatprep.mubr.f32.mxu0 %v11604_v1 }
 0x315   : > { %6343 = vmatpush1.bf16.msra.mxu1 %v11935_v18  ;;  %6535 = vmatpush1.bf16.msra.mxu0 %v11936_v9 }
 0x316   : > { %6345 = vmatprep.subr.bf16.mxu1 %v11937_v61  ;;  %6537 = vmatprep.subr.bf16.mxu0 %v11939_v58 }
 0x317   : > { %3569 = vmatmul.mubr.f32.gmra.mrb[42].mxu1 %v11938_v20  ;;  %5159 = vmatmul.mubr.f32.gmra.mrb[42].mxu0 %v11938_v20 }
 0x318   : > { %3574 = vmatprep.mubr.f32.mxu1 %v11604_v1  ;;  %5164 = vmatprep.mubr.f32.mxu0 %v11604_v1 }
 0x319   : > { %6347 = vmatpush1.bf16.msra.mxu1 %v11940_v53  ;;  %6539 = vmatpush1.bf16.msra.mxu0 %v11941_v21 }
 0x31a   : > { %6349 = vmatprep.subr.bf16.mxu1 %v11942_v4  ;;  %6541 = vmatprep.subr.bf16.mxu0 %v11944_v11 }
 0x31b   : > { %3576 = vmatmul.mubr.f32.gmra.mrb[44].mxu1 %v11943_v62  ;;  %5166 = vmatmul.mubr.f32.gmra.mrb[44].mxu0 %v11943_v62 }
 0x31c   : > { %3581 = vmatprep.mubr.f32.mxu1 %v11604_v1  ;;  %5171 = vmatprep.mubr.f32.mxu0 %v11604_v1 }
 0x31d   : > { %6351 = vmatpush1.bf16.msra.mxu1 %v11945_v13  ;;  %6543 = vmatpush1.bf16.msra.mxu0 %v11946_v34 }
 0x31e   : > { %6353 = vmatprep.subr.bf16.mxu1 %v11947_v42  ;;  %6545 = vmatprep.subr.bf16.mxu0 %v11795_v45  ;;  %v11950_v45 = vld [vmem:[#allocation115_spill] sm:$0xff] }
 0x31f   : > { %3583 = vmatmul.mubr.f32.gmra.mrb[46].mxu1 %v11948_v23  ;;  %5173 = vmatmul.mubr.f32.gmra.mrb[46].mxu0 %v11948_v23 }
 0x320   : > { %3588 = vmatprep.mubr.f32.mxu1 %v11604_v1  ;;  %5178 = vmatprep.mubr.f32.mxu0 %v11604_v1 }
 0x321   : > { %6355 = vmatpush1.bf16.msra.mxu1 %v11796_v60  ;;  %6547 = vmatpush1.bf16.msra.mxu0 %v11804_v6  ;;  %v11951_v6 = vld [vmem:[#allocation117_spill] sm:$0xff] }
 0x323   : > { %3590 = vmatmul.mubr.f32.gmra.mrb[48].mxu1 %v11949_v24  ;;  %5180 = vmatmul.mubr.f32.gmra.mrb[48].mxu0 %v11949_v24  ;;  %v2061_v0 = vpop.xlane.xlu0 %2060 }
 0x324   : > { %3595 = vmatprep.mubr.f32.mxu1 %v11604_v1  ;;  %7268 = vrcp.f32 %v2061_v0  ;;  %5185 = vmatprep.mubr.f32.mxu0 %v11604_v1 }
 0x327   : > { %3597 = vmatmul.mubr.f32.gmra.mrb[50].mxu1 %v11950_v45  ;;  %5187 = vmatmul.mubr.f32.gmra.mrb[50].mxu0 %v11950_v45  ;;  %v2064_v60 = vpop.xlane.xlu1 %2063 }
 0x328   : > { %3602 = vmatprep.mubr.f32.mxu1 %v11604_v1  ;;  %5192 = vmatprep.mubr.f32.mxu0 %v11604_v1  ;;  %7270 = vrcp.f32 %v2064_v60 }
 0x32b   : > { %3604 = vmatmul.mubr.f32.gmra.mrb[52].mxu1 %v11951_v6  ;;  %5194 = vmatmul.mubr.f32.gmra.mrb[52].mxu0 %v11951_v6  ;;  %v2067_v38 = vpop.xlane.xlu0 %2066 }
 0x32c   : > { %3609 = vmatprep.mubr.f32.mxu1 %v11604_v1  ;;  %5199 = vmatprep.mubr.f32.mxu0 %v11604_v1  ;;  %7272 = vrcp.f32 %v2067_v38 }
 0x32e   : > { %v7269_v25 = vpop.eup %7268 }
 0x32f   : > { %3611 = vmatmul.mubr.f32.gmra.mrb[54].mxu1 %v11952_v39  ;;  %5201 = vmatmul.mubr.f32.gmra.mrb[54].mxu0 %v11952_v39  ;;  %v2123_v19 = vmul.f32 %v7269_v25, %v11953_v47  ;;  %v2070_v16 = vpop.xlane.xlu1 %2069 }
 0x330   : > { %3616 = vmatprep.mubr.f32.mxu1 %v11604_v1  ;;  %5206 = vmatprep.mubr.f32.mxu0 %v11604_v1  ;;  %7274 = vrcp.f32 %v2070_v16 }
 0x331   : > { %5446 = vperm.xlu0 %7172, %v2123_v19   ;;  %5541 = vperm.xlu1 %7173, %v2123_v19  }
 0x332   : > { %v7271_v50 = vpop.eup %7270 }
 0x333   : > { %3618 = vmatmul.mubr.f32.gmra.mrb[56].mxu1 %v11954_v26  ;;  %5208 = vmatmul.mubr.f32.gmra.mrb[56].mxu0 %v11954_v26  ;;  %v2073_v27 = vpop.xlane.xlu0 %2072  ;;  %v2124_v57 = vmul.f32 %v7271_v50, %v11958_v40 }
 0x334   : > { %3623 = vmatprep.mubr.f32.mxu1 %v11604_v1  ;;  %5213 = vmatprep.mubr.f32.mxu0 %v11604_v1  ;;  %7276 = vrcp.f32 %v2073_v27 }
 0x335   : > { %7174 = vset.pattern.permute.xlu0 %v7470_v28  ;;  %7175 = vset.pattern.permute.xlu1 %v7471_v22 }
 0x336   : > { %5637 = vperm.xlu0 %7174, %v2123_v19   ;;  %5733 = vperm.xlu1 %7175, %v2123_v19   ;;  %v7273_v30 = vpop.eup %7272 }
 0x337   : > { %3625 = vmatmul.mubr.f32.gmra.mrb[58].mxu1 %v11955_v49  ;;  %5215 = vmatmul.mubr.f32.gmra.mrb[58].mxu0 %v11955_v49  ;;  %v2076_v41 = vpop.xlane.xlu1 %2075  ;;  %v2125_v17 = vmul.f32 %v7273_v30, %v11961_v55 }
 0x338   : > { %3630 = vmatprep.mubr.f32.mxu1 %v11604_v1  ;;  %5220 = vmatprep.mubr.f32.mxu0 %v11604_v1  ;;  %7278 = vrcp.f32 %v2076_v41 }
 0x33a   : > { %7177 = vset.pattern.permute.xlu0 %v11956_v10  ;;  %7176 = vset.pattern.permute.xlu1 %v11959_v14  ;;  %v7275_v29 = vpop.eup %7274 }
 0x33b   : > { %3632 = vmatmul.mubr.f32.gmra.mrb[60].mxu1 %v11957_v5  ;;  %5222 = vmatmul.mubr.f32.gmra.mrb[60].mxu0 %v11957_v5  ;;  %v10296_v52 = vmul.f32 %v7275_v29, %v11962_v37 }
 0x33c   : > { %5545 = vperm.xlu0 %7177, %v2124_v57   ;;  %5451 = vperm.xlu1 %7176, %v2124_v57  }
 0x33d   : > { %3637 = vmatprep.mubr.f32.mxu1 %v11604_v1  ;;  %5227 = vmatprep.mubr.f32.mxu0 %v11604_v1 }
 0x33e   : > { %v7277_v59 = vpop.eup %7276 }
 0x33f   : > { %3639 = vmatmul.mubr.f32.gmra.mrb[62].mxu1 %v11960_v48  ;;  %5229 = vmatmul.mubr.f32.gmra.mrb[62].mxu0 %v11960_v48  ;;  %v10308_v33 = vmul.f32 %v7277_v59, %v9914_v8  ;;  %v2244_v59 = vlaneseq }
 0x340   : > { %3741 = vmatprep.mubr.f32.mxu1 %v11604_v1  ;;  %7179 = vset.pattern.permute.xlu0 %v7471_v22 }
 0x341   : > { %7178 = vset.pattern.permute.xlu1 %v7470_v28  ;;  %5737 = vperm.xlu0 %7179, %v2124_v57  }
 0x342   : > { %5641 = vperm.xlu1 %7178, %v2124_v57   ;;  %5331 = vmatprep.mubr.f32.mxu0 %v11604_v1  ;;  %v7279_v8 = vpop.eup %7278 }
 0x343   : > { %3743 = vmatmul.mubr.f32.vlgmr.msra.gmra.mrb[32].mxu1 %v11914_v35  ;;  %5333 = vmatmul.mubr.f32.vlgmr.msra.gmra.mrb[32].mxu0 %v11914_v35  ;;  %v2079_v35 = vpop.xlane.xlu0 %2078 }
 0x344   : > { %3748 = vmatprep.mubr.f32.mxu1 %v11604_v1  ;;  %5338 = vmatprep.mubr.f32.mxu0 %v11604_v1  ;;  %7280 = vrcp.f32 %v2079_v35 }
 0x345   : > { %7186 = vset.pattern.permute.xlu0 %v7470_v28 }
 0x346   : > { %7180 = vset.pattern.permute.xlu1 %v11959_v14  ;;  %5649 = vperm.xlu0 %7186, %v10296_v52  }
 0x347   : > { %5456 = vperm.xlu1 %7180, %v2125_v17   ;;  %3750 = vmatmul.mubr.f32.gmra.mrb[34].mxu1 %v11918_v54 }
 0x348   : > { %5340 = vmatmul.mubr.f32.gmra.mrb[34].mxu0 %v11918_v54  ;;  %3755 = vmatprep.mubr.f32.mxu1 %v11604_v1  ;;  %v2082_v54 = vpop.xlane.xlu1 %2081 }
 0x349   : > { %5345 = vmatprep.mubr.f32.mxu0 %v11604_v1  ;;  %7282 = vrcp.f32 %v2082_v54 }
 0x34a   : > { %7189 = vset.pattern.permute.xlu0 %v11956_v10 }
 0x34b   : > { %7181 = vset.pattern.permute.xlu1 %v11956_v10  ;;  %3757 = vmatmul.mubr.f32.gmra.mrb[36].mxu1 %v11923_v12 }
 0x34c   : > { %5347 = vmatmul.mubr.f32.gmra.mrb[36].mxu0 %v11923_v12  ;;  %5549 = vperm.xlu1 %7181, %v2125_v17   ;;  %v10325_v12 = vmul.f32 %v7279_v8, %v9924_v32  ;;  %v2085_v32 = vpop.xlane.xlu0 %2084  ;;  %v2088_v18 = vpop.xlane.xlu1 %2087  ;;  %v2245_v8 = vshrl.u32 %v2244_v59, 7 }
 0x34d   : > { %5557 = vperm.xlu0 %7189, %v10308_v33   ;;  %3762 = vmatprep.mubr.f32.mxu1 %v11604_v1  ;;  %7284 = vrcp.f32 %v2085_v32  ;;  %v2242_v32 = vld [vmem:[%s10771_s5] sm:$0xf] }
 0x34e   : > { %5352 = vmatprep.mubr.f32.mxu0 %v11604_v1  ;;  %7286 = vrcp.f32 %v2088_v18  ;;  %v2258_v18 = vsub.s32 3, %v2245_v8 }
 0x34f   : > { %3764 = vmatmul.mubr.f32.gmra.mrb[38].mxu1 %v11928_v36 }
 0x350   : > { %5354 = vmatmul.mubr.f32.gmra.mrb[38].mxu0 %v11928_v36  ;;  %7182 = vset.pattern.permute.xlu1 %v7470_v28  ;;  %v7281_v36 = vpop.eup %7280  ;;  %v2094_v53 = vpop.xlane.xlu1 %2093 }
 0x351   : > { %7191 = vset.pattern.permute.xlu0 %v7471_v22  ;;  %5645 = vperm.xlu1 %7182, %v2125_v17  }
 0x352   : > { %5749 = vperm.xlu0 %7191, %v10308_v33   ;;  %3769 = vmatprep.mubr.f32.mxu1 %v11604_v1 }
 0x353   : > { %5359 = vmatprep.mubr.f32.mxu0 %v11604_v1  ;;  %3771 = vmatmul.mubr.f32.gmra.mrb[40].mxu1 %v11933_v63 }
 0x354   : > { %5361 = vmatmul.mubr.f32.gmra.mrb[40].mxu0 %v11933_v63  ;;  %3776 = vmatprep.mubr.f32.mxu1 %v11604_v1  ;;  %v10337_v63 = vmul.f32 %v7281_v36, %v9933_v15  ;;  %v7283_v15 = vpop.eup %7282  ;;  %v2246_v36 = vsub.s32 0, %v2245_v8 }
 0x355   : > { %5366 = vmatprep.mubr.f32.mxu0 %v11604_v1  ;;  %7183 = vset.pattern.permute.xlu1 %v7471_v22  ;;  %v10358_v9 = vmul.f32 %v7283_v15, %v9942_v31  ;;  %v2250_v15 = vsub.s32 1, %v2245_v8 }
 0x356   : > { %7194 = vset.pattern.permute.xlu0 %v7470_v28  ;;  %5741 = vperm.xlu1 %7183, %v2125_v17  }
 0x357   : > { %5657 = vperm.xlu0 %7194, %v10325_v12   ;;  %3778 = vmatmul.mubr.f32.gmra.mrb[42].mxu1 %v11938_v20  ;;  %v7285_v61 = vpop.eup %7284 }
 0x358   : > { %5368 = vmatmul.mubr.f32.gmra.mrb[42].mxu0 %v11938_v20  ;;  %3783 = vmatprep.mubr.f32.mxu1 %v11604_v1  ;;  %v10369_v31 = vmul.f32 %v7285_v61, %v9953_v56  ;;  %v2091_v56 = vpop.xlane.xlu0 %2090  ;;  %v7287_v20 = vpop.eup %7286 }
 0x359   : > { %5373 = vmatprep.mubr.f32.mxu0 %v11604_v1  ;;  %7288 = vrcp.f32 %v2091_v56  ;;  %v10392_v58 = vmul.f32 %v7287_v20, %v9962_v43  ;;  %v10555_v20 = vrot.slane %v2242_v32, %v2250_v15 }
 0x35a   : > { %7184 = vset.pattern.permute.xlu1 %v11959_v14  ;;  %7290 = vrcp.f32 %v2094_v53  ;;  %v10557_v53 = vrot.slane %v2242_v32, %v2258_v18 }
 0x35b   : > { %7197 = vset.pattern.permute.xlu0 %v11956_v10  ;;  %5461 = vperm.xlu1 %7184, %v10296_v52  }
 0x35c   : > { %5565 = vperm.xlu0 %7197, %v10337_v63   ;;  %3785 = vmatmul.mubr.f32.gmra.mrb[44].mxu1 %v11943_v62  ;;  %v2097_v4 = vpop.xlane.xlu0 %2096 }
 0x35d   : > { %5375 = vmatmul.mubr.f32.gmra.mrb[44].mxu0 %v11943_v62  ;;  %3790 = vmatprep.mubr.f32.mxu1 %v11604_v1  ;;  %7292 = vrcp.f32 %v2097_v4  ;;  %v2100_v62 = vpop.xlane.xlu1 %2099 }
 0x35e   : > { %5380 = vmatprep.mubr.f32.mxu0 %v11604_v1  ;;  %7294 = vrcp.f32 %v2100_v62 }
 0x35f   : > { %7185 = vset.pattern.permute.xlu1 %v11956_v10 }
 0x360   : > { %7199 = vset.pattern.permute.xlu0 %v7471_v22  ;;  %3792 = vmatmul.mubr.f32.gmra.mrb[46].mxu1 %v11948_v23  ;;  %v2103_v13 = vpop.xlane.xlu0 %2102 }
 0x361   : > { %5382 = vmatmul.mubr.f32.gmra.mrb[46].mxu0 %v11948_v23  ;;  %5553 = vperm.xlu1 %7185, %v10296_v52   ;;  %7296 = vrcp.f32 %v2103_v13  ;;  %v2106_v42 = vpop.xlane.xlu1 %2105 }
 0x362   : > { %5757 = vperm.xlu0 %7199, %v10337_v63   ;;  %3797 = vmatprep.mubr.f32.mxu1 %v11604_v1  ;;  %7298 = vrcp.f32 %v2106_v42 }
 0x363   : > { %5387 = vmatprep.mubr.f32.mxu0 %v11604_v1  ;;  %v7289_v43 = vpop.eup %7288 }
 0x364   : > { %3799 = vmatmul.mubr.f32.gmra.mrb[48].mxu1 %v11949_v24  ;;  %v10411_v21 = vmul.f32 %v7289_v43, %v9971_v7  ;;  %v7291_v7 = vpop.eup %7290 }
 0x365   : > { %5389 = vmatmul.mubr.f32.gmra.mrb[48].mxu0 %v11949_v24  ;;  %7187 = vset.pattern.permute.xlu1 %v7471_v22 }
 0x366   : > { %7202 = vset.pattern.permute.xlu0 %v7470_v28  ;;  %5745 = vperm.xlu1 %7187, %v10296_v52  }
 0x367   : > { %5665 = vperm.xlu0 %7202, %v10358_v9   ;;  %3804 = vmatprep.mubr.f32.mxu1 %v11604_v1  ;;  %v7293_v11 = vpop.eup %7292 }
 0x368   : > { %5394 = vmatprep.mubr.f32.mxu0 %v11604_v1  ;;  %3806 = vmatmul.mubr.f32.gmra.mrb[50].mxu1 %v11950_v45  ;;  %v7295_v34 = vpop.eup %7294 }
 0x369   : > { %5396 = vmatmul.mubr.f32.gmra.mrb[50].mxu0 %v11950_v45  ;;  %3811 = vmatprep.mubr.f32.mxu1 %v11604_v1 }
 0x36a   : > { %5401 = vmatprep.mubr.f32.mxu0 %v11604_v1  ;;  %7188 = vset.pattern.permute.xlu1 %v11959_v14 }
 0x36b   : > { %7205 = vset.pattern.permute.xlu0 %v11956_v10  ;;  %5466 = vperm.xlu1 %7188, %v10308_v33   ;;  %v7297_v23 = vpop.eup %7296 }
 0x36c   : > { %5573 = vperm.xlu0 %7205, %v10369_v31   ;;  %3813 = vmatmul.mubr.f32.gmra.mrb[52].mxu1 %v11951_v6  ;;  %v2137_v24 = vmul.f32 %v7297_v23, %v10041_v3 }
 0x36d   : > { %5403 = vmatmul.mubr.f32.gmra.mrb[52].mxu0 %v11951_v6  ;;  %3818 = vmatprep.mubr.f32.mxu1 %v11604_v1 }
 0x36e   : > { %5408 = vmatprep.mubr.f32.mxu0 %v11604_v1 }
 0x36f   : > { %7190 = vset.pattern.permute.xlu1 %v7470_v28 }
 0x370   : > { %7207 = vset.pattern.permute.xlu0 %v7471_v22  ;;  %5653 = vperm.xlu1 %7190, %v10308_v33  }
 0x371   : > { %5765 = vperm.xlu0 %7207, %v10369_v31   ;;  %3820 = vmatmul.mubr.f32.gmra.mrb[54].mxu1 %v11952_v39 }
 0x372   : > { %5410 = vmatmul.mubr.f32.gmra.mrb[54].mxu0 %v11952_v39  ;;  %3825 = vmatprep.mubr.f32.mxu1 %v11604_v1 }
 0x373   : > { %5415 = vmatprep.mubr.f32.mxu0 %v11604_v1 }
 0x374   : > { %7192 = vset.pattern.permute.xlu1 %v11959_v14 }
 0x375   : > { %7208 = vset.pattern.permute.xlu0 %v11959_v14  ;;  %3827 = vmatmul.mubr.f32.gmra.mrb[56].mxu1 %v11954_v26 }
 0x376   : > { %5417 = vmatmul.mubr.f32.gmra.mrb[56].mxu0 %v11954_v26  ;;  %5471 = vperm.xlu1 %7192, %v10325_v12  }
 0x377   : > { %5491 = vperm.xlu0 %7208, %v10392_v58   ;;  %3832 = vmatprep.mubr.f32.mxu1 %v11604_v1 }
 0x378   : > { %5422 = vmatprep.mubr.f32.mxu0 %v11604_v1 }
 0x379   : > { %3834 = vmatmul.mubr.f32.gmra.mrb[58].mxu1 %v11955_v49 }
 0x37a   : > { %5424 = vmatmul.mubr.f32.gmra.mrb[58].mxu0 %v11955_v49  ;;  %7193 = vset.pattern.permute.xlu1 %v11956_v10 }
 0x37b   : > { %7210 = vset.pattern.permute.xlu0 %v7470_v28  ;;  %5561 = vperm.xlu1 %7193, %v10325_v12  }
 0x37c   : > { %5673 = vperm.xlu0 %7210, %v10392_v58   ;;  %3839 = vmatprep.mubr.f32.mxu1 %v11604_v1 }
 0x37d   : > { %5429 = vmatprep.mubr.f32.mxu0 %v11604_v1  ;;  %3841 = vmatmul.mubr.f32.gmra.mrb[60].mxu1 %v11957_v5 }
 0x37e   : > { %5431 = vmatmul.mubr.f32.gmra.mrb[60].mxu0 %v11957_v5  ;;  %3846 = vmatprep.mubr.f32.mxu1 %v11604_v1 }
 0x37f   : > { %5436 = vmatprep.mubr.f32.mxu0 %v11604_v1  ;;  %7195 = vset.pattern.permute.xlu1 %v7471_v22  ;;  %v10426_v1 = vmul.f32 %v7291_v7, %v9980_v46  ;;  %v2135_v46 = vmul.f32 %v7293_v11, %v10001_v2  ;;  %v2136_v2 = vmul.f32 %v7295_v34, %v10021_v51  ;;  %v7299_v51 = vpop.eup %7298 }
 0x380   : > { %7213 = vset.pattern.permute.xlu0 %v11956_v10  ;;  %5753 = vperm.xlu1 %7195, %v10325_v12   ;;  %v2138_v0 = vmul.f32 %v7299_v51, %v10061_v44 }
 0x381   : > { %5581 = vperm.xlu0 %7213, %v10411_v21   ;;  %3848 = vmatmul.mubr.f32.gmra.mrb[62].mxu1 %v11960_v48 }
 0x382   : > { %5438 = vmatmul.mubr.f32.gmra.mrb[62].mxu0 %v11960_v48 }
 0x384   : > { %7196 = vset.pattern.permute.xlu1 %v11959_v14 }
 0x385   : > { %7215 = vset.pattern.permute.xlu0 %v7471_v22  ;;  %5476 = vperm.xlu1 %7196, %v10337_v63  }
 0x386   : > { %5773 = vperm.xlu0 %7215, %v10411_v21  }
 0x389   : > { %7198 = vset.pattern.permute.xlu1 %v7470_v28 }
 0x38a   : > { %7216 = vset.pattern.permute.xlu0 %v11959_v14  ;;  %5661 = vperm.xlu1 %7198, %v10337_v63   ;;  %v2254_v63 = vsub.s32 2, %v2245_v8 }
 0x38b   : > { %5501 = vperm.xlu0 %7216, %v10426_v1  }
 0x38c   : > { %v10553_v56 = vrot.slane %v2242_v32, %v2254_v63 }
 0x38e   : > { %7200 = vset.pattern.permute.xlu1 %v11959_v14 }
 0x38f   : > { %7218 = vset.pattern.permute.xlu0 %v7470_v28  ;;  %5481 = vperm.xlu1 %7200, %v10358_v9  }
 0x390   : > { %5681 = vperm.xlu0 %7218, %v10426_v1  }
 0x393   : > { %7201 = vset.pattern.permute.xlu1 %v11956_v10 }
 0x394   : > { %7221 = vset.pattern.permute.xlu0 %v11956_v10  ;;  %5569 = vperm.xlu1 %7201, %v10358_v9  }
 0x395   : > { %5589 = vperm.xlu0 %7221, %v2135_v46  }
 0x398   : > { %7203 = vset.pattern.permute.xlu1 %v7471_v22 }
 0x399   : > { %7223 = vset.pattern.permute.xlu0 %v7471_v22  ;;  %5761 = vperm.xlu1 %7203, %v10358_v9   ;;  %v10547_v9 = vrot.slane %v2242_v32, %v2246_v36 }
 0x39a   : > { %5781 = vperm.xlu0 %7223, %v2135_v46  }
 0x39d   : > { %7204 = vset.pattern.permute.xlu1 %v11959_v14 }
 0x39e   : > { %7224 = vset.pattern.permute.xlu0 %v11959_v14  ;;  %5486 = vperm.xlu1 %7204, %v10369_v31  }
 0x39f   : > { %5511 = vperm.xlu0 %7224, %v2136_v2  }
 0x3a2   : > { %7206 = vset.pattern.permute.xlu1 %v7470_v28 }
 0x3a3   : > { %7226 = vset.pattern.permute.xlu0 %v7470_v28  ;;  %5669 = vperm.xlu1 %7206, %v10369_v31  }
 0x3a4   : > { %5689 = vperm.xlu0 %7226, %v2136_v2  }
 0x3a7   : > { %7209 = vset.pattern.permute.xlu1 %v11956_v10 }
 0x3a8   : > { %7229 = vset.pattern.permute.xlu0 %v11956_v10  ;;  %5577 = vperm.xlu1 %7209, %v10392_v58  }
 0x3a9   : > { %5597 = vperm.xlu0 %7229, %v2137_v24  }
 0x3ac   : > { %7211 = vset.pattern.permute.xlu1 %v7471_v22 }
 0x3ad   : > { %7231 = vset.pattern.permute.xlu0 %v11959_v14  ;;  %5769 = vperm.xlu1 %7211, %v10392_v58  }
 0x3ae   : > { %5521 = vperm.xlu0 %7231, %v2138_v0  }
 0x3b0   : > { %v10458_v45 = vpop.permute.xlu1 %5541  ;;  %v10468_v44 = vpop.permute.xlu0 %5446 }
 0x3b1   : > { %7212 = vset.pattern.permute.xlu1 %v11959_v14 }
 0x3b2   : > { %7233 = vset.pattern.permute.xlu0 %v7470_v28  ;;  %5496 = vperm.xlu1 %7212, %v10411_v21  }
 0x3b3   : > { %5697 = vperm.xlu0 %7233, %v2138_v0  }
 0x3b5   : > { %v10465_v3 = vpop.permute.xlu1 %5733  ;;  %v10474_v6 = vpop.permute.xlu0 %5637 }
 0x3b6   : > { %7214 = vset.pattern.permute.xlu1 %v7470_v28 }
 0x3b7   : > { %7234 = vset.pattern.permute.xlu0 %v7471_v22  ;;  %5677 = vperm.xlu1 %7214, %v10411_v21  }
 0x3b8   : > { %5789 = vperm.xlu0 %7234, %v2137_v24  }
 0x3bb   : > { %7217 = vset.pattern.permute.xlu1 %v11956_v10  ;;  %v10471_v60 = vpop.permute.xlu1 %5451  ;;  %v10480_v39 = vpop.permute.xlu0 %5545 }
 0x3bc   : > { %5585 = vperm.xlu1 %7217, %v10426_v1  }
 0x3c0   : > { %7219 = vset.pattern.permute.xlu1 %v7471_v22  ;;  %v10486_v19 = vpop.permute.xlu0 %5737 }
 0x3c1   : > { %v10477_v25 = vpop.permute.xlu1 %5641  ;;  %5777 = vperm.xlu1 %7219, %v10426_v1  }
 0x3c5   : > { %7220 = vset.pattern.permute.xlu1 %v11959_v14  ;;  %v10493_v16 = vpop.permute.xlu0 %5649 }
 0x3c6   : > { %v10483_v47 = vpop.permute.xlu1 %5456  ;;  %5506 = vperm.xlu1 %7220, %v2135_v46  }
 0x3ca   : > { %7222 = vset.pattern.permute.xlu1 %v7470_v28 }
 0x3cb   : > { %5685 = vperm.xlu1 %7222, %v2135_v46   ;;  %v10488_v26 = vpop.permute.xlu1 %5549 }
 0x3cc   : > { %v10498_v50 = vpop.permute.xlu0 %5557 }
 0x3cf   : > { %7225 = vset.pattern.permute.xlu1 %v11956_v10 }
 0x3d0   : > { %5593 = vperm.xlu1 %7225, %v2136_v2   ;;  %v10491_v38 = vpop.permute.xlu1 %5645 }
 0x3d1   : > { %v10503_v5 = vpop.permute.xlu0 %5749 }
 0x3d4   : > { %7227 = vset.pattern.permute.xlu1 %v7471_v22 }
 0x3d5   : > { %5785 = vperm.xlu1 %7227, %v2136_v2   ;;  %v10496_v49 = vpop.permute.xlu1 %5741 }
 0x3d6   : > { %v10508_v57 = vpop.permute.xlu0 %5657 }
 0x3d9   : > { %7228 = vset.pattern.permute.xlu1 %v11959_v14 }
 0x3da   : > { %5516 = vperm.xlu1 %7228, %v2137_v24   ;;  %v10501_v27 = vpop.permute.xlu1 %5461 }
 0x3db   : > { %v10514_v14 = vpop.permute.xlu0 %5565 }
 0x3de   : > { %7230 = vset.pattern.permute.xlu1 %v7470_v28 }
 0x3df   : > { %5693 = vperm.xlu1 %7230, %v2137_v24  }
 0x3e0   : > { %v10506_v40 = vpop.permute.xlu1 %5553 }
 0x3e1   : > { %v10518_v29 = vpop.permute.xlu0 %5757 }
 0x3e3   : > { %7232 = vset.pattern.permute.xlu1 %v11956_v10 }
 0x3e4   : > { %5601 = vperm.xlu1 %7232, %v2138_v0  }
 0x3e5   : > { %v10511_v48 = vpop.permute.xlu1 %5745 }
 0x3e6   : > { %v10522_v41 = vpop.permute.xlu0 %5665 }
 0x3e8   : > { %7235 = vset.pattern.permute.xlu1 %v7471_v22 }
 0x3e9   : > { %5793 = vperm.xlu1 %7235, %v2138_v0  }
 0x3ea   : > { %v10516_v30 = vpop.permute.xlu1 %5466 }
 0x3eb   : > { %v10528_v10 = vpop.permute.xlu0 %5573 }
 0x3ef   : > { %v10520_v28 = vpop.permute.xlu1 %5653 }
 0x3f0   : > { %v10532_v22 = vpop.permute.xlu0 %5765 }
 0x3f5   : > { %v10524_v55 = vpop.permute.xlu1 %5471 }
 0x3f6   : > { %v10536_v35 = vpop.permute.xlu0 %5491 }
 0x3fa   : > { %v10526_v17 = vpop.permute.xlu1 %5561 }
 0x3fb   : > { %v10540_v54 = vpop.permute.xlu0 %5673 }
 0x3ff   : > { %v10530_v37 = vpop.permute.xlu1 %5753 }
 0x400   : > { %v10549_v61 = vpop.permute.xlu0 %5581 }
 0x404   : > { %v10534_v52 = vpop.permute.xlu1 %5476 }
 0x405   : > { %v10565_v13 = vpop.permute.xlu0 %5773 }
 0x409   : > { %v10538_v33 = vpop.permute.xlu1 %5661 }
 0x40e   : > { %v10542_v12 = vpop.permute.xlu1 %5481 }
 0x413   : > { %v10551_v31 = vpop.permute.xlu1 %5569 }
 0x416   : > { %v3744_v58 = vpop.f32.mrb[32].mxu1  ;;  %v5334_v21 = vpop.f32.mrb[32].mxu0 }
 0x417   : > { %v6580_v43 = vadd.f32 %v3744_v58, %v10547_v9  ;;  %v3746_v4 = vpop.f32.mrb[33].mxu1  ;;  %v6612_v7 = vadd.f32 %v5334_v21, %v10553_v56  ;;  %v5336_v62 = vpop.f32.mrb[33].mxu0 }
 0x418   : > { %v6581_v1 = vadd.f32 %v3746_v4, %v10555_v20  ;;  %v10562_v11 = vpop.permute.xlu1 %5761  ;;  %v6613_v42 = vadd.f32 %v5336_v62, %v10557_v53 }
 0x419   : > { %v5524_v46 = vmul.f32 %v6580_v43, %v10468_v44  ;;  %v5700_v24 = vmul.f32 %v6612_v7, %v10474_v6 }
 0x41a   : > { %v5604_v34 = vmul.f32 %v6581_v1, %v10458_v45  ;;  %v3751_v2 = vpop.f32.mrb[34].mxu1  ;;  %v5796_v63 = vmul.f32 %v6613_v42, %v10465_v3 }
 0x41b   : > { %v5341_v23 = vpop.f32.mrb[34].mxu0  ;;  %v6582_v0 = vadd.f32 %v3751_v2, %v10547_v9  ;;  %v3753_v59 = vpop.f32.mrb[35].mxu1 }
 0x41c   : > { %v5620_v51 = vadd.f32 %v5604_v34, %v5524_v46  ;;  %v5343_v8 = vpop.f32.mrb[35].mxu0  ;;  %v6614_v36 = vadd.f32 %v5341_v23, %v10553_v56  ;;  %v6583_v32 = vadd.f32 %v3753_v59, %v10555_v20  ;;  %v10583_v34 = vpop.permute.xlu0 %5501 }
 0x41d   : > { %v5525_v45 = vmul.f32 %v6582_v0, %v10471_v60  ;;  %v10575_v15 = vpop.permute.xlu1 %5486  ;;  %v6615_v6 = vadd.f32 %v5343_v8, %v10557_v53 }
 0x41e   : > { %v5716_v44 = vadd.f32 %v5700_v24, %v5620_v51  ;;  %v5605_v18 = vmul.f32 %v6583_v32, %v10480_v39  ;;  %v3758_v58 = vpop.f32.mrb[36].mxu1  ;;  %v5701_v3 = vmul.f32 %v6614_v36, %v10477_v25 }
 0x41f   : > { %v5348_v43 = vpop.f32.mrb[36].mxu0  ;;  %v6584_v4 = vadd.f32 %v3758_v58, %v10547_v9  ;;  %v3760_v1 = vpop.f32.mrb[37].mxu1  ;;  %v5797_v2 = vmul.f32 %v6615_v6, %v10486_v19 }
 0x420   : > { %v5812_v21 = vadd.f32 %v5796_v63, %v5716_v44  ;;  %v6616_v7 = vadd.f32 %v5348_v43, %v10553_v56  ;;  %v5350_v62 = vpop.f32.mrb[37].mxu0  ;;  %v5621_v46 = vadd.f32 %v5605_v18, %v5525_v45  ;;  %v6585_v60 = vadd.f32 %v3760_v1, %v10555_v20  ;;  %v10604_v43 = vpop.permute.xlu0 %5681 }
 0x421   : > { %v5526_v39 = vmul.f32 %v6584_v4, %v10483_v47  ;;  %v6617_v25 = vadd.f32 %v5350_v62, %v10557_v53 }
 0x422   : > { %5828 = vst [vmem:[%s10587_s15] sm:$0xff] %v5812_v21  ;;  %v5717_v42 = vadd.f32 %v5701_v3, %v5621_v46  ;;  %v5606_v23 = vmul.f32 %v6585_v60, %v10488_v26  ;;  %v10594_v24 = vpop.permute.xlu1 %5669  ;;  %v5702_v51 = vmul.f32 %v6616_v7, %v10491_v38  ;;  %v3765_v0 = vpop.f32.mrb[38].mxu1 }
 0x423   : > { %v5355_v59 = vpop.f32.mrb[38].mxu0  ;;  %v6586_v32 = vadd.f32 %v3765_v0, %v10547_v9  ;;  %v3767_v44 = vpop.f32.mrb[39].mxu1  ;;  %v5798_v45 = vmul.f32 %v6617_v25, %v10496_v49 }
 0x424   : > { %v5813_v8 = vadd.f32 %v5797_v2, %v5717_v42  ;;  %v5622_v36 = vadd.f32 %v5606_v23, %v5526_v39  ;;  %v6618_v47 = vadd.f32 %v5355_v59, %v10553_v56  ;;  %v5357_v63 = vpop.f32.mrb[39].mxu0  ;;  %v6587_v19 = vadd.f32 %v3767_v44, %v10555_v20 }
 0x425   : > { %v5527_v18 = vmul.f32 %v6586_v32, %v10501_v27  ;;  %v6619_v38 = vadd.f32 %v5357_v63, %v10557_v53  ;;  %v10625_v63 = vpop.permute.xlu0 %5589 }
 0x426   : > { %5829 = vst [vmem:[%s10587_s15 + $0x8] sm:$0xff] %v5813_v8  ;;  %v5718_v26 = vadd.f32 %v5702_v51, %v5622_v36  ;;  %v3772_v6 = vpop.f32.mrb[40].mxu1  ;;  %v5607_v21 = vmul.f32 %v6587_v19, %v10506_v40  ;;  %v5703_v62 = vmul.f32 %v6618_v47, %v10493_v16 }
 0x427   : > { %v5362_v58 = vpop.f32.mrb[40].mxu0  ;;  %v10607_v4 = vpop.permute.xlu1 %5577  ;;  %v6588_v7 = vadd.f32 %v3772_v6, %v10547_v9  ;;  %v5799_v42 = vmul.f32 %v6619_v38, %v10511_v48 }
 0x428   : > { %v5814_v1 = vadd.f32 %v5798_v45, %v5718_v26  ;;  %v3774_v3 = vpop.f32.mrb[41].mxu1  ;;  %v5364_v49 = vpop.f32.mrb[41].mxu0  ;;  %v5623_v46 = vadd.f32 %v5607_v21, %v5527_v18  ;;  %v6620_v60 = vadd.f32 %v5362_v58, %v10553_v56 }
 0x429   : > { %v5528_v27 = vmul.f32 %v6588_v7, %v10516_v30  ;;  %v6589_v39 = vadd.f32 %v3774_v3, %v10555_v20  ;;  %v6621_v16 = vadd.f32 %v5364_v49, %v10557_v53 }
 0x42a   : > { %5830 = vst [vmem:[%s10587_s15 + $0x10] sm:$0xff] %v5814_v1  ;;  %v3779_v40 = vpop.f32.mrb[42].mxu1  ;;  %v5719_v23 = vadd.f32 %v5703_v62, %v5623_v46  ;;  %v5704_v48 = vmul.f32 %v6620_v60, %v10520_v28 }
 0x42b   : > { %v5369_v2 = vpop.f32.mrb[42].mxu0  ;;  %v5608_v25 = vmul.f32 %v6589_v39, %v10498_v50  ;;  %v6590_v51 = vadd.f32 %v3779_v40, %v10547_v9  ;;  %v3781_v0 = vpop.f32.mrb[43].mxu1  ;;  %v5800_v45 = vmul.f32 %v6621_v16, %v10503_v5 }
 0x42c   : > { %v5371_v59 = vpop.f32.mrb[43].mxu0  ;;  %v10619_v30 = vpop.permute.xlu1 %5769  ;;  %v6622_v8 = vadd.f32 %v5369_v2, %v10553_v56  ;;  %v6591_v36 = vadd.f32 %v3781_v0, %v10555_v20  ;;  %v5815_v32 = vadd.f32 %v5799_v42, %v5719_v23 }
 0x42d   : > { %v5624_v47 = vadd.f32 %v5608_v25, %v5528_v27  ;;  %v5529_v44 = vmul.f32 %v6590_v51, %v10524_v55  ;;  %v6623_v19 = vadd.f32 %v5371_v59, %v10557_v53 }
 0x42e   : > { %v5609_v50 = vmul.f32 %v6591_v36, %v10526_v17  ;;  %5831 = vst [vmem:[%s10587_s15 + $0x18] sm:$0xff] %v5815_v32  ;;  %v5705_v6 = vmul.f32 %v6622_v8, %v10508_v57 }
 0x42f   : > { %v5720_v26 = vadd.f32 %v5704_v48, %v5624_v47  ;;  %v3786_v18 = vpop.f32.mrb[44].mxu1  ;;  %v5801_v49 = vmul.f32 %v6623_v19, %v10530_v37 }
 0x430   : > { %v5376_v38 = vpop.f32.mrb[44].mxu0  ;;  %v5625_v58 = vadd.f32 %v5609_v50, %v5529_v44  ;;  %v6592_v28 = vadd.f32 %v3786_v18, %v10547_v9  ;;  %v3788_v21 = vpop.f32.mrb[45].mxu1 }
 0x431   : > { %v5378_v55 = vpop.f32.mrb[45].mxu0  ;;  %v5816_v7 = vadd.f32 %v5800_v45, %v5720_v26  ;;  %v6624_v1 = vadd.f32 %v5376_v38, %v10553_v56  ;;  %v10634_v17 = vpop.permute.xlu1 %5496  ;;  %v6593_v62 = vadd.f32 %v3788_v21, %v10555_v20 }
 0x432   : > { %v5721_v3 = vadd.f32 %v5705_v6, %v5625_v58  ;;  %v5530_v5 = vmul.f32 %v6592_v28, %v10534_v52  ;;  %v6625_v46 = vadd.f32 %v5378_v55, %v10557_v53  ;;  %v10646_v52 = vpop.permute.xlu0 %5781 }
 0x433   : > { %5832 = vst [vmem:[%s10587_s15 + $0x20] sm:$0xff] %v5816_v7  ;;  %v5610_v57 = vmul.f32 %v6593_v62, %v10514_v14  ;;  %v3793_v27 = vpop.f32.mrb[46].mxu1  ;;  %v5706_v23 = vmul.f32 %v6624_v1, %v10538_v33 }
 0x434   : > { %v5383_v60 = vpop.f32.mrb[46].mxu0  ;;  %v5817_v39 = vadd.f32 %v5801_v49, %v5721_v3  ;;  %v6594_v42 = vadd.f32 %v3793_v27, %v10547_v9  ;;  %v3795_v40 = vpop.f32.mrb[47].mxu1  ;;  %v5802_v59 = vmul.f32 %v6625_v46, %v10518_v29 }
 0x435   : > { %v5385_v2 = vpop.f32.mrb[47].mxu0  ;;  %v5626_v25 = vadd.f32 %v5610_v57, %v5530_v5  ;;  %v6626_v37 = vadd.f32 %v5383_v60, %v10553_v56  ;;  %v6595_v16 = vadd.f32 %v3795_v40, %v10555_v20 }
 0x436   : > { %5833 = vst [vmem:[%s10587_s15 + $0x28] sm:$0xff] %v5817_v39  ;;  %v5531_v14 = vmul.f32 %v6594_v42, %v10542_v12  ;;  %v5678_v51 = vpop.permute.xlu1 %5677  ;;  %v6627_v36 = vadd.f32 %v5385_v2, %v10557_v53  ;;  %v10664_v1 = vpop.permute.xlu0 %5511 }
 0x437   : > { %v5722_v0 = vadd.f32 %v5706_v23, %v5626_v25  ;;  %v5611_v8 = vmul.f32 %v6595_v16, %v10551_v31  ;;  %v3800_v33 = vpop.f32.mrb[48].mxu1  ;;  %v5707_v12 = vmul.f32 %v6626_v37, %v10522_v41 }
 0x438   : > { %v5390_v32 = vpop.f32.mrb[48].mxu0  ;;  %v6596_v48 = vadd.f32 %v3800_v33, %v10547_v9  ;;  %v3802_v44 = vpop.f32.mrb[49].mxu1  ;;  %v5803_v18 = vmul.f32 %v6627_v36, %v10562_v11 }
 0x439   : > { %v6628_v47 = vadd.f32 %v5390_v32, %v10553_v56  ;;  %v5392_v50 = vpop.f32.mrb[49].mxu0  ;;  %v5818_v19 = vadd.f32 %v5802_v59, %v5722_v0  ;;  %v5627_v26 = vadd.f32 %v5611_v8, %v5531_v14  ;;  %v6597_v45 = vadd.f32 %v3802_v44, %v10555_v20 }
 0x43a   : > { %v5532_v29 = vmul.f32 %v6596_v48, %v10575_v15  ;;  %v6629_v6 = vadd.f32 %v5392_v50, %v10557_v53 }
 0x43b   : > { %5834 = vst [vmem:[%s10587_s15 + $0x30] sm:$0xff] %v5818_v19  ;;  %v5723_v31 = vadd.f32 %v5707_v12, %v5627_v26  ;;  %v5612_v38 = vmul.f32 %v6597_v45, %v10528_v10  ;;  %v5586_v58 = vpop.permute.xlu1 %5585  ;;  %v3807_v28 = vpop.f32.mrb[50].mxu1  ;;  %v5708_v21 = vmul.f32 %v6628_v47, %v10594_v24 }
 0x43c   : > { %v6598_v41 = vadd.f32 %v3807_v28, %v10547_v9  ;;  %v5397_v55 = vpop.f32.mrb[50].mxu0  ;;  %v3809_v7 = vpop.f32.mrb[51].mxu1  ;;  %v5804_v57 = vmul.f32 %v6629_v6, %v10532_v22 }
 0x43d   : > { %v5819_v15 = vadd.f32 %v5803_v18, %v5723_v31  ;;  %v5628_v62 = vadd.f32 %v5612_v38, %v5532_v29  ;;  %v6630_v3 = vadd.f32 %v5397_v55, %v10553_v56  ;;  %v6599_v11 = vadd.f32 %v3809_v7, %v10555_v20  ;;  %v5399_v49 = vpop.f32.mrb[51].mxu0 }
 0x43e   : > { %v5533_v10 = vmul.f32 %v6598_v41, %v10536_v35  ;;  %v6631_v46 = vadd.f32 %v5399_v49, %v10557_v53 }
 0x43f   : > { %5835 = vst [vmem:[%s10587_s15 + $0x38] sm:$0xff] %v5819_v15  ;;  %v5724_v5 = vadd.f32 %v5708_v21, %v5628_v62  ;;  %v5613_v24 = vmul.f32 %v6599_v11, %v10607_v4  ;;  %v3814_v27 = vpop.f32.mrb[52].mxu1  ;;  %v5709_v39 = vmul.f32 %v6630_v3, %v10540_v54  ;;  %v5690_v4 = vpop.permute.xlu0 %5689 }
 0x440   : > { %v5404_v60 = vpop.f32.mrb[52].mxu0  ;;  %v5778_v42 = vpop.permute.xlu1 %5777  ;;  %v6600_v40 = vadd.f32 %v3814_v27, %v10547_v9  ;;  %v5805_v0 = vmul.f32 %v6631_v46, %v10619_v30 }
 0x441   : > { %v3816_v2 = vpop.f32.mrb[53].mxu1  ;;  %v5820_v23 = vadd.f32 %v5804_v57, %v5724_v5  ;;  %v5629_v25 = vadd.f32 %v5613_v24, %v5533_v10  ;;  %v6632_v35 = vadd.f32 %v5404_v60, %v10553_v56  ;;  %v5406_v22 = vpop.f32.mrb[53].mxu0 }
 0x442   : > { %v6601_v37 = vadd.f32 %v3816_v2, %v10555_v20  ;;  %v5534_v16 = vmul.f32 %v6600_v40, %v10634_v17  ;;  %v6633_v59 = vadd.f32 %v5406_v22, %v10557_v53 }
 0x443   : > { %5836 = vst [vmem:[%s10587_s15 + $0x40] sm:$0xff] %v5820_v23  ;;  %v5725_v14 = vadd.f32 %v5709_v39, %v5629_v25  ;;  %v5710_v32 = vmul.f32 %v6632_v35, %v5678_v51  ;;  %v5598_v15 = vpop.permute.xlu0 %5597 }
 0x444   : > { %v5614_v54 = vmul.f32 %v6601_v37, %v10549_v61  ;;  %v3821_v8 = vpop.f32.mrb[54].mxu1  ;;  %v5806_v61 = vmul.f32 %v6633_v59, %v10565_v13 }
 0x445   : > { %v5411_v36 = vpop.f32.mrb[54].mxu0  ;;  %v5821_v33 = vadd.f32 %v5805_v0, %v5725_v14  ;;  %v6602_v47 = vadd.f32 %v3821_v8, %v10547_v9  ;;  %v5507_v44 = vpop.permute.xlu1 %5506 }
 0x446   : > { %v5630_v48 = vadd.f32 %v5614_v54, %v5534_v16  ;;  %v3823_v50 = vpop.f32.mrb[55].mxu1  ;;  %v6634_v17 = vadd.f32 %v5411_v36, %v10553_v56  ;;  %v5413_v12 = vpop.f32.mrb[55].mxu0 }
 0x447   : > { %v6603_v19 = vadd.f32 %v3823_v50, %v10555_v20  ;;  %5837 = vst [vmem:[%s10587_s15 + $0x48] sm:$0xff] %v5821_v33  ;;  %v5535_v26 = vmul.f32 %v6602_v47, %v10583_v34  ;;  %v6635_v51 = vadd.f32 %v5413_v12, %v10557_v53 }
 0x448   : > { %v5726_v30 = vadd.f32 %v5710_v32, %v5630_v48  ;;  %v3828_v29 = vpop.f32.mrb[56].mxu1  ;;  %v5711_v21 = vmul.f32 %v6634_v17, %v10604_v43 }
 0x449   : > { %v5615_v45 = vmul.f32 %v6603_v19, %v5586_v58  ;;  %v5418_v31 = vpop.f32.mrb[56].mxu0  ;;  %v6604_v38 = vadd.f32 %v3828_v29, %v10547_v9  ;;  %v3830_v6 = vpop.f32.mrb[57].mxu1  ;;  %v5807_v62 = vmul.f32 %v6635_v51, %v5778_v42 }
 0x44a   : > { %v5822_v18 = vadd.f32 %v5806_v61, %v5726_v30  ;;  %v5420_v28 = vpop.f32.mrb[57].mxu0  ;;  %v6636_v55 = vadd.f32 %v5418_v31, %v10553_v56  ;;  %v6605_v13 = vadd.f32 %v3830_v6, %v10555_v20  ;;  %v5686_v7 = vpop.permute.xlu1 %5685 }
 0x44b   : > { %v5631_v41 = vadd.f32 %v5615_v45, %v5535_v26  ;;  %v5536_v34 = vmul.f32 %v6604_v38, %v5507_v44  ;;  %v6637_v11 = vadd.f32 %v5420_v28, %v10557_v53 }
 0x44c   : > { %5838 = vst [vmem:[%s10587_s15 + $0x50] sm:$0xff] %v5822_v18  ;;  %v5616_v3 = vmul.f32 %v6605_v13, %v10625_v63  ;;  %v3835_v49 = vpop.f32.mrb[58].mxu1  ;;  %v5712_v60 = vmul.f32 %v6636_v55, %v5686_v7 }
 0x44d   : > { %v5727_v58 = vadd.f32 %v5711_v21, %v5631_v41  ;;  %v5425_v10 = vpop.f32.mrb[58].mxu0  ;;  %v6606_v43 = vadd.f32 %v3835_v49, %v10547_v9  ;;  %v3837_v57 = vpop.f32.mrb[59].mxu1  ;;  %v5808_v63 = vmul.f32 %v6637_v11, %v10646_v52 }
 0x44e   : > { %v6638_v5 = vadd.f32 %v5425_v10, %v10553_v56  ;;  %v5427_v24 = vpop.f32.mrb[59].mxu0  ;;  %v5632_v27 = vadd.f32 %v5616_v3, %v5536_v34  ;;  %v6607_v39 = vadd.f32 %v3837_v57, %v10555_v20  ;;  %v5522_v52 = vpop.permute.xlu0 %5521 }
 0x44f   : > { %v5823_v46 = vadd.f32 %v5807_v62, %v5727_v58  ;;  %v5537_v40 = vmul.f32 %v6606_v43, %v10664_v1  ;;  %v5594_v42 = vpop.permute.xlu1 %5593  ;;  %v6639_v36 = vadd.f32 %v5427_v24, %v10557_v53 }
 0x450   : > { %v5728_v2 = vadd.f32 %v5712_v60, %v5632_v27  ;;  %v5617_v23 = vmul.f32 %v6607_v39, %v5594_v42  ;;  %v3842_v25 = vpop.f32.mrb[60].mxu1  ;;  %v5713_v37 = vmul.f32 %v6638_v5, %v5690_v4 }
 0x451   : > { %5839 = vst [vmem:[%s10587_s15 + $0x58] sm:$0xff] %v5823_v46  ;;  %v5432_v35 = vpop.f32.mrb[60].mxu0  ;;  %v6608_v22 = vadd.f32 %v3842_v25, %v10547_v9  ;;  %v3844_v14 = vpop.f32.mrb[61].mxu1 }
 0x452   : > { %v6640_v16 = vadd.f32 %v5432_v35, %v10553_v56  ;;  %v5434_v0 = vpop.f32.mrb[61].mxu0  ;;  %v5824_v54 = vadd.f32 %v5808_v63, %v5728_v2  ;;  %v5633_v59 = vadd.f32 %v5617_v23, %v5537_v40  ;;  %v6609_v1 = vadd.f32 %v3844_v14, %v10555_v20  ;;  %v5698_v45 = vpop.permute.xlu0 %5697 }
 0x453   : > { %v6641_v8 = vadd.f32 %v5434_v0, %v10557_v53 }
 0x454   : > { %5840 = vst [vmem:[%s10587_s15 + $0x60] sm:$0xff] %v5824_v54  ;;  %v5729_v33 = vadd.f32 %v5713_v37, %v5633_v59  ;;  %v5786_v32 = vpop.permute.xlu1 %5785  ;;  %v3849_v4 = vpop.f32.mrb[62].mxu1  ;;  %v5618_v51 = vmul.f32 %v6609_v1, %v5598_v15 }
 0x455   : > { %v5809_v48 = vmul.f32 %v6639_v36, %v5786_v32  ;;  %v6610_v47 = vadd.f32 %v3849_v4, %v10547_v9  ;;  %v5439_v44 = vpop.f32.mrb[62].mxu0  ;;  %v3851_v50 = vpop.f32.mrb[63].mxu1 }
 0x456   : > { %v6642_v17 = vadd.f32 %v5439_v44, %v10553_v56  ;;  %v6611_v19 = vadd.f32 %v3851_v50, %v10555_v20  ;;  %v5441_v12 = vpop.f32.mrb[63].mxu0  ;;  %v5790_v38 = vpop.permute.xlu0 %5789 }
 0x457   : > { %v5825_v30 = vadd.f32 %v5809_v48, %v5729_v33  ;;  %v6643_v61 = vadd.f32 %v5441_v12, %v10557_v53  ;;  %v5810_v6 = vmul.f32 %v6641_v8, %v5790_v38  ;;  %v5539_v21 = vmul.f32 %v6610_v47, %v5522_v52 }
 0x458   : > { %v5715_v41 = vmul.f32 %v6642_v17, %v5698_v45 }
 0x459   : > { %5841 = vst [vmem:[%s10587_s15 + $0x68] sm:$0xff] %v5825_v30  ;;  %v5517_v26 = vpop.permute.xlu1 %5516 }
 0x45a   : > { %v5538_v29 = vmul.f32 %v6608_v22, %v5517_v26 }
 0x45c   : > { %v5634_v31 = vadd.f32 %v5618_v51, %v5538_v29 }
 0x45e   : > { %v5694_v9 = vpop.permute.xlu1 %5693 }
 0x45f   : > { %v5714_v18 = vmul.f32 %v6640_v16, %v5694_v9 }
 0x461   : > { %v5730_v56 = vadd.f32 %v5714_v18, %v5634_v31 }
 0x463   : > { %v5826_v20 = vadd.f32 %v5810_v6, %v5730_v56  ;;  %v5602_v28 = vpop.permute.xlu1 %5601 }
 0x464   : > { %v5619_v53 = vmul.f32 %v6611_v19, %v5602_v28 }
 0x465   : > { %5842 = vst [vmem:[%s10587_s15 + $0x70] sm:$0xff] %v5826_v20 }
 0x466   : > { %v5635_v55 = vadd.f32 %v5619_v53, %v5539_v21 }
 0x468   : > { %v5731_v13 = vadd.f32 %v5715_v41, %v5635_v55  ;;  %v5794_v7 = vpop.permute.xlu1 %5793 }
 0x469   : > { %v5811_v15 = vmul.f32 %v6643_v61, %v5794_v7 }
 0x46b   : > { %v5827_v34 = vadd.f32 %v5811_v15, %v5731_v13 }
 0x46d   : > { %5843 = vst [vmem:[%s10587_s15 + $0x78] sm:$0xff] %v5827_v34 }
 0x46e   : > { %7399 = shalt.err (!%p7396_p2)
}
 0x46f   : > { %s7400_s16 = scalar_lea.hbm %s10719_s10, 2048  ;;  %s7404_s19 = scalar_lea.hbm %s10772_s6, 4096 }
 0x470   : > { %p7401_p13 = scmp.ne.s32.totalorder %s10719_s10, %s7400_s16  ;;  %p7405_p4 = scmp.lt.u32.totalorder %s10719_s10, %s10772_s6 }
 0x471   : > { %p7406_p7 = scmp.lt.u32.totalorder %s7404_s19, %s7400_s16  ;;  %p7408_p11 = scmp.lt.u32.totalorder %s7400_s16, %s10719_s10 }
 0x472   : > { %p7402_p6 = pnand %p7401_p13, %p11963_p0 }
 0x473   : > { %p7407_p8 = por %p7406_p7, %p7405_p4 }
 0x474   : > { %p7403_p10 = pneg %p7402_p6 }
 0x475   : > { %p7409_p1 = por %p7408_p11, %p7407_p8 }
 0x477   : > { %p7410_p3 = pnand %p7409_p1, %p7403_p10 }
 0x479   : > { %7413 = shalt.err (!%p7410_p3)
}
 0x47a   : > { %s7473_s20 = smov 128   ;;  %s7474_s9 = smov 8  }
 0x47b   : > { %7102 = dma.vmem_to_hbm [thread:$0]  (%p11963_p0), %s10721_s30, 2048, %s10719_s10, %s5845_s14, %s7473_s20, %s7473_s20, %s7474_s9  }
 0x47c PF: > { %s5873_s8 = sand.u32 1, %s7444_s21   ;;  %p11964_p5 = scmp.ne.s32.totalorder %s11209_s28, 0 }
 0x47d   : > { %p11965_p9 = scmp.ge.s32.totalorder %s7456_s24, 2  ;;  %s5874_s25 = scalar_lea.sflag [#allocation4], %s5873_s8 }
 0x47f   : > { %p7116_p12 = pnand %p11965_p9, %p11964_p5 }
 0x481   : > { %7439 = dma.done.wait (!%p7116_p12), %s5874_s25, 2048  }
 0x482   : > { %7441 = vsyncadd (!%p7116_p12), %s5874_s25, 4294965248  ;;  %p20_p2 = scmp.ge.s32.totalorder %s7620_s26, 4   ;;  %s11966_s21 = smov %s7448_s22 }
 0x483   : > { %s11967_s22 = smov %s7452_s23  ;;  %s11968_s23 = smov %s7629_s11 }
 0x484   : > { %s11969_s24 = smov %s7620_s26  ;;  %22 = sbr.rel (!%p20_p2) target bundleno = 6 (0x6), region = 97 }
 0x48b   :  { %5879 = vsyncpa [#allocation3], 1 }
 0x48c   :  { %5881 = vsyncpa [#allocation3 + $0x1], 1 }
 0x48d   :  { %5882 = vsyncpa [#allocation6], 1 }
 0x48e   :  { %5883 = vsyncpa [#allocation4], 1 }
 0x48f   :  { %5885 = vsyncpa [#allocation4 + $0x1], 1 }

</bundles_post_ra>
